<compile_context>
chip_gen: v7x
topology: tpu7x:2x2x1
jax: 0.10.0
libtpu: 0.0.40
codegen_flags: <defaults>
</compile_context>

<pallas_src>
import functools
import math

import jax
import jax.numpy as jnp
from jax.experimental import pallas as pl
from jax.experimental.pallas import tpu as pltpu  # noqa: F401

# ---- small shapes consistent with the module ----
BS = 2            # batch
ML = 8            # mxl (sequence length)
IN_SIZE = 100     # word-emb size implied by GRU input = 100 + 15
POS_DIM = 15
NUM_POS = 2       # len(POS) + 2
HID = 32          # hid_size
RNN_LAYER = 2     # kernel below is written for exactly 2 RNN layers
GCN_LAYER = 2
NUM_REL = 3


# ------------------------------------------------------------------
# Single fused kernel: whole forward pass
# ------------------------------------------------------------------
def graphrel_kernel(inp_ref, pos_ref, adjf_ref, adjb_ref, emb_ref,
                    wih0_ref, bih0_ref, whh0_ref, bhh0_ref,
                    wih1_ref, bih1_ref, whh1_ref, bhh1_ref,
                    gw_ref, gb_ref,
                    ne_wih_ref, ne_whh_ref, ne_bih_ref, ne_bhh_ref,
                    fcne_w_ref, fcne_b_ref,
                    trs_w_ref, trs_b_ref,
                    relw0_ref, relw1_ref, relb_ref,
                    rep_ref,
                    out_ne_ref, out_rel_ref,
                    *, bs, ml, hid, in_size, num_pos, gcn_layer, num_rel):
    H = hid
    f32 = jnp.float32

    # ---- pos embedding (nn.Embedding lookup as one-hot matmul) + concat ----
    pos = pos_ref[...]                                            # [bs, ml, 1] i32
    klass = jax.lax.broadcasted_iota(jnp.int32, (bs, ml, num_pos), 2)
    onehot = (pos == klass).astype(f32)                           # [bs, ml, P]
    pos_emb = jnp.dot(onehot.reshape(bs * ml, num_pos), emb_ref[...],
                      preferred_element_type=f32)                 # [bs*ml, 15]
    x2d = jnp.concatenate(
        [inp_ref[...].reshape(bs * ml, in_size), pos_emb], axis=-1)  # [bs*ml, 115]
    # TODO(synk): nn.Dropout is stochastic at train time; modeled as eval-mode identity.

    # ---- GRU cell (PyTorch gate order r, z, n) ----
    def gru_cell(g, gh, h_prev):
        rz = jax.nn.sigmoid(g[:, :2 * H] + gh[:, :2 * H])
        r, z = rz[:, :H], rz[:, H:]
        n = jnp.tanh(g[:, 2 * H:] + r * gh[:, 2 * H:])
        return (1.0 - z) * n + z * h_prev

    # ---- fused bidirectional GRU layer ----
    # wih: [in, 6H] (fw|bw along N), whh: block-diag [2H, 6H], h = [h_f|h_b].
    def bigru(x, wih_ref, bih_ref, whh_ref, bhh_ref):
        gi = (jnp.dot(x, wih_ref[...], preferred_element_type=f32)
              + bih_ref[...]).reshape(bs, ml, 6 * H)              # hoisted projection
        whh = whh_ref[...]
        bhh = bhh_ref[...]
        h = jnp.zeros((bs, 2 * H), f32)
        hs_f, hs_b = [], []
        for t in range(ml):                                        # static unroll
            gh = jnp.dot(h, whh, preferred_element_type=f32) + bhh  # ONE dot/step
            h_f = gru_cell(gi[:, t, :3 * H], gh[:, :3 * H], h[:, :H])
            h_b = gru_cell(gi[:, ml - 1 - t, 3 * H:], gh[:, 3 * H:], h[:, H:])
            h = jnp.concatenate([h_f, h_b], axis=-1)
            hs_f.append(h_f)
            hs_b.append(h_b)
        # Position-ordered [bs, 2H] steps assembled once (no per-step stores).
        steps = [jnp.concatenate([hs_f[t], hs_b[ml - 1 - t]], axis=-1)
                 for t in range(ml)]
        return jnp.stack(steps, axis=1)                            # [bs, ml, 2H]

    x = bigru(x2d, wih0_ref, bih0_ref, whh0_ref, bhh0_ref)
    x = bigru(x.reshape(bs * ml, 2 * H), wih1_ref, bih1_ref, whh1_ref, bhh1_ref)

    # ---- GCN stack (fw|bw fused: weights along N, adjacency along batch) ----
    adj = jnp.concatenate([adjf_ref[...], adjb_ref[...]], axis=0)  # [2bs, ml, ml]
    for layer in range(gcn_layer):
        h2d = (jnp.dot(x.reshape(bs * ml, 2 * H), gw_ref[layer],
                       preferred_element_type=f32) + gb_ref[layer])
        h3 = h2d.reshape(bs, ml, 2 * H)
        hcat = jnp.concatenate([h3[:, :, :H], h3[:, :, H:]], axis=0)   # [2bs, ml, H]
        prop = jnp.einsum('bij,bjk->bik', adj, hcat,
                          preferred_element_type=f32)                  # one einsum
        x = jnp.maximum(jnp.concatenate([prop[:bs], prop[bs:]], axis=-1), 0.0)

    feat2d = x.reshape(bs * ml, 2 * H)                             # feat_1p in VMEM

    # ---- NE head: rnn_ne GRU (hoisted gi) + fc_ne hoisted out of recurrence ----
    gi = (jnp.dot(feat2d, ne_wih_ref[...], preferred_element_type=f32)
          + ne_bih_ref[...]).reshape(bs, ml, 3 * H)
    ne_whh = ne_whh_ref[...]
    ne_bhh = ne_bhh_ref[...]
    h = jnp.zeros((bs, H), f32)
    hs = []
    for t in range(ml):
        gh = jnp.dot(h, ne_whh, preferred_element_type=f32) + ne_bhh
        h = gru_cell(gi[:, t, :], gh, h)
        hs.append(h)
    h_all = jnp.stack(hs, axis=1).reshape(bs * ml, H)              # [bs*ml, H]
    out_ne = (jnp.dot(h_all, fcne_w_ref[...], preferred_element_type=f32)
              + fcne_b_ref[...])                                   # [bs*ml, 5]
    out_ne_ref[...] = out_ne.reshape(bs, ml, out_ne_ref.shape[-1])  # single store

    # ---- REL head: trs0|trs1 fused projection + algebraic fc_rel ----
    trs = jnp.maximum(jnp.dot(feat2d, trs_w_ref[...], preferred_element_type=f32)
                      + trs_b_ref[...], 0.0)                       # [bs*ml, 2H]
    a2d = jnp.dot(trs[:, :H], relw0_ref[...], preferred_element_type=f32)
    c2d = (jnp.dot(trs[:, H:], relw1_ref[...], preferred_element_type=f32)
           + relb_ref[...])
    ac = jnp.concatenate([a2d, c2d], axis=0)                       # [2*bs*ml, R]
    # out_rel[b,i,j] = a[b,i] + c[b,j]; broadcast realized as a constant
    # replication matmul so the whole output is one tile-friendly store.
    out2d = jnp.dot(rep_ref[...], ac, preferred_element_type=f32)  # [bs*ml*ml, R]
    out_rel_ref[...] = out2d.reshape(bs, ml, ml, num_rel)          # single store


# ------------------------------------------------------------------
# Parameters (deterministic synthetic init, shapes match the module)
# ------------------------------------------------------------------
def init_params(key):
    keys = iter(jax.random.split(key, 64))

    def u(shape, scale):
        return jax.random.uniform(next(keys), shape, jnp.float32, -scale, scale)

    def gru_dir(in_size, H):
        s = 1.0 / math.sqrt(H)
        return {"w_ih": u((in_size, 3 * H), s), "w_hh": u((H, 3 * H), s),
                "b_ih": u((3 * H,), s), "b_hh": u((3 * H,), s)}

    def gcn_p():
        s = 1.0 / math.sqrt(HID)            # GCN(hid=2*HID) -> stdv = 1/sqrt(HID)
        return {"W": u((2 * HID, HID), s), "b": u((HID,), s)}

    def lin(in_f, out_f):
        s = 1.0 / math.sqrt(in_f)
        return {"W": u((in_f, out_f), s), "b": u((out_f,), s)}

    params = {"emb_pos": u((NUM_POS, POS_DIM), 1.0)}
    params["rnn"] = []
    in_sz = IN_SIZE + POS_DIM
    for _ in range(RNN_LAYER):
        params["rnn"].append({"fw": gru_dir(in_sz, HID), "bw": gru_dir(in_sz, HID)})
        in_sz = 2 * HID
    params["gcn_fw"] = [gcn_p() for _ in range(GCN_LAYER)]
    params["gcn_bw"] = [gcn_p() for _ in range(GCN_LAYER)]
    params["rnn_ne"] = gru_dir(2 * HID, HID)
    params["fc_ne"] = lin(HID, 5)
    params["trs0"] = lin(2 * HID, HID)
    params["trs1"] = lin(2 * HID, HID)
    params["fc_rel"] = lin(2 * HID, NUM_REL)
    return params


def fuse_params(p):
    """One-time weight fusion (done at init, NOT in the jitted forward)."""
    f = {"emb_pos": p["emb_pos"]}
    for l in range(RNN_LAYER):
        fw, bw = p["rnn"][l]["fw"], p["rnn"][l]["bw"]
        f[f"rnn{l}_wih"] = jnp.concatenate([fw["w_ih"], bw["w_ih"]], axis=1)
        f[f"rnn{l}_bih"] = jnp.concatenate([fw["b_ih"], bw["b_ih"]]).reshape(1, -1)
        whh = jnp.zeros((2 * HID, 6 * HID), jnp.float32)
        whh = whh.at[:HID, :3 * HID].set(fw["w_hh"])
        whh = whh.at[HID:, 3 * HID:].set(bw["w_hh"])
        f[f"rnn{l}_whh"] = whh                                   # block-diag [2H,6H]
        f[f"rnn{l}_bhh"] = jnp.concatenate([fw["b_hh"], bw["b_hh"]]).reshape(1, -1)
    f["gcn_w"] = jnp.stack(
        [jnp.concatenate([p["gcn_fw"][i]["W"], p["gcn_bw"][i]["W"]], axis=1)
         for i in range(GCN_LAYER)], axis=0)                     # [L, 2H, 2H]
    f["gcn_b"] = jnp.stack(
        [jnp.concatenate([p["gcn_fw"][i]["b"], p["gcn_bw"][i]["b"]]).reshape(1, -1)
         for i in range(GCN_LAYER)], axis=0)                     # [L, 1, 2H]
    ne = p["rnn_ne"]
    f["ne_wih"], f["ne_whh"] = ne["w_ih"], ne["w_hh"]
    f["ne_bih"], f["ne_bhh"] = ne["b_ih"].reshape(1, -1), ne["b_hh"].reshape(1, -1)
    f["fcne_w"], f["fcne_b"] = p["fc_ne"]["W"], p["fc_ne"]["b"].reshape(1, -1)
    f["trs_w"] = jnp.concatenate([p["trs0"]["W"], p["trs1"]["W"]], axis=1)
    f["trs_b"] = jnp.concatenate([p["trs0"]["b"], p["trs1"]["b"]]).reshape(1, -1)
    f["rel_w0"] = p["fc_rel"]["W"][:HID]
    f["rel_w1"] = p["fc_rel"]["W"][HID:]
    f["rel_b"] = p["fc_rel"]["b"].reshape(1, -1)
    # Replication matrix for out_rel[b,i,j] = a[b,i] + c[b,j]:
    # out2d = [P | Q] @ [a2d ; c2d], row k <-> (b,i,j).
    k = jnp.arange(BS * ML * ML)
    b_idx = k // (ML * ML)
    i_idx = (k // ML) % ML
    j_idx = k % ML
    cols = jnp.arange(BS * ML)[None, :]
    P = (cols == (b_idx * ML + i_idx)[:, None]).astype(jnp.float32)
    Q = (cols == (b_idx * ML + j_idx)[:, None]).astype(jnp.float32)
    f["rel_rep"] = jnp.concatenate([P, Q], axis=1)               # [bs*ml*ml, 2*bs*ml]
    return f


# ------------------------------------------------------------------
# Forward pass (ARCH == '1p'): a single pallas_call
# ------------------------------------------------------------------
@jax.jit
def model_graphrel_forward(fused, inp, pos, dep_fw, dep_bw):
    bs, ml, _ = inp.shape
    pos3 = pos.reshape(bs, ml, 1).astype(jnp.int32)
    return pl.pallas_call(
        functools.partial(graphrel_kernel, bs=bs, ml=ml, hid=HID,
                          in_size=IN_SIZE, num_pos=NUM_POS,
                          gcn_layer=GCN_LAYER, num_rel=NUM_REL),
        out_shape=(jax.ShapeDtypeStruct((bs, ml, 5), jnp.float32),
                   jax.ShapeDtypeStruct((bs, ml, ml, NUM_REL), jnp.float32)),
    )(inp, pos3, dep_fw.astype(jnp.float32), dep_bw.astype(jnp.float32),
      fused["emb_pos"],
      fused["rnn0_wih"], fused["rnn0_bih"], fused["rnn0_whh"], fused["rnn0_bhh"],
      fused["rnn1_wih"], fused["rnn1_bih"], fused["rnn1_whh"], fused["rnn1_bhh"],
      fused["gcn_w"], fused["gcn_b"],
      fused["ne_wih"], fused["ne_whh"], fused["ne_bih"], fused["ne_bhh"],
      fused["fcne_w"], fused["fcne_b"],
      fused["trs_w"], fused["trs_b"],
      fused["rel_w0"], fused["rel_w1"], fused["rel_b"],
      fused["rel_rep"])


if __name__ == "__main__":
    key = jax.random.PRNGKey(0)
    kp, ki, kpos, kf = jax.random.split(key, 4)
    params = init_params(kp)
    fused = fuse_params(params)          # one-time weight fusion

    inp = jax.random.normal(ki, (BS, ML, IN_SIZE), jnp.float32)
    pos = jax.random.randint(kpos, (BS, ML), 0, NUM_POS)
    dep_fw = (jax.random.uniform(kf, (BS, ML, ML)) < 0.3).astype(jnp.float32)
    dep_bw = jnp.transpose(dep_fw, (0, 2, 1))

    out_ne, out_rel = model_graphrel_forward(fused, inp, pos, dep_fw, dep_bw)
    jax.block_until_ready((out_ne, out_rel))

    assert out_ne.shape == (BS, ML, 5)
    assert out_rel.shape == (BS, ML, ML, NUM_REL)
    assert bool(jnp.isfinite(out_ne).all()) and bool(jnp.isfinite(out_rel).all())
    print("KERNEL_OK")
</pallas_src>

<mosaic_0001>
module attributes {stable_mosaic.version = 11 : i64} {
  func.func @graphrel_kernel(%arg0: memref<2x8x100xf32, #tpu.memory_space<vmem>>, %arg1: memref<2x8x1xi32, #tpu.memory_space<vmem>>, %arg2: memref<2x8x8xf32, #tpu.memory_space<vmem>>, %arg3: memref<2x8x8xf32, #tpu.memory_space<vmem>>, %arg4: memref<2x15xf32, #tpu.memory_space<vmem>>, %arg5: memref<115x192xf32, #tpu.memory_space<vmem>>, %arg6: memref<1x192xf32, #tpu.memory_space<vmem>>, %arg7: memref<64x192xf32, #tpu.memory_space<vmem>>, %arg8: memref<1x192xf32, #tpu.memory_space<vmem>>, %arg9: memref<64x192xf32, #tpu.memory_space<vmem>>, %arg10: memref<1x192xf32, #tpu.memory_space<vmem>>, %arg11: memref<64x192xf32, #tpu.memory_space<vmem>>, %arg12: memref<1x192xf32, #tpu.memory_space<vmem>>, %arg13: memref<2x64x64xf32, #tpu.memory_space<vmem>>, %arg14: memref<2x1x64xf32, #tpu.memory_space<vmem>>, %arg15: memref<64x96xf32, #tpu.memory_space<vmem>>, %arg16: memref<32x96xf32, #tpu.memory_space<vmem>>, %arg17: memref<1x96xf32, #tpu.memory_space<vmem>>, %arg18: memref<1x96xf32, #tpu.memory_space<vmem>>, %arg19: memref<32x5xf32, #tpu.memory_space<vmem>>, %arg20: memref<1x5xf32, #tpu.memory_space<vmem>>, %arg21: memref<64x64xf32, #tpu.memory_space<vmem>>, %arg22: memref<1x64xf32, #tpu.memory_space<vmem>>, %arg23: memref<32x3xf32, #tpu.memory_space<vmem>>, %arg24: memref<32x3xf32, #tpu.memory_space<vmem>>, %arg25: memref<1x3xf32, #tpu.memory_space<vmem>>, %arg26: memref<128x32xf32, #tpu.memory_space<vmem>>, %arg27: memref<2x8x5xf32, #tpu.memory_space<vmem>>, %arg28: memref<2x8x8x3xf32, #tpu.memory_space<vmem>>) attributes {dimension_semantics = [], scalar_prefetch = 0 : i64, scratch_operands = 0 : i64, tpu.core_type = #tpu.core_type<tc>} {
    %c0 = arith.constant 0 : index
    %c0_0 = arith.constant 0 : index
    %c0_1 = arith.constant 0 : index
    %0 = vector.load %arg1[%c0, %c0_0, %c0_1] : memref<2x8x1xi32, #tpu.memory_space<vmem>>, vector<2x8x1xi32>
    %1 = tpu.iota {dimensions = array<i32: 2>} : vector<2x8x2xi32>
    %2 = vector.broadcast %0 : vector<2x8x1xi32> to vector<2x8x2xi32>
    %3 = arith.cmpi eq, %2, %1 : vector<2x8x2xi32>
    %4 = arith.extui %3 : vector<2x8x2xi1> to vector<2x8x2xi32>
    %5 = arith.sitofp %4 : vector<2x8x2xi32> to vector<2x8x2xf32>
    %6 = vector.shape_cast %5 : vector<2x8x2xf32> to vector<16x2xf32>
    %c0_2 = arith.constant 0 : index
    %c0_3 = arith.constant 0 : index
    %7 = vector.load %arg4[%c0_2, %c0_3] : memref<2x15xf32, #tpu.memory_space<vmem>>, vector<2x15xf32>
    %cst = arith.constant dense<0.000000e+00> : vector<16x15xf32>
    %8 = tpu.matmul %6, %7, %cst {dimension_numbers = #tpu.dot_dimension_numbers<[1], [0], [0], [1], [0, 0, 1, 1], [], []>} : vector<16x2xf32>, vector<2x15xf32>, vector<16x15xf32> -> vector<16x15xf32>
    %c0_4 = arith.constant 0 : index
    %c0_5 = arith.constant 0 : index
    %c0_6 = arith.constant 0 : index
    %9 = vector.load %arg0[%c0_4, %c0_5, %c0_6] : memref<2x8x100xf32, #tpu.memory_space<vmem>>, vector<2x8x100xf32>
    %10 = vector.shape_cast %9 : vector<2x8x100xf32> to vector<16x100xf32>
    %11 = tpu.concatenate %10, %8 in 1 : vector<16x100xf32>, vector<16x15xf32> -> vector<16x115xf32>
    %c0_7 = arith.constant 0 : index
    %c0_8 = arith.constant 0 : index
    %12 = vector.load %arg5[%c0_7, %c0_8] : memref<115x192xf32, #tpu.memory_space<vmem>>, vector<115x192xf32>
    %cst_9 = arith.constant dense<0.000000e+00> : vector<16x192xf32>
    %13 = tpu.matmul %11, %12, %cst_9 {dimension_numbers = #tpu.dot_dimension_numbers<[1], [0], [0], [1], [0, 0, 1, 1], [], []>} : vector<16x115xf32>, vector<115x192xf32>, vector<16x192xf32> -> vector<16x192xf32>
    %c0_10 = arith.constant 0 : index
    %c0_11 = arith.constant 0 : index
    %14 = vector.load %arg6[%c0_10, %c0_11] : memref<1x192xf32, #tpu.memory_space<vmem>>, vector<1x192xf32>
    %15 = vector.broadcast %14 : vector<1x192xf32> to vector<16x192xf32>
    %16 = arith.addf %13, %15 : vector<16x192xf32>
    %17 = vector.shape_cast %16 : vector<16x192xf32> to vector<2x8x192xf32>
    %c0_12 = arith.constant 0 : index
    %c0_13 = arith.constant 0 : index
    %18 = vector.load %arg7[%c0_12, %c0_13] : memref<64x192xf32, #tpu.memory_space<vmem>>, vector<64x192xf32>
    %c0_14 = arith.constant 0 : index
    %c0_15 = arith.constant 0 : index
    %19 = vector.load %arg8[%c0_14, %c0_15] : memref<1x192xf32, #tpu.memory_space<vmem>>, vector<1x192xf32>
    %cst_16 = arith.constant 0.000000e+00 : f32
    %20 = vector.broadcast %cst_16 : f32 to vector<2x64xf32>
    %cst_17 = arith.constant dense<0.000000e+00> : vector<2x192xf32>
    %21 = tpu.matmul %20, %18, %cst_17 {dimension_numbers = #tpu.dot_dimension_numbers<[1], [0], [0], [1], [0, 0, 1, 1], [], []>} : vector<2x64xf32>, vector<64x192xf32>, vector<2x192xf32> -> vector<2x192xf32>
    %22 = vector.broadcast %19 : vector<1x192xf32> to vector<2x192xf32>
    %23 = arith.addf %21, %22 : vector<2x192xf32>
    %24 = vector.extract_strided_slice %17 {offsets = [0, 0, 0], sizes = [2, 1, 96], strides = [1, 1, 1]} : vector<2x8x192xf32> to vector<2x1x96xf32>
    %25 = vector.shape_cast %24 : vector<2x1x96xf32> to vector<2x96xf32>
    %26 = vector.extract_strided_slice %23 {offsets = [0, 0], sizes = [2, 96], strides = [1, 1]} : vector<2x192xf32> to vector<2x96xf32>
    %27 = vector.extract_strided_slice %20 {offsets = [0, 0], sizes = [2, 32], strides = [1, 1]} : vector<2x64xf32> to vector<2x32xf32>
    %28 = vector.extract_strided_slice %25 {offsets = [0, 0], sizes = [2, 64], strides = [1, 1]} : vector<2x96xf32> to vector<2x64xf32>
    %29 = vector.extract_strided_slice %26 {offsets = [0, 0], sizes = [2, 64], strides = [1, 1]} : vector<2x96xf32> to vector<2x64xf32>
    %30 = arith.addf %28, %29 : vector<2x64xf32>
    %31 = arith.negf %30 : vector<2x64xf32>
    %32 = math.exp %31 : vector<2x64xf32>
    %cst_18 = arith.constant 1.000000e+00 : f32
    %33 = vector.broadcast %cst_18 : f32 to vector<2x64xf32>
    %34 = arith.addf %33, %32 : vector<2x64xf32>
    %35 = arith.divf %33, %34 : vector<2x64xf32>
    %36 = vector.extract_strided_slice %35 {offsets = [0, 0], sizes = [2, 32], strides = [1, 1]} : vector<2x64xf32> to vector<2x32xf32>
    %37 = vector.extract_strided_slice %35 {offsets = [0, 32], sizes = [2, 32], strides = [1, 1]} : vector<2x64xf32> to vector<2x32xf32>
    %38 = vector.extract_strided_slice %25 {offsets = [0, 64], sizes = [2, 32], strides = [1, 1]} : vector<2x96xf32> to vector<2x32xf32>
    %39 = vector.extract_strided_slice %26 {offsets = [0, 64], sizes = [2, 32], strides = [1, 1]} : vector<2x96xf32> to vector<2x32xf32>
    %40 = arith.mulf %36, %39 : vector<2x32xf32>
    %41 = arith.addf %38, %40 : vector<2x32xf32>
    %42 = math.tanh %41 : vector<2x32xf32>
    %cst_19 = arith.constant 1.000000e+00 : f32
    %43 = vector.broadcast %cst_19 : f32 to vector<2x32xf32>
    %44 = arith.subf %43, %37 : vector<2x32xf32>
    %45 = arith.mulf %44, %42 : vector<2x32xf32>
    %46 = arith.mulf %37, %27 : vector<2x32xf32>
    %47 = arith.addf %45, %46 : vector<2x32xf32>
    %48 = vector.extract_strided_slice %17 {offsets = [0, 7, 96], sizes = [2, 1, 96], strides = [1, 1, 1]} : vector<2x8x192xf32> to vector<2x1x96xf32>
    %49 = vector.shape_cast %48 : vector<2x1x96xf32> to vector<2x96xf32>
    %50 = vector.extract_strided_slice %23 {offsets = [0, 96], sizes = [2, 96], strides = [1, 1]} : vector<2x192xf32> to vector<2x96xf32>
    %51 = vector.extract_strided_slice %20 {offsets = [0, 32], sizes = [2, 32], strides = [1, 1]} : vector<2x64xf32> to vector<2x32xf32>
    %52 = vector.extract_strided_slice %49 {offsets = [0, 0], sizes = [2, 64], strides = [1, 1]} : vector<2x96xf32> to vector<2x64xf32>
    %53 = vector.extract_strided_slice %50 {offsets = [0, 0], sizes = [2, 64], strides = [1, 1]} : vector<2x96xf32> to vector<2x64xf32>
    %54 = arith.addf %52, %53 : vector<2x64xf32>
    %55 = arith.negf %54 : vector<2x64xf32>
    %56 = math.exp %55 : vector<2x64xf32>
    %cst_20 = arith.constant 1.000000e+00 : f32
    %57 = vector.broadcast %cst_20 : f32 to vector<2x64xf32>
    %58 = arith.addf %57, %56 : vector<2x64xf32>
    %59 = arith.divf %57, %58 : vector<2x64xf32>
    %60 = vector.extract_strided_slice %59 {offsets = [0, 0], sizes = [2, 32], strides = [1, 1]} : vector<2x64xf32> to vector<2x32xf32>
    %61 = vector.extract_strided_slice %59 {offsets = [0, 32], sizes = [2, 32], strides = [1, 1]} : vector<2x64xf32> to vector<2x32xf32>
    %62 = vector.extract_strided_slice %49 {offsets = [0, 64], sizes = [2, 32], strides = [1, 1]} : vector<2x96xf32> to vector<2x32xf32>
    %63 = vector.extract_strided_slice %50 {offsets = [0, 64], sizes = [2, 32], strides = [1, 1]} : vector<2x96xf32> to vector<2x32xf32>
    %64 = arith.mulf %60, %63 : vector<2x32xf32>
    %65 = arith.addf %62, %64 : vector<2x32xf32>
    %66 = math.tanh %65 : vector<2x32xf32>
    %cst_21 = arith.constant 1.000000e+00 : f32
    %67 = vector.broadcast %cst_21 : f32 to vector<2x32xf32>
    %68 = arith.subf %67, %61 : vector<2x32xf32>
    %69 = arith.mulf %68, %66 : vector<2x32xf32>
    %70 = arith.mulf %61, %51 : vector<2x32xf32>
    %71 = arith.addf %69, %70 : vector<2x32xf32>
    %72 = tpu.concatenate %47, %71 in 1 : vector<2x32xf32>, vector<2x32xf32> -> vector<2x64xf32>
    %cst_22 = arith.constant dense<0.000000e+00> : vector<2x192xf32>
    %73 = tpu.matmul %72, %18, %cst_22 {dimension_numbers = #tpu.dot_dimension_numbers<[1], [0], [0], [1], [0, 0, 1, 1], [], []>} : vector<2x64xf32>, vector<64x192xf32>, vector<2x192xf32> -> vector<2x192xf32>
    %74 = vector.broadcast %19 : vector<1x192xf32> to vector<2x192xf32>
    %75 = arith.addf %73, %74 : vector<2x192xf32>
    %76 = vector.extract_strided_slice %17 {offsets = [0, 1, 0], sizes = [2, 1, 96], strides = [1, 1, 1]} : vector<2x8x192xf32> to vector<2x1x96xf32>
    %77 = vector.shape_cast %76 : vector<2x1x96xf32> to vector<2x96xf32>
    %78 = vector.extract_strided_slice %75 {offsets = [0, 0], sizes = [2, 96], strides = [1, 1]} : vector<2x192xf32> to vector<2x96xf32>
    %79 = vector.extract_strided_slice %72 {offsets = [0, 0], sizes = [2, 32], strides = [1, 1]} : vector<2x64xf32> to vector<2x32xf32>
    %80 = vector.extract_strided_slice %77 {offsets = [0, 0], sizes = [2, 64], strides = [1, 1]} : vector<2x96xf32> to vector<2x64xf32>
    %81 = vector.extract_strided_slice %78 {offsets = [0, 0], sizes = [2, 64], strides = [1, 1]} : vector<2x96xf32> to vector<2x64xf32>
    %82 = arith.addf %80, %81 : vector<2x64xf32>
    %83 = arith.negf %82 : vector<2x64xf32>
    %84 = math.exp %83 : vector<2x64xf32>
    %cst_23 = arith.constant 1.000000e+00 : f32
    %85 = vector.broadcast %cst_23 : f32 to vector<2x64xf32>
    %86 = arith.addf %85, %84 : vector<2x64xf32>
    %87 = arith.divf %85, %86 : vector<2x64xf32>
    %88 = vector.extract_strided_slice %87 {offsets = [0, 0], sizes = [2, 32], strides = [1, 1]} : vector<2x64xf32> to vector<2x32xf32>
    %89 = vector.extract_strided_slice %87 {offsets = [0, 32], sizes = [2, 32], strides = [1, 1]} : vector<2x64xf32> to vector<2x32xf32>
    %90 = vector.extract_strided_slice %77 {offsets = [0, 64], sizes = [2, 32], strides = [1, 1]} : vector<2x96xf32> to vector<2x32xf32>
    %91 = vector.extract_strided_slice %78 {offsets = [0, 64], sizes = [2, 32], strides = [1, 1]} : vector<2x96xf32> to vector<2x32xf32>
    %92 = arith.mulf %88, %91 : vector<2x32xf32>
    %93 = arith.addf %90, %92 : vector<2x32xf32>
    %94 = math.tanh %93 : vector<2x32xf32>
    %cst_24 = arith.constant 1.000000e+00 : f32
    %95 = vector.broadcast %cst_24 : f32 to vector<2x32xf32>
    %96 = arith.subf %95, %89 : vector<2x32xf32>
    %97 = arith.mulf %96, %94 : vector<2x32xf32>
    %98 = arith.mulf %89, %79 : vector<2x32xf32>
    %99 = arith.addf %97, %98 : vector<2x32xf32>
    %100 = vector.extract_strided_slice %17 {offsets = [0, 6, 96], sizes = [2, 1, 96], strides = [1, 1, 1]} : vector<2x8x192xf32> to vector<2x1x96xf32>
    %101 = vector.shape_cast %100 : vector<2x1x96xf32> to vector<2x96xf32>
    %102 = vector.extract_strided_slice %75 {offsets = [0, 96], sizes = [2, 96], strides = [1, 1]} : vector<2x192xf32> to vector<2x96xf32>
    %103 = vector.extract_strided_slice %72 {offsets = [0, 32], sizes = [2, 32], strides = [1, 1]} : vector<2x64xf32> to vector<2x32xf32>
    %104 = vector.extract_strided_slice %101 {offsets = [0, 0], sizes = [2, 64], strides = [1, 1]} : vector<2x96xf32> to vector<2x64xf32>
    %105 = vector.extract_strided_slice %102 {offsets = [0, 0], sizes = [2, 64], strides = [1, 1]} : vector<2x96xf32> to vector<2x64xf32>
    %106 = arith.addf %104, %105 : vector<2x64xf32>
    %107 = arith.negf %106 : vector<2x64xf32>
    %108 = math.exp %107 : vector<2x64xf32>
    %cst_25 = arith.constant 1.000000e+00 : f32
    %109 = vector.broadcast %cst_25 : f32 to vector<2x64xf32>
    %110 = arith.addf %109, %108 : vector<2x64xf32>
    %111 = arith.divf %109, %110 : vector<2x64xf32>
    %112 = vector.extract_strided_slice %111 {offsets = [0, 0], sizes = [2, 32], strides = [1, 1]} : vector<2x64xf32> to vector<2x32xf32>
    %113 = vector.extract_strided_slice %111 {offsets = [0, 32], sizes = [2, 32], strides = [1, 1]} : vector<2x64xf32> to vector<2x32xf32>
    %114 = vector.extract_strided_slice %101 {offsets = [0, 64], sizes = [2, 32], strides = [1, 1]} : vector<2x96xf32> to vector<2x32xf32>
    %115 = vector.extract_strided_slice %102 {offsets = [0, 64], sizes = [2, 32], strides = [1, 1]} : vector<2x96xf32> to vector<2x32xf32>
    %116 = arith.mulf %112, %115 : vector<2x32xf32>
    %117 = arith.addf %114, %116 : vector<2x32xf32>
    %118 = math.tanh %117 : vector<2x32xf32>
    %cst_26 = arith.constant 1.000000e+00 : f32
    %119 = vector.broadcast %cst_26 : f32 to vector<2x32xf32>
    %120 = arith.subf %119, %113 : vector<2x32xf32>
    %121 = arith.mulf %120, %118 : vector<2x32xf32>
    %122 = arith.mulf %113, %103 : vector<2x32xf32>
    %123 = arith.addf %121, %122 : vector<2x32xf32>
    %124 = tpu.concatenate %99, %123 in 1 : vector<2x32xf32>, vector<2x32xf32> -> vector<2x64xf32>
    %cst_27 = arith.constant dense<0.000000e+00> : vector<2x192xf32>
    %125 = tpu.matmul %124, %18, %cst_27 {dimension_numbers = #tpu.dot_dimension_numbers<[1], [0], [0], [1], [0, 0, 1, 1], [], []>} : vector<2x64xf32>, vector<64x192xf32>, vector<2x192xf32> -> vector<2x192xf32>
    %126 = vector.broadcast %19 : vector<1x192xf32> to vector<2x192xf32>
    %127 = arith.addf %125, %126 : vector<2x192xf32>
    %128 = vector.extract_strided_slice %17 {offsets = [0, 2, 0], sizes = [2, 1, 96], strides = [1, 1, 1]} : vector<2x8x192xf32> to vector<2x1x96xf32>
    %129 = vector.shape_cast %128 : vector<2x1x96xf32> to vector<2x96xf32>
    %130 = vector.extract_strided_slice %127 {offsets = [0, 0], sizes = [2, 96], strides = [1, 1]} : vector<2x192xf32> to vector<2x96xf32>
    %131 = vector.extract_strided_slice %124 {offsets = [0, 0], sizes = [2, 32], strides = [1, 1]} : vector<2x64xf32> to vector<2x32xf32>
    %132 = vector.extract_strided_slice %129 {offsets = [0, 0], sizes = [2, 64], strides = [1, 1]} : vector<2x96xf32> to vector<2x64xf32>
    %133 = vector.extract_strided_slice %130 {offsets = [0, 0], sizes = [2, 64], strides = [1, 1]} : vector<2x96xf32> to vector<2x64xf32>
    %134 = arith.addf %132, %133 : vector<2x64xf32>
    %135 = arith.negf %134 : vector<2x64xf32>
    %136 = math.exp %135 : vector<2x64xf32>
    %cst_28 = arith.constant 1.000000e+00 : f32
    %137 = vector.broadcast %cst_28 : f32 to vector<2x64xf32>
    %138 = arith.addf %137, %136 : vector<2x64xf32>
    %139 = arith.divf %137, %138 : vector<2x64xf32>
    %140 = vector.extract_strided_slice %139 {offsets = [0, 0], sizes = [2, 32], strides = [1, 1]} : vector<2x64xf32> to vector<2x32xf32>
    %141 = vector.extract_strided_slice %139 {offsets = [0, 32], sizes = [2, 32], strides = [1, 1]} : vector<2x64xf32> to vector<2x32xf32>
    %142 = vector.extract_strided_slice %129 {offsets = [0, 64], sizes = [2, 32], strides = [1, 1]} : vector<2x96xf32> to vector<2x32xf32>
    %143 = vector.extract_strided_slice %130 {offsets = [0, 64], sizes = [2, 32], strides = [1, 1]} : vector<2x96xf32> to vector<2x32xf32>
    %144 = arith.mulf %140, %143 : vector<2x32xf32>
    %145 = arith.addf %142, %144 : vector<2x32xf32>
    %146 = math.tanh %145 : vector<2x32xf32>
    %cst_29 = arith.constant 1.000000e+00 : f32
    %147 = vector.broadcast %cst_29 : f32 to vector<2x32xf32>
    %148 = arith.subf %147, %141 : vector<2x32xf32>
    %149 = arith.mulf %148, %146 : vector<2x32xf32>
    %150 = arith.mulf %141, %131 : vector<2x32xf32>
    %151 = arith.addf %149, %150 : vector<2x32xf32>
    %152 = vector.extract_strided_slice %17 {offsets = [0, 5, 96], sizes = [2, 1, 96], strides = [1, 1, 1]} : vector<2x8x192xf32> to vector<2x1x96xf32>
    %153 = vector.shape_cast %152 : vector<2x1x96xf32> to vector<2x96xf32>
    %154 = vector.extract_strided_slice %127 {offsets = [0, 96], sizes = [2, 96], strides = [1, 1]} : vector<2x192xf32> to vector<2x96xf32>
    %155 = vector.extract_strided_slice %124 {offsets = [0, 32], sizes = [2, 32], strides = [1, 1]} : vector<2x64xf32> to vector<2x32xf32>
    %156 = vector.extract_strided_slice %153 {offsets = [0, 0], sizes = [2, 64], strides = [1, 1]} : vector<2x96xf32> to vector<2x64xf32>
    %157 = vector.extract_strided_slice %154 {offsets = [0, 0], sizes = [2, 64], strides = [1, 1]} : vector<2x96xf32> to vector<2x64xf32>
    %158 = arith.addf %156, %157 : vector<2x64xf32>
    %159 = arith.negf %158 : vector<2x64xf32>
    %160 = math.exp %159 : vector<2x64xf32>
    %cst_30 = arith.constant 1.000000e+00 : f32
    %161 = vector.broadcast %cst_30 : f32 to vector<2x64xf32>
    %162 = arith.addf %161, %160 : vector<2x64xf32>
    %163 = arith.divf %161, %162 : vector<2x64xf32>
    %164 = vector.extract_strided_slice %163 {offsets = [0, 0], sizes = [2, 32], strides = [1, 1]} : vector<2x64xf32> to vector<2x32xf32>
    %165 = vector.extract_strided_slice %163 {offsets = [0, 32], sizes = [2, 32], strides = [1, 1]} : vector<2x64xf32> to vector<2x32xf32>
    %166 = vector.extract_strided_slice %153 {offsets = [0, 64], sizes = [2, 32], strides = [1, 1]} : vector<2x96xf32> to vector<2x32xf32>
    %167 = vector.extract_strided_slice %154 {offsets = [0, 64], sizes = [2, 32], strides = [1, 1]} : vector<2x96xf32> to vector<2x32xf32>
    %168 = arith.mulf %164, %167 : vector<2x32xf32>
    %169 = arith.addf %166, %168 : vector<2x32xf32>
    %170 = math.tanh %169 : vector<2x32xf32>
    %cst_31 = arith.constant 1.000000e+00 : f32
    %171 = vector.broadcast %cst_31 : f32 to vector<2x32xf32>
    %172 = arith.subf %171, %165 : vector<2x32xf32>
    %173 = arith.mulf %172, %170 : vector<2x32xf32>
    %174 = arith.mulf %165, %155 : vector<2x32xf32>
    %175 = arith.addf %173, %174 : vector<2x32xf32>
    %176 = tpu.concatenate %151, %175 in 1 : vector<2x32xf32>, vector<2x32xf32> -> vector<2x64xf32>
    %cst_32 = arith.constant dense<0.000000e+00> : vector<2x192xf32>
    %177 = tpu.matmul %176, %18, %cst_32 {dimension_numbers = #tpu.dot_dimension_numbers<[1], [0], [0], [1], [0, 0, 1, 1], [], []>} : vector<2x64xf32>, vector<64x192xf32>, vector<2x192xf32> -> vector<2x192xf32>
    %178 = vector.broadcast %19 : vector<1x192xf32> to vector<2x192xf32>
    %179 = arith.addf %177, %178 : vector<2x192xf32>
    %180 = vector.extract_strided_slice %17 {offsets = [0, 3, 0], sizes = [2, 1, 96], strides = [1, 1, 1]} : vector<2x8x192xf32> to vector<2x1x96xf32>
    %181 = vector.shape_cast %180 : vector<2x1x96xf32> to vector<2x96xf32>
    %182 = vector.extract_strided_slice %179 {offsets = [0, 0], sizes = [2, 96], strides = [1, 1]} : vector<2x192xf32> to vector<2x96xf32>
    %183 = vector.extract_strided_slice %176 {offsets = [0, 0], sizes = [2, 32], strides = [1, 1]} : vector<2x64xf32> to vector<2x32xf32>
    %184 = vector.extract_strided_slice %181 {offsets = [0, 0], sizes = [2, 64], strides = [1, 1]} : vector<2x96xf32> to vector<2x64xf32>
    %185 = vector.extract_strided_slice %182 {offsets = [0, 0], sizes = [2, 64], strides = [1, 1]} : vector<2x96xf32> to vector<2x64xf32>
    %186 = arith.addf %184, %185 : vector<2x64xf32>
    %187 = arith.negf %186 : vector<2x64xf32>
    %188 = math.exp %187 : vector<2x64xf32>
    %cst_33 = arith.constant 1.000000e+00 : f32
    %189 = vector.broadcast %cst_33 : f32 to vector<2x64xf32>
    %190 = arith.addf %189, %188 : vector<2x64xf32>
    %191 = arith.divf %189, %190 : vector<2x64xf32>
    %192 = vector.extract_strided_slice %191 {offsets = [0, 0], sizes = [2, 32], strides = [1, 1]} : vector<2x64xf32> to vector<2x32xf32>
    %193 = vector.extract_strided_slice %191 {offsets = [0, 32], sizes = [2, 32], strides = [1, 1]} : vector<2x64xf32> to vector<2x32xf32>
    %194 = vector.extract_strided_slice %181 {offsets = [0, 64], sizes = [2, 32], strides = [1, 1]} : vector<2x96xf32> to vector<2x32xf32>
    %195 = vector.extract_strided_slice %182 {offsets = [0, 64], sizes = [2, 32], strides = [1, 1]} : vector<2x96xf32> to vector<2x32xf32>
    %196 = arith.mulf %192, %195 : vector<2x32xf32>
    %197 = arith.addf %194, %196 : vector<2x32xf32>
    %198 = math.tanh %197 : vector<2x32xf32>
    %cst_34 = arith.constant 1.000000e+00 : f32
    %199 = vector.broadcast %cst_34 : f32 to vector<2x32xf32>
    %200 = arith.subf %199, %193 : vector<2x32xf32>
    %201 = arith.mulf %200, %198 : vector<2x32xf32>
    %202 = arith.mulf %193, %183 : vector<2x32xf32>
    %203 = arith.addf %201, %202 : vector<2x32xf32>
    %204 = vector.extract_strided_slice %17 {offsets = [0, 4, 96], sizes = [2, 1, 96], strides = [1, 1, 1]} : vector<2x8x192xf32> to vector<2x1x96xf32>
    %205 = vector.shape_cast %204 : vector<2x1x96xf32> to vector<2x96xf32>
    %206 = vector.extract_strided_slice %179 {offsets = [0, 96], sizes = [2, 96], strides = [1, 1]} : vector<2x192xf32> to vector<2x96xf32>
    %207 = vector.extract_strided_slice %176 {offsets = [0, 32], sizes = [2, 32], strides = [1, 1]} : vector<2x64xf32> to vector<2x32xf32>
    %208 = vector.extract_strided_slice %205 {offsets = [0, 0], sizes = [2, 64], strides = [1, 1]} : vector<2x96xf32> to vector<2x64xf32>
    %209 = vector.extract_strided_slice %206 {offsets = [0, 0], sizes = [2, 64], strides = [1, 1]} : vector<2x96xf32> to vector<2x64xf32>
    %210 = arith.addf %208, %209 : vector<2x64xf32>
    %211 = arith.negf %210 : vector<2x64xf32>
    %212 = math.exp %211 : vector<2x64xf32>
    %cst_35 = arith.constant 1.000000e+00 : f32
    %213 = vector.broadcast %cst_35 : f32 to vector<2x64xf32>
    %214 = arith.addf %213, %212 : vector<2x64xf32>
    %215 = arith.divf %213, %214 : vector<2x64xf32>
    %216 = vector.extract_strided_slice %215 {offsets = [0, 0], sizes = [2, 32], strides = [1, 1]} : vector<2x64xf32> to vector<2x32xf32>
    %217 = vector.extract_strided_slice %215 {offsets = [0, 32], sizes = [2, 32], strides = [1, 1]} : vector<2x64xf32> to vector<2x32xf32>
    %218 = vector.extract_strided_slice %205 {offsets = [0, 64], sizes = [2, 32], strides = [1, 1]} : vector<2x96xf32> to vector<2x32xf32>
    %219 = vector.extract_strided_slice %206 {offsets = [0, 64], sizes = [2, 32], strides = [1, 1]} : vector<2x96xf32> to vector<2x32xf32>
    %220 = arith.mulf %216, %219 : vector<2x32xf32>
    %221 = arith.addf %218, %220 : vector<2x32xf32>
    %222 = math.tanh %221 : vector<2x32xf32>
    %cst_36 = arith.constant 1.000000e+00 : f32
    %223 = vector.broadcast %cst_36 : f32 to vector<2x32xf32>
    %224 = arith.subf %223, %217 : vector<2x32xf32>
    %225 = arith.mulf %224, %222 : vector<2x32xf32>
    %226 = arith.mulf %217, %207 : vector<2x32xf32>
    %227 = arith.addf %225, %226 : vector<2x32xf32>
    %228 = tpu.concatenate %203, %227 in 1 : vector<2x32xf32>, vector<2x32xf32> -> vector<2x64xf32>
    %cst_37 = arith.constant dense<0.000000e+00> : vector<2x192xf32>
    %229 = tpu.matmul %228, %18, %cst_37 {dimension_numbers = #tpu.dot_dimension_numbers<[1], [0], [0], [1], [0, 0, 1, 1], [], []>} : vector<2x64xf32>, vector<64x192xf32>, vector<2x192xf32> -> vector<2x192xf32>
    %230 = vector.broadcast %19 : vector<1x192xf32> to vector<2x192xf32>
    %231 = arith.addf %229, %230 : vector<2x192xf32>
    %232 = vector.extract_strided_slice %17 {offsets = [0, 4, 0], sizes = [2, 1, 96], strides = [1, 1, 1]} : vector<2x8x192xf32> to vector<2x1x96xf32>
    %233 = vector.shape_cast %232 : vector<2x1x96xf32> to vector<2x96xf32>
    %234 = vector.extract_strided_slice %231 {offsets = [0, 0], sizes = [2, 96], strides = [1, 1]} : vector<2x192xf32> to vector<2x96xf32>
    %235 = vector.extract_strided_slice %228 {offsets = [0, 0], sizes = [2, 32], strides = [1, 1]} : vector<2x64xf32> to vector<2x32xf32>
    %236 = vector.extract_strided_slice %233 {offsets = [0, 0], sizes = [2, 64], strides = [1, 1]} : vector<2x96xf32> to vector<2x64xf32>
    %237 = vector.extract_strided_slice %234 {offsets = [0, 0], sizes = [2, 64], strides = [1, 1]} : vector<2x96xf32> to vector<2x64xf32>
    %238 = arith.addf %236, %237 : vector<2x64xf32>
    %239 = arith.negf %238 : vector<2x64xf32>
    %240 = math.exp %239 : vector<2x64xf32>
    %cst_38 = arith.constant 1.000000e+00 : f32
    %241 = vector.broadcast %cst_38 : f32 to vector<2x64xf32>
    %242 = arith.addf %241, %240 : vector<2x64xf32>
    %243 = arith.divf %241, %242 : vector<2x64xf32>
    %244 = vector.extract_strided_slice %243 {offsets = [0, 0], sizes = [2, 32], strides = [1, 1]} : vector<2x64xf32> to vector<2x32xf32>
    %245 = vector.extract_strided_slice %243 {offsets = [0, 32], sizes = [2, 32], strides = [1, 1]} : vector<2x64xf32> to vector<2x32xf32>
    %246 = vector.extract_strided_slice %233 {offsets = [0, 64], sizes = [2, 32], strides = [1, 1]} : vector<2x96xf32> to vector<2x32xf32>
    %247 = vector.extract_strided_slice %234 {offsets = [0, 64], sizes = [2, 32], strides = [1, 1]} : vector<2x96xf32> to vector<2x32xf32>
    %248 = arith.mulf %244, %247 : vector<2x32xf32>
    %249 = arith.addf %246, %248 : vector<2x32xf32>
    %250 = math.tanh %249 : vector<2x32xf32>
    %cst_39 = arith.constant 1.000000e+00 : f32
    %251 = vector.broadcast %cst_39 : f32 to vector<2x32xf32>
    %252 = arith.subf %251, %245 : vector<2x32xf32>
    %253 = arith.mulf %252, %250 : vector<2x32xf32>
    %254 = arith.mulf %245, %235 : vector<2x32xf32>
    %255 = arith.addf %253, %254 : vector<2x32xf32>
    %256 = vector.extract_strided_slice %17 {offsets = [0, 3, 96], sizes = [2, 1, 96], strides = [1, 1, 1]} : vector<2x8x192xf32> to vector<2x1x96xf32>
    %257 = vector.shape_cast %256 : vector<2x1x96xf32> to vector<2x96xf32>
    %258 = vector.extract_strided_slice %231 {offsets = [0, 96], sizes = [2, 96], strides = [1, 1]} : vector<2x192xf32> to vector<2x96xf32>
    %259 = vector.extract_strided_slice %228 {offsets = [0, 32], sizes = [2, 32], strides = [1, 1]} : vector<2x64xf32> to vector<2x32xf32>
    %260 = vector.extract_strided_slice %257 {offsets = [0, 0], sizes = [2, 64], strides = [1, 1]} : vector<2x96xf32> to vector<2x64xf32>
    %261 = vector.extract_strided_slice %258 {offsets = [0, 0], sizes = [2, 64], strides = [1, 1]} : vector<2x96xf32> to vector<2x64xf32>
    %262 = arith.addf %260, %261 : vector<2x64xf32>
    %263 = arith.negf %262 : vector<2x64xf32>
    %264 = math.exp %263 : vector<2x64xf32>
    %cst_40 = arith.constant 1.000000e+00 : f32
    %265 = vector.broadcast %cst_40 : f32 to vector<2x64xf32>
    %266 = arith.addf %265, %264 : vector<2x64xf32>
    %267 = arith.divf %265, %266 : vector<2x64xf32>
    %268 = vector.extract_strided_slice %267 {offsets = [0, 0], sizes = [2, 32], strides = [1, 1]} : vector<2x64xf32> to vector<2x32xf32>
    %269 = vector.extract_strided_slice %267 {offsets = [0, 32], sizes = [2, 32], strides = [1, 1]} : vector<2x64xf32> to vector<2x32xf32>
    %270 = vector.extract_strided_slice %257 {offsets = [0, 64], sizes = [2, 32], strides = [1, 1]} : vector<2x96xf32> to vector<2x32xf32>
    %271 = vector.extract_strided_slice %258 {offsets = [0, 64], sizes = [2, 32], strides = [1, 1]} : vector<2x96xf32> to vector<2x32xf32>
    %272 = arith.mulf %268, %271 : vector<2x32xf32>
    %273 = arith.addf %270, %272 : vector<2x32xf32>
    %274 = math.tanh %273 : vector<2x32xf32>
    %cst_41 = arith.constant 1.000000e+00 : f32
    %275 = vector.broadcast %cst_41 : f32 to vector<2x32xf32>
    %276 = arith.subf %275, %269 : vector<2x32xf32>
    %277 = arith.mulf %276, %274 : vector<2x32xf32>
    %278 = arith.mulf %269, %259 : vector<2x32xf32>
    %279 = arith.addf %277, %278 : vector<2x32xf32>
    %280 = tpu.concatenate %255, %279 in 1 : vector<2x32xf32>, vector<2x32xf32> -> vector<2x64xf32>
    %cst_42 = arith.constant dense<0.000000e+00> : vector<2x192xf32>
    %281 = tpu.matmul %280, %18, %cst_42 {dimension_numbers = #tpu.dot_dimension_numbers<[1], [0], [0], [1], [0, 0, 1, 1], [], []>} : vector<2x64xf32>, vector<64x192xf32>, vector<2x192xf32> -> vector<2x192xf32>
    %282 = vector.broadcast %19 : vector<1x192xf32> to vector<2x192xf32>
    %283 = arith.addf %281, %282 : vector<2x192xf32>
    %284 = vector.extract_strided_slice %17 {offsets = [0, 5, 0], sizes = [2, 1, 96], strides = [1, 1, 1]} : vector<2x8x192xf32> to vector<2x1x96xf32>
    %285 = vector.shape_cast %284 : vector<2x1x96xf32> to vector<2x96xf32>
    %286 = vector.extract_strided_slice %283 {offsets = [0, 0], sizes = [2, 96], strides = [1, 1]} : vector<2x192xf32> to vector<2x96xf32>
    %287 = vector.extract_strided_slice %280 {offsets = [0, 0], sizes = [2, 32], strides = [1, 1]} : vector<2x64xf32> to vector<2x32xf32>
    %288 = vector.extract_strided_slice %285 {offsets = [0, 0], sizes = [2, 64], strides = [1, 1]} : vector<2x96xf32> to vector<2x64xf32>
    %289 = vector.extract_strided_slice %286 {offsets = [0, 0], sizes = [2, 64], strides = [1, 1]} : vector<2x96xf32> to vector<2x64xf32>
    %290 = arith.addf %288, %289 : vector<2x64xf32>
    %291 = arith.negf %290 : vector<2x64xf32>
    %292 = math.exp %291 : vector<2x64xf32>
    %cst_43 = arith.constant 1.000000e+00 : f32
    %293 = vector.broadcast %cst_43 : f32 to vector<2x64xf32>
    %294 = arith.addf %293, %292 : vector<2x64xf32>
    %295 = arith.divf %293, %294 : vector<2x64xf32>
    %296 = vector.extract_strided_slice %295 {offsets = [0, 0], sizes = [2, 32], strides = [1, 1]} : vector<2x64xf32> to vector<2x32xf32>
    %297 = vector.extract_strided_slice %295 {offsets = [0, 32], sizes = [2, 32], strides = [1, 1]} : vector<2x64xf32> to vector<2x32xf32>
    %298 = vector.extract_strided_slice %285 {offsets = [0, 64], sizes = [2, 32], strides = [1, 1]} : vector<2x96xf32> to vector<2x32xf32>
    %299 = vector.extract_strided_slice %286 {offsets = [0, 64], sizes = [2, 32], strides = [1, 1]} : vector<2x96xf32> to vector<2x32xf32>
    %300 = arith.mulf %296, %299 : vector<2x32xf32>
    %301 = arith.addf %298, %300 : vector<2x32xf32>
    %302 = math.tanh %301 : vector<2x32xf32>
    %cst_44 = arith.constant 1.000000e+00 : f32
    %303 = vector.broadcast %cst_44 : f32 to vector<2x32xf32>
    %304 = arith.subf %303, %297 : vector<2x32xf32>
    %305 = arith.mulf %304, %302 : vector<2x32xf32>
    %306 = arith.mulf %297, %287 : vector<2x32xf32>
    %307 = arith.addf %305, %306 : vector<2x32xf32>
    %308 = vector.extract_strided_slice %17 {offsets = [0, 2, 96], sizes = [2, 1, 96], strides = [1, 1, 1]} : vector<2x8x192xf32> to vector<2x1x96xf32>
    %309 = vector.shape_cast %308 : vector<2x1x96xf32> to vector<2x96xf32>
    %310 = vector.extract_strided_slice %283 {offsets = [0, 96], sizes = [2, 96], strides = [1, 1]} : vector<2x192xf32> to vector<2x96xf32>
    %311 = vector.extract_strided_slice %280 {offsets = [0, 32], sizes = [2, 32], strides = [1, 1]} : vector<2x64xf32> to vector<2x32xf32>
    %312 = vector.extract_strided_slice %309 {offsets = [0, 0], sizes = [2, 64], strides = [1, 1]} : vector<2x96xf32> to vector<2x64xf32>
    %313 = vector.extract_strided_slice %310 {offsets = [0, 0], sizes = [2, 64], strides = [1, 1]} : vector<2x96xf32> to vector<2x64xf32>
    %314 = arith.addf %312, %313 : vector<2x64xf32>
    %315 = arith.negf %314 : vector<2x64xf32>
    %316 = math.exp %315 : vector<2x64xf32>
    %cst_45 = arith.constant 1.000000e+00 : f32
    %317 = vector.broadcast %cst_45 : f32 to vector<2x64xf32>
    %318 = arith.addf %317, %316 : vector<2x64xf32>
    %319 = arith.divf %317, %318 : vector<2x64xf32>
    %320 = vector.extract_strided_slice %319 {offsets = [0, 0], sizes = [2, 32], strides = [1, 1]} : vector<2x64xf32> to vector<2x32xf32>
    %321 = vector.extract_strided_slice %319 {offsets = [0, 32], sizes = [2, 32], strides = [1, 1]} : vector<2x64xf32> to vector<2x32xf32>
    %322 = vector.extract_strided_slice %309 {offsets = [0, 64], sizes = [2, 32], strides = [1, 1]} : vector<2x96xf32> to vector<2x32xf32>
    %323 = vector.extract_strided_slice %310 {offsets = [0, 64], sizes = [2, 32], strides = [1, 1]} : vector<2x96xf32> to vector<2x32xf32>
    %324 = arith.mulf %320, %323 : vector<2x32xf32>
    %325 = arith.addf %322, %324 : vector<2x32xf32>
    %326 = math.tanh %325 : vector<2x32xf32>
    %cst_46 = arith.constant 1.000000e+00 : f32
    %327 = vector.broadcast %cst_46 : f32 to vector<2x32xf32>
    %328 = arith.subf %327, %321 : vector<2x32xf32>
    %329 = arith.mulf %328, %326 : vector<2x32xf32>
    %330 = arith.mulf %321, %311 : vector<2x32xf32>
    %331 = arith.addf %329, %330 : vector<2x32xf32>
    %332 = tpu.concatenate %307, %331 in 1 : vector<2x32xf32>, vector<2x32xf32> -> vector<2x64xf32>
    %cst_47 = arith.constant dense<0.000000e+00> : vector<2x192xf32>
    %333 = tpu.matmul %332, %18, %cst_47 {dimension_numbers = #tpu.dot_dimension_numbers<[1], [0], [0], [1], [0, 0, 1, 1], [], []>} : vector<2x64xf32>, vector<64x192xf32>, vector<2x192xf32> -> vector<2x192xf32>
    %334 = vector.broadcast %19 : vector<1x192xf32> to vector<2x192xf32>
    %335 = arith.addf %333, %334 : vector<2x192xf32>
    %336 = vector.extract_strided_slice %17 {offsets = [0, 6, 0], sizes = [2, 1, 96], strides = [1, 1, 1]} : vector<2x8x192xf32> to vector<2x1x96xf32>
    %337 = vector.shape_cast %336 : vector<2x1x96xf32> to vector<2x96xf32>
    %338 = vector.extract_strided_slice %335 {offsets = [0, 0], sizes = [2, 96], strides = [1, 1]} : vector<2x192xf32> to vector<2x96xf32>
    %339 = vector.extract_strided_slice %332 {offsets = [0, 0], sizes = [2, 32], strides = [1, 1]} : vector<2x64xf32> to vector<2x32xf32>
    %340 = vector.extract_strided_slice %337 {offsets = [0, 0], sizes = [2, 64], strides = [1, 1]} : vector<2x96xf32> to vector<2x64xf32>
    %341 = vector.extract_strided_slice %338 {offsets = [0, 0], sizes = [2, 64], strides = [1, 1]} : vector<2x96xf32> to vector<2x64xf32>
    %342 = arith.addf %340, %341 : vector<2x64xf32>
    %343 = arith.negf %342 : vector<2x64xf32>
    %344 = math.exp %343 : vector<2x64xf32>
    %cst_48 = arith.constant 1.000000e+00 : f32
    %345 = vector.broadcast %cst_48 : f32 to vector<2x64xf32>
    %346 = arith.addf %345, %344 : vector<2x64xf32>
    %347 = arith.divf %345, %346 : vector<2x64xf32>
    %348 = vector.extract_strided_slice %347 {offsets = [0, 0], sizes = [2, 32], strides = [1, 1]} : vector<2x64xf32> to vector<2x32xf32>
    %349 = vector.extract_strided_slice %347 {offsets = [0, 32], sizes = [2, 32], strides = [1, 1]} : vector<2x64xf32> to vector<2x32xf32>
    %350 = vector.extract_strided_slice %337 {offsets = [0, 64], sizes = [2, 32], strides = [1, 1]} : vector<2x96xf32> to vector<2x32xf32>
    %351 = vector.extract_strided_slice %338 {offsets = [0, 64], sizes = [2, 32], strides = [1, 1]} : vector<2x96xf32> to vector<2x32xf32>
    %352 = arith.mulf %348, %351 : vector<2x32xf32>
    %353 = arith.addf %350, %352 : vector<2x32xf32>
    %354 = math.tanh %353 : vector<2x32xf32>
    %cst_49 = arith.constant 1.000000e+00 : f32
    %355 = vector.broadcast %cst_49 : f32 to vector<2x32xf32>
    %356 = arith.subf %355, %349 : vector<2x32xf32>
    %357 = arith.mulf %356, %354 : vector<2x32xf32>
    %358 = arith.mulf %349, %339 : vector<2x32xf32>
    %359 = arith.addf %357, %358 : vector<2x32xf32>
    %360 = vector.extract_strided_slice %17 {offsets = [0, 1, 96], sizes = [2, 1, 96], strides = [1, 1, 1]} : vector<2x8x192xf32> to vector<2x1x96xf32>
    %361 = vector.shape_cast %360 : vector<2x1x96xf32> to vector<2x96xf32>
    %362 = vector.extract_strided_slice %335 {offsets = [0, 96], sizes = [2, 96], strides = [1, 1]} : vector<2x192xf32> to vector<2x96xf32>
    %363 = vector.extract_strided_slice %332 {offsets = [0, 32], sizes = [2, 32], strides = [1, 1]} : vector<2x64xf32> to vector<2x32xf32>
    %364 = vector.extract_strided_slice %361 {offsets = [0, 0], sizes = [2, 64], strides = [1, 1]} : vector<2x96xf32> to vector<2x64xf32>
    %365 = vector.extract_strided_slice %362 {offsets = [0, 0], sizes = [2, 64], strides = [1, 1]} : vector<2x96xf32> to vector<2x64xf32>
    %366 = arith.addf %364, %365 : vector<2x64xf32>
    %367 = arith.negf %366 : vector<2x64xf32>
    %368 = math.exp %367 : vector<2x64xf32>
    %cst_50 = arith.constant 1.000000e+00 : f32
    %369 = vector.broadcast %cst_50 : f32 to vector<2x64xf32>
    %370 = arith.addf %369, %368 : vector<2x64xf32>
    %371 = arith.divf %369, %370 : vector<2x64xf32>
    %372 = vector.extract_strided_slice %371 {offsets = [0, 0], sizes = [2, 32], strides = [1, 1]} : vector<2x64xf32> to vector<2x32xf32>
    %373 = vector.extract_strided_slice %371 {offsets = [0, 32], sizes = [2, 32], strides = [1, 1]} : vector<2x64xf32> to vector<2x32xf32>
    %374 = vector.extract_strided_slice %361 {offsets = [0, 64], sizes = [2, 32], strides = [1, 1]} : vector<2x96xf32> to vector<2x32xf32>
    %375 = vector.extract_strided_slice %362 {offsets = [0, 64], sizes = [2, 32], strides = [1, 1]} : vector<2x96xf32> to vector<2x32xf32>
    %376 = arith.mulf %372, %375 : vector<2x32xf32>
    %377 = arith.addf %374, %376 : vector<2x32xf32>
    %378 = math.tanh %377 : vector<2x32xf32>
    %cst_51 = arith.constant 1.000000e+00 : f32
    %379 = vector.broadcast %cst_51 : f32 to vector<2x32xf32>
    %380 = arith.subf %379, %373 : vector<2x32xf32>
    %381 = arith.mulf %380, %378 : vector<2x32xf32>
    %382 = arith.mulf %373, %363 : vector<2x32xf32>
    %383 = arith.addf %381, %382 : vector<2x32xf32>
    %384 = tpu.concatenate %359, %383 in 1 : vector<2x32xf32>, vector<2x32xf32> -> vector<2x64xf32>
    %cst_52 = arith.constant dense<0.000000e+00> : vector<2x192xf32>
    %385 = tpu.matmul %384, %18, %cst_52 {dimension_numbers = #tpu.dot_dimension_numbers<[1], [0], [0], [1], [0, 0, 1, 1], [], []>} : vector<2x64xf32>, vector<64x192xf32>, vector<2x192xf32> -> vector<2x192xf32>
    %386 = vector.broadcast %19 : vector<1x192xf32> to vector<2x192xf32>
    %387 = arith.addf %385, %386 : vector<2x192xf32>
    %388 = vector.extract_strided_slice %17 {offsets = [0, 7, 0], sizes = [2, 1, 96], strides = [1, 1, 1]} : vector<2x8x192xf32> to vector<2x1x96xf32>
    %389 = vector.shape_cast %388 : vector<2x1x96xf32> to vector<2x96xf32>
    %390 = vector.extract_strided_slice %387 {offsets = [0, 0], sizes = [2, 96], strides = [1, 1]} : vector<2x192xf32> to vector<2x96xf32>
    %391 = vector.extract_strided_slice %384 {offsets = [0, 0], sizes = [2, 32], strides = [1, 1]} : vector<2x64xf32> to vector<2x32xf32>
    %392 = vector.extract_strided_slice %389 {offsets = [0, 0], sizes = [2, 64], strides = [1, 1]} : vector<2x96xf32> to vector<2x64xf32>
    %393 = vector.extract_strided_slice %390 {offsets = [0, 0], sizes = [2, 64], strides = [1, 1]} : vector<2x96xf32> to vector<2x64xf32>
    %394 = arith.addf %392, %393 : vector<2x64xf32>
    %395 = arith.negf %394 : vector<2x64xf32>
    %396 = math.exp %395 : vector<2x64xf32>
    %cst_53 = arith.constant 1.000000e+00 : f32
    %397 = vector.broadcast %cst_53 : f32 to vector<2x64xf32>
    %398 = arith.addf %397, %396 : vector<2x64xf32>
    %399 = arith.divf %397, %398 : vector<2x64xf32>
    %400 = vector.extract_strided_slice %399 {offsets = [0, 0], sizes = [2, 32], strides = [1, 1]} : vector<2x64xf32> to vector<2x32xf32>
    %401 = vector.extract_strided_slice %399 {offsets = [0, 32], sizes = [2, 32], strides = [1, 1]} : vector<2x64xf32> to vector<2x32xf32>
    %402 = vector.extract_strided_slice %389 {offsets = [0, 64], sizes = [2, 32], strides = [1, 1]} : vector<2x96xf32> to vector<2x32xf32>
    %403 = vector.extract_strided_slice %390 {offsets = [0, 64], sizes = [2, 32], strides = [1, 1]} : vector<2x96xf32> to vector<2x32xf32>
    %404 = arith.mulf %400, %403 : vector<2x32xf32>
    %405 = arith.addf %402, %404 : vector<2x32xf32>
    %406 = math.tanh %405 : vector<2x32xf32>
    %cst_54 = arith.constant 1.000000e+00 : f32
    %407 = vector.broadcast %cst_54 : f32 to vector<2x32xf32>
    %408 = arith.subf %407, %401 : vector<2x32xf32>
    %409 = arith.mulf %408, %406 : vector<2x32xf32>
    %410 = arith.mulf %401, %391 : vector<2x32xf32>
    %411 = arith.addf %409, %410 : vector<2x32xf32>
    %412 = vector.extract_strided_slice %17 {offsets = [0, 0, 96], sizes = [2, 1, 96], strides = [1, 1, 1]} : vector<2x8x192xf32> to vector<2x1x96xf32>
    %413 = vector.shape_cast %412 : vector<2x1x96xf32> to vector<2x96xf32>
    %414 = vector.extract_strided_slice %387 {offsets = [0, 96], sizes = [2, 96], strides = [1, 1]} : vector<2x192xf32> to vector<2x96xf32>
    %415 = vector.extract_strided_slice %384 {offsets = [0, 32], sizes = [2, 32], strides = [1, 1]} : vector<2x64xf32> to vector<2x32xf32>
    %416 = vector.extract_strided_slice %413 {offsets = [0, 0], sizes = [2, 64], strides = [1, 1]} : vector<2x96xf32> to vector<2x64xf32>
    %417 = vector.extract_strided_slice %414 {offsets = [0, 0], sizes = [2, 64], strides = [1, 1]} : vector<2x96xf32> to vector<2x64xf32>
    %418 = arith.addf %416, %417 : vector<2x64xf32>
    %419 = arith.negf %418 : vector<2x64xf32>
    %420 = math.exp %419 : vector<2x64xf32>
    %cst_55 = arith.constant 1.000000e+00 : f32
    %421 = vector.broadcast %cst_55 : f32 to vector<2x64xf32>
    %422 = arith.addf %421, %420 : vector<2x64xf32>
    %423 = arith.divf %421, %422 : vector<2x64xf32>
    %424 = vector.extract_strided_slice %423 {offsets = [0, 0], sizes = [2, 32], strides = [1, 1]} : vector<2x64xf32> to vector<2x32xf32>
    %425 = vector.extract_strided_slice %423 {offsets = [0, 32], sizes = [2, 32], strides = [1, 1]} : vector<2x64xf32> to vector<2x32xf32>
    %426 = vector.extract_strided_slice %413 {offsets = [0, 64], sizes = [2, 32], strides = [1, 1]} : vector<2x96xf32> to vector<2x32xf32>
    %427 = vector.extract_strided_slice %414 {offsets = [0, 64], sizes = [2, 32], strides = [1, 1]} : vector<2x96xf32> to vector<2x32xf32>
    %428 = arith.mulf %424, %427 : vector<2x32xf32>
    %429 = arith.addf %426, %428 : vector<2x32xf32>
    %430 = math.tanh %429 : vector<2x32xf32>
    %cst_56 = arith.constant 1.000000e+00 : f32
    %431 = vector.broadcast %cst_56 : f32 to vector<2x32xf32>
    %432 = arith.subf %431, %425 : vector<2x32xf32>
    %433 = arith.mulf %432, %430 : vector<2x32xf32>
    %434 = arith.mulf %425, %415 : vector<2x32xf32>
    %435 = arith.addf %433, %434 : vector<2x32xf32>
    %436 = tpu.concatenate %47, %435 in 1 : vector<2x32xf32>, vector<2x32xf32> -> vector<2x64xf32>
    %437 = tpu.concatenate %99, %383 in 1 : vector<2x32xf32>, vector<2x32xf32> -> vector<2x64xf32>
    %438 = tpu.concatenate %151, %331 in 1 : vector<2x32xf32>, vector<2x32xf32> -> vector<2x64xf32>
    %439 = tpu.concatenate %203, %279 in 1 : vector<2x32xf32>, vector<2x32xf32> -> vector<2x64xf32>
    %440 = tpu.concatenate %255, %227 in 1 : vector<2x32xf32>, vector<2x32xf32> -> vector<2x64xf32>
    %441 = tpu.concatenate %307, %175 in 1 : vector<2x32xf32>, vector<2x32xf32> -> vector<2x64xf32>
    %442 = tpu.concatenate %359, %123 in 1 : vector<2x32xf32>, vector<2x32xf32> -> vector<2x64xf32>
    %443 = tpu.concatenate %411, %71 in 1 : vector<2x32xf32>, vector<2x32xf32> -> vector<2x64xf32>
    %444 = vector.shape_cast %436 : vector<2x64xf32> to vector<2x1x64xf32>
    %445 = vector.shape_cast %437 : vector<2x64xf32> to vector<2x1x64xf32>
    %446 = vector.shape_cast %438 : vector<2x64xf32> to vector<2x1x64xf32>
    %447 = vector.shape_cast %439 : vector<2x64xf32> to vector<2x1x64xf32>
    %448 = vector.shape_cast %440 : vector<2x64xf32> to vector<2x1x64xf32>
    %449 = vector.shape_cast %441 : vector<2x64xf32> to vector<2x1x64xf32>
    %450 = vector.shape_cast %442 : vector<2x64xf32> to vector<2x1x64xf32>
    %451 = vector.shape_cast %443 : vector<2x64xf32> to vector<2x1x64xf32>
    %452 = tpu.concatenate %444, %445, %446, %447, %448, %449, %450, %451 in 1 : vector<2x1x64xf32>, vector<2x1x64xf32>, vector<2x1x64xf32>, vector<2x1x64xf32>, vector<2x1x64xf32>, vector<2x1x64xf32>, vector<2x1x64xf32>, vector<2x1x64xf32> -> vector<2x8x64xf32>
    %453 = vector.shape_cast %452 : vector<2x8x64xf32> to vector<16x64xf32>
    %c0_57 = arith.constant 0 : index
    %c0_58 = arith.constant 0 : index
    %454 = vector.load %arg9[%c0_57, %c0_58] : memref<64x192xf32, #tpu.memory_space<vmem>>, vector<64x192xf32>
    %cst_59 = arith.constant dense<0.000000e+00> : vector<16x192xf32>
    %455 = tpu.matmul %453, %454, %cst_59 {dimension_numbers = #tpu.dot_dimension_numbers<[1], [0], [0], [1], [0, 0, 1, 1], [], []>} : vector<16x64xf32>, vector<64x192xf32>, vector<16x192xf32> -> vector<16x192xf32>
    %c0_60 = arith.constant 0 : index
    %c0_61 = arith.constant 0 : index
    %456 = vector.load %arg10[%c0_60, %c0_61] : memref<1x192xf32, #tpu.memory_space<vmem>>, vector<1x192xf32>
    %457 = vector.broadcast %456 : vector<1x192xf32> to vector<16x192xf32>
    %458 = arith.addf %455, %457 : vector<16x192xf32>
    %459 = vector.shape_cast %458 : vector<16x192xf32> to vector<2x8x192xf32>
    %c0_62 = arith.constant 0 : index
    %c0_63 = arith.constant 0 : index
    %460 = vector.load %arg11[%c0_62, %c0_63] : memref<64x192xf32, #tpu.memory_space<vmem>>, vector<64x192xf32>
    %c0_64 = arith.constant 0 : index
    %c0_65 = arith.constant 0 : index
    %461 = vector.load %arg12[%c0_64, %c0_65] : memref<1x192xf32, #tpu.memory_space<vmem>>, vector<1x192xf32>
    %cst_66 = arith.constant 0.000000e+00 : f32
    %462 = vector.broadcast %cst_66 : f32 to vector<2x64xf32>
    %cst_67 = arith.constant dense<0.000000e+00> : vector<2x192xf32>
    %463 = tpu.matmul %462, %460, %cst_67 {dimension_numbers = #tpu.dot_dimension_numbers<[1], [0], [0], [1], [0, 0, 1, 1], [], []>} : vector<2x64xf32>, vector<64x192xf32>, vector<2x192xf32> -> vector<2x192xf32>
    %464 = vector.broadcast %461 : vector<1x192xf32> to vector<2x192xf32>
    %465 = arith.addf %463, %464 : vector<2x192xf32>
    %466 = vector.extract_strided_slice %459 {offsets = [0, 0, 0], sizes = [2, 1, 96], strides = [1, 1, 1]} : vector<2x8x192xf32> to vector<2x1x96xf32>
    %467 = vector.shape_cast %466 : vector<2x1x96xf32> to vector<2x96xf32>
    %468 = vector.extract_strided_slice %465 {offsets = [0, 0], sizes = [2, 96], strides = [1, 1]} : vector<2x192xf32> to vector<2x96xf32>
    %469 = vector.extract_strided_slice %462 {offsets = [0, 0], sizes = [2, 32], strides = [1, 1]} : vector<2x64xf32> to vector<2x32xf32>
    %470 = vector.extract_strided_slice %467 {offsets = [0, 0], sizes = [2, 64], strides = [1, 1]} : vector<2x96xf32> to vector<2x64xf32>
    %471 = vector.extract_strided_slice %468 {offsets = [0, 0], sizes = [2, 64], strides = [1, 1]} : vector<2x96xf32> to vector<2x64xf32>
    %472 = arith.addf %470, %471 : vector<2x64xf32>
    %473 = arith.negf %472 : vector<2x64xf32>
    %474 = math.exp %473 : vector<2x64xf32>
    %cst_68 = arith.constant 1.000000e+00 : f32
    %475 = vector.broadcast %cst_68 : f32 to vector<2x64xf32>
    %476 = arith.addf %475, %474 : vector<2x64xf32>
    %477 = arith.divf %475, %476 : vector<2x64xf32>
    %478 = vector.extract_strided_slice %477 {offsets = [0, 0], sizes = [2, 32], strides = [1, 1]} : vector<2x64xf32> to vector<2x32xf32>
    %479 = vector.extract_strided_slice %477 {offsets = [0, 32], sizes = [2, 32], strides = [1, 1]} : vector<2x64xf32> to vector<2x32xf32>
    %480 = vector.extract_strided_slice %467 {offsets = [0, 64], sizes = [2, 32], strides = [1, 1]} : vector<2x96xf32> to vector<2x32xf32>
    %481 = vector.extract_strided_slice %468 {offsets = [0, 64], sizes = [2, 32], strides = [1, 1]} : vector<2x96xf32> to vector<2x32xf32>
    %482 = arith.mulf %478, %481 : vector<2x32xf32>
    %483 = arith.addf %480, %482 : vector<2x32xf32>
    %484 = math.tanh %483 : vector<2x32xf32>
    %cst_69 = arith.constant 1.000000e+00 : f32
    %485 = vector.broadcast %cst_69 : f32 to vector<2x32xf32>
    %486 = arith.subf %485, %479 : vector<2x32xf32>
    %487 = arith.mulf %486, %484 : vector<2x32xf32>
    %488 = arith.mulf %479, %469 : vector<2x32xf32>
    %489 = arith.addf %487, %488 : vector<2x32xf32>
    %490 = vector.extract_strided_slice %459 {offsets = [0, 7, 96], sizes = [2, 1, 96], strides = [1, 1, 1]} : vector<2x8x192xf32> to vector<2x1x96xf32>
    %491 = vector.shape_cast %490 : vector<2x1x96xf32> to vector<2x96xf32>
    %492 = vector.extract_strided_slice %465 {offsets = [0, 96], sizes = [2, 96], strides = [1, 1]} : vector<2x192xf32> to vector<2x96xf32>
    %493 = vector.extract_strided_slice %462 {offsets = [0, 32], sizes = [2, 32], strides = [1, 1]} : vector<2x64xf32> to vector<2x32xf32>
    %494 = vector.extract_strided_slice %491 {offsets = [0, 0], sizes = [2, 64], strides = [1, 1]} : vector<2x96xf32> to vector<2x64xf32>
    %495 = vector.extract_strided_slice %492 {offsets = [0, 0], sizes = [2, 64], strides = [1, 1]} : vector<2x96xf32> to vector<2x64xf32>
    %496 = arith.addf %494, %495 : vector<2x64xf32>
    %497 = arith.negf %496 : vector<2x64xf32>
    %498 = math.exp %497 : vector<2x64xf32>
    %cst_70 = arith.constant 1.000000e+00 : f32
    %499 = vector.broadcast %cst_70 : f32 to vector<2x64xf32>
    %500 = arith.addf %499, %498 : vector<2x64xf32>
    %501 = arith.divf %499, %500 : vector<2x64xf32>
    %502 = vector.extract_strided_slice %501 {offsets = [0, 0], sizes = [2, 32], strides = [1, 1]} : vector<2x64xf32> to vector<2x32xf32>
    %503 = vector.extract_strided_slice %501 {offsets = [0, 32], sizes = [2, 32], strides = [1, 1]} : vector<2x64xf32> to vector<2x32xf32>
    %504 = vector.extract_strided_slice %491 {offsets = [0, 64], sizes = [2, 32], strides = [1, 1]} : vector<2x96xf32> to vector<2x32xf32>
    %505 = vector.extract_strided_slice %492 {offsets = [0, 64], sizes = [2, 32], strides = [1, 1]} : vector<2x96xf32> to vector<2x32xf32>
    %506 = arith.mulf %502, %505 : vector<2x32xf32>
    %507 = arith.addf %504, %506 : vector<2x32xf32>
    %508 = math.tanh %507 : vector<2x32xf32>
    %cst_71 = arith.constant 1.000000e+00 : f32
    %509 = vector.broadcast %cst_71 : f32 to vector<2x32xf32>
    %510 = arith.subf %509, %503 : vector<2x32xf32>
    %511 = arith.mulf %510, %508 : vector<2x32xf32>
    %512 = arith.mulf %503, %493 : vector<2x32xf32>
    %513 = arith.addf %511, %512 : vector<2x32xf32>
    %514 = tpu.concatenate %489, %513 in 1 : vector<2x32xf32>, vector<2x32xf32> -> vector<2x64xf32>
    %cst_72 = arith.constant dense<0.000000e+00> : vector<2x192xf32>
    %515 = tpu.matmul %514, %460, %cst_72 {dimension_numbers = #tpu.dot_dimension_numbers<[1], [0], [0], [1], [0, 0, 1, 1], [], []>} : vector<2x64xf32>, vector<64x192xf32>, vector<2x192xf32> -> vector<2x192xf32>
    %516 = vector.broadcast %461 : vector<1x192xf32> to vector<2x192xf32>
    %517 = arith.addf %515, %516 : vector<2x192xf32>
    %518 = vector.extract_strided_slice %459 {offsets = [0, 1, 0], sizes = [2, 1, 96], strides = [1, 1, 1]} : vector<2x8x192xf32> to vector<2x1x96xf32>
    %519 = vector.shape_cast %518 : vector<2x1x96xf32> to vector<2x96xf32>
    %520 = vector.extract_strided_slice %517 {offsets = [0, 0], sizes = [2, 96], strides = [1, 1]} : vector<2x192xf32> to vector<2x96xf32>
    %521 = vector.extract_strided_slice %514 {offsets = [0, 0], sizes = [2, 32], strides = [1, 1]} : vector<2x64xf32> to vector<2x32xf32>
    %522 = vector.extract_strided_slice %519 {offsets = [0, 0], sizes = [2, 64], strides = [1, 1]} : vector<2x96xf32> to vector<2x64xf32>
    %523 = vector.extract_strided_slice %520 {offsets = [0, 0], sizes = [2, 64], strides = [1, 1]} : vector<2x96xf32> to vector<2x64xf32>
    %524 = arith.addf %522, %523 : vector<2x64xf32>
    %525 = arith.negf %524 : vector<2x64xf32>
    %526 = math.exp %525 : vector<2x64xf32>
    %cst_73 = arith.constant 1.000000e+00 : f32
    %527 = vector.broadcast %cst_73 : f32 to vector<2x64xf32>
    %528 = arith.addf %527, %526 : vector<2x64xf32>
    %529 = arith.divf %527, %528 : vector<2x64xf32>
    %530 = vector.extract_strided_slice %529 {offsets = [0, 0], sizes = [2, 32], strides = [1, 1]} : vector<2x64xf32> to vector<2x32xf32>
    %531 = vector.extract_strided_slice %529 {offsets = [0, 32], sizes = [2, 32], strides = [1, 1]} : vector<2x64xf32> to vector<2x32xf32>
    %532 = vector.extract_strided_slice %519 {offsets = [0, 64], sizes = [2, 32], strides = [1, 1]} : vector<2x96xf32> to vector<2x32xf32>
    %533 = vector.extract_strided_slice %520 {offsets = [0, 64], sizes = [2, 32], strides = [1, 1]} : vector<2x96xf32> to vector<2x32xf32>
    %534 = arith.mulf %530, %533 : vector<2x32xf32>
    %535 = arith.addf %532, %534 : vector<2x32xf32>
    %536 = math.tanh %535 : vector<2x32xf32>
    %cst_74 = arith.constant 1.000000e+00 : f32
    %537 = vector.broadcast %cst_74 : f32 to vector<2x32xf32>
    %538 = arith.subf %537, %531 : vector<2x32xf32>
    %539 = arith.mulf %538, %536 : vector<2x32xf32>
    %540 = arith.mulf %531, %521 : vector<2x32xf32>
    %541 = arith.addf %539, %540 : vector<2x32xf32>
    %542 = vector.extract_strided_slice %459 {offsets = [0, 6, 96], sizes = [2, 1, 96], strides = [1, 1, 1]} : vector<2x8x192xf32> to vector<2x1x96xf32>
    %543 = vector.shape_cast %542 : vector<2x1x96xf32> to vector<2x96xf32>
    %544 = vector.extract_strided_slice %517 {offsets = [0, 96], sizes = [2, 96], strides = [1, 1]} : vector<2x192xf32> to vector<2x96xf32>
    %545 = vector.extract_strided_slice %514 {offsets = [0, 32], sizes = [2, 32], strides = [1, 1]} : vector<2x64xf32> to vector<2x32xf32>
    %546 = vector.extract_strided_slice %543 {offsets = [0, 0], sizes = [2, 64], strides = [1, 1]} : vector<2x96xf32> to vector<2x64xf32>
    %547 = vector.extract_strided_slice %544 {offsets = [0, 0], sizes = [2, 64], strides = [1, 1]} : vector<2x96xf32> to vector<2x64xf32>
    %548 = arith.addf %546, %547 : vector<2x64xf32>
    %549 = arith.negf %548 : vector<2x64xf32>
    %550 = math.exp %549 : vector<2x64xf32>
    %cst_75 = arith.constant 1.000000e+00 : f32
    %551 = vector.broadcast %cst_75 : f32 to vector<2x64xf32>
    %552 = arith.addf %551, %550 : vector<2x64xf32>
    %553 = arith.divf %551, %552 : vector<2x64xf32>
    %554 = vector.extract_strided_slice %553 {offsets = [0, 0], sizes = [2, 32], strides = [1, 1]} : vector<2x64xf32> to vector<2x32xf32>
    %555 = vector.extract_strided_slice %553 {offsets = [0, 32], sizes = [2, 32], strides = [1, 1]} : vector<2x64xf32> to vector<2x32xf32>
    %556 = vector.extract_strided_slice %543 {offsets = [0, 64], sizes = [2, 32], strides = [1, 1]} : vector<2x96xf32> to vector<2x32xf32>
    %557 = vector.extract_strided_slice %544 {offsets = [0, 64], sizes = [2, 32], strides = [1, 1]} : vector<2x96xf32> to vector<2x32xf32>
    %558 = arith.mulf %554, %557 : vector<2x32xf32>
    %559 = arith.addf %556, %558 : vector<2x32xf32>
    %560 = math.tanh %559 : vector<2x32xf32>
    %cst_76 = arith.constant 1.000000e+00 : f32
    %561 = vector.broadcast %cst_76 : f32 to vector<2x32xf32>
    %562 = arith.subf %561, %555 : vector<2x32xf32>
    %563 = arith.mulf %562, %560 : vector<2x32xf32>
    %564 = arith.mulf %555, %545 : vector<2x32xf32>
    %565 = arith.addf %563, %564 : vector<2x32xf32>
    %566 = tpu.concatenate %541, %565 in 1 : vector<2x32xf32>, vector<2x32xf32> -> vector<2x64xf32>
    %cst_77 = arith.constant dense<0.000000e+00> : vector<2x192xf32>
    %567 = tpu.matmul %566, %460, %cst_77 {dimension_numbers = #tpu.dot_dimension_numbers<[1], [0], [0], [1], [0, 0, 1, 1], [], []>} : vector<2x64xf32>, vector<64x192xf32>, vector<2x192xf32> -> vector<2x192xf32>
    %568 = vector.broadcast %461 : vector<1x192xf32> to vector<2x192xf32>
    %569 = arith.addf %567, %568 : vector<2x192xf32>
    %570 = vector.extract_strided_slice %459 {offsets = [0, 2, 0], sizes = [2, 1, 96], strides = [1, 1, 1]} : vector<2x8x192xf32> to vector<2x1x96xf32>
    %571 = vector.shape_cast %570 : vector<2x1x96xf32> to vector<2x96xf32>
    %572 = vector.extract_strided_slice %569 {offsets = [0, 0], sizes = [2, 96], strides = [1, 1]} : vector<2x192xf32> to vector<2x96xf32>
    %573 = vector.extract_strided_slice %566 {offsets = [0, 0], sizes = [2, 32], strides = [1, 1]} : vector<2x64xf32> to vector<2x32xf32>
    %574 = vector.extract_strided_slice %571 {offsets = [0, 0], sizes = [2, 64], strides = [1, 1]} : vector<2x96xf32> to vector<2x64xf32>
    %575 = vector.extract_strided_slice %572 {offsets = [0, 0], sizes = [2, 64], strides = [1, 1]} : vector<2x96xf32> to vector<2x64xf32>
    %576 = arith.addf %574, %575 : vector<2x64xf32>
    %577 = arith.negf %576 : vector<2x64xf32>
    %578 = math.exp %577 : vector<2x64xf32>
    %cst_78 = arith.constant 1.000000e+00 : f32
    %579 = vector.broadcast %cst_78 : f32 to vector<2x64xf32>
    %580 = arith.addf %579, %578 : vector<2x64xf32>
    %581 = arith.divf %579, %580 : vector<2x64xf32>
    %582 = vector.extract_strided_slice %581 {offsets = [0, 0], sizes = [2, 32], strides = [1, 1]} : vector<2x64xf32> to vector<2x32xf32>
    %583 = vector.extract_strided_slice %581 {offsets = [0, 32], sizes = [2, 32], strides = [1, 1]} : vector<2x64xf32> to vector<2x32xf32>
    %584 = vector.extract_strided_slice %571 {offsets = [0, 64], sizes = [2, 32], strides = [1, 1]} : vector<2x96xf32> to vector<2x32xf32>
    %585 = vector.extract_strided_slice %572 {offsets = [0, 64], sizes = [2, 32], strides = [1, 1]} : vector<2x96xf32> to vector<2x32xf32>
    %586 = arith.mulf %582, %585 : vector<2x32xf32>
    %587 = arith.addf %584, %586 : vector<2x32xf32>
    %588 = math.tanh %587 : vector<2x32xf32>
    %cst_79 = arith.constant 1.000000e+00 : f32
    %589 = vector.broadcast %cst_79 : f32 to vector<2x32xf32>
    %590 = arith.subf %589, %583 : vector<2x32xf32>
    %591 = arith.mulf %590, %588 : vector<2x32xf32>
    %592 = arith.mulf %583, %573 : vector<2x32xf32>
    %593 = arith.addf %591, %592 : vector<2x32xf32>
    %594 = vector.extract_strided_slice %459 {offsets = [0, 5, 96], sizes = [2, 1, 96], strides = [1, 1, 1]} : vector<2x8x192xf32> to vector<2x1x96xf32>
    %595 = vector.shape_cast %594 : vector<2x1x96xf32> to vector<2x96xf32>
    %596 = vector.extract_strided_slice %569 {offsets = [0, 96], sizes = [2, 96], strides = [1, 1]} : vector<2x192xf32> to vector<2x96xf32>
    %597 = vector.extract_strided_slice %566 {offsets = [0, 32], sizes = [2, 32], strides = [1, 1]} : vector<2x64xf32> to vector<2x32xf32>
    %598 = vector.extract_strided_slice %595 {offsets = [0, 0], sizes = [2, 64], strides = [1, 1]} : vector<2x96xf32> to vector<2x64xf32>
    %599 = vector.extract_strided_slice %596 {offsets = [0, 0], sizes = [2, 64], strides = [1, 1]} : vector<2x96xf32> to vector<2x64xf32>
    %600 = arith.addf %598, %599 : vector<2x64xf32>
    %601 = arith.negf %600 : vector<2x64xf32>
    %602 = math.exp %601 : vector<2x64xf32>
    %cst_80 = arith.constant 1.000000e+00 : f32
    %603 = vector.broadcast %cst_80 : f32 to vector<2x64xf32>
    %604 = arith.addf %603, %602 : vector<2x64xf32>
    %605 = arith.divf %603, %604 : vector<2x64xf32>
    %606 = vector.extract_strided_slice %605 {offsets = [0, 0], sizes = [2, 32], strides = [1, 1]} : vector<2x64xf32> to vector<2x32xf32>
    %607 = vector.extract_strided_slice %605 {offsets = [0, 32], sizes = [2, 32], strides = [1, 1]} : vector<2x64xf32> to vector<2x32xf32>
    %608 = vector.extract_strided_slice %595 {offsets = [0, 64], sizes = [2, 32], strides = [1, 1]} : vector<2x96xf32> to vector<2x32xf32>
    %609 = vector.extract_strided_slice %596 {offsets = [0, 64], sizes = [2, 32], strides = [1, 1]} : vector<2x96xf32> to vector<2x32xf32>
    %610 = arith.mulf %606, %609 : vector<2x32xf32>
    %611 = arith.addf %608, %610 : vector<2x32xf32>
    %612 = math.tanh %611 : vector<2x32xf32>
    %cst_81 = arith.constant 1.000000e+00 : f32
    %613 = vector.broadcast %cst_81 : f32 to vector<2x32xf32>
    %614 = arith.subf %613, %607 : vector<2x32xf32>
    %615 = arith.mulf %614, %612 : vector<2x32xf32>
    %616 = arith.mulf %607, %597 : vector<2x32xf32>
    %617 = arith.addf %615, %616 : vector<2x32xf32>
    %618 = tpu.concatenate %593, %617 in 1 : vector<2x32xf32>, vector<2x32xf32> -> vector<2x64xf32>
    %cst_82 = arith.constant dense<0.000000e+00> : vector<2x192xf32>
    %619 = tpu.matmul %618, %460, %cst_82 {dimension_numbers = #tpu.dot_dimension_numbers<[1], [0], [0], [1], [0, 0, 1, 1], [], []>} : vector<2x64xf32>, vector<64x192xf32>, vector<2x192xf32> -> vector<2x192xf32>
    %620 = vector.broadcast %461 : vector<1x192xf32> to vector<2x192xf32>
    %621 = arith.addf %619, %620 : vector<2x192xf32>
    %622 = vector.extract_strided_slice %459 {offsets = [0, 3, 0], sizes = [2, 1, 96], strides = [1, 1, 1]} : vector<2x8x192xf32> to vector<2x1x96xf32>
    %623 = vector.shape_cast %622 : vector<2x1x96xf32> to vector<2x96xf32>
    %624 = vector.extract_strided_slice %621 {offsets = [0, 0], sizes = [2, 96], strides = [1, 1]} : vector<2x192xf32> to vector<2x96xf32>
    %625 = vector.extract_strided_slice %618 {offsets = [0, 0], sizes = [2, 32], strides = [1, 1]} : vector<2x64xf32> to vector<2x32xf32>
    %626 = vector.extract_strided_slice %623 {offsets = [0, 0], sizes = [2, 64], strides = [1, 1]} : vector<2x96xf32> to vector<2x64xf32>
    %627 = vector.extract_strided_slice %624 {offsets = [0, 0], sizes = [2, 64], strides = [1, 1]} : vector<2x96xf32> to vector<2x64xf32>
    %628 = arith.addf %626, %627 : vector<2x64xf32>
    %629 = arith.negf %628 : vector<2x64xf32>
    %630 = math.exp %629 : vector<2x64xf32>
    %cst_83 = arith.constant 1.000000e+00 : f32
    %631 = vector.broadcast %cst_83 : f32 to vector<2x64xf32>
    %632 = arith.addf %631, %630 : vector<2x64xf32>
    %633 = arith.divf %631, %632 : vector<2x64xf32>
    %634 = vector.extract_strided_slice %633 {offsets = [0, 0], sizes = [2, 32], strides = [1, 1]} : vector<2x64xf32> to vector<2x32xf32>
    %635 = vector.extract_strided_slice %633 {offsets = [0, 32], sizes = [2, 32], strides = [1, 1]} : vector<2x64xf32> to vector<2x32xf32>
    %636 = vector.extract_strided_slice %623 {offsets = [0, 64], sizes = [2, 32], strides = [1, 1]} : vector<2x96xf32> to vector<2x32xf32>
    %637 = vector.extract_strided_slice %624 {offsets = [0, 64], sizes = [2, 32], strides = [1, 1]} : vector<2x96xf32> to vector<2x32xf32>
    %638 = arith.mulf %634, %637 : vector<2x32xf32>
    %639 = arith.addf %636, %638 : vector<2x32xf32>
    %640 = math.tanh %639 : vector<2x32xf32>
    %cst_84 = arith.constant 1.000000e+00 : f32
    %641 = vector.broadcast %cst_84 : f32 to vector<2x32xf32>
    %642 = arith.subf %641, %635 : vector<2x32xf32>
    %643 = arith.mulf %642, %640 : vector<2x32xf32>
    %644 = arith.mulf %635, %625 : vector<2x32xf32>
    %645 = arith.addf %643, %644 : vector<2x32xf32>
    %646 = vector.extract_strided_slice %459 {offsets = [0, 4, 96], sizes = [2, 1, 96], strides = [1, 1, 1]} : vector<2x8x192xf32> to vector<2x1x96xf32>
    %647 = vector.shape_cast %646 : vector<2x1x96xf32> to vector<2x96xf32>
    %648 = vector.extract_strided_slice %621 {offsets = [0, 96], sizes = [2, 96], strides = [1, 1]} : vector<2x192xf32> to vector<2x96xf32>
    %649 = vector.extract_strided_slice %618 {offsets = [0, 32], sizes = [2, 32], strides = [1, 1]} : vector<2x64xf32> to vector<2x32xf32>
    %650 = vector.extract_strided_slice %647 {offsets = [0, 0], sizes = [2, 64], strides = [1, 1]} : vector<2x96xf32> to vector<2x64xf32>
    %651 = vector.extract_strided_slice %648 {offsets = [0, 0], sizes = [2, 64], strides = [1, 1]} : vector<2x96xf32> to vector<2x64xf32>
    %652 = arith.addf %650, %651 : vector<2x64xf32>
    %653 = arith.negf %652 : vector<2x64xf32>
    %654 = math.exp %653 : vector<2x64xf32>
    %cst_85 = arith.constant 1.000000e+00 : f32
    %655 = vector.broadcast %cst_85 : f32 to vector<2x64xf32>
    %656 = arith.addf %655, %654 : vector<2x64xf32>
    %657 = arith.divf %655, %656 : vector<2x64xf32>
    %658 = vector.extract_strided_slice %657 {offsets = [0, 0], sizes = [2, 32], strides = [1, 1]} : vector<2x64xf32> to vector<2x32xf32>
    %659 = vector.extract_strided_slice %657 {offsets = [0, 32], sizes = [2, 32], strides = [1, 1]} : vector<2x64xf32> to vector<2x32xf32>
    %660 = vector.extract_strided_slice %647 {offsets = [0, 64], sizes = [2, 32], strides = [1, 1]} : vector<2x96xf32> to vector<2x32xf32>
    %661 = vector.extract_strided_slice %648 {offsets = [0, 64], sizes = [2, 32], strides = [1, 1]} : vector<2x96xf32> to vector<2x32xf32>
    %662 = arith.mulf %658, %661 : vector<2x32xf32>
    %663 = arith.addf %660, %662 : vector<2x32xf32>
    %664 = math.tanh %663 : vector<2x32xf32>
    %cst_86 = arith.constant 1.000000e+00 : f32
    %665 = vector.broadcast %cst_86 : f32 to vector<2x32xf32>
    %666 = arith.subf %665, %659 : vector<2x32xf32>
    %667 = arith.mulf %666, %664 : vector<2x32xf32>
    %668 = arith.mulf %659, %649 : vector<2x32xf32>
    %669 = arith.addf %667, %668 : vector<2x32xf32>
    %670 = tpu.concatenate %645, %669 in 1 : vector<2x32xf32>, vector<2x32xf32> -> vector<2x64xf32>
    %cst_87 = arith.constant dense<0.000000e+00> : vector<2x192xf32>
    %671 = tpu.matmul %670, %460, %cst_87 {dimension_numbers = #tpu.dot_dimension_numbers<[1], [0], [0], [1], [0, 0, 1, 1], [], []>} : vector<2x64xf32>, vector<64x192xf32>, vector<2x192xf32> -> vector<2x192xf32>
    %672 = vector.broadcast %461 : vector<1x192xf32> to vector<2x192xf32>
    %673 = arith.addf %671, %672 : vector<2x192xf32>
    %674 = vector.extract_strided_slice %459 {offsets = [0, 4, 0], sizes = [2, 1, 96], strides = [1, 1, 1]} : vector<2x8x192xf32> to vector<2x1x96xf32>
    %675 = vector.shape_cast %674 : vector<2x1x96xf32> to vector<2x96xf32>
    %676 = vector.extract_strided_slice %673 {offsets = [0, 0], sizes = [2, 96], strides = [1, 1]} : vector<2x192xf32> to vector<2x96xf32>
    %677 = vector.extract_strided_slice %670 {offsets = [0, 0], sizes = [2, 32], strides = [1, 1]} : vector<2x64xf32> to vector<2x32xf32>
    %678 = vector.extract_strided_slice %675 {offsets = [0, 0], sizes = [2, 64], strides = [1, 1]} : vector<2x96xf32> to vector<2x64xf32>
    %679 = vector.extract_strided_slice %676 {offsets = [0, 0], sizes = [2, 64], strides = [1, 1]} : vector<2x96xf32> to vector<2x64xf32>
    %680 = arith.addf %678, %679 : vector<2x64xf32>
    %681 = arith.negf %680 : vector<2x64xf32>
    %682 = math.exp %681 : vector<2x64xf32>
    %cst_88 = arith.constant 1.000000e+00 : f32
    %683 = vector.broadcast %cst_88 : f32 to vector<2x64xf32>
    %684 = arith.addf %683, %682 : vector<2x64xf32>
    %685 = arith.divf %683, %684 : vector<2x64xf32>
    %686 = vector.extract_strided_slice %685 {offsets = [0, 0], sizes = [2, 32], strides = [1, 1]} : vector<2x64xf32> to vector<2x32xf32>
    %687 = vector.extract_strided_slice %685 {offsets = [0, 32], sizes = [2, 32], strides = [1, 1]} : vector<2x64xf32> to vector<2x32xf32>
    %688 = vector.extract_strided_slice %675 {offsets = [0, 64], sizes = [2, 32], strides = [1, 1]} : vector<2x96xf32> to vector<2x32xf32>
    %689 = vector.extract_strided_slice %676 {offsets = [0, 64], sizes = [2, 32], strides = [1, 1]} : vector<2x96xf32> to vector<2x32xf32>
    %690 = arith.mulf %686, %689 : vector<2x32xf32>
    %691 = arith.addf %688, %690 : vector<2x32xf32>
    %692 = math.tanh %691 : vector<2x32xf32>
    %cst_89 = arith.constant 1.000000e+00 : f32
    %693 = vector.broadcast %cst_89 : f32 to vector<2x32xf32>
    %694 = arith.subf %693, %687 : vector<2x32xf32>
    %695 = arith.mulf %694, %692 : vector<2x32xf32>
    %696 = arith.mulf %687, %677 : vector<2x32xf32>
    %697 = arith.addf %695, %696 : vector<2x32xf32>
    %698 = vector.extract_strided_slice %459 {offsets = [0, 3, 96], sizes = [2, 1, 96], strides = [1, 1, 1]} : vector<2x8x192xf32> to vector<2x1x96xf32>
    %699 = vector.shape_cast %698 : vector<2x1x96xf32> to vector<2x96xf32>
    %700 = vector.extract_strided_slice %673 {offsets = [0, 96], sizes = [2, 96], strides = [1, 1]} : vector<2x192xf32> to vector<2x96xf32>
    %701 = vector.extract_strided_slice %670 {offsets = [0, 32], sizes = [2, 32], strides = [1, 1]} : vector<2x64xf32> to vector<2x32xf32>
    %702 = vector.extract_strided_slice %699 {offsets = [0, 0], sizes = [2, 64], strides = [1, 1]} : vector<2x96xf32> to vector<2x64xf32>
    %703 = vector.extract_strided_slice %700 {offsets = [0, 0], sizes = [2, 64], strides = [1, 1]} : vector<2x96xf32> to vector<2x64xf32>
    %704 = arith.addf %702, %703 : vector<2x64xf32>
    %705 = arith.negf %704 : vector<2x64xf32>
    %706 = math.exp %705 : vector<2x64xf32>
    %cst_90 = arith.constant 1.000000e+00 : f32
    %707 = vector.broadcast %cst_90 : f32 to vector<2x64xf32>
    %708 = arith.addf %707, %706 : vector<2x64xf32>
    %709 = arith.divf %707, %708 : vector<2x64xf32>
    %710 = vector.extract_strided_slice %709 {offsets = [0, 0], sizes = [2, 32], strides = [1, 1]} : vector<2x64xf32> to vector<2x32xf32>
    %711 = vector.extract_strided_slice %709 {offsets = [0, 32], sizes = [2, 32], strides = [1, 1]} : vector<2x64xf32> to vector<2x32xf32>
    %712 = vector.extract_strided_slice %699 {offsets = [0, 64], sizes = [2, 32], strides = [1, 1]} : vector<2x96xf32> to vector<2x32xf32>
    %713 = vector.extract_strided_slice %700 {offsets = [0, 64], sizes = [2, 32], strides = [1, 1]} : vector<2x96xf32> to vector<2x32xf32>
    %714 = arith.mulf %710, %713 : vector<2x32xf32>
    %715 = arith.addf %712, %714 : vector<2x32xf32>
    %716 = math.tanh %715 : vector<2x32xf32>
    %cst_91 = arith.constant 1.000000e+00 : f32
    %717 = vector.broadcast %cst_91 : f32 to vector<2x32xf32>
    %718 = arith.subf %717, %711 : vector<2x32xf32>
    %719 = arith.mulf %718, %716 : vector<2x32xf32>
    %720 = arith.mulf %711, %701 : vector<2x32xf32>
    %721 = arith.addf %719, %720 : vector<2x32xf32>
    %722 = tpu.concatenate %697, %721 in 1 : vector<2x32xf32>, vector<2x32xf32> -> vector<2x64xf32>
    %cst_92 = arith.constant dense<0.000000e+00> : vector<2x192xf32>
    %723 = tpu.matmul %722, %460, %cst_92 {dimension_numbers = #tpu.dot_dimension_numbers<[1], [0], [0], [1], [0, 0, 1, 1], [], []>} : vector<2x64xf32>, vector<64x192xf32>, vector<2x192xf32> -> vector<2x192xf32>
    %724 = vector.broadcast %461 : vector<1x192xf32> to vector<2x192xf32>
    %725 = arith.addf %723, %724 : vector<2x192xf32>
    %726 = vector.extract_strided_slice %459 {offsets = [0, 5, 0], sizes = [2, 1, 96], strides = [1, 1, 1]} : vector<2x8x192xf32> to vector<2x1x96xf32>
    %727 = vector.shape_cast %726 : vector<2x1x96xf32> to vector<2x96xf32>
    %728 = vector.extract_strided_slice %725 {offsets = [0, 0], sizes = [2, 96], strides = [1, 1]} : vector<2x192xf32> to vector<2x96xf32>
    %729 = vector.extract_strided_slice %722 {offsets = [0, 0], sizes = [2, 32], strides = [1, 1]} : vector<2x64xf32> to vector<2x32xf32>
    %730 = vector.extract_strided_slice %727 {offsets = [0, 0], sizes = [2, 64], strides = [1, 1]} : vector<2x96xf32> to vector<2x64xf32>
    %731 = vector.extract_strided_slice %728 {offsets = [0, 0], sizes = [2, 64], strides = [1, 1]} : vector<2x96xf32> to vector<2x64xf32>
    %732 = arith.addf %730, %731 : vector<2x64xf32>
    %733 = arith.negf %732 : vector<2x64xf32>
    %734 = math.exp %733 : vector<2x64xf32>
    %cst_93 = arith.constant 1.000000e+00 : f32
    %735 = vector.broadcast %cst_93 : f32 to vector<2x64xf32>
    %736 = arith.addf %735, %734 : vector<2x64xf32>
    %737 = arith.divf %735, %736 : vector<2x64xf32>
    %738 = vector.extract_strided_slice %737 {offsets = [0, 0], sizes = [2, 32], strides = [1, 1]} : vector<2x64xf32> to vector<2x32xf32>
    %739 = vector.extract_strided_slice %737 {offsets = [0, 32], sizes = [2, 32], strides = [1, 1]} : vector<2x64xf32> to vector<2x32xf32>
    %740 = vector.extract_strided_slice %727 {offsets = [0, 64], sizes = [2, 32], strides = [1, 1]} : vector<2x96xf32> to vector<2x32xf32>
    %741 = vector.extract_strided_slice %728 {offsets = [0, 64], sizes = [2, 32], strides = [1, 1]} : vector<2x96xf32> to vector<2x32xf32>
    %742 = arith.mulf %738, %741 : vector<2x32xf32>
    %743 = arith.addf %740, %742 : vector<2x32xf32>
    %744 = math.tanh %743 : vector<2x32xf32>
    %cst_94 = arith.constant 1.000000e+00 : f32
    %745 = vector.broadcast %cst_94 : f32 to vector<2x32xf32>
    %746 = arith.subf %745, %739 : vector<2x32xf32>
    %747 = arith.mulf %746, %744 : vector<2x32xf32>
    %748 = arith.mulf %739, %729 : vector<2x32xf32>
    %749 = arith.addf %747, %748 : vector<2x32xf32>
    %750 = vector.extract_strided_slice %459 {offsets = [0, 2, 96], sizes = [2, 1, 96], strides = [1, 1, 1]} : vector<2x8x192xf32> to vector<2x1x96xf32>
    %751 = vector.shape_cast %750 : vector<2x1x96xf32> to vector<2x96xf32>
    %752 = vector.extract_strided_slice %725 {offsets = [0, 96], sizes = [2, 96], strides = [1, 1]} : vector<2x192xf32> to vector<2x96xf32>
    %753 = vector.extract_strided_slice %722 {offsets = [0, 32], sizes = [2, 32], strides = [1, 1]} : vector<2x64xf32> to vector<2x32xf32>
    %754 = vector.extract_strided_slice %751 {offsets = [0, 0], sizes = [2, 64], strides = [1, 1]} : vector<2x96xf32> to vector<2x64xf32>
    %755 = vector.extract_strided_slice %752 {offsets = [0, 0], sizes = [2, 64], strides = [1, 1]} : vector<2x96xf32> to vector<2x64xf32>
    %756 = arith.addf %754, %755 : vector<2x64xf32>
    %757 = arith.negf %756 : vector<2x64xf32>
    %758 = math.exp %757 : vector<2x64xf32>
    %cst_95 = arith.constant 1.000000e+00 : f32
    %759 = vector.broadcast %cst_95 : f32 to vector<2x64xf32>
    %760 = arith.addf %759, %758 : vector<2x64xf32>
    %761 = arith.divf %759, %760 : vector<2x64xf32>
    %762 = vector.extract_strided_slice %761 {offsets = [0, 0], sizes = [2, 32], strides = [1, 1]} : vector<2x64xf32> to vector<2x32xf32>
    %763 = vector.extract_strided_slice %761 {offsets = [0, 32], sizes = [2, 32], strides = [1, 1]} : vector<2x64xf32> to vector<2x32xf32>
    %764 = vector.extract_strided_slice %751 {offsets = [0, 64], sizes = [2, 32], strides = [1, 1]} : vector<2x96xf32> to vector<2x32xf32>
    %765 = vector.extract_strided_slice %752 {offsets = [0, 64], sizes = [2, 32], strides = [1, 1]} : vector<2x96xf32> to vector<2x32xf32>
    %766 = arith.mulf %762, %765 : vector<2x32xf32>
    %767 = arith.addf %764, %766 : vector<2x32xf32>
    %768 = math.tanh %767 : vector<2x32xf32>
    %cst_96 = arith.constant 1.000000e+00 : f32
    %769 = vector.broadcast %cst_96 : f32 to vector<2x32xf32>
    %770 = arith.subf %769, %763 : vector<2x32xf32>
    %771 = arith.mulf %770, %768 : vector<2x32xf32>
    %772 = arith.mulf %763, %753 : vector<2x32xf32>
    %773 = arith.addf %771, %772 : vector<2x32xf32>
    %774 = tpu.concatenate %749, %773 in 1 : vector<2x32xf32>, vector<2x32xf32> -> vector<2x64xf32>
    %cst_97 = arith.constant dense<0.000000e+00> : vector<2x192xf32>
    %775 = tpu.matmul %774, %460, %cst_97 {dimension_numbers = #tpu.dot_dimension_numbers<[1], [0], [0], [1], [0, 0, 1, 1], [], []>} : vector<2x64xf32>, vector<64x192xf32>, vector<2x192xf32> -> vector<2x192xf32>
    %776 = vector.broadcast %461 : vector<1x192xf32> to vector<2x192xf32>
    %777 = arith.addf %775, %776 : vector<2x192xf32>
    %778 = vector.extract_strided_slice %459 {offsets = [0, 6, 0], sizes = [2, 1, 96], strides = [1, 1, 1]} : vector<2x8x192xf32> to vector<2x1x96xf32>
    %779 = vector.shape_cast %778 : vector<2x1x96xf32> to vector<2x96xf32>
    %780 = vector.extract_strided_slice %777 {offsets = [0, 0], sizes = [2, 96], strides = [1, 1]} : vector<2x192xf32> to vector<2x96xf32>
    %781 = vector.extract_strided_slice %774 {offsets = [0, 0], sizes = [2, 32], strides = [1, 1]} : vector<2x64xf32> to vector<2x32xf32>
    %782 = vector.extract_strided_slice %779 {offsets = [0, 0], sizes = [2, 64], strides = [1, 1]} : vector<2x96xf32> to vector<2x64xf32>
    %783 = vector.extract_strided_slice %780 {offsets = [0, 0], sizes = [2, 64], strides = [1, 1]} : vector<2x96xf32> to vector<2x64xf32>
    %784 = arith.addf %782, %783 : vector<2x64xf32>
    %785 = arith.negf %784 : vector<2x64xf32>
    %786 = math.exp %785 : vector<2x64xf32>
    %cst_98 = arith.constant 1.000000e+00 : f32
    %787 = vector.broadcast %cst_98 : f32 to vector<2x64xf32>
    %788 = arith.addf %787, %786 : vector<2x64xf32>
    %789 = arith.divf %787, %788 : vector<2x64xf32>
    %790 = vector.extract_strided_slice %789 {offsets = [0, 0], sizes = [2, 32], strides = [1, 1]} : vector<2x64xf32> to vector<2x32xf32>
    %791 = vector.extract_strided_slice %789 {offsets = [0, 32], sizes = [2, 32], strides = [1, 1]} : vector<2x64xf32> to vector<2x32xf32>
    %792 = vector.extract_strided_slice %779 {offsets = [0, 64], sizes = [2, 32], strides = [1, 1]} : vector<2x96xf32> to vector<2x32xf32>
    %793 = vector.extract_strided_slice %780 {offsets = [0, 64], sizes = [2, 32], strides = [1, 1]} : vector<2x96xf32> to vector<2x32xf32>
    %794 = arith.mulf %790, %793 : vector<2x32xf32>
    %795 = arith.addf %792, %794 : vector<2x32xf32>
    %796 = math.tanh %795 : vector<2x32xf32>
    %cst_99 = arith.constant 1.000000e+00 : f32
    %797 = vector.broadcast %cst_99 : f32 to vector<2x32xf32>
    %798 = arith.subf %797, %791 : vector<2x32xf32>
    %799 = arith.mulf %798, %796 : vector<2x32xf32>
    %800 = arith.mulf %791, %781 : vector<2x32xf32>
    %801 = arith.addf %799, %800 : vector<2x32xf32>
    %802 = vector.extract_strided_slice %459 {offsets = [0, 1, 96], sizes = [2, 1, 96], strides = [1, 1, 1]} : vector<2x8x192xf32> to vector<2x1x96xf32>
    %803 = vector.shape_cast %802 : vector<2x1x96xf32> to vector<2x96xf32>
    %804 = vector.extract_strided_slice %777 {offsets = [0, 96], sizes = [2, 96], strides = [1, 1]} : vector<2x192xf32> to vector<2x96xf32>
    %805 = vector.extract_strided_slice %774 {offsets = [0, 32], sizes = [2, 32], strides = [1, 1]} : vector<2x64xf32> to vector<2x32xf32>
    %806 = vector.extract_strided_slice %803 {offsets = [0, 0], sizes = [2, 64], strides = [1, 1]} : vector<2x96xf32> to vector<2x64xf32>
    %807 = vector.extract_strided_slice %804 {offsets = [0, 0], sizes = [2, 64], strides = [1, 1]} : vector<2x96xf32> to vector<2x64xf32>
    %808 = arith.addf %806, %807 : vector<2x64xf32>
    %809 = arith.negf %808 : vector<2x64xf32>
    %810 = math.exp %809 : vector<2x64xf32>
    %cst_100 = arith.constant 1.000000e+00 : f32
    %811 = vector.broadcast %cst_100 : f32 to vector<2x64xf32>
    %812 = arith.addf %811, %810 : vector<2x64xf32>
    %813 = arith.divf %811, %812 : vector<2x64xf32>
    %814 = vector.extract_strided_slice %813 {offsets = [0, 0], sizes = [2, 32], strides = [1, 1]} : vector<2x64xf32> to vector<2x32xf32>
    %815 = vector.extract_strided_slice %813 {offsets = [0, 32], sizes = [2, 32], strides = [1, 1]} : vector<2x64xf32> to vector<2x32xf32>
    %816 = vector.extract_strided_slice %803 {offsets = [0, 64], sizes = [2, 32], strides = [1, 1]} : vector<2x96xf32> to vector<2x32xf32>
    %817 = vector.extract_strided_slice %804 {offsets = [0, 64], sizes = [2, 32], strides = [1, 1]} : vector<2x96xf32> to vector<2x32xf32>
    %818 = arith.mulf %814, %817 : vector<2x32xf32>
    %819 = arith.addf %816, %818 : vector<2x32xf32>
    %820 = math.tanh %819 : vector<2x32xf32>
    %cst_101 = arith.constant 1.000000e+00 : f32
    %821 = vector.broadcast %cst_101 : f32 to vector<2x32xf32>
    %822 = arith.subf %821, %815 : vector<2x32xf32>
    %823 = arith.mulf %822, %820 : vector<2x32xf32>
    %824 = arith.mulf %815, %805 : vector<2x32xf32>
    %825 = arith.addf %823, %824 : vector<2x32xf32>
    %826 = tpu.concatenate %801, %825 in 1 : vector<2x32xf32>, vector<2x32xf32> -> vector<2x64xf32>
    %cst_102 = arith.constant dense<0.000000e+00> : vector<2x192xf32>
    %827 = tpu.matmul %826, %460, %cst_102 {dimension_numbers = #tpu.dot_dimension_numbers<[1], [0], [0], [1], [0, 0, 1, 1], [], []>} : vector<2x64xf32>, vector<64x192xf32>, vector<2x192xf32> -> vector<2x192xf32>
    %828 = vector.broadcast %461 : vector<1x192xf32> to vector<2x192xf32>
    %829 = arith.addf %827, %828 : vector<2x192xf32>
    %830 = vector.extract_strided_slice %459 {offsets = [0, 7, 0], sizes = [2, 1, 96], strides = [1, 1, 1]} : vector<2x8x192xf32> to vector<2x1x96xf32>
    %831 = vector.shape_cast %830 : vector<2x1x96xf32> to vector<2x96xf32>
    %832 = vector.extract_strided_slice %829 {offsets = [0, 0], sizes = [2, 96], strides = [1, 1]} : vector<2x192xf32> to vector<2x96xf32>
    %833 = vector.extract_strided_slice %826 {offsets = [0, 0], sizes = [2, 32], strides = [1, 1]} : vector<2x64xf32> to vector<2x32xf32>
    %834 = vector.extract_strided_slice %831 {offsets = [0, 0], sizes = [2, 64], strides = [1, 1]} : vector<2x96xf32> to vector<2x64xf32>
    %835 = vector.extract_strided_slice %832 {offsets = [0, 0], sizes = [2, 64], strides = [1, 1]} : vector<2x96xf32> to vector<2x64xf32>
    %836 = arith.addf %834, %835 : vector<2x64xf32>
    %837 = arith.negf %836 : vector<2x64xf32>
    %838 = math.exp %837 : vector<2x64xf32>
    %cst_103 = arith.constant 1.000000e+00 : f32
    %839 = vector.broadcast %cst_103 : f32 to vector<2x64xf32>
    %840 = arith.addf %839, %838 : vector<2x64xf32>
    %841 = arith.divf %839, %840 : vector<2x64xf32>
    %842 = vector.extract_strided_slice %841 {offsets = [0, 0], sizes = [2, 32], strides = [1, 1]} : vector<2x64xf32> to vector<2x32xf32>
    %843 = vector.extract_strided_slice %841 {offsets = [0, 32], sizes = [2, 32], strides = [1, 1]} : vector<2x64xf32> to vector<2x32xf32>
    %844 = vector.extract_strided_slice %831 {offsets = [0, 64], sizes = [2, 32], strides = [1, 1]} : vector<2x96xf32> to vector<2x32xf32>
    %845 = vector.extract_strided_slice %832 {offsets = [0, 64], sizes = [2, 32], strides = [1, 1]} : vector<2x96xf32> to vector<2x32xf32>
    %846 = arith.mulf %842, %845 : vector<2x32xf32>
    %847 = arith.addf %844, %846 : vector<2x32xf32>
    %848 = math.tanh %847 : vector<2x32xf32>
    %cst_104 = arith.constant 1.000000e+00 : f32
    %849 = vector.broadcast %cst_104 : f32 to vector<2x32xf32>
    %850 = arith.subf %849, %843 : vector<2x32xf32>
    %851 = arith.mulf %850, %848 : vector<2x32xf32>
    %852 = arith.mulf %843, %833 : vector<2x32xf32>
    %853 = arith.addf %851, %852 : vector<2x32xf32>
    %854 = vector.extract_strided_slice %459 {offsets = [0, 0, 96], sizes = [2, 1, 96], strides = [1, 1, 1]} : vector<2x8x192xf32> to vector<2x1x96xf32>
    %855 = vector.shape_cast %854 : vector<2x1x96xf32> to vector<2x96xf32>
    %856 = vector.extract_strided_slice %829 {offsets = [0, 96], sizes = [2, 96], strides = [1, 1]} : vector<2x192xf32> to vector<2x96xf32>
    %857 = vector.extract_strided_slice %826 {offsets = [0, 32], sizes = [2, 32], strides = [1, 1]} : vector<2x64xf32> to vector<2x32xf32>
    %858 = vector.extract_strided_slice %855 {offsets = [0, 0], sizes = [2, 64], strides = [1, 1]} : vector<2x96xf32> to vector<2x64xf32>
    %859 = vector.extract_strided_slice %856 {offsets = [0, 0], sizes = [2, 64], strides = [1, 1]} : vector<2x96xf32> to vector<2x64xf32>
    %860 = arith.addf %858, %859 : vector<2x64xf32>
    %861 = arith.negf %860 : vector<2x64xf32>
    %862 = math.exp %861 : vector<2x64xf32>
    %cst_105 = arith.constant 1.000000e+00 : f32
    %863 = vector.broadcast %cst_105 : f32 to vector<2x64xf32>
    %864 = arith.addf %863, %862 : vector<2x64xf32>
    %865 = arith.divf %863, %864 : vector<2x64xf32>
    %866 = vector.extract_strided_slice %865 {offsets = [0, 0], sizes = [2, 32], strides = [1, 1]} : vector<2x64xf32> to vector<2x32xf32>
    %867 = vector.extract_strided_slice %865 {offsets = [0, 32], sizes = [2, 32], strides = [1, 1]} : vector<2x64xf32> to vector<2x32xf32>
    %868 = vector.extract_strided_slice %855 {offsets = [0, 64], sizes = [2, 32], strides = [1, 1]} : vector<2x96xf32> to vector<2x32xf32>
    %869 = vector.extract_strided_slice %856 {offsets = [0, 64], sizes = [2, 32], strides = [1, 1]} : vector<2x96xf32> to vector<2x32xf32>
    %870 = arith.mulf %866, %869 : vector<2x32xf32>
    %871 = arith.addf %868, %870 : vector<2x32xf32>
    %872 = math.tanh %871 : vector<2x32xf32>
    %cst_106 = arith.constant 1.000000e+00 : f32
    %873 = vector.broadcast %cst_106 : f32 to vector<2x32xf32>
    %874 = arith.subf %873, %867 : vector<2x32xf32>
    %875 = arith.mulf %874, %872 : vector<2x32xf32>
    %876 = arith.mulf %867, %857 : vector<2x32xf32>
    %877 = arith.addf %875, %876 : vector<2x32xf32>
    %878 = tpu.concatenate %489, %877 in 1 : vector<2x32xf32>, vector<2x32xf32> -> vector<2x64xf32>
    %879 = tpu.concatenate %541, %825 in 1 : vector<2x32xf32>, vector<2x32xf32> -> vector<2x64xf32>
    %880 = tpu.concatenate %593, %773 in 1 : vector<2x32xf32>, vector<2x32xf32> -> vector<2x64xf32>
    %881 = tpu.concatenate %645, %721 in 1 : vector<2x32xf32>, vector<2x32xf32> -> vector<2x64xf32>
    %882 = tpu.concatenate %697, %669 in 1 : vector<2x32xf32>, vector<2x32xf32> -> vector<2x64xf32>
    %883 = tpu.concatenate %749, %617 in 1 : vector<2x32xf32>, vector<2x32xf32> -> vector<2x64xf32>
    %884 = tpu.concatenate %801, %565 in 1 : vector<2x32xf32>, vector<2x32xf32> -> vector<2x64xf32>
    %885 = tpu.concatenate %853, %513 in 1 : vector<2x32xf32>, vector<2x32xf32> -> vector<2x64xf32>
    %886 = vector.shape_cast %878 : vector<2x64xf32> to vector<2x1x64xf32>
    %887 = vector.shape_cast %879 : vector<2x64xf32> to vector<2x1x64xf32>
    %888 = vector.shape_cast %880 : vector<2x64xf32> to vector<2x1x64xf32>
    %889 = vector.shape_cast %881 : vector<2x64xf32> to vector<2x1x64xf32>
    %890 = vector.shape_cast %882 : vector<2x64xf32> to vector<2x1x64xf32>
    %891 = vector.shape_cast %883 : vector<2x64xf32> to vector<2x1x64xf32>
    %892 = vector.shape_cast %884 : vector<2x64xf32> to vector<2x1x64xf32>
    %893 = vector.shape_cast %885 : vector<2x64xf32> to vector<2x1x64xf32>
    %894 = tpu.concatenate %886, %887, %888, %889, %890, %891, %892, %893 in 1 : vector<2x1x64xf32>, vector<2x1x64xf32>, vector<2x1x64xf32>, vector<2x1x64xf32>, vector<2x1x64xf32>, vector<2x1x64xf32>, vector<2x1x64xf32>, vector<2x1x64xf32> -> vector<2x8x64xf32>
    %c0_107 = arith.constant 0 : index
    %c0_108 = arith.constant 0 : index
    %c0_109 = arith.constant 0 : index
    %895 = vector.load %arg2[%c0_107, %c0_108, %c0_109] : memref<2x8x8xf32, #tpu.memory_space<vmem>>, vector<2x8x8xf32>
    %c0_110 = arith.constant 0 : index
    %c0_111 = arith.constant 0 : index
    %c0_112 = arith.constant 0 : index
    %896 = vector.load %arg3[%c0_110, %c0_111, %c0_112] : memref<2x8x8xf32, #tpu.memory_space<vmem>>, vector<2x8x8xf32>
    %897 = tpu.concatenate %895, %896 in 0 : vector<2x8x8xf32>, vector<2x8x8xf32> -> vector<4x8x8xf32>
    %898 = vector.shape_cast %894 : vector<2x8x64xf32> to vector<16x64xf32>
    %c0_113 = arith.constant 0 : index
    %c0_114 = arith.constant 0 : index
    %c0_115 = arith.constant 0 : index
    %899 = vector.load %arg13[%c0_113, %c0_114, %c0_115] : memref<2x64x64xf32, #tpu.memory_space<vmem>>, vector<1x64x64xf32>
    %900 = vector.shape_cast %899 : vector<1x64x64xf32> to vector<64x64xf32>
    %cst_116 = arith.constant dense<0.000000e+00> : vector<16x64xf32>
    %901 = tpu.matmul %898, %900, %cst_116 {dimension_numbers = #tpu.dot_dimension_numbers<[1], [0], [0], [1], [0, 0, 1, 1], [], []>} : vector<16x64xf32>, vector<64x64xf32>, vector<16x64xf32> -> vector<16x64xf32>
    %c0_117 = arith.constant 0 : index
    %c0_118 = arith.constant 0 : index
    %c0_119 = arith.constant 0 : index
    %902 = vector.load %arg14[%c0_117, %c0_118, %c0_119] : memref<2x1x64xf32, #tpu.memory_space<vmem>>, vector<1x1x64xf32>
    %903 = vector.shape_cast %902 : vector<1x1x64xf32> to vector<1x64xf32>
    %904 = vector.broadcast %903 : vector<1x64xf32> to vector<16x64xf32>
    %905 = arith.addf %901, %904 : vector<16x64xf32>
    %906 = vector.shape_cast %905 : vector<16x64xf32> to vector<2x8x64xf32>
    %907 = vector.extract_strided_slice %906 {offsets = [0, 0, 0], sizes = [2, 8, 32], strides = [1, 1, 1]} : vector<2x8x64xf32> to vector<2x8x32xf32>
    %908 = vector.extract_strided_slice %906 {offsets = [0, 0, 32], sizes = [2, 8, 32], strides = [1, 1, 1]} : vector<2x8x64xf32> to vector<2x8x32xf32>
    %909 = tpu.concatenate %907, %908 in 0 : vector<2x8x32xf32>, vector<2x8x32xf32> -> vector<4x8x32xf32>
    "tpu.trace_start"() <{level = 10 : i32, message = "bij,bjk->bik"}> : () -> ()
    %cst_120 = arith.constant dense<0.000000e+00> : vector<4x8x32xf32>
    %910 = tpu.matmul %897, %909, %cst_120 {dimension_numbers = #tpu.dot_dimension_numbers<[2], [1], [1], [2], [0, 0, 0, 1, 1, 2], [0], [0]>} : vector<4x8x8xf32>, vector<4x8x32xf32>, vector<4x8x32xf32> -> vector<4x8x32xf32>
    "tpu.trace_stop"() : () -> ()
    %911 = vector.extract_strided_slice %910 {offsets = [0, 0, 0], sizes = [2, 8, 32], strides = [1, 1, 1]} : vector<4x8x32xf32> to vector<2x8x32xf32>
    %912 = vector.extract_strided_slice %910 {offsets = [2, 0, 0], sizes = [2, 8, 32], strides = [1, 1, 1]} : vector<4x8x32xf32> to vector<2x8x32xf32>
    %913 = tpu.concatenate %911, %912 in 2 : vector<2x8x32xf32>, vector<2x8x32xf32> -> vector<2x8x64xf32>
    %cst_121 = arith.constant 0.000000e+00 : f32
    %914 = vector.broadcast %cst_121 : f32 to vector<2x8x64xf32>
    %915 = arith.maximumf %913, %914 : vector<2x8x64xf32>
    %916 = vector.shape_cast %915 : vector<2x8x64xf32> to vector<16x64xf32>
    %c1 = arith.constant 1 : index
    %c0_122 = arith.constant 0 : index
    %c0_123 = arith.constant 0 : index
    %917 = vector.load %arg13[%c1, %c0_122, %c0_123] : memref<2x64x64xf32, #tpu.memory_space<vmem>>, vector<1x64x64xf32>
    %918 = vector.shape_cast %917 : vector<1x64x64xf32> to vector<64x64xf32>
    %cst_124 = arith.constant dense<0.000000e+00> : vector<16x64xf32>
    %919 = tpu.matmul %916, %918, %cst_124 {dimension_numbers = #tpu.dot_dimension_numbers<[1], [0], [0], [1], [0, 0, 1, 1], [], []>} : vector<16x64xf32>, vector<64x64xf32>, vector<16x64xf32> -> vector<16x64xf32>
    %c1_125 = arith.constant 1 : index
    %c0_126 = arith.constant 0 : index
    %c0_127 = arith.constant 0 : index
    %920 = vector.load %arg14[%c1_125, %c0_126, %c0_127] : memref<2x1x64xf32, #tpu.memory_space<vmem>>, vector<1x1x64xf32>
    %921 = vector.shape_cast %920 : vector<1x1x64xf32> to vector<1x64xf32>
    %922 = vector.broadcast %921 : vector<1x64xf32> to vector<16x64xf32>
    %923 = arith.addf %919, %922 : vector<16x64xf32>
    %924 = vector.shape_cast %923 : vector<16x64xf32> to vector<2x8x64xf32>
    %925 = vector.extract_strided_slice %924 {offsets = [0, 0, 0], sizes = [2, 8, 32], strides = [1, 1, 1]} : vector<2x8x64xf32> to vector<2x8x32xf32>
    %926 = vector.extract_strided_slice %924 {offsets = [0, 0, 32], sizes = [2, 8, 32], strides = [1, 1, 1]} : vector<2x8x64xf32> to vector<2x8x32xf32>
    %927 = tpu.concatenate %925, %926 in 0 : vector<2x8x32xf32>, vector<2x8x32xf32> -> vector<4x8x32xf32>
    "tpu.trace_start"() <{level = 10 : i32, message = "bij,bjk->bik"}> : () -> ()
    %cst_128 = arith.constant dense<0.000000e+00> : vector<4x8x32xf32>
    %928 = tpu.matmul %897, %927, %cst_128 {dimension_numbers = #tpu.dot_dimension_numbers<[2], [1], [1], [2], [0, 0, 0, 1, 1, 2], [0], [0]>} : vector<4x8x8xf32>, vector<4x8x32xf32>, vector<4x8x32xf32> -> vector<4x8x32xf32>
    "tpu.trace_stop"() : () -> ()
    %929 = vector.extract_strided_slice %928 {offsets = [0, 0, 0], sizes = [2, 8, 32], strides = [1, 1, 1]} : vector<4x8x32xf32> to vector<2x8x32xf32>
    %930 = vector.extract_strided_slice %928 {offsets = [2, 0, 0], sizes = [2, 8, 32], strides = [1, 1, 1]} : vector<4x8x32xf32> to vector<2x8x32xf32>
    %931 = tpu.concatenate %929, %930 in 2 : vector<2x8x32xf32>, vector<2x8x32xf32> -> vector<2x8x64xf32>
    %cst_129 = arith.constant 0.000000e+00 : f32
    %932 = vector.broadcast %cst_129 : f32 to vector<2x8x64xf32>
    %933 = arith.maximumf %931, %932 : vector<2x8x64xf32>
    %934 = vector.shape_cast %933 : vector<2x8x64xf32> to vector<16x64xf32>
    %c0_130 = arith.constant 0 : index
    %c0_131 = arith.constant 0 : index
    %935 = vector.load %arg15[%c0_130, %c0_131] : memref<64x96xf32, #tpu.memory_space<vmem>>, vector<64x96xf32>
    %cst_132 = arith.constant dense<0.000000e+00> : vector<16x96xf32>
    %936 = tpu.matmul %934, %935, %cst_132 {dimension_numbers = #tpu.dot_dimension_numbers<[1], [0], [0], [1], [0, 0, 1, 1], [], []>} : vector<16x64xf32>, vector<64x96xf32>, vector<16x96xf32> -> vector<16x96xf32>
    %c0_133 = arith.constant 0 : index
    %c0_134 = arith.constant 0 : index
    %937 = vector.load %arg17[%c0_133, %c0_134] : memref<1x96xf32, #tpu.memory_space<vmem>>, vector<1x96xf32>
    %938 = vector.broadcast %937 : vector<1x96xf32> to vector<16x96xf32>
    %939 = arith.addf %936, %938 : vector<16x96xf32>
    %940 = vector.shape_cast %939 : vector<16x96xf32> to vector<2x8x96xf32>
    %c0_135 = arith.constant 0 : index
    %c0_136 = arith.constant 0 : index
    %941 = vector.load %arg16[%c0_135, %c0_136] : memref<32x96xf32, #tpu.memory_space<vmem>>, vector<32x96xf32>
    %c0_137 = arith.constant 0 : index
    %c0_138 = arith.constant 0 : index
    %942 = vector.load %arg18[%c0_137, %c0_138] : memref<1x96xf32, #tpu.memory_space<vmem>>, vector<1x96xf32>
    %cst_139 = arith.constant 0.000000e+00 : f32
    %943 = vector.broadcast %cst_139 : f32 to vector<2x32xf32>
    %cst_140 = arith.constant dense<0.000000e+00> : vector<2x96xf32>
    %944 = tpu.matmul %943, %941, %cst_140 {dimension_numbers = #tpu.dot_dimension_numbers<[1], [0], [0], [1], [0, 0, 1, 1], [], []>} : vector<2x32xf32>, vector<32x96xf32>, vector<2x96xf32> -> vector<2x96xf32>
    %945 = vector.broadcast %942 : vector<1x96xf32> to vector<2x96xf32>
    %946 = arith.addf %944, %945 : vector<2x96xf32>
    %947 = vector.extract_strided_slice %940 {offsets = [0, 0, 0], sizes = [2, 1, 96], strides = [1, 1, 1]} : vector<2x8x96xf32> to vector<2x1x96xf32>
    %948 = vector.shape_cast %947 : vector<2x1x96xf32> to vector<2x96xf32>
    %949 = vector.extract_strided_slice %948 {offsets = [0, 0], sizes = [2, 64], strides = [1, 1]} : vector<2x96xf32> to vector<2x64xf32>
    %950 = vector.extract_strided_slice %946 {offsets = [0, 0], sizes = [2, 64], strides = [1, 1]} : vector<2x96xf32> to vector<2x64xf32>
    %951 = arith.addf %949, %950 : vector<2x64xf32>
    %952 = arith.negf %951 : vector<2x64xf32>
    %953 = math.exp %952 : vector<2x64xf32>
    %cst_141 = arith.constant 1.000000e+00 : f32
    %954 = vector.broadcast %cst_141 : f32 to vector<2x64xf32>
    %955 = arith.addf %954, %953 : vector<2x64xf32>
    %956 = arith.divf %954, %955 : vector<2x64xf32>
    %957 = vector.extract_strided_slice %956 {offsets = [0, 0], sizes = [2, 32], strides = [1, 1]} : vector<2x64xf32> to vector<2x32xf32>
    %958 = vector.extract_strided_slice %956 {offsets = [0, 32], sizes = [2, 32], strides = [1, 1]} : vector<2x64xf32> to vector<2x32xf32>
    %959 = vector.extract_strided_slice %948 {offsets = [0, 64], sizes = [2, 32], strides = [1, 1]} : vector<2x96xf32> to vector<2x32xf32>
    %960 = vector.extract_strided_slice %946 {offsets = [0, 64], sizes = [2, 32], strides = [1, 1]} : vector<2x96xf32> to vector<2x32xf32>
    %961 = arith.mulf %957, %960 : vector<2x32xf32>
    %962 = arith.addf %959, %961 : vector<2x32xf32>
    %963 = math.tanh %962 : vector<2x32xf32>
    %cst_142 = arith.constant 1.000000e+00 : f32
    %964 = vector.broadcast %cst_142 : f32 to vector<2x32xf32>
    %965 = arith.subf %964, %958 : vector<2x32xf32>
    %966 = arith.mulf %965, %963 : vector<2x32xf32>
    %967 = arith.mulf %958, %943 : vector<2x32xf32>
    %968 = arith.addf %966, %967 : vector<2x32xf32>
    %cst_143 = arith.constant dense<0.000000e+00> : vector<2x96xf32>
    %969 = tpu.matmul %968, %941, %cst_143 {dimension_numbers = #tpu.dot_dimension_numbers<[1], [0], [0], [1], [0, 0, 1, 1], [], []>} : vector<2x32xf32>, vector<32x96xf32>, vector<2x96xf32> -> vector<2x96xf32>
    %970 = vector.broadcast %942 : vector<1x96xf32> to vector<2x96xf32>
    %971 = arith.addf %969, %970 : vector<2x96xf32>
    %972 = vector.extract_strided_slice %940 {offsets = [0, 1, 0], sizes = [2, 1, 96], strides = [1, 1, 1]} : vector<2x8x96xf32> to vector<2x1x96xf32>
    %973 = vector.shape_cast %972 : vector<2x1x96xf32> to vector<2x96xf32>
    %974 = vector.extract_strided_slice %973 {offsets = [0, 0], sizes = [2, 64], strides = [1, 1]} : vector<2x96xf32> to vector<2x64xf32>
    %975 = vector.extract_strided_slice %971 {offsets = [0, 0], sizes = [2, 64], strides = [1, 1]} : vector<2x96xf32> to vector<2x64xf32>
    %976 = arith.addf %974, %975 : vector<2x64xf32>
    %977 = arith.negf %976 : vector<2x64xf32>
    %978 = math.exp %977 : vector<2x64xf32>
    %cst_144 = arith.constant 1.000000e+00 : f32
    %979 = vector.broadcast %cst_144 : f32 to vector<2x64xf32>
    %980 = arith.addf %979, %978 : vector<2x64xf32>
    %981 = arith.divf %979, %980 : vector<2x64xf32>
    %982 = vector.extract_strided_slice %981 {offsets = [0, 0], sizes = [2, 32], strides = [1, 1]} : vector<2x64xf32> to vector<2x32xf32>
    %983 = vector.extract_strided_slice %981 {offsets = [0, 32], sizes = [2, 32], strides = [1, 1]} : vector<2x64xf32> to vector<2x32xf32>
    %984 = vector.extract_strided_slice %973 {offsets = [0, 64], sizes = [2, 32], strides = [1, 1]} : vector<2x96xf32> to vector<2x32xf32>
    %985 = vector.extract_strided_slice %971 {offsets = [0, 64], sizes = [2, 32], strides = [1, 1]} : vector<2x96xf32> to vector<2x32xf32>
    %986 = arith.mulf %982, %985 : vector<2x32xf32>
    %987 = arith.addf %984, %986 : vector<2x32xf32>
    %988 = math.tanh %987 : vector<2x32xf32>
    %cst_145 = arith.constant 1.000000e+00 : f32
    %989 = vector.broadcast %cst_145 : f32 to vector<2x32xf32>
    %990 = arith.subf %989, %983 : vector<2x32xf32>
    %991 = arith.mulf %990, %988 : vector<2x32xf32>
    %992 = arith.mulf %983, %968 : vector<2x32xf32>
    %993 = arith.addf %991, %992 : vector<2x32xf32>
    %cst_146 = arith.constant dense<0.000000e+00> : vector<2x96xf32>
    %994 = tpu.matmul %993, %941, %cst_146 {dimension_numbers = #tpu.dot_dimension_numbers<[1], [0], [0], [1], [0, 0, 1, 1], [], []>} : vector<2x32xf32>, vector<32x96xf32>, vector<2x96xf32> -> vector<2x96xf32>
    %995 = vector.broadcast %942 : vector<1x96xf32> to vector<2x96xf32>
    %996 = arith.addf %994, %995 : vector<2x96xf32>
    %997 = vector.extract_strided_slice %940 {offsets = [0, 2, 0], sizes = [2, 1, 96], strides = [1, 1, 1]} : vector<2x8x96xf32> to vector<2x1x96xf32>
    %998 = vector.shape_cast %997 : vector<2x1x96xf32> to vector<2x96xf32>
    %999 = vector.extract_strided_slice %998 {offsets = [0, 0], sizes = [2, 64], strides = [1, 1]} : vector<2x96xf32> to vector<2x64xf32>
    %1000 = vector.extract_strided_slice %996 {offsets = [0, 0], sizes = [2, 64], strides = [1, 1]} : vector<2x96xf32> to vector<2x64xf32>
    %1001 = arith.addf %999, %1000 : vector<2x64xf32>
    %1002 = arith.negf %1001 : vector<2x64xf32>
    %1003 = math.exp %1002 : vector<2x64xf32>
    %cst_147 = arith.constant 1.000000e+00 : f32
    %1004 = vector.broadcast %cst_147 : f32 to vector<2x64xf32>
    %1005 = arith.addf %1004, %1003 : vector<2x64xf32>
    %1006 = arith.divf %1004, %1005 : vector<2x64xf32>
    %1007 = vector.extract_strided_slice %1006 {offsets = [0, 0], sizes = [2, 32], strides = [1, 1]} : vector<2x64xf32> to vector<2x32xf32>
    %1008 = vector.extract_strided_slice %1006 {offsets = [0, 32], sizes = [2, 32], strides = [1, 1]} : vector<2x64xf32> to vector<2x32xf32>
    %1009 = vector.extract_strided_slice %998 {offsets = [0, 64], sizes = [2, 32], strides = [1, 1]} : vector<2x96xf32> to vector<2x32xf32>
    %1010 = vector.extract_strided_slice %996 {offsets = [0, 64], sizes = [2, 32], strides = [1, 1]} : vector<2x96xf32> to vector<2x32xf32>
    %1011 = arith.mulf %1007, %1010 : vector<2x32xf32>
    %1012 = arith.addf %1009, %1011 : vector<2x32xf32>
    %1013 = math.tanh %1012 : vector<2x32xf32>
    %cst_148 = arith.constant 1.000000e+00 : f32
    %1014 = vector.broadcast %cst_148 : f32 to vector<2x32xf32>
    %1015 = arith.subf %1014, %1008 : vector<2x32xf32>
    %1016 = arith.mulf %1015, %1013 : vector<2x32xf32>
    %1017 = arith.mulf %1008, %993 : vector<2x32xf32>
    %1018 = arith.addf %1016, %1017 : vector<2x32xf32>
    %cst_149 = arith.constant dense<0.000000e+00> : vector<2x96xf32>
    %1019 = tpu.matmul %1018, %941, %cst_149 {dimension_numbers = #tpu.dot_dimension_numbers<[1], [0], [0], [1], [0, 0, 1, 1], [], []>} : vector<2x32xf32>, vector<32x96xf32>, vector<2x96xf32> -> vector<2x96xf32>
    %1020 = vector.broadcast %942 : vector<1x96xf32> to vector<2x96xf32>
    %1021 = arith.addf %1019, %1020 : vector<2x96xf32>
    %1022 = vector.extract_strided_slice %940 {offsets = [0, 3, 0], sizes = [2, 1, 96], strides = [1, 1, 1]} : vector<2x8x96xf32> to vector<2x1x96xf32>
    %1023 = vector.shape_cast %1022 : vector<2x1x96xf32> to vector<2x96xf32>
    %1024 = vector.extract_strided_slice %1023 {offsets = [0, 0], sizes = [2, 64], strides = [1, 1]} : vector<2x96xf32> to vector<2x64xf32>
    %1025 = vector.extract_strided_slice %1021 {offsets = [0, 0], sizes = [2, 64], strides = [1, 1]} : vector<2x96xf32> to vector<2x64xf32>
    %1026 = arith.addf %1024, %1025 : vector<2x64xf32>
    %1027 = arith.negf %1026 : vector<2x64xf32>
    %1028 = math.exp %1027 : vector<2x64xf32>
    %cst_150 = arith.constant 1.000000e+00 : f32
    %1029 = vector.broadcast %cst_150 : f32 to vector<2x64xf32>
    %1030 = arith.addf %1029, %1028 : vector<2x64xf32>
    %1031 = arith.divf %1029, %1030 : vector<2x64xf32>
    %1032 = vector.extract_strided_slice %1031 {offsets = [0, 0], sizes = [2, 32], strides = [1, 1]} : vector<2x64xf32> to vector<2x32xf32>
    %1033 = vector.extract_strided_slice %1031 {offsets = [0, 32], sizes = [2, 32], strides = [1, 1]} : vector<2x64xf32> to vector<2x32xf32>
    %1034 = vector.extract_strided_slice %1023 {offsets = [0, 64], sizes = [2, 32], strides = [1, 1]} : vector<2x96xf32> to vector<2x32xf32>
    %1035 = vector.extract_strided_slice %1021 {offsets = [0, 64], sizes = [2, 32], strides = [1, 1]} : vector<2x96xf32> to vector<2x32xf32>
    %1036 = arith.mulf %1032, %1035 : vector<2x32xf32>
    %1037 = arith.addf %1034, %1036 : vector<2x32xf32>
    %1038 = math.tanh %1037 : vector<2x32xf32>
    %cst_151 = arith.constant 1.000000e+00 : f32
    %1039 = vector.broadcast %cst_151 : f32 to vector<2x32xf32>
    %1040 = arith.subf %1039, %1033 : vector<2x32xf32>
    %1041 = arith.mulf %1040, %1038 : vector<2x32xf32>
    %1042 = arith.mulf %1033, %1018 : vector<2x32xf32>
    %1043 = arith.addf %1041, %1042 : vector<2x32xf32>
    %cst_152 = arith.constant dense<0.000000e+00> : vector<2x96xf32>
    %1044 = tpu.matmul %1043, %941, %cst_152 {dimension_numbers = #tpu.dot_dimension_numbers<[1], [0], [0], [1], [0, 0, 1, 1], [], []>} : vector<2x32xf32>, vector<32x96xf32>, vector<2x96xf32> -> vector<2x96xf32>
    %1045 = vector.broadcast %942 : vector<1x96xf32> to vector<2x96xf32>
    %1046 = arith.addf %1044, %1045 : vector<2x96xf32>
    %1047 = vector.extract_strided_slice %940 {offsets = [0, 4, 0], sizes = [2, 1, 96], strides = [1, 1, 1]} : vector<2x8x96xf32> to vector<2x1x96xf32>
    %1048 = vector.shape_cast %1047 : vector<2x1x96xf32> to vector<2x96xf32>
    %1049 = vector.extract_strided_slice %1048 {offsets = [0, 0], sizes = [2, 64], strides = [1, 1]} : vector<2x96xf32> to vector<2x64xf32>
    %1050 = vector.extract_strided_slice %1046 {offsets = [0, 0], sizes = [2, 64], strides = [1, 1]} : vector<2x96xf32> to vector<2x64xf32>
    %1051 = arith.addf %1049, %1050 : vector<2x64xf32>
    %1052 = arith.negf %1051 : vector<2x64xf32>
    %1053 = math.exp %1052 : vector<2x64xf32>
    %cst_153 = arith.constant 1.000000e+00 : f32
    %1054 = vector.broadcast %cst_153 : f32 to vector<2x64xf32>
    %1055 = arith.addf %1054, %1053 : vector<2x64xf32>
    %1056 = arith.divf %1054, %1055 : vector<2x64xf32>
    %1057 = vector.extract_strided_slice %1056 {offsets = [0, 0], sizes = [2, 32], strides = [1, 1]} : vector<2x64xf32> to vector<2x32xf32>
    %1058 = vector.extract_strided_slice %1056 {offsets = [0, 32], sizes = [2, 32], strides = [1, 1]} : vector<2x64xf32> to vector<2x32xf32>
    %1059 = vector.extract_strided_slice %1048 {offsets = [0, 64], sizes = [2, 32], strides = [1, 1]} : vector<2x96xf32> to vector<2x32xf32>
    %1060 = vector.extract_strided_slice %1046 {offsets = [0, 64], sizes = [2, 32], strides = [1, 1]} : vector<2x96xf32> to vector<2x32xf32>
    %1061 = arith.mulf %1057, %1060 : vector<2x32xf32>
    %1062 = arith.addf %1059, %1061 : vector<2x32xf32>
    %1063 = math.tanh %1062 : vector<2x32xf32>
    %cst_154 = arith.constant 1.000000e+00 : f32
    %1064 = vector.broadcast %cst_154 : f32 to vector<2x32xf32>
    %1065 = arith.subf %1064, %1058 : vector<2x32xf32>
    %1066 = arith.mulf %1065, %1063 : vector<2x32xf32>
    %1067 = arith.mulf %1058, %1043 : vector<2x32xf32>
    %1068 = arith.addf %1066, %1067 : vector<2x32xf32>
    %cst_155 = arith.constant dense<0.000000e+00> : vector<2x96xf32>
    %1069 = tpu.matmul %1068, %941, %cst_155 {dimension_numbers = #tpu.dot_dimension_numbers<[1], [0], [0], [1], [0, 0, 1, 1], [], []>} : vector<2x32xf32>, vector<32x96xf32>, vector<2x96xf32> -> vector<2x96xf32>
    %1070 = vector.broadcast %942 : vector<1x96xf32> to vector<2x96xf32>
    %1071 = arith.addf %1069, %1070 : vector<2x96xf32>
    %1072 = vector.extract_strided_slice %940 {offsets = [0, 5, 0], sizes = [2, 1, 96], strides = [1, 1, 1]} : vector<2x8x96xf32> to vector<2x1x96xf32>
    %1073 = vector.shape_cast %1072 : vector<2x1x96xf32> to vector<2x96xf32>
    %1074 = vector.extract_strided_slice %1073 {offsets = [0, 0], sizes = [2, 64], strides = [1, 1]} : vector<2x96xf32> to vector<2x64xf32>
    %1075 = vector.extract_strided_slice %1071 {offsets = [0, 0], sizes = [2, 64], strides = [1, 1]} : vector<2x96xf32> to vector<2x64xf32>
    %1076 = arith.addf %1074, %1075 : vector<2x64xf32>
    %1077 = arith.negf %1076 : vector<2x64xf32>
    %1078 = math.exp %1077 : vector<2x64xf32>
    %cst_156 = arith.constant 1.000000e+00 : f32
    %1079 = vector.broadcast %cst_156 : f32 to vector<2x64xf32>
    %1080 = arith.addf %1079, %1078 : vector<2x64xf32>
    %1081 = arith.divf %1079, %1080 : vector<2x64xf32>
    %1082 = vector.extract_strided_slice %1081 {offsets = [0, 0], sizes = [2, 32], strides = [1, 1]} : vector<2x64xf32> to vector<2x32xf32>
    %1083 = vector.extract_strided_slice %1081 {offsets = [0, 32], sizes = [2, 32], strides = [1, 1]} : vector<2x64xf32> to vector<2x32xf32>
    %1084 = vector.extract_strided_slice %1073 {offsets = [0, 64], sizes = [2, 32], strides = [1, 1]} : vector<2x96xf32> to vector<2x32xf32>
    %1085 = vector.extract_strided_slice %1071 {offsets = [0, 64], sizes = [2, 32], strides = [1, 1]} : vector<2x96xf32> to vector<2x32xf32>
    %1086 = arith.mulf %1082, %1085 : vector<2x32xf32>
    %1087 = arith.addf %1084, %1086 : vector<2x32xf32>
    %1088 = math.tanh %1087 : vector<2x32xf32>
    %cst_157 = arith.constant 1.000000e+00 : f32
    %1089 = vector.broadcast %cst_157 : f32 to vector<2x32xf32>
    %1090 = arith.subf %1089, %1083 : vector<2x32xf32>
    %1091 = arith.mulf %1090, %1088 : vector<2x32xf32>
    %1092 = arith.mulf %1083, %1068 : vector<2x32xf32>
    %1093 = arith.addf %1091, %1092 : vector<2x32xf32>
    %cst_158 = arith.constant dense<0.000000e+00> : vector<2x96xf32>
    %1094 = tpu.matmul %1093, %941, %cst_158 {dimension_numbers = #tpu.dot_dimension_numbers<[1], [0], [0], [1], [0, 0, 1, 1], [], []>} : vector<2x32xf32>, vector<32x96xf32>, vector<2x96xf32> -> vector<2x96xf32>
    %1095 = vector.broadcast %942 : vector<1x96xf32> to vector<2x96xf32>
    %1096 = arith.addf %1094, %1095 : vector<2x96xf32>
    %1097 = vector.extract_strided_slice %940 {offsets = [0, 6, 0], sizes = [2, 1, 96], strides = [1, 1, 1]} : vector<2x8x96xf32> to vector<2x1x96xf32>
    %1098 = vector.shape_cast %1097 : vector<2x1x96xf32> to vector<2x96xf32>
    %1099 = vector.extract_strided_slice %1098 {offsets = [0, 0], sizes = [2, 64], strides = [1, 1]} : vector<2x96xf32> to vector<2x64xf32>
    %1100 = vector.extract_strided_slice %1096 {offsets = [0, 0], sizes = [2, 64], strides = [1, 1]} : vector<2x96xf32> to vector<2x64xf32>
    %1101 = arith.addf %1099, %1100 : vector<2x64xf32>
    %1102 = arith.negf %1101 : vector<2x64xf32>
    %1103 = math.exp %1102 : vector<2x64xf32>
    %cst_159 = arith.constant 1.000000e+00 : f32
    %1104 = vector.broadcast %cst_159 : f32 to vector<2x64xf32>
    %1105 = arith.addf %1104, %1103 : vector<2x64xf32>
    %1106 = arith.divf %1104, %1105 : vector<2x64xf32>
    %1107 = vector.extract_strided_slice %1106 {offsets = [0, 0], sizes = [2, 32], strides = [1, 1]} : vector<2x64xf32> to vector<2x32xf32>
    %1108 = vector.extract_strided_slice %1106 {offsets = [0, 32], sizes = [2, 32], strides = [1, 1]} : vector<2x64xf32> to vector<2x32xf32>
    %1109 = vector.extract_strided_slice %1098 {offsets = [0, 64], sizes = [2, 32], strides = [1, 1]} : vector<2x96xf32> to vector<2x32xf32>
    %1110 = vector.extract_strided_slice %1096 {offsets = [0, 64], sizes = [2, 32], strides = [1, 1]} : vector<2x96xf32> to vector<2x32xf32>
    %1111 = arith.mulf %1107, %1110 : vector<2x32xf32>
    %1112 = arith.addf %1109, %1111 : vector<2x32xf32>
    %1113 = math.tanh %1112 : vector<2x32xf32>
    %cst_160 = arith.constant 1.000000e+00 : f32
    %1114 = vector.broadcast %cst_160 : f32 to vector<2x32xf32>
    %1115 = arith.subf %1114, %1108 : vector<2x32xf32>
    %1116 = arith.mulf %1115, %1113 : vector<2x32xf32>
    %1117 = arith.mulf %1108, %1093 : vector<2x32xf32>
    %1118 = arith.addf %1116, %1117 : vector<2x32xf32>
    %cst_161 = arith.constant dense<0.000000e+00> : vector<2x96xf32>
    %1119 = tpu.matmul %1118, %941, %cst_161 {dimension_numbers = #tpu.dot_dimension_numbers<[1], [0], [0], [1], [0, 0, 1, 1], [], []>} : vector<2x32xf32>, vector<32x96xf32>, vector<2x96xf32> -> vector<2x96xf32>
    %1120 = vector.broadcast %942 : vector<1x96xf32> to vector<2x96xf32>
    %1121 = arith.addf %1119, %1120 : vector<2x96xf32>
    %1122 = vector.extract_strided_slice %940 {offsets = [0, 7, 0], sizes = [2, 1, 96], strides = [1, 1, 1]} : vector<2x8x96xf32> to vector<2x1x96xf32>
    %1123 = vector.shape_cast %1122 : vector<2x1x96xf32> to vector<2x96xf32>
    %1124 = vector.extract_strided_slice %1123 {offsets = [0, 0], sizes = [2, 64], strides = [1, 1]} : vector<2x96xf32> to vector<2x64xf32>
    %1125 = vector.extract_strided_slice %1121 {offsets = [0, 0], sizes = [2, 64], strides = [1, 1]} : vector<2x96xf32> to vector<2x64xf32>
    %1126 = arith.addf %1124, %1125 : vector<2x64xf32>
    %1127 = arith.negf %1126 : vector<2x64xf32>
    %1128 = math.exp %1127 : vector<2x64xf32>
    %cst_162 = arith.constant 1.000000e+00 : f32
    %1129 = vector.broadcast %cst_162 : f32 to vector<2x64xf32>
    %1130 = arith.addf %1129, %1128 : vector<2x64xf32>
    %1131 = arith.divf %1129, %1130 : vector<2x64xf32>
    %1132 = vector.extract_strided_slice %1131 {offsets = [0, 0], sizes = [2, 32], strides = [1, 1]} : vector<2x64xf32> to vector<2x32xf32>
    %1133 = vector.extract_strided_slice %1131 {offsets = [0, 32], sizes = [2, 32], strides = [1, 1]} : vector<2x64xf32> to vector<2x32xf32>
    %1134 = vector.extract_strided_slice %1123 {offsets = [0, 64], sizes = [2, 32], strides = [1, 1]} : vector<2x96xf32> to vector<2x32xf32>
    %1135 = vector.extract_strided_slice %1121 {offsets = [0, 64], sizes = [2, 32], strides = [1, 1]} : vector<2x96xf32> to vector<2x32xf32>
    %1136 = arith.mulf %1132, %1135 : vector<2x32xf32>
    %1137 = arith.addf %1134, %1136 : vector<2x32xf32>
    %1138 = math.tanh %1137 : vector<2x32xf32>
    %cst_163 = arith.constant 1.000000e+00 : f32
    %1139 = vector.broadcast %cst_163 : f32 to vector<2x32xf32>
    %1140 = arith.subf %1139, %1133 : vector<2x32xf32>
    %1141 = arith.mulf %1140, %1138 : vector<2x32xf32>
    %1142 = arith.mulf %1133, %1118 : vector<2x32xf32>
    %1143 = arith.addf %1141, %1142 : vector<2x32xf32>
    %1144 = vector.shape_cast %968 : vector<2x32xf32> to vector<2x1x32xf32>
    %1145 = vector.shape_cast %993 : vector<2x32xf32> to vector<2x1x32xf32>
    %1146 = vector.shape_cast %1018 : vector<2x32xf32> to vector<2x1x32xf32>
    %1147 = vector.shape_cast %1043 : vector<2x32xf32> to vector<2x1x32xf32>
    %1148 = vector.shape_cast %1068 : vector<2x32xf32> to vector<2x1x32xf32>
    %1149 = vector.shape_cast %1093 : vector<2x32xf32> to vector<2x1x32xf32>
    %1150 = vector.shape_cast %1118 : vector<2x32xf32> to vector<2x1x32xf32>
    %1151 = vector.shape_cast %1143 : vector<2x32xf32> to vector<2x1x32xf32>
    %1152 = tpu.concatenate %1144, %1145, %1146, %1147, %1148, %1149, %1150, %1151 in 1 : vector<2x1x32xf32>, vector<2x1x32xf32>, vector<2x1x32xf32>, vector<2x1x32xf32>, vector<2x1x32xf32>, vector<2x1x32xf32>, vector<2x1x32xf32>, vector<2x1x32xf32> -> vector<2x8x32xf32>
    %1153 = vector.shape_cast %1152 : vector<2x8x32xf32> to vector<16x32xf32>
    %c0_164 = arith.constant 0 : index
    %c0_165 = arith.constant 0 : index
    %1154 = vector.load %arg19[%c0_164, %c0_165] : memref<32x5xf32, #tpu.memory_space<vmem>>, vector<32x5xf32>
    %cst_166 = arith.constant dense<0.000000e+00> : vector<16x5xf32>
    %1155 = tpu.matmul %1153, %1154, %cst_166 {dimension_numbers = #tpu.dot_dimension_numbers<[1], [0], [0], [1], [0, 0, 1, 1], [], []>} : vector<16x32xf32>, vector<32x5xf32>, vector<16x5xf32> -> vector<16x5xf32>
    %c0_167 = arith.constant 0 : index
    %c0_168 = arith.constant 0 : index
    %1156 = vector.load %arg20[%c0_167, %c0_168] : memref<1x5xf32, #tpu.memory_space<vmem>>, vector<1x5xf32>
    %1157 = vector.broadcast %1156 : vector<1x5xf32> to vector<16x5xf32>
    %1158 = arith.addf %1155, %1157 : vector<16x5xf32>
    %1159 = vector.shape_cast %1158 : vector<16x5xf32> to vector<2x8x5xf32>
    %c0_169 = arith.constant 0 : index
    %c0_170 = arith.constant 0 : index
    %c0_171 = arith.constant 0 : index
    %1160 = vector.load %arg27[%c0_169, %c0_170, %c0_171] : memref<2x8x5xf32, #tpu.memory_space<vmem>>, vector<2x8x5xf32>
    tpu.vector_store %arg27[%c0_169, %c0_170, %c0_171], %1159 {strides = array<i32>} : memref<2x8x5xf32, #tpu.memory_space<vmem>>, vector<2x8x5xf32>,
    %c0_172 = arith.constant 0 : index
    %c0_173 = arith.constant 0 : index
    %1161 = vector.load %arg21[%c0_172, %c0_173] : memref<64x64xf32, #tpu.memory_space<vmem>>, vector<64x64xf32>
    %cst_174 = arith.constant dense<0.000000e+00> : vector<16x64xf32>
    %1162 = tpu.matmul %934, %1161, %cst_174 {dimension_numbers = #tpu.dot_dimension_numbers<[1], [0], [0], [1], [0, 0, 1, 1], [], []>} : vector<16x64xf32>, vector<64x64xf32>, vector<16x64xf32> -> vector<16x64xf32>
    %c0_175 = arith.constant 0 : index
    %c0_176 = arith.constant 0 : index
    %1163 = vector.load %arg22[%c0_175, %c0_176] : memref<1x64xf32, #tpu.memory_space<vmem>>, vector<1x64xf32>
    %1164 = vector.broadcast %1163 : vector<1x64xf32> to vector<16x64xf32>
    %1165 = arith.addf %1162, %1164 : vector<16x64xf32>
    %cst_177 = arith.constant 0.000000e+00 : f32
    %1166 = vector.broadcast %cst_177 : f32 to vector<16x64xf32>
    %1167 = arith.maximumf %1165, %1166 : vector<16x64xf32>
    %1168 = vector.extract_strided_slice %1167 {offsets = [0, 0], sizes = [16, 32], strides = [1, 1]} : vector<16x64xf32> to vector<16x32xf32>
    %c0_178 = arith.constant 0 : index
    %c0_179 = arith.constant 0 : index
    %1169 = vector.load %arg23[%c0_178, %c0_179] : memref<32x3xf32, #tpu.memory_space<vmem>>, vector<32x3xf32>
    %cst_180 = arith.constant dense<0.000000e+00> : vector<16x3xf32>
    %1170 = tpu.matmul %1168, %1169, %cst_180 {dimension_numbers = #tpu.dot_dimension_numbers<[1], [0], [0], [1], [0, 0, 1, 1], [], []>} : vector<16x32xf32>, vector<32x3xf32>, vector<16x3xf32> -> vector<16x3xf32>
    %1171 = vector.extract_strided_slice %1167 {offsets = [0, 32], sizes = [16, 32], strides = [1, 1]} : vector<16x64xf32> to vector<16x32xf32>
    %c0_181 = arith.constant 0 : index
    %c0_182 = arith.constant 0 : index
    %1172 = vector.load %arg24[%c0_181, %c0_182] : memref<32x3xf32, #tpu.memory_space<vmem>>, vector<32x3xf32>
    %cst_183 = arith.constant dense<0.000000e+00> : vector<16x3xf32>
    %1173 = tpu.matmul %1171, %1172, %cst_183 {dimension_numbers = #tpu.dot_dimension_numbers<[1], [0], [0], [1], [0, 0, 1, 1], [], []>} : vector<16x32xf32>, vector<32x3xf32>, vector<16x3xf32> -> vector<16x3xf32>
    %c0_184 = arith.constant 0 : index
    %c0_185 = arith.constant 0 : index
    %1174 = vector.load %arg25[%c0_184, %c0_185] : memref<1x3xf32, #tpu.memory_space<vmem>>, vector<1x3xf32>
    %1175 = vector.broadcast %1174 : vector<1x3xf32> to vector<16x3xf32>
    %1176 = arith.addf %1173, %1175 : vector<16x3xf32>
    %1177 = tpu.concatenate %1170, %1176 in 0 : vector<16x3xf32>, vector<16x3xf32> -> vector<32x3xf32>
    %c0_186 = arith.constant 0 : index
    %c0_187 = arith.constant 0 : index
    %1178 = vector.load %arg26[%c0_186, %c0_187] : memref<128x32xf32, #tpu.memory_space<vmem>>, vector<128x32xf32>
    %cst_188 = arith.constant dense<0.000000e+00> : vector<128x3xf32>
    %1179 = tpu.matmul %1178, %1177, %cst_188 {dimension_numbers = #tpu.dot_dimension_numbers<[1], [0], [0], [1], [0, 0, 1, 1], [], []>} : vector<128x32xf32>, vector<32x3xf32>, vector<128x3xf32> -> vector<128x3xf32>
    %1180 = vector.shape_cast %1179 : vector<128x3xf32> to vector<2x8x8x3xf32>
    %c0_189 = arith.constant 0 : index
    %c0_190 = arith.constant 0 : index
    %c0_191 = arith.constant 0 : index
    %c0_192 = arith.constant 0 : index
    %1181 = vector.load %arg28[%c0_189, %c0_190, %c0_191, %c0_192] : memref<2x8x8x3xf32, #tpu.memory_space<vmem>>, vector<2x8x8x3xf32>
    tpu.vector_store %arg28[%c0_189, %c0_190, %c0_191, %c0_192], %1180 {strides = array<i32>} : memref<2x8x8x3xf32, #tpu.memory_space<vmem>>, vector<2x8x8x3xf32>,
    return
  }
}

</mosaic_0001>

<bundles_post_ra>
// kernel: model_graphrel_forward.1
= control target key start
LH: loop header
LB: loop body
LE: loop exit
PB: predicated region body
PF: predicated region fallthrough
CT: control target
= control target key end

     0   :  { %s12168_s0 = inlined_call_operand.vmem [shape: f32[2,8,100], index: 0, kind: input, shape index: {}]   ;;  %s12169_s1 = inlined_call_operand.vmem [shape: s32[2,8,1], index: 1, kind: input, shape index: {}]   ;;  %s12170_s2 = inlined_call_operand.vmem [shape: f32[2,8,8], index: 2, kind: input, shape index: {}]   ;;  %s12171_s3 = inlined_call_operand.vmem [shape: f32[2,8,8], index: 3, kind: input, shape index: {}]   ;;  %s12172_s4 = inlined_call_operand.hbm [shape: f32[2,15], index: 4, kind: input, shape index: {}]   ;;  %s12173_s5 = inlined_call_operand.vmem [shape: f32[115,192], index: 5, kind: input, shape index: {}]   ;;  %s12174_s6 = inlined_call_operand.hbm [shape: f32[1,192], index: 6, kind: input, shape index: {}]   ;;  %s12175_s7 = inlined_call_operand.vmem [shape: f32[64,192], index: 7, kind: input, shape index: {}]   ;;  %s12176_s8 = inlined_call_operand.hbm [shape: f32[1,192], index: 8, kind: input, shape index: {}]   ;;  %s12177_s9 = inlined_call_operand.vmem [shape: f32[64,192], index: 9, kind: input, shape index: {}]   ;;  %s12178_s10 = inlined_call_operand.hbm [shape: f32[1,192], index: 10, kind: input, shape index: {}]   ;;  %s12179_s11 = inlined_call_operand.vmem [shape: f32[64,192], index: 11, kind: input, shape index: {}]   ;;  %s12180_s12 = inlined_call_operand.hbm [shape: f32[1,192], index: 12, kind: input, shape index: {}]   ;;  %s12181_s13 = inlined_call_operand.vmem [shape: f32[2,64,64], index: 13, kind: input, shape index: {}]   ;;  %s12182_s14 = inlined_call_operand.hbm [shape: f32[2,1,64], index: 14, kind: input, shape index: {}]   ;;  %s12183_s15 = inlined_call_operand.vmem [shape: f32[64,96], index: 15, kind: input, shape index: {}]   ;;  %s12184_s16 = inlined_call_operand.hbm [shape: f32[32,96], index: 16, kind: input, shape index: {}]   ;;  %s12185_s17 = inlined_call_operand.vmem [shape: f32[1,96], index: 17, kind: input, shape index: {}]   ;;  %s12186_s18 = inlined_call_operand.hbm [shape: f32[1,96], index: 18, kind: input, shape index: {}]   ;;  %s12187_s19 = inlined_call_operand.vmem [shape: f32[32,5], index: 19, kind: input, shape index: {}]   ;;  %s12188_s20 = inlined_call_operand.hbm [shape: f32[1,5], index: 20, kind: input, shape index: {}]   ;;  %s12189_s21 = inlined_call_operand.hbm [shape: f32[64,64], index: 21, kind: input, shape index: {}]   ;;  %s12190_s22 = inlined_call_operand.hbm [shape: f32[1,64], index: 22, kind: input, shape index: {}]   ;;  %s12191_s23 = inlined_call_operand.vmem [shape: f32[32,3], index: 23, kind: input, shape index: {}]   ;;  %s12192_s24 = inlined_call_operand.vmem [shape: f32[32,3], index: 24, kind: input, shape index: {}]   ;;  %s12193_s25 = inlined_call_operand.hbm [shape: f32[1,3], index: 25, kind: input, shape index: {}]   ;;  %s12194_s26 = inlined_call_operand.vmem [shape: f32[128,32], index: 26, kind: input, shape index: {}]   ;;  %s12195_s27 = inlined_call_operand.vmem [shape: f32[2,8,5], index: 27, kind: output, shape index: {0}]   ;;  %s12196_s28 = inlined_call_operand.vmem [shape: f32[2,8,8,3], index: 28, kind: output, shape index: {1}]  }
   0x1   :  { %12210 = sst [smem:[#allocation28_spill]] %s12168_s0 }
   0x2   :  { %12211 = sst [smem:[#allocation29_spill]] %s12169_s1 }
   0x3   :  { %12212 = sst [smem:[#allocation30_spill]] %s12170_s2 }
   0x4   :  { %12213 = sst [smem:[#allocation31_spill]] %s12171_s3 }
   0x5   :  { %12214 = sst [smem:[#allocation32_spill]] %s12172_s4 }
   0x6   :  { %12215 = sst [smem:[#allocation33_spill]] %s12173_s5 }
   0x7   :  { %12216 = sst [smem:[#allocation34_spill]] %s12174_s6 }
   0x8   :  { %12217 = sst [smem:[#allocation35_spill]] %s12175_s7 }
   0x9   :  { %12218 = sst [smem:[#allocation36_spill]] %s12176_s8 }
   0xa   :  { %12219 = sst [smem:[#allocation37_spill]] %s12177_s9 }
   0xb   :  { %12220 = sst [smem:[#allocation38_spill]] %s12178_s10 }
   0xc   :  { %12221 = sst [smem:[#allocation39_spill]] %s12179_s11 }
   0xd   :  { %12222 = sst [smem:[#allocation40_spill]] %s12180_s12 }
   0xe   :  { %34 = vsyncpa [#allocation3], 0 }
   0xf   :  { %35 = vsyncpa [#allocation5], 0 }
  0x10   :  { %36 = vsyncpa [#allocation8], 0 }
  0x11   :  { %37 = vsyncpa [#allocation11], 0 }
  0x12   :  { %38 = vsyncpa [#allocation14], 0 }
  0x13   :  { %39 = vsyncpa [#allocation17], 0 }
  0x14   :  { %40 = vsyncpa [#allocation20], 0  ;;  %s9613_s8 = smov [#allocation4]   ;;  %s9614_s9 = smov [#allocation7]  }
  0x15   :  { %s67_s5 = sshll.u32 %s9613_s8, 4  ;;  %s91_s30 = sshll.u32 %s9614_s9, 4  ;;  %s68_s5 = int_to_ptr.vmem [resolvable:$true] %s67_s5  ;;  %s92_s30 = int_to_ptr.vmem [resolvable:$true] %s91_s30 }
  0x16   :  { %s12223_s10 = sld [smem:[#allocation34_spill]] }
  0x1c   :  { %s9335_s0 = scalar_lea.hbm %s12223_s10, 32 }
  0x1d   :  { %p9336_p0 = scmp.ne.s32.totalorder %s12223_s10, %s9335_s0  ;;  %p9339_p1 = scmp.lt.u32.totalorder %s9335_s0, %s12223_s10 }
  0x1f   :  { %p9341_p2 = pnand %p9339_p1, %p9336_p0 }
  0x21   :  { %9344 = shalt.err (!%p9341_p2)
}
  0x22   :  { %s9345_s12 = scalar_lea.vmem %s68_s5, 32  ;;  %p9350_p4 = scmp.lt.s32.totalorder %s68_s5, %s68_s5 }
  0x23   :  { %p9346_p3 = scmp.ne.s32.totalorder %s68_s5, %s9345_s12  ;;  %p9351_p5 = scmp.lt.s32.totalorder %s9345_s12, %s9345_s12 }
  0x25   :  { %p9352_p6 = por %p9351_p5, %p9350_p4 }
  0x27   :  { %p9353_p7 = pnand %p9352_p6, %p9346_p3 }
  0x29   :  { %9356 = shalt.err (!%p9353_p7)
}
  0x2a   :  { %70 = dma.hbm_to_vmem [thread:$0]  %s12223_s10, 32, %s68_s5, [#allocation5]  }
  0x2b   :  { %s12224_s3 = sld [smem:[#allocation38_spill]] }
  0x31   :  { %s9357_s6 = scalar_lea.hbm %s12224_s3, 32 }
  0x32   :  { %p9358_p8 = scmp.ne.s32.totalorder %s12224_s3, %s9357_s6  ;;  %p9361_p9 = scmp.lt.u32.totalorder %s9357_s6, %s12224_s3 }
  0x34   :  { %p9363_p10 = pnand %p9361_p9, %p9358_p8 }
  0x36   :  { %9366 = shalt.err (!%p9363_p10)
}
  0x37   :  { %s9367_s7 = scalar_lea.vmem %s92_s30, 32  ;;  %p9372_p12 = scmp.lt.s32.totalorder %s92_s30, %s92_s30 }
  0x38   :  { %p9368_p11 = scmp.ne.s32.totalorder %s92_s30, %s9367_s7  ;;  %p9373_p13 = scmp.lt.s32.totalorder %s9367_s7, %s9367_s7 }
  0x3a   :  { %p9374_p0 = por %p9373_p13, %p9372_p12 }
  0x3c   :  { %p9375_p1 = pnand %p9374_p0, %p9368_p11 }
  0x3e   :  { %9378 = shalt.err (!%p9375_p1)
}
  0x3f   :  { %94 = dma.hbm_to_vmem [thread:$0]  %s12224_s3, 32, %s92_s30, [#allocation8]  }
  0x40   :  { %s9615_s12 = smov [#allocation10]   ;;  %s9379_s9 = scalar_lea.hbm %s12182_s14, 32 }
  0x41   :  { %s114_s1 = sshll.u32 %s9615_s12, 4  ;;  %p9380_p2 = scmp.ne.s32.totalorder %s12182_s14, %s9379_s9  ;;  %s115_s1 = int_to_ptr.vmem [resolvable:$true] %s114_s1 }
  0x42   :  { %p9383_p3 = scmp.lt.u32.totalorder %s9379_s9, %s12182_s14 }
  0x44   :  { %p9385_p4 = pnand %p9383_p3, %p9380_p2 }
  0x46   :  { %9388 = shalt.err (!%p9385_p4)
}
  0x47   :  { %s9389_s2 = scalar_lea.vmem %s115_s1, 32  ;;  %p9394_p6 = scmp.lt.s32.totalorder %s115_s1, %s115_s1 }
  0x48   :  { %p9390_p5 = scmp.ne.s32.totalorder %s115_s1, %s9389_s2  ;;  %p9395_p7 = scmp.lt.s32.totalorder %s9389_s2, %s9389_s2 }
  0x4a   :  { %p9396_p8 = por %p9395_p7, %p9394_p6 }
  0x4c   :  { %p9397_p9 = pnand %p9396_p8, %p9390_p5 }
  0x4e   :  { %9400 = shalt.err (!%p9397_p9)
}
  0x4f   :  { %s9616_s30 = smov 16   ;;  %s9617_s3 = smov 1  }
  0x50   :  { %120 = dma.hbm_to_vmem [thread:$0]  %s12182_s14, 32, %s115_s1, [#allocation11], %s9616_s30, %s9616_s30, %s9617_s3  }
  0x51   :  { %s9618_s10 = smov [#allocation13]   ;;  %s9401_s9 = scalar_lea.hbm %s12186_s18, 16 }
  0x52   :  { %s143_s12 = sshll.u32 %s9618_s10, 4  ;;  %p9402_p10 = scmp.ne.s32.totalorder %s12186_s18, %s9401_s9  ;;  %s144_s12 = int_to_ptr.vmem [resolvable:$true] %s143_s12 }
  0x53   :  { %p9405_p11 = scmp.lt.u32.totalorder %s9401_s9, %s12186_s18 }
  0x55   :  { %p9407_p12 = pnand %p9405_p11, %p9402_p10 }
  0x57   :  { %9410 = shalt.err (!%p9407_p12)
}
  0x58   :  { %s9411_s2 = scalar_lea.vmem %s144_s12, 16  ;;  %s9415_s14 = scalar_lea.vmem %s144_s12, 32 }
  0x59   :  { %p9412_p13 = scmp.ne.s32.totalorder %s144_s12, %s9411_s2  ;;  %p9416_p0 = scmp.lt.s32.totalorder %s144_s12, %s144_s12 }
  0x5a   :  { %p9417_p1 = scmp.lt.s32.totalorder %s9415_s14, %s9411_s2 }
  0x5c   :  { %p9418_p2 = por %p9417_p1, %p9416_p0 }
  0x5e   :  { %p9419_p3 = pnand %p9418_p2, %p9412_p13 }
  0x60   :  { %9422 = shalt.err (!%p9419_p3)
}
  0x61   :  { %146 = dma.hbm_to_vmem [thread:$0]  %s12186_s18, 16, %s144_s12, [#allocation14]  }
  0x62   :  { %s9619_s3 = smov [#allocation16]   ;;  %s9620_s5 = smov [#allocation2]  }
  0x63   :  { %s164_s7 = sshll.u32 %s9619_s3, 4  ;;  %s55_s10 = sshll.u32 %s9620_s5, 4  ;;  %s165_s7 = int_to_ptr.vmem [resolvable:$true] %s164_s7  ;;  %s56_s10 = int_to_ptr.vmem [resolvable:$true] %s55_s10 }
  0x64   :  { %s9423_s9 = scalar_lea.hbm %s12189_s21, 1024 }
  0x65   :  { %p9424_p4 = scmp.ne.s32.totalorder %s12189_s21, %s9423_s9  ;;  %p9427_p5 = scmp.lt.u32.totalorder %s9423_s9, %s12189_s21 }
  0x67   :  { %p9429_p6 = pnand %p9427_p5, %p9424_p4 }
  0x69   :  { %9432 = shalt.err (!%p9429_p6)
}
  0x6a   :  { %s9433_s18 = scalar_lea.vmem %s165_s7, 1024  ;;  %p9438_p8 = scmp.lt.s32.totalorder %s165_s7, %s165_s7 }
  0x6b   :  { %p9434_p7 = scmp.ne.s32.totalorder %s165_s7, %s9433_s18  ;;  %p9439_p9 = scmp.lt.s32.totalorder %s9433_s18, %s9433_s18 }
  0x6d   :  { %p9440_p10 = por %p9439_p9, %p9438_p8 }
  0x6f   :  { %p9441_p11 = pnand %p9440_p10, %p9434_p7 }
  0x71   :  { %9444 = shalt.err (!%p9441_p11)
}
  0x72   :  { %s9621_s12 = smov 128   ;;  %s9622_s2 = smov 8  }
  0x73   :  { %170 = dma.hbm_to_vmem [thread:$0]  %s12189_s21, 1024, %s165_s7, [#allocation17], %s9621_s12, %s9621_s12, %s9622_s2  }
  0x74   :  { %s12225_s5 = sld [smem:[#allocation32_spill]] }
  0x7a   :  { %s9445_s4 = scalar_lea.hbm %s12225_s5, 32 }
  0x7b   :  { %p9446_p12 = scmp.ne.s32.totalorder %s12225_s5, %s9445_s4  ;;  %p9449_p13 = scmp.lt.u32.totalorder %s9445_s4, %s12225_s5 }
  0x7d   :  { %p9451_p0 = pnand %p9449_p13, %p9446_p12 }
  0x7f   :  { %9454 = shalt.err (!%p9451_p0)
}
  0x80   :  { %s9455_s29 = scalar_lea.vmem %s56_s10, 32  ;;  %p9460_p2 = scmp.lt.s32.totalorder %s56_s10, %s56_s10 }
  0x81   :  { %p9456_p1 = scmp.ne.s32.totalorder %s56_s10, %s9455_s29  ;;  %p9461_p3 = scmp.lt.s32.totalorder %s9455_s29, %s9455_s29 }
  0x83   :  { %p9462_p4 = por %p9461_p3, %p9460_p2 }
  0x85   :  { %p9463_p5 = pnand %p9462_p4, %p9456_p1 }
  0x87   :  { %9466 = shalt.err (!%p9463_p5)
}
  0x88   :  { %58 = dma.hbm_to_vmem [thread:$0]  %s12225_s5, 32, %s56_s10, [#allocation3]  }
  0x89   :  { %s9623_s0 = smov [#allocation6]   ;;  %s9624_s14 = smov [#allocation9]  }
  0x8a   :  { %s79_s18 = sshll.u32 %s9623_s0, 4  ;;  %s103_s1 = sshll.u32 %s9624_s14, 4  ;;  %s80_s18 = int_to_ptr.vmem [resolvable:$true] %s79_s18  ;;  %s104_s1 = int_to_ptr.vmem [resolvable:$true] %s103_s1 }
  0x8b   :  { %s12226_s4 = sld [smem:[#allocation36_spill]] }
  0x91   :  { %s9467_s8 = scalar_lea.hbm %s12226_s4, 32 }
  0x92   :  { %p9468_p6 = scmp.ne.s32.totalorder %s12226_s4, %s9467_s8  ;;  %p9471_p7 = scmp.lt.u32.totalorder %s9467_s8, %s12226_s4 }
  0x94   :  { %p9473_p8 = pnand %p9471_p7, %p9468_p6 }
  0x96   :  { %9476 = shalt.err (!%p9473_p8)
}
  0x97   :  { %s9477_s10 = scalar_lea.vmem %s80_s18, 32  ;;  %p9482_p10 = scmp.lt.s32.totalorder %s80_s18, %s80_s18 }
  0x98   :  { %p9478_p9 = scmp.ne.s32.totalorder %s80_s18, %s9477_s10  ;;  %p9483_p11 = scmp.lt.s32.totalorder %s9477_s10, %s9477_s10 }
  0x9a   :  { %p9484_p12 = por %p9483_p11, %p9482_p10 }
  0x9c   :  { %p9485_p13 = pnand %p9484_p12, %p9478_p9 }
  0x9e   :  { %9488 = shalt.err (!%p9485_p13)
}
  0x9f   :  { %82 = dma.hbm_to_vmem [thread:$0]  %s12226_s4, 32, %s80_s18, [#allocation5]  }
  0xa0   :  { %s12227_s14 = sld [smem:[#allocation40_spill]] }
  0xa6   :  { %s9489_s30 = scalar_lea.hbm %s12227_s14, 32 }
  0xa7   :  { %p9490_p0 = scmp.ne.s32.totalorder %s12227_s14, %s9489_s30  ;;  %p9493_p1 = scmp.lt.u32.totalorder %s9489_s30, %s12227_s14 }
  0xa9   :  { %p9495_p2 = pnand %p9493_p1, %p9490_p0 }
  0xab   :  { %9498 = shalt.err (!%p9495_p2)
}
  0xac   :  { %s9499_s11 = scalar_lea.vmem %s104_s1, 32  ;;  %p9504_p4 = scmp.lt.s32.totalorder %s104_s1, %s104_s1 }
  0xad   :  { %p9500_p3 = scmp.ne.s32.totalorder %s104_s1, %s9499_s11  ;;  %p9505_p5 = scmp.lt.s32.totalorder %s9499_s11, %s9499_s11 }
  0xaf   :  { %p9506_p6 = por %p9505_p5, %p9504_p4 }
  0xb1   :  { %p9507_p7 = pnand %p9506_p6, %p9500_p3 }
  0xb3   :  { %9510 = shalt.err (!%p9507_p7)
}
  0xb4   :  { %106 = dma.hbm_to_vmem [thread:$0]  %s12227_s14, 32, %s104_s1, [#allocation8]  }
  0xb5   :  { %s9625_s29 = smov [#allocation12]   ;;  %s9626_s5 = smov [#allocation15]  }
  0xb6   :  { %s128_s10 = sshll.u32 %s9625_s29, 4  ;;  %s155_s21 = sshll.u32 %s9626_s5, 4  ;;  %s129_s10 = int_to_ptr.vmem [resolvable:$true] %s128_s10  ;;  %s156_s21 = int_to_ptr.vmem [resolvable:$true] %s155_s21 }
  0xb7   :  { %s9511_s30 = scalar_lea.hbm %s12184_s16, 512 }
  0xb8   :  { %p9512_p8 = scmp.ne.s32.totalorder %s12184_s16, %s9511_s30  ;;  %p9515_p9 = scmp.lt.u32.totalorder %s9511_s30, %s12184_s16 }
  0xba   :  { %p9517_p10 = pnand %p9515_p9, %p9512_p8 }
  0xbc   :  { %9520 = shalt.err (!%p9517_p10)
}
  0xbd   :  { %s9521_s1 = scalar_lea.vmem %s129_s10, 512  ;;  %p9526_p12 = scmp.lt.s32.totalorder %s129_s10, %s129_s10 }
  0xbe   :  { %p9522_p11 = scmp.ne.s32.totalorder %s129_s10, %s9521_s1  ;;  %p9527_p13 = scmp.lt.s32.totalorder %s9521_s1, %s9521_s1 }
  0xc0   :  { %p9528_p0 = por %p9527_p13, %p9526_p12 }
  0xc2   :  { %p9529_p1 = pnand %p9528_p0, %p9522_p11 }
  0xc4   :  { %9532 = shalt.err (!%p9529_p1)
}
  0xc5   :  { %134 = dma.hbm_to_vmem [thread:$0]  %s12184_s16, 512, %s129_s10, [#allocation11], %s9621_s12, %s9621_s12, %s9622_s2  }
  0xc6   :  { %s9533_s29 = scalar_lea.hbm %s12188_s20, 16 }
  0xc7   :  { %p9534_p2 = scmp.ne.s32.totalorder %s12188_s20, %s9533_s29  ;;  %p9537_p3 = scmp.lt.u32.totalorder %s9533_s29, %s12188_s20 }
  0xc9   :  { %p9539_p4 = pnand %p9537_p3, %p9534_p2 }
  0xcb   :  { %9542 = shalt.err (!%p9539_p4)
}
  0xcc   :  { %s9543_s3 = scalar_lea.vmem %s156_s21, 16  ;;  %s9547_s9 = scalar_lea.vmem %s156_s21, 32 }
  0xcd   :  { %p9544_p5 = scmp.ne.s32.totalorder %s156_s21, %s9543_s3  ;;  %p9548_p6 = scmp.lt.s32.totalorder %s156_s21, %s156_s21 }
  0xce   :  { %p9549_p7 = scmp.lt.s32.totalorder %s9547_s9, %s9543_s3 }
  0xd0   :  { %p9550_p8 = por %p9549_p7, %p9548_p6 }
  0xd2   :  { %p9551_p9 = pnand %p9550_p8, %p9544_p5 }
  0xd4   :  { %9554 = shalt.err (!%p9551_p9)
}
  0xd5   :  { %158 = dma.hbm_to_vmem [thread:$0]  %s12188_s20, 16, %s156_s21, [#allocation14]  }
  0xd6   :  { %s9627_s2 = smov [#allocation18]   ;;  %s9628_s8 = smov [#allocation19]  }
  0xd7   :  { %s177_s10 = sshll.u32 %s9627_s2, 4  ;;  %s191_s6 = sshll.u32 %s9628_s8, 4  ;;  %s178_s10 = int_to_ptr.vmem [resolvable:$true] %s177_s10  ;;  %s192_s6 = int_to_ptr.vmem [resolvable:$true] %s191_s6 }
  0xd8   :  { %s9555_s11 = scalar_lea.hbm %s12190_s22, 16 }
  0xd9   :  { %p9556_p10 = scmp.ne.s32.totalorder %s12190_s22, %s9555_s11  ;;  %p9559_p11 = scmp.lt.u32.totalorder %s9555_s11, %s12190_s22 }
  0xdb   :  { %p9561_p12 = pnand %p9559_p11, %p9556_p10 }
  0xdd   :  { %9564 = shalt.err (!%p9561_p12)
}
  0xde   :  { %s9565_s20 = scalar_lea.vmem %s178_s10, 16  ;;  %s9569_s21 = scalar_lea.vmem %s178_s10, 32 }
  0xdf   :  { %p9566_p13 = scmp.ne.s32.totalorder %s178_s10, %s9565_s20  ;;  %p9570_p0 = scmp.lt.s32.totalorder %s178_s10, %s178_s10 }
  0xe0   :  { %p9571_p1 = scmp.lt.s32.totalorder %s9569_s21, %s9565_s20 }
  0xe2   :  { %p9572_p2 = por %p9571_p1, %p9570_p0 }
  0xe4   :  { %p9573_p3 = pnand %p9572_p2, %p9566_p13 }
  0xe6   :  { %9576 = shalt.err (!%p9573_p3)
}
  0xe7   :  { %180 = dma.hbm_to_vmem [thread:$0]  %s12190_s22, 16, %s178_s10, [#allocation17]  }
  0xe8   :  { %s9577_s9 = scalar_lea.hbm %s12193_s25, 16 }
  0xe9   :  { %p9578_p4 = scmp.ne.s32.totalorder %s12193_s25, %s9577_s9  ;;  %p9581_p5 = scmp.lt.u32.totalorder %s9577_s9, %s12193_s25 }
  0xeb   :  { %p9583_p6 = pnand %p9581_p5, %p9578_p4 }
  0xed   :  { %9586 = shalt.err (!%p9583_p6)
}
  0xee   :  { %s9587_s1 = scalar_lea.vmem %s192_s6, 16  ;;  %s9591_s14 = scalar_lea.vmem %s192_s6, 32 }
  0xef   :  { %p9588_p7 = scmp.ne.s32.totalorder %s192_s6, %s9587_s1  ;;  %p9592_p8 = scmp.lt.s32.totalorder %s192_s6, %s192_s6 }
  0xf0   :  { %p9593_p9 = scmp.lt.s32.totalorder %s9591_s14, %s9587_s1 }
  0xf2   :  { %p9594_p10 = por %p9593_p9, %p9592_p8 }
  0xf4   :  { %p9595_p11 = pnand %p9594_p10, %p9588_p7 }
  0xf6   :  { %9598 = shalt.err (!%p9595_p11)
}
  0xf7   :  { %194 = dma.hbm_to_vmem [thread:$0]  %s12193_s25, 16, %s192_s6, [#allocation20]  }
  0xf8   :  { %9599 = dma.done.wait [#allocation3], 32  }
  0xf9   :  { %9600 = vsyncadd [#allocation3], 4294967264 }
  0xfa   :  { %9601 = dma.done.wait [#allocation5], 64  }
  0xfb   :  { %9602 = vsyncadd [#allocation5], 4294967232 }
  0xfc   :  { %9603 = dma.done.wait [#allocation8], 64  }
  0xfd   :  { %9604 = vsyncadd [#allocation8], 4294967232 }
  0xfe   :  { %9605 = dma.done.wait [#allocation11], 544  }
  0xff   :  { %9606 = vsyncadd [#allocation11], 4294966752 }
 0x100   :  { %9607 = dma.done.wait [#allocation14], 32  }
 0x101   :  { %9608 = vsyncadd [#allocation14], 4294967264 }
 0x102   :  { %9609 = dma.done.wait [#allocation17], 1040  }
 0x103   :  { %9610 = vsyncadd [#allocation17], 4294966256 }
 0x104   :  { %9611 = dma.done.wait [#allocation20], 16  }
 0x105   :  { %9612 = vsyncadd [#allocation20], 4294967280  ;;  %v9629_v0 = vmov 0   ;;  %s12228_s4 = sld [smem:[#allocation29_spill]]  ;;  %v9630_v3 = vmov 0.0   ;;  %vm257_vm0 = vcmask 1041408   ;;  %v235_v5 = vlaneseq }
 0x106   :  { %8726 = vset.pattern.permute.xlu0 %v9629_v0  ;;  %469 = vmatprep.mubr.f32.mxu1 %v9630_v3  ;;  %v249_v4 = vld [vmem:[#allocation2] sm:$0x3]  ;;  %vm250_vm1 = vcmask 15360   ;;  %s12229_s20 = sld [smem:[#allocation33_spill]]  ;;  %vm398_vm4 = vcmask 1042432   ;;  %s12230_s6 = sld [smem:[#allocation35_spill]] }
 0x107   :  { %7983 = vmatprep.subr.msk.mxu0 %vm257_vm0, %v249_v4  ;;  %v236_v6 = vand.u32 127, %v235_v5  ;;  %s9631_s16 = smov 100   ;;  %s12231_s8 = sld [smem:[#allocation28_spill]]  ;;  %vm346_vm5 = vcmask 818176   ;;  %vm391_vm6 = vcmask 941056   ;;  %vm713_vm7 = vcmask 1041409  }
 0x108   :  { %7984 = vmatpush3.msk.msra.mxu0 %vm257_vm0, %v249_v4  ;;  %s9632_s14 = smov 64   ;;  %s9633_s22 = smov 96   ;;  %vm726_vm8 = vcmask 261120   ;;  %vm510_vm9 = vcmask 523264   ;;  %vm947_vm10 = vcmask 1042434   ;;  %vm2112_vm11 = vcmask 1047559  }
 0x109   :  { %s9634_s10 = smov 32   ;;  %vm1182_vm12 = vcmask 1043459   ;;  %vm1880_vm13 = vcmask 1046534   ;;  %vm1414_vm14 = vcmask 1044484   ;;  %vm1645_vm15 = vcmask 1045509   ;;  %s12235_s12 = sld [smem:[#allocation31_spill]] }
 0x10b   :  { %v233_v1 = vld [vmem:[%s12228_s4] sm:$0xff]  ;;  %v234_v2 = vld [vmem:[%s12228_s4 + $0x8] sm:$0xff]  ;;  %s12232_s4 = sld [smem:[#allocation39_spill]] }
 0x10c   :  { %238 = vperm.xlu0 %8726, %v233_v1   ;;  %v350_v11 = vld [vmem:[%s12229_s20 + $0x8] sm:$0xff]  ;;  %v352_v12 = vld [vmem:[%s12229_s20 + $0x18] sm:$0xff]  ;;  %v349_v13 = vld [vmem:[%s12229_s20] sm:$0xff] }
 0x10d   :  { %v8257_v14 = vpack.c.bf16 %v352_v12, %v350_v11  ;;  %v351_v15 = vld [vmem:[%s12229_s20 + $0x10] sm:$0xff]  ;;  %v354_v16 = vld [vmem:[%s12229_s20 + $0x28] sm:$0xff]  ;;  %v356_v17 = vld [vmem:[%s12229_s20 + $0x38] sm:$0xff] }
 0x10e   :  { %v8259_v18 = vpack.c.bf16 %v351_v15, %v349_v13  ;;  %v8261_v19 = vpack.c.bf16 %v356_v17, %v354_v16  ;;  %v353_v20 = vld [vmem:[%s12229_s20 + $0x20] sm:$0xff]  ;;  %v355_v21 = vld [vmem:[%s12229_s20 + $0x30] sm:$0xff]  ;;  %v358_v22 = vld [vmem:[%s12229_s20 + $0x48] sm:$0xff] }
 0x10f   :  { %8258 = vmatprep.subr.bf16.mxu1 %v8257_v14  ;;  %v360_v23 = vld [vmem:[%s12229_s20 + $0x58] sm:$0xff]  ;;  %v8263_v24 = vpack.c.bf16 %v355_v21, %v353_v20  ;;  %v357_v26 = vld [vmem:[%s12229_s20 + $0x40] sm:$0xff]  ;;  %v359_v27 = vld [vmem:[%s12229_s20 + $0x50] sm:$0xff] }
 0x110   :  { %241 = vperm.xlu0 %8726, %v234_v2   ;;  %8260 = vmatpush1.bf16.msra.mxu1 %v8259_v18  ;;  %v8265_v25 = vpack.c.bf16 %v360_v23, %v358_v22  ;;  %v362_v28 = vld [vmem:[%s12229_s20 + $0x68] sm:$0xff]  ;;  %v364_v29 = vld [vmem:[%s12229_s20 + $0x78] sm:$0xff]  ;;  %v8267_v30 = vpack.c.bf16 %v359_v27, %v357_v26  ;;  %v361_v32 = vld [vmem:[%s12229_s20 + $0x60] sm:$0xff] }
 0x111   :  { %8262 = vmatprep.subr.bf16.mxu1 %v8261_v19  ;;  %v8269_v31 = vpack.c.bf16 %v364_v29, %v362_v28  ;;  %v363_v33 = vld [vmem:[%s12229_s20 + $0x70] sm:$0xff]  ;;  %v366_v34 = vld [vmem:[%s12229_s20 + $0x88] sm:$0xff]  ;;  %v368_v35 = vld [vmem:[%s12229_s20 + $0x98] sm:$0xff]  ;;  %v10143_v29 = vshrl.u32 %v235_v5, 7 }
 0x112   :  { %v8271_v36 = vpack.c.bf16 %v363_v33, %v361_v32  ;;  %v8273_v37 = vpack.c.bf16 %v368_v35, %v366_v34  ;;  %v365_v38 = vld [vmem:[%s12229_s20 + $0x80] sm:$0xff]  ;;  %v367_v39 = vld [vmem:[%s12229_s20 + $0x90] sm:$0xff]  ;;  %v370_v40 = vld [vmem:[%s12229_s20 + $0xa8] sm:$0xff] }
 0x113   :  { %v372_v41 = vld [vmem:[%s12229_s20 + $0xb8] sm:$0xff]  ;;  %v8275_v42 = vpack.c.bf16 %v367_v39, %v365_v38  ;;  %v369_v44 = vld [vmem:[%s12229_s20 + $0xa0] sm:$0xff]  ;;  %v371_v45 = vld [vmem:[%s12229_s20 + $0xb0] sm:$0xff]  ;;  %v10149_v32 = vsub.s32 1, %v10143_v29 }
 0x114   :  { %8264 = vmatpush1.bf16.msra.mxu1 %v8263_v24  ;;  %v8277_v43 = vpack.c.bf16 %v372_v41, %v370_v40  ;;  %v374_v46 = vld [vmem:[%s12229_s20 + $0xc8] sm:$0xff]  ;;  %v376_v47 = vld [vmem:[%s12229_s20 + $0xd8] sm:$0xff]  ;;  %v8279_v48 = vpack.c.bf16 %v371_v45, %v369_v44  ;;  %v373_v50 = vld [vmem:[%s12229_s20 + $0xc0] sm:$0xff] }
 0x115   :  { %8266 = vmatprep.subr.bf16.mxu1 %v8265_v25  ;;  %v8281_v49 = vpack.c.bf16 %v376_v47, %v374_v46  ;;  %v375_v51 = vld [vmem:[%s12229_s20 + $0xd0] sm:$0xff]  ;;  %v378_v53 = vld [vmem:[%s12229_s20 + $0xe8] sm:$0x7]  ;;  %v377_v54 = vld [vmem:[%s12229_s20 + $0xe0] sm:$0x7]  ;;  %s12234_s20 = sld [smem:[#allocation30_spill]] }
 0x116   :  { %v8283_v52 = vpack.c.bf16 %v375_v51, %v373_v50  ;;  %v483_v55 = vld [vmem:[%s12230_s6 + $0x8] sm:$0xff]  ;;  %v485_v56 = vld [vmem:[%s12230_s6 + $0x18] sm:$0xff]  ;;  %v482_v58 = vld [vmem:[%s12230_s6] sm:$0xff] }
 0x117   :  { %v10044_v57 = vpack.c.bf16 %v485_v56, %v483_v55  ;;  %v484_v59 = vld [vmem:[%s12230_s6 + $0x10] sm:$0xff]  ;;  %v487_v61 = vld [vmem:[%s12230_s6 + $0x28] sm:$0xff]  ;;  %v489_v62 = vld [vmem:[%s12230_s6 + $0x38] sm:$0xff] }
 0x118   :  { %8268 = vmatpush1.bf16.msra.mxu1 %v8267_v30  ;;  %v10052_v60 = vpack.c.bf16 %v484_v59, %v482_v58  ;;  %v10063_v63 = vpack.c.bf16 %v489_v62, %v487_v61  ;;  %v486_v0 = vld [vmem:[%s12230_s6 + $0x20] sm:$0xff]  ;;  %v488_v1 = vld [vmem:[%s12230_s6 + $0x30] sm:$0xff]  ;;  %v491_v4 = vld [vmem:[%s12230_s6 + $0x48] sm:$0xff] }
 0x119   :  { %8270 = vmatprep.subr.bf16.mxu1 %v8269_v31  ;;  %8302 = vmatprep.subr.bf16.mxu0 %v10044_v57  ;;  %v10071_v2 = vpack.c.bf16 %v488_v1, %v486_v0  ;;  %v495_v11 = vld [vmem:[%s12230_s6 + $0x68] sm:$0xff]  ;;  %v497_v12 = vld [vmem:[%s12230_s6 + $0x78] sm:$0xff]  ;;  %v494_v15 = vld [vmem:[%s12230_s6 + $0x60] sm:$0xff]  ;;  %v10146_v31 = vsub.s32 0, %v10143_v29 }
 0x11a   :  { %v10099_v14 = vpack.c.bf16 %v497_v12, %v495_v11  ;;  %v496_v16 = vld [vmem:[%s12230_s6 + $0x70] sm:$0xff]  ;;  %v336_v19 = vld [vmem:[%s12231_s8] sm:$0xff]  ;;  %v337_v22 = vld [vmem:[%s12231_s8 + $0x8] sm:$0xff]  ;;  %s12233_s8 = sld [smem:[#allocation37_spill]] }
 0x11b   :  { %v10107_v18 = vpack.c.bf16 %v496_v16, %v494_v15  ;;  %v498_v30 = vld [vmem:[#allocation6] sm:$0x3]  ;;  %v379_v41 = vld [vmem:[#allocation4] sm:$0x3] }
 0x11c   :  { %8272 = vmatpush1.bf16.msra.mxu1 %v8271_v36  ;;  %v10152_v33 = vrot.slane %v498_v30, %v10146_v31  ;;  %v10155_v34 = vrot.slane %v498_v30, %v10149_v32 }
 0x11d   :  { %8274 = vmatprep.subr.bf16.mxu1 %v8273_v37 }
 0x120   :  { %8276 = vmatpush1.bf16.msra.mxu1 %v8275_v42  ;;  %v384_v42 = vrot.slane %v379_v41, %v10146_v31 }
 0x121   :  { %8278 = vmatprep.subr.bf16.mxu1 %v8277_v43 }
 0x124   :  { %8280 = vmatpush1.bf16.msra.mxu1 %v8279_v48 }
 0x125   :  { %8282 = vmatprep.subr.bf16.mxu1 %v8281_v49 }
 0x128   :  { %8284 = vmatpush1.bf16.msra.mxu1 %v8283_v52 }
 0x129   :  { %7654 = vmatprep.subr.msk.mxu1 %vm398_vm4, %v378_v53 }
 0x12c   :  { %7655 = vmatpush1.msk.msra.mxu1 %vm398_vm4, %v377_v54 }
 0x12d   :  { %8286 = vmatprep.subr.bf16.mxu1 %v10044_v57 }
 0x18b   :  { %v239_v7 = vpop.permute.xlu0 %238 }
 0x18c   :  { %vm243_vm2 = vcmp.eq.s32.totalorder %v239_v7, %v236_v6 }
 0x18d   :  { %v7649_v8 = vsel %vm243_vm2, 1.0, %v9630_v3  ;;  %vm2691_vm2 = vcmask 1043456  }
 0x18e   :  { %7985 = vmatprep.mubr.msk.f32.mxu0 %vm250_vm1, %v7649_v8  ;;  %v490_v8 = vld [vmem:[%s12230_s6 + $0x40] sm:$0xff] }
 0x18f   :  { %v242_v9 = vpop.permute.xlu0 %241 }
 0x190   :  { %vm244_vm3 = vcmp.eq.s32.totalorder %v242_v9, %v236_v6  ;;  %v493_v6 = vld [vmem:[%s12230_s6 + $0x58] sm:$0xff]  ;;  %v492_v9 = vld [vmem:[%s12230_s6 + $0x50] sm:$0xff] }
 0x191   :  { %v7650_v10 = vsel %vm244_vm3, 1.0, %v9630_v3  ;;  %v10081_v7 = vpack.c.bf16 %v493_v6, %v491_v4  ;;  %vm2694_vm3 = vcmask 1044480  }
 0x192   :  { %7986 = vmatmul.mubr.msk.f32.vlgmr.msra.gmra.mrb[0].mxu0 %vm250_vm1, %v7650_v10  ;;  %v10089_v10 = vpack.c.bf16 %v492_v9, %v490_v8  ;;  %vm2684_vm1 = vcmask 1040384  }
 0x193   :  { %795 = vmatprep.mubr.f32.mxu0 %v9630_v3  ;;  %8304 = vmatpush1.bf16.msra.mxu0 %v10052_v60 }
 0x194   :  { %8306 = vmatprep.subr.bf16.mxu0 %v10063_v63 }
 0x197   :  { %8308 = vmatpush1.bf16.msra.mxu0 %v10071_v2 }
 0x198   :  { %8310 = vmatprep.subr.bf16.mxu0 %v10081_v7 }
 0x19b   :  { %8312 = vmatpush1.bf16.msra.mxu0 %v10089_v10 }
 0x19c   :  { %8314 = vmatprep.subr.bf16.mxu0 %v10099_v14 }
 0x19f   :  { %8316 = vmatpush1.bf16.msra.mxu0 %v10107_v18 }
 0x1a0   :  { %8334 = vmatprep.subr.bf16.mxu0 %v10044_v57 }
 0x265   :  { %v7987_v13 = vpop.f32.mrb[0].mxu0 }
 0x266   :  { %v327_v17 = vpop.f32.mrb[1].mxu0 }
 0x267   :  { %340 = vrot.lane.b32.xlu1 %v327_v17, %s9631_s16 }
 0x26b   :  { %342 = vrot.lane.b32.xlu1 %v7987_v13, %s9631_s16 }
 0x2d9   :  { %v341_v20 = vpop.permute.xlu1 %340 }
 0x2da   :  { %v347_v21 = vsel %vm346_vm5, %v336_v19, %v341_v20  ;;  %v388_v20 = vrot.slane %v379_v41, %v10149_v32 }
 0x2db   :  { %7656 = vmatmul.mubr.msk.f32.vlgmr.msra.gmra.mrb[0].mxu1 %vm391_vm6, %v347_v21 }
 0x2dc   :  { %8288 = vmatpush1.bf16.msra.mxu1 %v10052_v60  ;;  %475 = vmatprep.mubr.f32.mxu1 %v9630_v3 }
 0x2dd   :  { %v343_v23 = vpop.permute.xlu1 %342  ;;  %8290 = vmatprep.subr.bf16.mxu1 %v10063_v63 }
 0x2de   :  { %v348_v24 = vsel %vm346_vm5, %v337_v22, %v343_v23  ;;  %vm2697_vm5 = vcmask 1045504  }
 0x2df   :  { %7657 = vmatmul.mubr.msk.f32.gmra.mrb[2].mxu1 %vm391_vm6, %v348_v24  ;;  %vm2700_vm6 = vcmask 1046528  }
 0x2e0   :  { %8292 = vmatpush1.bf16.msra.mxu1 %v10071_v2  ;;  %578 = vmatprep.mubr.f32.mxu1 %v9630_v3 }
 0x2e1   :  { %8294 = vmatprep.subr.bf16.mxu1 %v10081_v7 }
 0x2e4   :  { %8296 = vmatpush1.bf16.msra.mxu1 %v10089_v10 }
 0x2e5   :  { %8298 = vmatprep.subr.bf16.mxu1 %v10099_v14 }
 0x2e8   :  { %8300 = vmatpush1.bf16.msra.mxu1 %v10107_v18 }
 0x2e9   :  { %8318 = vmatprep.subr.bf16.mxu1 %v10044_v57 }
 0x2eb   :  { %579 = vmatmul.mubr.f32.vlgmr.msra.gmra.mrb[4].mxu1 %v9630_v3 }
 0x2ec   :  { %8320 = vmatpush1.bf16.msra.mxu1 %v10052_v60  ;;  %1029 = vmatprep.mubr.f32.mxu1 %v9630_v3 }
 0x2ed   :  { %8322 = vmatprep.subr.bf16.mxu1 %v10063_v63 }
 0x2f0   :  { %8324 = vmatpush1.bf16.msra.mxu1 %v10071_v2 }
 0x2f1   :  { %8326 = vmatprep.subr.bf16.mxu1 %v10081_v7 }
 0x2f4   :  { %8328 = vmatpush1.bf16.msra.mxu1 %v10089_v10 }
 0x2f5   :  { %8330 = vmatprep.subr.bf16.mxu1 %v10099_v14 }
 0x2f8   :  { %8332 = vmatpush1.bf16.msra.mxu1 %v10107_v18 }
 0x2f9   :  { %8350 = vmatprep.subr.bf16.mxu1 %v10044_v57 }
 0x3ae   :  { %v471_v25 = vpop.f32.mrb[0].mxu1 }
 0x3af   :  { %v10138_v26 = vpop.f32.mrb[1].mxu1  ;;  %v10174_v44 = vadd.f32 %v471_v25, %v384_v42 }
 0x3b0   :  { %v10186_v21 = vadd.f32 %v10138_v26, %v388_v20 }
 0x3b2   :  { %v477_v27 = vpop.f32.mrb[2].mxu1 }
 0x3b3   :  { %v10140_v28 = vpop.f32.mrb[3].mxu1  ;;  %v10172_v43 = vadd.f32 %v477_v27, %v384_v42 }
 0x3b4   :  { %v10191_v27 = vadd.f32 %v10140_v28, %v388_v20 }
 0x3be   :  { %v580_v35 = vpop.f32.mrb[4].mxu1 }
 0x3bf   :  { %v581_v36 = vadd.f32 %v580_v35, %v10152_v33  ;;  %v582_v37 = vpop.f32.mrb[5].mxu1 }
 0x3c0   :  { %v10159_v5 = vadd.f32 %v582_v37, %v10155_v34 }
 0x3c1   :  { %v586_v38 = vrot.slane %v581_v36, 1  ;;  %v641_v45 = vrot.slane %v581_v36, 2  ;;  %v589_v50 = vadd.f32 %v581_v36, %v10174_v44 }
 0x3c2   :  { %v640_v39 = vrot.slane %v10159_v5, 1  ;;  %v642_v40 = vrot.slane %v10159_v5, 2 }
 0x3c3   :  { %605 = vrot.lane.b32.xlu0 %v586_v38, %s9632_s14  ;;  %v590_v46 = vadd.f32 %v586_v38, %v10172_v43  ;;  %v646_v47 = vadd.f32 %v586_v38, %v10174_v44  ;;  %v648_v48 = vadd.f32 %v641_v45, %v10172_v43  ;;  %v7658_v53 = vmul.f32 -1.442695, %v589_v50 }
 0x3c4   :  { %674 = vrot.lane.b32.xlu1 %v640_v39, %s9632_s14  ;;  %v647_v42 = vadd.f32 %v640_v39, %v10186_v21  ;;  %v649_v45 = vadd.f32 %v642_v40, %v10191_v27 }
 0x3c5   :  { %v7659_v49 = vmul.f32 -1.442695, %v590_v46  ;;  %v7660_v51 = vmul.f32 -1.442695, %v646_v47  ;;  %v7662_v52 = vmul.f32 -1.442695, %v648_v48 }
 0x3c6   :  { %v7661_v46 = vmul.f32 -1.442695, %v647_v42  ;;  %v7663_v47 = vmul.f32 -1.442695, %v649_v45 }
 0x3c7   :  { %676 = vrot.lane.b32.xlu0 %v642_v40, %s9632_s14  ;;  %8727 = vpow2.f32 %v7659_v49 }
 0x3c8   :  { %603 = vrot.lane.b32.xlu1 %v581_v36, %s9632_s14  ;;  %8729 = vpow2.f32 %v7660_v51 }
 0x3c9   :  { %8731 = vpow2.f32 %v7662_v52 }
 0x3ca   :  { %8733 = vpow2.f32 %v7658_v53 }
 0x3d1   :  { %v8728_v54 = vpop.eup %8727 }
 0x3d2   :  { %v8730_v55 = vpop.eup %8729  ;;  %v598_v56 = vadd.f32 1.0, %v8728_v54 }
 0x3d3   :  { %v8732_v58 = vpop.eup %8731  ;;  %v662_v59 = vadd.f32 1.0, %v8730_v55 }
 0x3d4   :  { %v8734_v61 = vpop.eup %8733  ;;  %8735 = vrcp.f32 %v598_v56  ;;  %v664_v62 = vadd.f32 1.0, %v8732_v58 }
 0x3d5   :  { %v597_v0 = vadd.f32 1.0, %v8734_v61  ;;  %8737 = vrcp.f32 %v662_v59 }
 0x3d6   :  { %8739 = vrcp.f32 %v664_v62 }
 0x3d7   :  { %8741 = vrcp.f32 %v597_v0 }
 0x3de   :  { %v8736_v1 = vpop.eup %8735 }
 0x3df   :  { %v8738_v6 = vpop.eup %8737  ;;  %v624_v53 = vsub.f32 1.0, %v8736_v1  ;;  %v636_v59 = vmul.f32 0.0, %v8736_v1 }
 0x3e0   :  { %v8740_v12 = vpop.eup %8739 }
 0x3e1   :  { %v8742_v15 = vpop.eup %8741 }
 0x435   :  { %v606_v4 = vpop.permute.xlu0 %605 }
 0x436   :  { %v610_v8 = vmul.f32 %v8736_v1, %v606_v4  ;;  %v675_v9 = vpop.permute.xlu1 %674  ;;  %v623_v4 = vsub.f32 1.0, %v8742_v15 }
 0x437   :  { %v680_v11 = vmul.f32 %v8738_v6, %v675_v9 }
 0x438   :  { %615 = vrot.lane.b32.xlu0 %v610_v8, %s9632_s14 }
 0x439   :  { %v677_v13 = vpop.permute.xlu0 %676  ;;  %684 = vrot.lane.b32.xlu1 %v680_v11, %s9632_s14 }
 0x43a   :  { %v681_v16 = vmul.f32 %v8740_v12, %v677_v13  ;;  %v604_v17 = vpop.permute.xlu1 %603  ;;  %v635_v12 = vmul.f32 0.0, %v8742_v15 }
 0x43b   :  { %v609_v19 = vmul.f32 %v8742_v15, %v604_v17 }
 0x43c   :  { %686 = vrot.lane.b32.xlu0 %v681_v16, %s9632_s14 }
 0x43d   :  { %613 = vrot.lane.b32.xlu1 %v609_v19, %s9632_s14 }
 0x4aa   :  { %v616_v22 = vpop.permute.xlu0 %615 }
 0x4ab   :  { %v620_v23 = vadd.f32 %v616_v22, %v10172_v43  ;;  %v685_v24 = vpop.permute.xlu1 %684 }
 0x4ac   :  { %v690_v25 = vadd.f32 %v685_v24, %v10186_v21 }
 0x4ad   :  { %8743 = vtanh.f32 %v620_v23 }
 0x4ae   :  { %8745 = vtanh.f32 %v690_v25  ;;  %v687_v30 = vpop.permute.xlu0 %686 }
 0x4af   :  { %v691_v35 = vadd.f32 %v687_v30, %v10191_v27  ;;  %v614_v36 = vpop.permute.xlu1 %613 }
 0x4b0   :  { %v619_v37 = vadd.f32 %v614_v36, %v10174_v44 }
 0x4b1   :  { %8747 = vtanh.f32 %v691_v35 }
 0x4b2   :  { %8749 = vtanh.f32 %v619_v37 }
 0x4b3   :  { %8751 = vpow2.f32 %v7661_v46 }
 0x4b4   :  { %8753 = vpow2.f32 %v7663_v47 }
 0x4b7   :  { %v8744_v26 = vpop.eup %8743 }
 0x4b8   :  { %v8746_v38 = vpop.eup %8745  ;;  %629 = vrot.lane.b32.xlu0 %v8744_v26, %s9633_s22 }
 0x4b9   :  { %698 = vrot.lane.b32.xlu1 %v8746_v38, %s9633_s22 }
 0x4bb   :  { %v8748_v41 = vpop.eup %8747 }
 0x4bc   :  { %v8750_v28 = vpop.eup %8749  ;;  %700 = vrot.lane.b32.xlu0 %v8748_v41, %s9633_s22 }
 0x4bd   :  { %627 = vrot.lane.b32.xlu1 %v8750_v28, %s9633_s22  ;;  %v8752_v48 = vpop.eup %8751 }
 0x4be   :  { %v8754_v49 = vpop.eup %8753  ;;  %v663_v50 = vadd.f32 1.0, %v8752_v48 }
 0x4bf   :  { %v665_v51 = vadd.f32 1.0, %v8754_v49 }
 0x4c0   :  { %8755 = vrcp.f32 %v663_v50 }
 0x4c1   :  { %8757 = vrcp.f32 %v665_v51 }
 0x4ca   :  { %v8756_v52 = vpop.eup %8755 }
 0x4cb   :  { %v8758_v54 = vpop.eup %8757  ;;  %v694_v56 = vsub.f32 1.0, %v8756_v52  ;;  %v706_v40 = vmul.f32 0.0, %v8756_v52 }
 0x4cc   :  { %v695_v61 = vsub.f32 1.0, %v8758_v54  ;;  %v707_v8 = vmul.f32 0.0, %v8758_v54 }
 0x52a   :  { %v630_v55 = vpop.permute.xlu0 %629 }
 0x52b   :  { %v634_v39 = vmul.f32 %v630_v55, %v624_v53  ;;  %v699_v58 = vpop.permute.xlu1 %698 }
 0x52c   :  { %v704_v5 = vmul.f32 %v699_v58, %v694_v56 }
 0x52d   :  { %v638_v62 = vadd.f32 %v636_v59, %v634_v39 }
 0x52e   :  { %v701_v0 = vpop.permute.xlu0 %700  ;;  %v10205_v6 = vadd.f32 %v706_v40, %v704_v5 }
 0x52f   :  { %v705_v9 = vmul.f32 %v701_v0, %v695_v61  ;;  %v628_v11 = vpop.permute.xlu1 %627  ;;  %v712_v17 = vrot.slane %v638_v62, 7 }
 0x530   :  { %v633_v13 = vmul.f32 %v628_v11, %v623_v4  ;;  %v720_v1 = vrot.slane %v10205_v6, 7 }
 0x531   :  { %v10207_v16 = vadd.f32 %v707_v8, %v705_v9 }
 0x532   :  { %v637_v19 = vadd.f32 %v635_v12, %v633_v13 }
 0x533   :  { %v721_v20 = vrot.slane %v10207_v16, 6 }
 0x534   :  { %v714_v22 = vsel %vm713_vm7, %v712_v17, %v637_v19 }
 0x535   :  { %715 = vrot.lane.b32.xlu0 %v714_v22, %s9633_s22  ;;  %v722_v23 = vsel %vm713_vm7, %v721_v20, %v720_v1 }
 0x536   :  { %723 = vrot.lane.b32.xlu1 %v722_v23, %s9634_s10 }
 0x5a7   :  { %v10215_v15 = vpop.permute.xlu0 %715 }
 0x5a8   :  { %v724_v24 = vpop.permute.xlu1 %723 }
 0x5a9   :  { %v10219_v25 = vsel %vm726_vm8, %v10215_v15, %v724_v24 }
 0x5aa   :  { %7664 = vmatmul.mubr.msk.f32.vlgmr.msra.gmra.mrb[2].mxu0 %vm510_vm9, %v10219_v25  ;;  %v932_v1 = vrot.slane %v10219_v25, 2  ;;  %v933_v20 = vrot.slane %v10219_v25, 3 }
 0x5ab   :  { %8336 = vmatpush1.bf16.msra.mxu0 %v10052_v60  ;;  %1264 = vmatprep.mubr.f32.mxu0 %v9630_v3 }
 0x5ac   :  { %8338 = vmatprep.subr.bf16.mxu0 %v10063_v63 }
 0x5af   :  { %8340 = vmatpush1.bf16.msra.mxu0 %v10071_v2 }
 0x5b0   :  { %8342 = vmatprep.subr.bf16.mxu0 %v10081_v7 }
 0x5b3   :  { %8344 = vmatpush1.bf16.msra.mxu0 %v10089_v10 }
 0x5b4   :  { %8346 = vmatprep.subr.bf16.mxu0 %v10099_v14 }
 0x5b7   :  { %8348 = vmatpush1.bf16.msra.mxu0 %v10107_v18 }
 0x5b8   :  { %8366 = vmatprep.subr.bf16.mxu0 %v10044_v57 }
 0x67d   :  { %v797_v30 = vpop.f32.mrb[2].mxu0 }
 0x67e   :  { %v798_v35 = vadd.f32 %v797_v30, %v10152_v33  ;;  %v799_v36 = vpop.f32.mrb[3].mxu0 }
 0x67f   :  { %v10234_v37 = vadd.f32 %v799_v36, %v10155_v34 }
 0x680   :  { %822 = vrot.lane.b32.xlu0 %v798_v35, %s9632_s14  ;;  %v803_v41 = vrot.slane %v798_v35, 7  ;;  %v864_v28 = vrot.slane %v798_v35, 2  ;;  %v807_v42 = vadd.f32 %v798_v35, %v10172_v43  ;;  %v866_v45 = vrot.slane %v798_v35, 3 }
 0x681   :  { %v865_v26 = vrot.slane %v10234_v37, 2  ;;  %v867_v38 = vrot.slane %v10234_v37, 3 }
 0x682   :  { %v872_v46 = vadd.f32 %v864_v28, %v10174_v44  ;;  %v7666_v47 = vmul.f32 -1.442695, %v807_v42  ;;  %v874_v48 = vadd.f32 %v866_v45, %v10172_v43  ;;  %v806_v50 = vadd.f32 %v803_v41, %v10174_v44 }
 0x683   :  { %900 = vrot.lane.b32.xlu1 %v865_v26, %s9632_s14 }
 0x684   :  { %902 = vrot.lane.b32.xlu0 %v867_v38, %s9632_s14  ;;  %v7667_v49 = vmul.f32 -1.442695, %v872_v46  ;;  %8759 = vpow2.f32 %v7666_v47  ;;  %v7669_v51 = vmul.f32 -1.442695, %v874_v48  ;;  %v7665_v52 = vmul.f32 -1.442695, %v806_v50 }
 0x685   :  { %v852_v48 = vrot.slane %v10219_v25, 7  ;;  %v875_v50 = vadd.f32 %v867_v38, %v10191_v27 }
 0x686   :  { %8761 = vpow2.f32 %v7667_v49  ;;  %v873_v49 = vadd.f32 %v865_v26, %v10186_v21 }
 0x687   :  { %820 = vrot.lane.b32.xlu1 %v803_v41, %s9632_s14  ;;  %8763 = vpow2.f32 %v7669_v51 }
 0x688   :  { %8765 = vpow2.f32 %v7665_v52  ;;  %v7668_v51 = vmul.f32 -1.442695, %v873_v49  ;;  %v7670_v52 = vmul.f32 -1.442695, %v875_v50 }
 0x68e   :  { %v8760_v53 = vpop.eup %8759 }
 0x68f   :  { %v815_v55 = vadd.f32 1.0, %v8760_v53 }
 0x690   :  { %v8762_v54 = vpop.eup %8761 }
 0x691   :  { %v8764_v56 = vpop.eup %8763  ;;  %v888_v39 = vadd.f32 1.0, %v8762_v54  ;;  %8767 = vrcp.f32 %v815_v55 }
 0x692   :  { %v8766_v58 = vpop.eup %8765  ;;  %v890_v59 = vadd.f32 1.0, %v8764_v56 }
 0x693   :  { %v814_v5 = vadd.f32 1.0, %v8766_v58  ;;  %8769 = vrcp.f32 %v888_v39 }
 0x694   :  { %8771 = vrcp.f32 %v890_v59 }
 0x695   :  { %8773 = vrcp.f32 %v814_v5 }
 0x69b   :  { %v10250_v40 = vpop.eup %8767 }
 0x69d   :  { %v8770_v0 = vpop.eup %8769 }
 0x69e   :  { %v8772_v8 = vpop.eup %8771 }
 0x69f   :  { %v10255_v13 = vpop.eup %8773 }
 0x6f2   :  { %v823_v61 = vpop.permute.xlu0 %822 }
 0x6f3   :  { %v827_v62 = vmul.f32 %v10250_v40, %v823_v61  ;;  %v841_v61 = vsub.f32 1.0, %v10250_v40 }
 0x6f5   :  { %v901_v4 = vpop.permute.xlu1 %900  ;;  %832 = vrot.lane.b32.xlu0 %v827_v62, %s9632_s14 }
 0x6f6   :  { %v906_v9 = vmul.f32 %v8770_v0, %v901_v4  ;;  %v903_v11 = vpop.permute.xlu0 %902 }
 0x6f7   :  { %v907_v12 = vmul.f32 %v8772_v8, %v903_v11 }
 0x6f8   :  { %910 = vrot.lane.b32.xlu1 %v906_v9, %s9632_s14 }
 0x6f9   :  { %912 = vrot.lane.b32.xlu0 %v907_v12, %s9632_s14  ;;  %v821_v17 = vpop.permute.xlu1 %820 }
 0x6fa   :  { %v826_v19 = vmul.f32 %v10255_v13, %v821_v17 }
 0x6fc   :  { %830 = vrot.lane.b32.xlu1 %v826_v19, %s9632_s14 }
 0x6fd   :  { %934 = vrot.lane.b32.xlu0 %v932_v1, %s9633_s22 }
 0x700   :  { %855 = vrot.lane.b32.xlu1 %v10219_v25, %s9634_s10 }
 0x704   :  { %936 = vrot.lane.b32.xlu1 %v933_v20, %s9633_s22  ;;  %v840_v20 = vsub.f32 1.0, %v10255_v13 }
 0x767   :  { %v833_v22 = vpop.permute.xlu0 %832 }
 0x768   :  { %v837_v23 = vadd.f32 %v833_v22, %v10172_v43 }
 0x76a   :  { %8775 = vtanh.f32 %v837_v23  ;;  %v911_v24 = vpop.permute.xlu1 %910 }
 0x76b   :  { %v916_v30 = vadd.f32 %v911_v24, %v10186_v21  ;;  %v913_v35 = vpop.permute.xlu0 %912 }
 0x76c   :  { %v917_v36 = vadd.f32 %v913_v35, %v10191_v27 }
 0x76d   :  { %8777 = vtanh.f32 %v916_v30 }
 0x76e   :  { %8779 = vtanh.f32 %v917_v36  ;;  %v831_v41 = vpop.permute.xlu1 %830 }
 0x76f   :  { %v836_v28 = vadd.f32 %v831_v41, %v10174_v44  ;;  %v935_v39 = vpop.permute.xlu0 %934 }
 0x771   :  { %8781 = vtanh.f32 %v836_v28 }
 0x772   :  { %8783 = vpow2.f32 %v7668_v51  ;;  %v856_v56 = vpop.permute.xlu1 %855 }
 0x773   :  { %8785 = vpow2.f32 %v7670_v52  ;;  %v860_v17 = vmul.f32 %v10250_v40, %v856_v56 }
 0x774   :  { %v8776_v42 = vpop.eup %8775 }
 0x775   :  { %846 = vrot.lane.b32.xlu0 %v8776_v42, %s9633_s22 }
 0x776   :  { %v937_v5 = vpop.permute.xlu1 %936 }
 0x777   :  { %v8778_v45 = vpop.eup %8777 }
 0x778   :  { %v8780_v46 = vpop.eup %8779 }
 0x779   :  { %924 = vrot.lane.b32.xlu0 %v8778_v45, %s9633_s22  ;;  %926 = vrot.lane.b32.xlu1 %v8780_v46, %s9633_s22 }
 0x77b   :  { %v8782_v47 = vpop.eup %8781 }
 0x77c   :  { %v8784_v53 = vpop.eup %8783 }
 0x77d   :  { %853 = vrot.lane.b32.xlu1 %v852_v48, %s9634_s10  ;;  %844 = vrot.lane.b32.xlu0 %v8782_v47, %s9633_s22  ;;  %v8786_v54 = vpop.eup %8785  ;;  %v889_v55 = vadd.f32 1.0, %v8784_v53 }
 0x77e   :  { %v891_v25 = vadd.f32 1.0, %v8786_v54 }
 0x77f   :  { %8787 = vrcp.f32 %v889_v55 }
 0x780   :  { %8789 = vrcp.f32 %v891_v25 }
 0x789   :  { %v8788_v58 = vpop.eup %8787 }
 0x78a   :  { %v8790_v59 = vpop.eup %8789  ;;  %v920_v37 = vsub.f32 1.0, %v8788_v58  ;;  %v940_v8 = vmul.f32 %v8788_v58, %v935_v39 }
 0x78b   :  { %v921_v38 = vsub.f32 1.0, %v8790_v59  ;;  %v941_v9 = vmul.f32 %v8790_v59, %v937_v5 }
 0x7e7   :  { %v847_v26 = vpop.permute.xlu0 %846 }
 0x7e8   :  { %v851_v62 = vmul.f32 %v847_v26, %v841_v61 }
 0x7ea   :  { %v862_v22 = vadd.f32 %v860_v17, %v851_v62 }
 0x7eb   :  { %v925_v0 = vpop.permute.xlu0 %924  ;;  %v927_v4 = vpop.permute.xlu1 %926 }
 0x7ec   :  { %v930_v11 = vmul.f32 %v925_v0, %v920_v37  ;;  %v931_v12 = vmul.f32 %v927_v4, %v921_v38  ;;  %v946_v40 = vrot.slane %v862_v22, 7 }
 0x7ee   :  { %v942_v19 = vadd.f32 %v940_v8, %v930_v11  ;;  %v943_v1 = vadd.f32 %v941_v9, %v931_v12 }
 0x7ef   :  { %v845_v23 = vpop.permute.xlu0 %844  ;;  %v854_v24 = vpop.permute.xlu1 %853 }
 0x7f0   :  { %v954_v30 = vrot.slane %v942_v19, 5  ;;  %v955_v35 = vrot.slane %v943_v1, 4  ;;  %v2376_v36 = vrot.slane %v943_v1, 7  ;;  %v850_v41 = vmul.f32 %v845_v23, %v840_v20 }
 0x7f1   :  { %v859_v28 = vmul.f32 %v10255_v13, %v854_v24 }
 0x7f2   :  { %v956_v42 = vsel %vm947_vm10, %v955_v35, %v954_v30  ;;  %v10288_v45 = vsel %vm2112_vm11, %v2376_v36, %v942_v19 }
 0x7f3   :  { %v861_v46 = vadd.f32 %v859_v28, %v850_v41  ;;  %957 = vrot.lane.b32.xlu1 %v956_v42, %s9634_s10 }
 0x7f5   :  { %v948_v47 = vsel %vm947_vm10, %v946_v40, %v861_v46 }
 0x7f6   :  { %949 = vrot.lane.b32.xlu0 %v948_v47, %s9633_s22 }
 0x865   :  { %v958_v48 = vpop.permute.xlu1 %957 }
 0x868   :  { %v10293_v49 = vpop.permute.xlu0 %949 }
 0x869   :  { %v10297_v50 = vsel %vm726_vm8, %v10293_v49, %v958_v48 }
 0x86a   :  { %v962_v13 = vrot.slane %v10297_v50, 1  ;;  %v1167_v48 = vrot.slane %v10297_v50, 4 }
 0x86c   :  { %7671 = vmatmul.mubr.msk.f32.vlgmr.msra.gmra.mrb[6].mxu1 %vm510_vm9, %v962_v13  ;;  %v1168_v13 = vrot.slane %v10297_v50, 5 }
 0x86d   :  { %8352 = vmatpush1.bf16.msra.mxu1 %v10052_v60  ;;  %1495 = vmatprep.mubr.f32.mxu1 %v9630_v3 }
 0x86e   :  { %8354 = vmatprep.subr.bf16.mxu1 %v10063_v63 }
 0x871   :  { %8356 = vmatpush1.bf16.msra.mxu1 %v10071_v2 }
 0x872   :  { %8358 = vmatprep.subr.bf16.mxu1 %v10081_v7 }
 0x875   :  { %8360 = vmatpush1.bf16.msra.mxu1 %v10089_v10 }
 0x876   :  { %8362 = vmatprep.subr.bf16.mxu1 %v10099_v14 }
 0x879   :  { %8364 = vmatpush1.bf16.msra.mxu1 %v10107_v18 }
 0x87a   :  { %8382 = vmatprep.subr.bf16.mxu1 %v10044_v57 }
 0x93f   :  { %v1031_v51 = vpop.f32.mrb[6].mxu1 }
 0x940   :  { %v1032_v52 = vadd.f32 %v1031_v51, %v10152_v33  ;;  %v1033_v53 = vpop.f32.mrb[7].mxu1 }
 0x941   :  { %v10312_v54 = vadd.f32 %v1033_v53, %v10155_v34 }
 0x942   :  { %v1038_v55 = vrot.slane %v1032_v52, 7  ;;  %v1037_v39 = vrot.slane %v1032_v52, 6  ;;  %v1099_v58 = vrot.slane %v1032_v52, 3  ;;  %v1101_v59 = vrot.slane %v1032_v52, 4 }
 0x943   :  { %v1100_v25 = vrot.slane %v10312_v54, 3  ;;  %v1102_v56 = vrot.slane %v10312_v54, 4 }
 0x944   :  { %1057 = vrot.lane.b32.xlu0 %v1038_v55, %s9632_s14  ;;  %v1042_v5 = vadd.f32 %v1038_v55, %v10172_v43  ;;  %v1107_v26 = vadd.f32 %v1099_v58, %v10174_v44  ;;  %v1109_v61 = vadd.f32 %v1101_v59, %v10172_v43  ;;  %v1041_v62 = vadd.f32 %v1037_v39, %v10174_v44 }
 0x945   :  { %1135 = vrot.lane.b32.xlu1 %v1100_v25, %s9632_s14 }
 0x946   :  { %v7673_v37 = vmul.f32 -1.442695, %v1042_v5  ;;  %v7674_v38 = vmul.f32 -1.442695, %v1107_v26  ;;  %v7676_v0 = vmul.f32 -1.442695, %v1109_v61 }
 0x947   :  { %v7672_v4 = vmul.f32 -1.442695, %v1041_v62 }
 0x948   :  { %1137 = vrot.lane.b32.xlu0 %v1102_v56, %s9632_s14  ;;  %8791 = vpow2.f32 %v7673_v37 }
 0x949   :  { %1055 = vrot.lane.b32.xlu1 %v1037_v39, %s9632_s14  ;;  %8793 = vpow2.f32 %v7674_v38  ;;  %v1087_v38 = vrot.slane %v10297_v50, 7 }
 0x94a   :  { %8795 = vpow2.f32 %v7676_v0  ;;  %v1108_v0 = vadd.f32 %v1100_v25, %v10186_v21 }
 0x94b   :  { %8797 = vpow2.f32 %v7672_v4  ;;  %v1110_v4 = vadd.f32 %v1102_v56, %v10191_v27 }
 0x952   :  { %v8792_v8 = vpop.eup %8791 }
 0x953   :  { %v8794_v9 = vpop.eup %8793  ;;  %v1050_v11 = vadd.f32 1.0, %v8792_v8  ;;  %v7675_v8 = vmul.f32 -1.442695, %v1108_v0 }
 0x954   :  { %v8796_v12 = vpop.eup %8795  ;;  %v1123_v17 = vadd.f32 1.0, %v8794_v9  ;;  %v7677_v9 = vmul.f32 -1.442695, %v1110_v4 }
 0x955   :  { %v8798_v19 = vpop.eup %8797  ;;  %8799 = vrcp.f32 %v1050_v11  ;;  %v1125_v1 = vadd.f32 1.0, %v8796_v12 }
 0x956   :  { %v1049_v20 = vadd.f32 1.0, %v8798_v19  ;;  %8801 = vrcp.f32 %v1123_v17 }
 0x957   :  { %8803 = vrcp.f32 %v1125_v1 }
 0x958   :  { %8805 = vrcp.f32 %v1049_v20 }
 0x95f   :  { %v10328_v22 = vpop.eup %8799 }
 0x960   :  { %v8802_v24 = vpop.eup %8801 }
 0x961   :  { %v8804_v41 = vpop.eup %8803 }
 0x962   :  { %v10333_v42 = vpop.eup %8805 }
 0x9b6   :  { %v1058_v23 = vpop.permute.xlu0 %1057 }
 0x9b7   :  { %v1062_v30 = vmul.f32 %v10328_v22, %v1058_v23  ;;  %v1136_v35 = vpop.permute.xlu1 %1135 }
 0x9b8   :  { %v1141_v36 = vmul.f32 %v8802_v24, %v1136_v35 }
 0x9b9   :  { %1067 = vrot.lane.b32.xlu0 %v1062_v30, %s9632_s14  ;;  %v1076_v30 = vsub.f32 1.0, %v10328_v22 }
 0x9ba   :  { %v1138_v28 = vpop.permute.xlu0 %1137  ;;  %1145 = vrot.lane.b32.xlu1 %v1141_v36, %s9632_s14 }
 0x9bb   :  { %v1142_v40 = vmul.f32 %v8804_v41, %v1138_v28  ;;  %v1056_v46 = vpop.permute.xlu1 %1055 }
 0x9bc   :  { %v1061_v47 = vmul.f32 %v10333_v42, %v1056_v46 }
 0x9bd   :  { %1147 = vrot.lane.b32.xlu0 %v1142_v40, %s9632_s14 }
 0x9be   :  { %1065 = vrot.lane.b32.xlu1 %v1061_v47, %s9632_s14 }
 0x9c1   :  { %1169 = vrot.lane.b32.xlu0 %v1167_v48, %s9633_s22 }
 0x9c2   :  { %1090 = vrot.lane.b32.xlu1 %v10297_v50, %s9634_s10 }
 0x9c6   :  { %1171 = vrot.lane.b32.xlu1 %v1168_v13, %s9633_s22 }
 0xa2b   :  { %v1068_v51 = vpop.permute.xlu0 %1067 }
 0xa2c   :  { %v1072_v52 = vadd.f32 %v1068_v51, %v10172_v43  ;;  %v1146_v53 = vpop.permute.xlu1 %1145 }
 0xa2d   :  { %v1151_v55 = vadd.f32 %v1146_v53, %v10186_v21 }
 0xa2e   :  { %8807 = vtanh.f32 %v1072_v52  ;;  %v1075_v52 = vsub.f32 1.0, %v10333_v42 }
 0xa2f   :  { %v1148_v39 = vpop.permute.xlu0 %1147  ;;  %8809 = vtanh.f32 %v1151_v55 }
 0xa30   :  { %v1152_v58 = vadd.f32 %v1148_v39, %v10191_v27  ;;  %v1066_v59 = vpop.permute.xlu1 %1065 }
 0xa31   :  { %v1071_v5 = vadd.f32 %v1066_v59, %v10174_v44 }
 0xa32   :  { %8811 = vtanh.f32 %v1152_v58 }
 0xa33   :  { %8813 = vtanh.f32 %v1071_v5  ;;  %v1170_v1 = vpop.permute.xlu0 %1169 }
 0xa34   :  { %8815 = vpow2.f32 %v7675_v8  ;;  %v1091_v19 = vpop.permute.xlu1 %1090 }
 0xa35   :  { %8817 = vpow2.f32 %v7677_v9  ;;  %v1095_v48 = vmul.f32 %v10328_v22, %v1091_v19 }
 0xa38   :  { %v8808_v26 = vpop.eup %8807  ;;  %v1172_v24 = vpop.permute.xlu1 %1171 }
 0xa39   :  { %1081 = vrot.lane.b32.xlu0 %v8808_v26, %s9633_s22  ;;  %v8810_v61 = vpop.eup %8809 }
 0xa3c   :  { %v8812_v37 = vpop.eup %8811 }
 0xa3d   :  { %1159 = vrot.lane.b32.xlu0 %v8810_v61, %s9633_s22  ;;  %1161 = vrot.lane.b32.xlu1 %v8812_v37, %s9633_s22  ;;  %v8814_v62 = vpop.eup %8813 }
 0xa3e   :  { %v8816_v11 = vpop.eup %8815 }
 0xa3f   :  { %v8818_v12 = vpop.eup %8817  ;;  %v1124_v50 = vadd.f32 1.0, %v8816_v11 }
 0xa40   :  { %v1126_v17 = vadd.f32 1.0, %v8818_v12 }
 0xa41   :  { %1088 = vrot.lane.b32.xlu1 %v1087_v38, %s9634_s10  ;;  %1079 = vrot.lane.b32.xlu0 %v8814_v62, %s9633_s22  ;;  %8819 = vrcp.f32 %v1124_v50 }
 0xa42   :  { %8821 = vrcp.f32 %v1126_v17 }
 0xa4b   :  { %v8820_v20 = vpop.eup %8819 }
 0xa4c   :  { %v8822_v23 = vpop.eup %8821  ;;  %v1155_v54 = vsub.f32 1.0, %v8820_v20  ;;  %v1175_v28 = vmul.f32 %v8820_v20, %v1170_v1 }
 0xa4d   :  { %v1156_v56 = vsub.f32 1.0, %v8822_v23  ;;  %v1176_v40 = vmul.f32 %v8822_v23, %v1172_v24 }
 0xaab   :  { %v1082_v25 = vpop.permute.xlu0 %1081 }
 0xaac   :  { %v1086_v35 = vmul.f32 %v1082_v25, %v1076_v30 }
 0xaae   :  { %v1097_v53 = vadd.f32 %v1095_v48, %v1086_v35 }
 0xaaf   :  { %v1160_v36 = vpop.permute.xlu0 %1159  ;;  %v1162_v41 = vpop.permute.xlu1 %1161 }
 0xab0   :  { %v1165_v46 = vmul.f32 %v1160_v36, %v1155_v54  ;;  %v1166_v47 = vmul.f32 %v1162_v41, %v1156_v56  ;;  %v1181_v22 = vrot.slane %v1097_v53, 7 }
 0xab2   :  { %v1177_v13 = vadd.f32 %v1175_v28, %v1165_v46  ;;  %v1178_v51 = vadd.f32 %v1176_v40, %v1166_v47 }
 0xab3   :  { %v1080_v55 = vpop.permute.xlu0 %1079  ;;  %v1089_v39 = vpop.permute.xlu1 %1088 }
 0xab4   :  { %v1189_v58 = vrot.slane %v1177_v13, 3  ;;  %v1190_v59 = vrot.slane %v1178_v51, 2  ;;  %v2370_v5 = vrot.slane %v1178_v51, 7  ;;  %v1085_v26 = vmul.f32 %v1080_v55, %v1075_v52 }
 0xab5   :  { %v1094_v61 = vmul.f32 %v10333_v42, %v1089_v39 }
 0xab6   :  { %v1191_v37 = vsel %vm1182_vm12, %v1190_v59, %v1189_v58  ;;  %v10366_v38 = vsel %vm1880_vm13, %v2370_v5, %v1177_v13 }
 0xab7   :  { %v1096_v62 = vadd.f32 %v1094_v61, %v1085_v26  ;;  %1192 = vrot.lane.b32.xlu1 %v1191_v37, %s9634_s10 }
 0xab9   :  { %v1183_v0 = vsel %vm1182_vm12, %v1181_v22, %v1096_v62 }
 0xaba   :  { %1184 = vrot.lane.b32.xlu0 %v1183_v0, %s9633_s22 }
 0xb29   :  { %v1193_v4 = vpop.permute.xlu1 %1192 }
 0xb2c   :  { %v10371_v8 = vpop.permute.xlu0 %1184 }
 0xb2d   :  { %v10375_v9 = vsel %vm726_vm8, %v10371_v8, %v1193_v4 }
 0xb2e   :  { %v1197_v42 = vrot.slane %v10375_v9, 2  ;;  %v1400_v4 = vrot.slane %v10375_v9, 6 }
 0xb30   :  { %7678 = vmatmul.mubr.msk.f32.vlgmr.msra.gmra.mrb[4].mxu0 %vm510_vm9, %v1197_v42  ;;  %v1322_v42 = vrot.slane %v10375_v9, 7 }
 0xb31   :  { %8368 = vmatpush1.bf16.msra.mxu0 %v10052_v60  ;;  %1727 = vmatprep.mubr.f32.mxu0 %v9630_v3 }
 0xb32   :  { %8370 = vmatprep.subr.bf16.mxu0 %v10063_v63 }
 0xb35   :  { %8372 = vmatpush1.bf16.msra.mxu0 %v10071_v2 }
 0xb36   :  { %8374 = vmatprep.subr.bf16.mxu0 %v10081_v7 }
 0xb39   :  { %8376 = vmatpush1.bf16.msra.mxu0 %v10089_v10 }
 0xb3a   :  { %8378 = vmatprep.subr.bf16.mxu0 %v10099_v14 }
 0xb3d   :  { %8380 = vmatpush1.bf16.msra.mxu0 %v10107_v18 }
 0xb3e   :  { %8398 = vmatprep.subr.bf16.mxu0 %v10044_v57 }
 0xc03   :  { %v1266_v11 = vpop.f32.mrb[4].mxu0 }
 0xc04   :  { %v1267_v12 = vadd.f32 %v1266_v11, %v10152_v33  ;;  %v1268_v50 = vpop.f32.mrb[5].mxu0 }
 0xc05   :  { %v10390_v17 = vadd.f32 %v1268_v50, %v10155_v34 }
 0xc06   :  { %v1273_v19 = vrot.slane %v1267_v12, 6  ;;  %v1272_v20 = vrot.slane %v1267_v12, 5  ;;  %v1334_v57 = vrot.slane %v1267_v12, 4 }
 0xc07   :  { %v1335_v1 = vrot.slane %v10390_v17, 4  ;;  %v1336_v23 = vrot.slane %v10390_v17, 5 }
 0xc08   :  { %1292 = vrot.lane.b32.xlu0 %v1273_v19, %s9632_s14  ;;  %v1277_v24 = vadd.f32 %v1273_v19, %v10172_v43  ;;  %v1340_v25 = vadd.f32 %v1334_v57, %v10174_v44  ;;  %v1276_v54 = vadd.f32 %v1272_v20, %v10174_v44  ;;  %v1342_v35 = vadd.f32 %v1272_v20, %v10172_v43 }
 0xc09   :  { %1368 = vrot.lane.b32.xlu1 %v1335_v1, %s9632_s14 }
 0xc0a   :  { %v7680_v30 = vmul.f32 -1.442695, %v1277_v24  ;;  %v7681_v56 = vmul.f32 -1.442695, %v1340_v25  ;;  %v7679_v36 = vmul.f32 -1.442695, %v1276_v54 }
 0xc0b   :  { %v7683_v41 = vmul.f32 -1.442695, %v1342_v35  ;;  %v1341_v35 = vadd.f32 %v1335_v1, %v10186_v21 }
 0xc0c   :  { %1290 = vrot.lane.b32.xlu0 %v1272_v20, %s9632_s14  ;;  %8823 = vpow2.f32 %v7680_v30 }
 0xc0d   :  { %1370 = vrot.lane.b32.xlu1 %v1336_v23, %s9632_s14  ;;  %8825 = vpow2.f32 %v7681_v56 }
 0xc0e   :  { %8827 = vpow2.f32 %v7679_v36  ;;  %v1343_v36 = vadd.f32 %v1336_v23, %v10191_v27 }
 0xc0f   :  { %8829 = vpow2.f32 %v7683_v41  ;;  %v7682_v41 = vmul.f32 -1.442695, %v1341_v35 }
 0xc16   :  { %v8824_v28 = vpop.eup %8823 }
 0xc17   :  { %v8826_v40 = vpop.eup %8825  ;;  %v1285_v46 = vadd.f32 1.0, %v8824_v28  ;;  %v7684_v28 = vmul.f32 -1.442695, %v1343_v36 }
 0xc18   :  { %v8828_v47 = vpop.eup %8827  ;;  %v1356_v48 = vadd.f32 1.0, %v8826_v40 }
 0xc19   :  { %v8830_v13 = vpop.eup %8829  ;;  %8831 = vrcp.f32 %v1285_v46  ;;  %v1284_v51 = vadd.f32 1.0, %v8828_v47 }
 0xc1a   :  { %8833 = vrcp.f32 %v1356_v48  ;;  %v1358_v52 = vadd.f32 1.0, %v8830_v13 }
 0xc1b   :  { %8835 = vrcp.f32 %v1284_v51 }
 0xc1c   :  { %8837 = vrcp.f32 %v1358_v52 }
 0xc23   :  { %v8832_v53 = vpop.eup %8831 }
 0xc24   :  { %v8834_v39 = vpop.eup %8833  ;;  %v1311_v52 = vsub.f32 1.0, %v8832_v53 }
 0xc25   :  { %v8836_v26 = vpop.eup %8835 }
 0xc26   :  { %v8838_v37 = vpop.eup %8837  ;;  %v1310_v17 = vsub.f32 1.0, %v8836_v26 }
 0xc7a   :  { %v1293_v55 = vpop.permute.xlu0 %1292 }
 0xc7b   :  { %v1297_v58 = vmul.f32 %v8832_v53, %v1293_v55  ;;  %v1369_v59 = vpop.permute.xlu1 %1368 }
 0xc7c   :  { %v1374_v5 = vmul.f32 %v8834_v39, %v1369_v59 }
 0xc7d   :  { %1302 = vrot.lane.b32.xlu0 %v1297_v58, %s9632_s14 }
 0xc7e   :  { %1378 = vrot.lane.b32.xlu1 %v1374_v5, %s9632_s14  ;;  %v1291_v61 = vpop.permute.xlu0 %1290 }
 0xc7f   :  { %v1296_v22 = vmul.f32 %v8836_v26, %v1291_v61  ;;  %v1371_v62 = vpop.permute.xlu1 %1370 }
 0xc80   :  { %v1375_v0 = vmul.f32 %v8838_v37, %v1371_v62 }
 0xc81   :  { %1300 = vrot.lane.b32.xlu0 %v1296_v22, %s9632_s14 }
 0xc82   :  { %1380 = vrot.lane.b32.xlu1 %v1375_v0, %s9632_s14 }
 0xc86   :  { %1325 = vrot.lane.b32.xlu1 %v10375_v9, %s9634_s10 }
 0xc8a   :  { %1401 = vrot.lane.b32.xlu1 %v1400_v4, %s9633_s22 }
 0xc8e   :  { %1323 = vrot.lane.b32.xlu1 %v1322_v42, %s9634_s10 }
 0xc92   :  { %1403 = vrot.lane.b32.xlu1 %v1322_v42, %s9633_s22 }
 0xcef   :  { %v1303_v11 = vpop.permute.xlu0 %1302 }
 0xcf0   :  { %v1307_v12 = vadd.f32 %v1303_v11, %v10172_v43  ;;  %v1379_v50 = vpop.permute.xlu1 %1378 }
 0xcf1   :  { %v1384_v57 = vadd.f32 %v1379_v50, %v10186_v21 }
 0xcf2   :  { %8839 = vtanh.f32 %v1307_v12 }
 0xcf3   :  { %v1301_v19 = vpop.permute.xlu0 %1300 }
 0xcf4   :  { %v1306_v20 = vadd.f32 %v1301_v19, %v10174_v44  ;;  %v1381_v24 = vpop.permute.xlu1 %1380 }
 0xcf5   :  { %v1385_v25 = vadd.f32 %v1381_v24, %v10191_v27 }
 0xcf6   :  { %8841 = vtanh.f32 %v1306_v20 }
 0xcf7   :  { %8843 = vtanh.f32 %v1384_v57 }
 0xcf8   :  { %8845 = vtanh.f32 %v1385_v25  ;;  %v1326_v47 = vpop.permute.xlu1 %1325 }
 0xcf9   :  { %8847 = vpow2.f32 %v7682_v41  ;;  %v1330_v39 = vmul.f32 %v8832_v53, %v1326_v47 }
 0xcfa   :  { %8849 = vpow2.f32 %v7684_v28 }
 0xcfc   :  { %v8840_v9 = vpop.eup %8839  ;;  %v1402_v51 = vpop.permute.xlu1 %1401 }
 0xcfd   :  { %1316 = vrot.lane.b32.xlu0 %v8840_v9, %s9633_s22 }
 0xd00   :  { %v8842_v30 = vpop.eup %8841  ;;  %v1324_v58 = vpop.permute.xlu1 %1323 }
 0xd01   :  { %1314 = vrot.lane.b32.xlu0 %v8842_v30, %s9633_s22  ;;  %v8844_v54 = vpop.eup %8843  ;;  %v1329_v61 = vmul.f32 %v8836_v26, %v1324_v58 }
 0xd02   :  { %v8846_v56 = vpop.eup %8845 }
 0xd03   :  { %v8848_v40 = vpop.eup %8847 }
 0xd04   :  { %v1357_v46 = vadd.f32 1.0, %v8848_v40  ;;  %v8850_v48 = vpop.eup %8849  ;;  %v1404_v19 = vpop.permute.xlu1 %1403 }
 0xd05   :  { %1392 = vrot.lane.b32.xlu0 %v8844_v54, %s9633_s22  ;;  %v1359_v13 = vadd.f32 1.0, %v8850_v48 }
 0xd06   :  { %8851 = vrcp.f32 %v1357_v46 }
 0xd07   :  { %8853 = vrcp.f32 %v1359_v13 }
 0xd09   :  { %1394 = vrot.lane.b32.xlu0 %v8846_v56, %s9633_s22 }
 0xd10   :  { %v8852_v23 = vpop.eup %8851 }
 0xd11   :  { %v1388_v0 = vsub.f32 1.0, %v8852_v23  ;;  %v8854_v4 = vpop.eup %8853  ;;  %v1407_v11 = vmul.f32 %v8852_v23, %v1402_v51 }
 0xd12   :  { %v1389_v20 = vsub.f32 1.0, %v8854_v4  ;;  %v1408_v24 = vmul.f32 %v8854_v4, %v1404_v19 }
 0xd6f   :  { %v1317_v55 = vpop.permute.xlu0 %1316 }
 0xd70   :  { %v1321_v1 = vmul.f32 %v1317_v55, %v1311_v52 }
 0xd72   :  { %v1332_v59 = vadd.f32 %v1330_v39, %v1321_v1 }
 0xd73   :  { %v1315_v5 = vpop.permute.xlu0 %1314 }
 0xd74   :  { %v1320_v37 = vmul.f32 %v1315_v5, %v1310_v17  ;;  %v1413_v22 = vrot.slane %v1332_v59, 7 }
 0xd76   :  { %v1331_v62 = vadd.f32 %v1329_v61, %v1320_v37 }
 0xd77   :  { %v1393_v42 = vpop.permute.xlu0 %1392 }
 0xd78   :  { %v1398_v12 = vmul.f32 %v1393_v42, %v1388_v0  ;;  %v1415_v50 = vsel %vm1414_vm14, %v1413_v22, %v1331_v62 }
 0xd79   :  { %1416 = vrot.lane.b32.xlu0 %v1415_v50, %s9633_s22 }
 0xd7a   :  { %v1409_v53 = vadd.f32 %v1407_v11, %v1398_v12 }
 0xd7b   :  { %v1395_v57 = vpop.permute.xlu0 %1394 }
 0xd7c   :  { %v1399_v25 = vmul.f32 %v1395_v57, %v1389_v20  ;;  %v1421_v26 = vrot.slane %v1409_v53, 1 }
 0xd7e   :  { %v1410_v9 = vadd.f32 %v1408_v24, %v1399_v25 }
 0xd80   :  { %v2364_v30 = vrot.slane %v1410_v9, 7  ;;  %v1422_v54 = vsel %vm1414_vm14, %v1410_v9, %v1421_v26 }
 0xd81   :  { %1423 = vrot.lane.b32.xlu1 %v1422_v54, %s9634_s10 }
 0xd82   :  { %v10436_v56 = vsel %vm1645_vm15, %v2364_v30, %v1409_v53 }
 0xdeb   :  { %v10438_v35 = vpop.permute.xlu0 %1416 }
 0xdf3   :  { %v1424_v36 = vpop.permute.xlu1 %1423 }
 0xdf4   :  { %v10442_v41 = vsel %vm726_vm8, %v10438_v35, %v1424_v36 }
 0xdf5   :  { %v1428_v28 = vrot.slane %v10442_v41, 3 }
 0xdf7   :  { %7685 = vmatmul.mubr.msk.f32.vlgmr.msra.gmra.mrb[8].mxu1 %vm510_vm9, %v1428_v28 }
 0xdf8   :  { %8384 = vmatpush1.bf16.msra.mxu1 %v10052_v60  ;;  %1962 = vmatprep.mubr.f32.mxu1 %v9630_v3 }
 0xdf9   :  { %8386 = vmatprep.subr.bf16.mxu1 %v10063_v63 }
 0xdfc   :  { %8388 = vmatpush1.bf16.msra.mxu1 %v10071_v2 }
 0xdfd   :  { %8390 = vmatprep.subr.bf16.mxu1 %v10081_v7 }
 0xe00   :  { %8392 = vmatpush1.bf16.msra.mxu1 %v10089_v10 }
 0xe01   :  { %8394 = vmatprep.subr.bf16.mxu1 %v10099_v14 }
 0xe04   :  { %8396 = vmatpush1.bf16.msra.mxu1 %v10107_v18 }
 0xeca   :  { %v1497_v40 = vpop.f32.mrb[8].mxu1 }
 0xecb   :  { %v1498_v46 = vadd.f32 %v1497_v40, %v10152_v33  ;;  %v1499_v47 = vpop.f32.mrb[9].mxu1  ;;  %v1631_v40 = vrot.slane %v10442_v41, 1 }
 0xecc   :  { %v10456_v48 = vadd.f32 %v1499_v47, %v10155_v34 }
 0xecd   :  { %v1504_v13 = vrot.slane %v1498_v46, 5  ;;  %v1503_v55 = vrot.slane %v1498_v46, 4  ;;  %v1566_v39 = vrot.slane %v1498_v46, 6 }
 0xece   :  { %v1565_v51 = vrot.slane %v10456_v48, 5  ;;  %v1567_v52 = vrot.slane %v10456_v48, 6 }
 0xecf   :  { %1523 = vrot.lane.b32.xlu0 %v1504_v13, %s9632_s14  ;;  %v1508_v1 = vadd.f32 %v1504_v13, %v10172_v43  ;;  %v1571_v58 = vadd.f32 %v1504_v13, %v10174_v44  ;;  %v1573_v59 = vadd.f32 %v1566_v39, %v10172_v43  ;;  %v1507_v5 = vadd.f32 %v1503_v55, %v10174_v44 }
 0xed0   :  { %1599 = vrot.lane.b32.xlu1 %v1565_v51, %s9632_s14 }
 0xed1   :  { %v7687_v17 = vmul.f32 -1.442695, %v1508_v1  ;;  %v7688_v23 = vmul.f32 -1.442695, %v1571_v58  ;;  %v7690_v61 = vmul.f32 -1.442695, %v1573_v59 }
 0xed2   :  { %v7686_v37 = vmul.f32 -1.442695, %v1507_v5 }
 0xed3   :  { %1601 = vrot.lane.b32.xlu0 %v1567_v52, %s9632_s14  ;;  %8855 = vpow2.f32 %v7687_v17 }
 0xed4   :  { %1521 = vrot.lane.b32.xlu1 %v1503_v55, %s9632_s14  ;;  %8857 = vpow2.f32 %v7688_v23 }
 0xed5   :  { %8859 = vpow2.f32 %v7690_v61  ;;  %v1553_v61 = vrot.slane %v10442_v41, 7 }
 0xed6   :  { %8861 = vpow2.f32 %v7686_v37 }
 0xedd   :  { %v8856_v22 = vpop.eup %8855 }
 0xede   :  { %v8858_v62 = vpop.eup %8857  ;;  %v1516_v0 = vadd.f32 1.0, %v8856_v22  ;;  %v1572_v22 = vadd.f32 %v1565_v51, %v10186_v21 }
 0xedf   :  { %v8860_v4 = vpop.eup %8859  ;;  %v1587_v42 = vadd.f32 1.0, %v8858_v62  ;;  %v1574_v62 = vadd.f32 %v1567_v52, %v10191_v27 }
 0xee0   :  { %v8862_v11 = vpop.eup %8861  ;;  %v1589_v12 = vadd.f32 1.0, %v8860_v4  ;;  %8863 = vrcp.f32 %v1516_v0  ;;  %v7689_v0 = vmul.f32 -1.442695, %v1572_v22 }
 0xee1   :  { %v1515_v50 = vadd.f32 1.0, %v8862_v11  ;;  %8865 = vrcp.f32 %v1587_v42  ;;  %v7691_v4 = vmul.f32 -1.442695, %v1574_v62 }
 0xee2   :  { %8867 = vrcp.f32 %v1589_v12 }
 0xee3   :  { %8869 = vrcp.f32 %v1515_v50 }
 0xeea   :  { %v10472_v19 = vpop.eup %8863 }
 0xeeb   :  { %v8866_v20 = vpop.eup %8865 }
 0xeec   :  { %v8868_v26 = vpop.eup %8867 }
 0xeed   :  { %v10477_v30 = vpop.eup %8869 }
 0xf41   :  { %v1524_v53 = vpop.permute.xlu0 %1523 }
 0xf42   :  { %v1528_v57 = vmul.f32 %v10472_v19, %v1524_v53  ;;  %v1600_v24 = vpop.permute.xlu1 %1599 }
 0xf43   :  { %v1605_v25 = vmul.f32 %v8866_v20, %v1600_v24 }
 0xf44   :  { %1533 = vrot.lane.b32.xlu0 %v1528_v57, %s9632_s14 }
 0xf45   :  { %v1602_v9 = vpop.permute.xlu0 %1601  ;;  %1609 = vrot.lane.b32.xlu1 %v1605_v25, %s9632_s14  ;;  %v1542_v25 = vsub.f32 1.0, %v10472_v19 }
 0xf46   :  { %v1606_v54 = vmul.f32 %v8868_v26, %v1602_v9  ;;  %v1522_v36 = vpop.permute.xlu1 %1521 }
 0xf47   :  { %v1527_v28 = vmul.f32 %v10477_v30, %v1522_v36 }
 0xf48   :  { %1611 = vrot.lane.b32.xlu0 %v1606_v54, %s9632_s14 }
 0xf49   :  { %1531 = vrot.lane.b32.xlu1 %v1527_v28, %s9632_s14 }
 0xf4c   :  { %1632 = vrot.lane.b32.xlu0 %v10442_v41, %s9633_s22 }
 0xf4d   :  { %1556 = vrot.lane.b32.xlu1 %v10442_v41, %s9634_s10 }
 0xf51   :  { %1634 = vrot.lane.b32.xlu1 %v1631_v40, %s9633_s22 }
 0xfb6   :  { %v1534_v46 = vpop.permute.xlu0 %1533 }
 0xfb7   :  { %v1538_v47 = vadd.f32 %v1534_v46, %v10172_v43  ;;  %v1610_v13 = vpop.permute.xlu1 %1609 }
 0xfb8   :  { %v1615_v55 = vadd.f32 %v1610_v13, %v10186_v21 }
 0xfb9   :  { %8871 = vtanh.f32 %v1538_v47 }
 0xfba   :  { %v1612_v39 = vpop.permute.xlu0 %1611  ;;  %8873 = vtanh.f32 %v1615_v55 }
 0xfbb   :  { %v1616_v1 = vadd.f32 %v1612_v39, %v10191_v27  ;;  %v1532_v58 = vpop.permute.xlu1 %1531  ;;  %v1541_v39 = vsub.f32 1.0, %v10477_v30 }
 0xfbc   :  { %v1537_v59 = vadd.f32 %v1532_v58, %v10174_v44 }
 0xfbd   :  { %8875 = vtanh.f32 %v1616_v1 }
 0xfbe   :  { %8877 = vtanh.f32 %v1537_v59  ;;  %v1633_v53 = vpop.permute.xlu0 %1632 }
 0xfbf   :  { %8879 = vpow2.f32 %v7689_v0  ;;  %v1557_v50 = vpop.permute.xlu1 %1556 }
 0xfc0   :  { %8881 = vpow2.f32 %v7691_v4  ;;  %v1561_v47 = vmul.f32 %v10472_v19, %v1557_v50 }
 0xfc3   :  { %v8872_v17 = vpop.eup %8871  ;;  %v1635_v24 = vpop.permute.xlu1 %1634 }
 0xfc4   :  { %1547 = vrot.lane.b32.xlu0 %v8872_v17, %s9633_s22  ;;  %v8874_v23 = vpop.eup %8873 }
 0xfc7   :  { %v8876_v5 = vpop.eup %8875 }
 0xfc8   :  { %1623 = vrot.lane.b32.xlu0 %v8874_v23, %s9633_s22  ;;  %1625 = vrot.lane.b32.xlu1 %v8876_v5, %s9633_s22  ;;  %v8878_v37 = vpop.eup %8877 }
 0xfc9   :  { %v8880_v42 = vpop.eup %8879 }
 0xfca   :  { %v8882_v11 = vpop.eup %8881  ;;  %v1588_v41 = vadd.f32 1.0, %v8880_v42 }
 0xfcb   :  { %v1590_v12 = vadd.f32 1.0, %v8882_v11 }
 0xfcc   :  { %1554 = vrot.lane.b32.xlu1 %v1553_v61, %s9634_s10  ;;  %1545 = vrot.lane.b32.xlu0 %v8878_v37, %s9633_s22  ;;  %8883 = vrcp.f32 %v1588_v41 }
 0xfcd   :  { %8885 = vrcp.f32 %v1590_v12 }
 0xfd6   :  { %v8884_v20 = vpop.eup %8883 }
 0xfd7   :  { %v8886_v57 = vpop.eup %8885  ;;  %v1619_v48 = vsub.f32 1.0, %v8884_v20  ;;  %v1638_v36 = vmul.f32 %v8884_v20, %v1633_v53 }
 0xfd8   :  { %v1620_v52 = vsub.f32 1.0, %v8886_v57  ;;  %v1639_v28 = vmul.f32 %v8886_v57, %v1635_v24 }
0x1036   :  { %v1548_v51 = vpop.permute.xlu0 %1547 }
0x1037   :  { %v1552_v26 = vmul.f32 %v1548_v51, %v1542_v25 }
0x1039   :  { %v1563_v1 = vadd.f32 %v1561_v47, %v1552_v26 }
0x103a   :  { %v1624_v9 = vpop.permute.xlu0 %1623  ;;  %v1626_v54 = vpop.permute.xlu1 %1625 }
0x103b   :  { %v1629_v40 = vmul.f32 %v1624_v9, %v1619_v48  ;;  %v1630_v46 = vmul.f32 %v1626_v54, %v1620_v52  ;;  %v1644_v0 = vrot.slane %v1563_v1, 7 }
0x103d   :  { %v1640_v13 = vadd.f32 %v1638_v36, %v1629_v40  ;;  %v1641_v55 = vadd.f32 %v1639_v28, %v1630_v46 }
0x103e   :  { %v1546_v58 = vpop.permute.xlu0 %1545  ;;  %v1555_v59 = vpop.permute.xlu1 %1554 }
0x103f   :  { %v1652_v17 = vrot.slane %v1640_v13, 7  ;;  %v1653_v23 = vrot.slane %v1641_v55, 6  ;;  %v2358_v5 = vrot.slane %v1641_v55, 7  ;;  %v1551_v61 = vmul.f32 %v1546_v58, %v1541_v39 }
0x1040   :  { %v1560_v37 = vmul.f32 %v10477_v30, %v1555_v59 }
0x1041   :  { %v1654_v22 = vsel %vm1645_vm15, %v1653_v23, %v1652_v17  ;;  %v10510_v62 = vsel %vm1414_vm14, %v2358_v5, %v1640_v13 }
0x1042   :  { %v1562_v19 = vadd.f32 %v1560_v37, %v1551_v61  ;;  %1655 = vrot.lane.b32.xlu1 %v1654_v22, %s9634_s10 }
0x1044   :  { %v1646_v4 = vsel %vm1645_vm15, %v1644_v0, %v1562_v19 }
0x1045   :  { %1647 = vrot.lane.b32.xlu0 %v1646_v4, %s9633_s22 }
0x10b4   :  { %v1656_v42 = vpop.permute.xlu1 %1655 }
0x10b7   :  { %v10515_v11 = vpop.permute.xlu0 %1647 }
0x10b8   :  { %v10519_v41 = vsel %vm726_vm8, %v10515_v11, %v1656_v42 }
0x10b9   :  { %v1660_v30 = vrot.slane %v10519_v41, 4  ;;  %v1865_v19 = vrot.slane %v10519_v41, 2  ;;  %v1866_v4 = vrot.slane %v10519_v41, 3 }
0x10bb   :  { %7692 = vmatmul.mubr.msk.f32.vlgmr.msra.gmra.mrb[6].mxu0 %vm510_vm9, %v1660_v30 }
0x10bc   :  { %8400 = vmatpush1.bf16.msra.mxu0 %v10052_v60  ;;  %2194 = vmatprep.mubr.f32.mxu0 %v9630_v3 }
0x10bd   :  { %8402 = vmatprep.subr.bf16.mxu0 %v10063_v63 }
0x10c0   :  { %8404 = vmatpush1.bf16.msra.mxu0 %v10071_v2 }
0x10c1   :  { %8406 = vmatprep.subr.bf16.mxu0 %v10081_v7 }
0x10c4   :  { %8408 = vmatpush1.bf16.msra.mxu0 %v10089_v10 }
0x10c5   :  { %8410 = vmatprep.subr.bf16.mxu0 %v10099_v14 }
0x10c8   :  { %8412 = vmatpush1.bf16.msra.mxu0 %v10107_v18 }
0x118e   :  { %v1729_v12 = vpop.f32.mrb[6].mxu0 }
0x118f   :  { %v1730_v50 = vadd.f32 %v1729_v12, %v10152_v33  ;;  %v1731_v53 = vpop.f32.mrb[7].mxu0 }
0x1190   :  { %v10533_v60 = vadd.f32 %v1731_v53, %v10155_v34 }
0x1191   :  { %v1736_v20 = vrot.slane %v1730_v50, 4  ;;  %v1735_v7 = vrot.slane %v1730_v50, 3  ;;  %v1797_v10 = vrot.slane %v1730_v50, 6  ;;  %v1799_v14 = vrot.slane %v1730_v50, 7 }
0x1192   :  { %v1798_v63 = vrot.slane %v10533_v60, 6  ;;  %v1800_v2 = vrot.slane %v10533_v60, 7 }
0x1193   :  { %1755 = vrot.lane.b32.xlu0 %v1736_v20, %s9632_s14  ;;  %v1740_v18 = vadd.f32 %v1736_v20, %v10172_v43  ;;  %v1805_v57 = vadd.f32 %v1797_v10, %v10174_v44  ;;  %v1807_v24 = vadd.f32 %v1799_v14, %v10172_v43  ;;  %v1739_v48 = vadd.f32 %v1735_v7, %v10174_v44 }
0x1194   :  { %1833 = vrot.lane.b32.xlu1 %v1798_v63, %s9632_s14 }
0x1195   :  { %v7694_v51 = vmul.f32 -1.442695, %v1740_v18  ;;  %v7695_v25 = vmul.f32 -1.442695, %v1805_v57  ;;  %v7697_v52 = vmul.f32 -1.442695, %v1807_v24 }
0x1196   :  { %v7693_v26 = vmul.f32 -1.442695, %v1739_v48  ;;  %v1785_v24 = vrot.slane %v10519_v41, 7  ;;  %v1808_v48 = vadd.f32 %v1800_v2, %v10191_v27 }
0x1197   :  { %1835 = vrot.lane.b32.xlu0 %v1800_v2, %s9632_s14  ;;  %8887 = vpow2.f32 %v7694_v51 }
0x1198   :  { %1753 = vrot.lane.b32.xlu1 %v1735_v7, %s9632_s14  ;;  %8889 = vpow2.f32 %v7695_v25  ;;  %v1806_v25 = vadd.f32 %v1798_v63, %v10186_v21 }
0x1199   :  { %8891 = vpow2.f32 %v7697_v52 }
0x119a   :  { %8893 = vpow2.f32 %v7693_v26  ;;  %v7696_v52 = vmul.f32 -1.442695, %v1806_v25  ;;  %v7698_v26 = vmul.f32 -1.442695, %v1808_v48 }
0x11a1   :  { %v8888_v9 = vpop.eup %8887 }
0x11a2   :  { %v8890_v54 = vpop.eup %8889  ;;  %v1748_v36 = vadd.f32 1.0, %v8888_v9 }
0x11a3   :  { %v8892_v28 = vpop.eup %8891  ;;  %v1821_v40 = vadd.f32 1.0, %v8890_v54 }
0x11a4   :  { %v8894_v46 = vpop.eup %8893  ;;  %8895 = vrcp.f32 %v1748_v36  ;;  %v1823_v47 = vadd.f32 1.0, %v8892_v28 }
0x11a5   :  { %v1747_v13 = vadd.f32 1.0, %v8894_v46  ;;  %8897 = vrcp.f32 %v1821_v40 }
0x11a6   :  { %8899 = vrcp.f32 %v1823_v47 }
0x11a7   :  { %8901 = vrcp.f32 %v1747_v13 }
0x11ae   :  { %v10549_v55 = vpop.eup %8895 }
0x11af   :  { %v8898_v1 = vpop.eup %8897 }
0x11b0   :  { %v8900_v23 = vpop.eup %8899 }
0x11b1   :  { %v10554_v61 = vpop.eup %8901 }
0x1205   :  { %v1756_v39 = vpop.permute.xlu0 %1755 }
0x1206   :  { %v1760_v58 = vmul.f32 %v10549_v55, %v1756_v39  ;;  %v1834_v59 = vpop.permute.xlu1 %1833  ;;  %v1774_v39 = vsub.f32 1.0, %v10549_v55 }
0x1207   :  { %v1839_v17 = vmul.f32 %v8898_v1, %v1834_v59 }
0x1208   :  { %1765 = vrot.lane.b32.xlu0 %v1760_v58, %s9632_s14 }
0x1209   :  { %v1836_v5 = vpop.permute.xlu0 %1835  ;;  %1843 = vrot.lane.b32.xlu1 %v1839_v17, %s9632_s14 }
0x120a   :  { %v1840_v37 = vmul.f32 %v8900_v23, %v1836_v5  ;;  %v1754_v22 = vpop.permute.xlu1 %1753 }
0x120b   :  { %v1759_v0 = vmul.f32 %v10554_v61, %v1754_v22 }
0x120c   :  { %1845 = vrot.lane.b32.xlu0 %v1840_v37, %s9632_s14 }
0x120d   :  { %1763 = vrot.lane.b32.xlu1 %v1759_v0, %s9632_s14 }
0x1210   :  { %1867 = vrot.lane.b32.xlu0 %v1865_v19, %s9633_s22 }
0x1211   :  { %1788 = vrot.lane.b32.xlu1 %v10519_v41, %s9634_s10 }
0x1215   :  { %1869 = vrot.lane.b32.xlu1 %v1866_v4, %s9633_s22  ;;  %v1773_v4 = vsub.f32 1.0, %v10554_v61 }
0x127a   :  { %v1766_v42 = vpop.permute.xlu0 %1765 }
0x127b   :  { %v1770_v30 = vadd.f32 %v1766_v42, %v10172_v43  ;;  %v1844_v12 = vpop.permute.xlu1 %1843 }
0x127c   :  { %v1849_v50 = vadd.f32 %v1844_v12, %v10186_v21 }
0x127d   :  { %8903 = vtanh.f32 %v1770_v30 }
0x127e   :  { %v1846_v53 = vpop.permute.xlu0 %1845  ;;  %8905 = vtanh.f32 %v1849_v50 }
0x127f   :  { %v1850_v20 = vadd.f32 %v1846_v53, %v10191_v27  ;;  %v1764_v7 = vpop.permute.xlu1 %1763 }
0x1280   :  { %v1769_v10 = vadd.f32 %v1764_v7, %v10174_v44 }
0x1281   :  { %8907 = vtanh.f32 %v1850_v20 }
0x1282   :  { %8909 = vtanh.f32 %v1769_v10  ;;  %v1868_v40 = vpop.permute.xlu0 %1867 }
0x1283   :  { %8911 = vpow2.f32 %v7696_v52  ;;  %v1789_v28 = vpop.permute.xlu1 %1788 }
0x1284   :  { %8913 = vpow2.f32 %v7698_v26  ;;  %v1793_v22 = vmul.f32 %v10549_v55, %v1789_v28 }
0x1287   :  { %v8904_v14 = vpop.eup %8903  ;;  %v1870_v13 = vpop.permute.xlu1 %1869 }
0x1288   :  { %1779 = vrot.lane.b32.xlu0 %v8904_v14, %s9633_s22  ;;  %v8906_v18 = vpop.eup %8905 }
0x128b   :  { %v8908_v57 = vpop.eup %8907 }
0x128c   :  { %1857 = vrot.lane.b32.xlu0 %v8906_v18, %s9633_s22  ;;  %1859 = vrot.lane.b32.xlu1 %v8908_v57, %s9633_s22  ;;  %v8910_v51 = vpop.eup %8909 }
0x128d   :  { %v8912_v9 = vpop.eup %8911 }
0x128e   :  { %v8914_v54 = vpop.eup %8913  ;;  %v1822_v41 = vadd.f32 1.0, %v8912_v9 }
0x128f   :  { %v1824_v36 = vadd.f32 1.0, %v8914_v54 }
0x1290   :  { %1786 = vrot.lane.b32.xlu1 %v1785_v24, %s9634_s10  ;;  %1777 = vrot.lane.b32.xlu0 %v8910_v51, %s9633_s22  ;;  %8915 = vrcp.f32 %v1822_v41 }
0x1291   :  { %8917 = vrcp.f32 %v1824_v36 }
0x129a   :  { %v8916_v46 = vpop.eup %8915 }
0x129b   :  { %v8918_v47 = vpop.eup %8917  ;;  %v1853_v60 = vsub.f32 1.0, %v8916_v46  ;;  %v1873_v17 = vmul.f32 %v8916_v46, %v1868_v40 }
0x129c   :  { %v1854_v2 = vsub.f32 1.0, %v8918_v47  ;;  %v1874_v23 = vmul.f32 %v8918_v47, %v1870_v13 }
0x12fa   :  { %v1780_v63 = vpop.permute.xlu0 %1779 }
0x12fb   :  { %v1784_v1 = vmul.f32 %v1780_v63, %v1774_v39 }
0x12fd   :  { %v1795_v42 = vadd.f32 %v1793_v22, %v1784_v1 }
0x12fe   :  { %v1858_v58 = vpop.permute.xlu0 %1857  ;;  %v1860_v59 = vpop.permute.xlu1 %1859 }
0x12ff   :  { %v1863_v5 = vmul.f32 %v1858_v58, %v1853_v60  ;;  %v1864_v37 = vmul.f32 %v1860_v59, %v1854_v2  ;;  %v1879_v57 = vrot.slane %v1795_v42, 7 }
0x1301   :  { %v1875_v0 = vadd.f32 %v1873_v17, %v1863_v5  ;;  %v1876_v19 = vadd.f32 %v1874_v23, %v1864_v37 }
0x1302   :  { %v1778_v30 = vpop.permute.xlu0 %1777  ;;  %v1787_v12 = vpop.permute.xlu1 %1786 }
0x1303   :  { %v1887_v50 = vrot.slane %v1875_v0, 5  ;;  %v1888_v53 = vrot.slane %v1876_v19, 4  ;;  %v2352_v20 = vrot.slane %v1876_v19, 7  ;;  %v1783_v7 = vmul.f32 %v1778_v30, %v1773_v4 }
0x1304   :  { %v1792_v10 = vmul.f32 %v10554_v61, %v1787_v12 }
0x1305   :  { %v1889_v14 = vsel %vm1880_vm13, %v1888_v53, %v1887_v50  ;;  %v10587_v18 = vsel %vm1182_vm12, %v2352_v20, %v1875_v0 }
0x1306   :  { %v1794_v55 = vadd.f32 %v1792_v10, %v1783_v7  ;;  %1890 = vrot.lane.b32.xlu1 %v1889_v14, %s9634_s10 }
0x1308   :  { %v1881_v24 = vsel %vm1880_vm13, %v1879_v57, %v1794_v55 }
0x1309   :  { %1882 = vrot.lane.b32.xlu0 %v1881_v24, %s9633_s22 }
0x1378   :  { %v1891_v51 = vpop.permute.xlu1 %1890 }
0x137b   :  { %v10592_v25 = vpop.permute.xlu0 %1882 }
0x137c   :  { %v10596_v48 = vsel %vm726_vm8, %v10592_v25, %v1891_v51 }
0x137d   :  { %v1895_v61 = vrot.slane %v10596_v48, 5  ;;  %v2098_v55 = vrot.slane %v10596_v48, 4 }
0x137f   :  { %7699 = vmatmul.mubr.msk.f32.vlgmr.msra.gmra.mrb[10].mxu1 %vm510_vm9, %v1895_v61 }
0x1380   :  { %2801 = vmatprep.mubr.f32.mxu1 %v9630_v3 }
0x1452   :  { %v1964_v52 = vpop.f32.mrb[10].mxu1 }
0x1453   :  { %v1965_v26 = vadd.f32 %v1964_v52, %v10152_v33  ;;  %v1966_v9 = vpop.f32.mrb[11].mxu1 }
0x1454   :  { %v10603_v54 = vadd.f32 %v1966_v9, %v10155_v34 }
0x1455   :  { %v1971_v41 = vrot.slane %v1965_v26, 3  ;;  %v1970_v28 = vrot.slane %v1965_v26, 2  ;;  %v2032_v40 = vrot.slane %v1965_v26, 7  ;;  %v2040_v13 = vadd.f32 %v1965_v26, %v10172_v43 }
0x1456   :  { %v2033_v36 = vrot.slane %v10603_v54, 7 }
0x1457   :  { %1990 = vrot.lane.b32.xlu0 %v1971_v41, %s9632_s14  ;;  %v1975_v46 = vadd.f32 %v1971_v41, %v10172_v43  ;;  %v2038_v47 = vadd.f32 %v2032_v40, %v10174_v44  ;;  %v1974_v60 = vadd.f32 %v1970_v28, %v10174_v44  ;;  %v7704_v2 = vmul.f32 -1.442695, %v2040_v13 }
0x1458   :  { %2066 = vrot.lane.b32.xlu1 %v2033_v36, %s9632_s14  ;;  %v2020_v13 = vrot.slane %v10596_v48, 7 }
0x1459   :  { %v7701_v63 = vmul.f32 -1.442695, %v1975_v46  ;;  %v7702_v39 = vmul.f32 -1.442695, %v2038_v47  ;;  %v7700_v1 = vmul.f32 -1.442695, %v1974_v60  ;;  %v2039_v60 = vadd.f32 %v2033_v36, %v10186_v21 }
0x145b   :  { %2068 = vrot.lane.b32.xlu0 %v10603_v54, %s9632_s14  ;;  %8919 = vpow2.f32 %v7701_v63 }
0x145c   :  { %1988 = vrot.lane.b32.xlu1 %v1970_v28, %s9632_s14  ;;  %8921 = vpow2.f32 %v7702_v39  ;;  %v2041_v39 = vadd.f32 %v10603_v54, %v10191_v27 }
0x145d   :  { %8923 = vpow2.f32 %v7704_v2 }
0x145e   :  { %8925 = vpow2.f32 %v7700_v1  ;;  %v7705_v2 = vmul.f32 -1.442695, %v2041_v39  ;;  %v7703_v1 = vmul.f32 -1.442695, %v2039_v60 }
0x1465   :  { %v8920_v58 = vpop.eup %8919 }
0x1466   :  { %v8922_v59 = vpop.eup %8921  ;;  %v1983_v17 = vadd.f32 1.0, %v8920_v58 }
0x1467   :  { %v8924_v23 = vpop.eup %8923  ;;  %v2054_v5 = vadd.f32 1.0, %v8922_v59 }
0x1468   :  { %v8926_v37 = vpop.eup %8925  ;;  %v2056_v22 = vadd.f32 1.0, %v8924_v23  ;;  %8927 = vrcp.f32 %v1983_v17 }
0x1469   :  { %v1982_v0 = vadd.f32 1.0, %v8926_v37  ;;  %8929 = vrcp.f32 %v2054_v5 }
0x146a   :  { %8931 = vrcp.f32 %v2056_v22 }
0x146b   :  { %8933 = vrcp.f32 %v1982_v0 }
0x1472   :  { %v10617_v19 = vpop.eup %8927 }
0x1473   :  { %v8930_v42 = vpop.eup %8929 }
0x1474   :  { %v8932_v53 = vpop.eup %8931 }
0x1475   :  { %v10622_v7 = vpop.eup %8933 }
0x14c9   :  { %v1991_v4 = vpop.permute.xlu0 %1990 }
0x14ca   :  { %v1995_v30 = vmul.f32 %v10617_v19, %v1991_v4  ;;  %v2067_v12 = vpop.permute.xlu1 %2066 }
0x14cb   :  { %v2072_v50 = vmul.f32 %v8930_v42, %v2067_v12  ;;  %v2009_v42 = vsub.f32 1.0, %v10617_v19 }
0x14cc   :  { %2000 = vrot.lane.b32.xlu0 %v1995_v30, %s9632_s14 }
0x14cd   :  { %v2069_v20 = vpop.permute.xlu0 %2068  ;;  %2076 = vrot.lane.b32.xlu1 %v2072_v50, %s9632_s14 }
0x14ce   :  { %v2073_v10 = vmul.f32 %v8932_v53, %v2069_v20  ;;  %v1989_v14 = vpop.permute.xlu1 %1988 }
0x14cf   :  { %v1994_v57 = vmul.f32 %v10622_v7, %v1989_v14 }
0x14d0   :  { %2078 = vrot.lane.b32.xlu0 %v2073_v10, %s9632_s14 }
0x14d1   :  { %1998 = vrot.lane.b32.xlu1 %v1994_v57, %s9632_s14 }
0x14d4   :  { %2099 = vrot.lane.b32.xlu0 %v2098_v55, %s9633_s22 }
0x14d5   :  { %2023 = vrot.lane.b32.xlu1 %v10596_v48, %s9634_s10 }
0x14d9   :  { %2101 = vrot.lane.b32.xlu1 %v1895_v61, %s9633_s22 }
0x153e   :  { %v2001_v24 = vpop.permute.xlu0 %2000 }
0x153f   :  { %v2005_v51 = vadd.f32 %v2001_v24, %v10172_v43  ;;  %v2077_v52 = vpop.permute.xlu1 %2076 }
0x1540   :  { %v2082_v26 = vadd.f32 %v2077_v52, %v10186_v21 }
0x1541   :  { %8935 = vtanh.f32 %v2005_v51  ;;  %v2008_v51 = vsub.f32 1.0, %v10622_v7 }
0x1542   :  { %v2079_v9 = vpop.permute.xlu0 %2078  ;;  %8937 = vtanh.f32 %v2082_v26 }
0x1543   :  { %v2083_v41 = vadd.f32 %v2079_v9, %v10191_v27  ;;  %v1999_v28 = vpop.permute.xlu1 %1998 }
0x1544   :  { %v2004_v40 = vadd.f32 %v1999_v28, %v10174_v44 }
0x1545   :  { %8939 = vtanh.f32 %v2083_v41 }
0x1546   :  { %8941 = vtanh.f32 %v2004_v40  ;;  %v2100_v5 = vpop.permute.xlu0 %2099 }
0x1547   :  { %8943 = vpow2.f32 %v7705_v2  ;;  %v2024_v23 = vpop.permute.xlu1 %2023 }
0x1548   :  { %8945 = vpow2.f32 %v7703_v1  ;;  %v2028_v57 = vmul.f32 %v10617_v19, %v2024_v23 }
0x154b   :  { %v8936_v46 = vpop.eup %8935  ;;  %v2102_v0 = vpop.permute.xlu1 %2101 }
0x154c   :  { %2014 = vrot.lane.b32.xlu0 %v8936_v46, %s9633_s22  ;;  %v8938_v61 = vpop.eup %8937 }
0x154f   :  { %v8940_v47 = vpop.eup %8939 }
0x1550   :  { %2090 = vrot.lane.b32.xlu0 %v8938_v61, %s9633_s22  ;;  %2092 = vrot.lane.b32.xlu1 %v8940_v47, %s9633_s22  ;;  %v8942_v63 = vpop.eup %8941 }
0x1551   :  { %v8944_v58 = vpop.eup %8943 }
0x1552   :  { %v8946_v59 = vpop.eup %8945  ;;  %v2057_v17 = vadd.f32 1.0, %v8944_v58 }
0x1553   :  { %v2055_v48 = vadd.f32 1.0, %v8946_v59 }
0x1554   :  { %2021 = vrot.lane.b32.xlu1 %v2020_v13, %s9634_s10  ;;  %2012 = vrot.lane.b32.xlu0 %v8942_v63, %s9633_s22  ;;  %8947 = vrcp.f32 %v2057_v17 }
0x1555   :  { %8949 = vrcp.f32 %v2055_v48 }
0x155e   :  { %v8948_v37 = vpop.eup %8947 }
0x155f   :  { %v8950_v22 = vpop.eup %8949  ;;  %v2087_v36 = vsub.f32 1.0, %v8948_v37  ;;  %v2106_v20 = vmul.f32 %v8948_v37, %v2102_v0 }
0x1560   :  { %v2086_v54 = vsub.f32 1.0, %v8950_v22  ;;  %v2105_v53 = vmul.f32 %v8950_v22, %v2100_v5 }
0x15be   :  { %v2015_v4 = vpop.permute.xlu0 %2014 }
0x15bf   :  { %v2019_v30 = vmul.f32 %v2015_v4, %v2009_v42 }
0x15c1   :  { %v2030_v52 = vadd.f32 %v2028_v57, %v2019_v30 }
0x15c2   :  { %v2091_v12 = vpop.permute.xlu0 %2090  ;;  %v2093_v50 = vpop.permute.xlu1 %2092 }
0x15c3   :  { %v2096_v10 = vmul.f32 %v2091_v12, %v2086_v54  ;;  %v2097_v14 = vmul.f32 %v2093_v50, %v2087_v36  ;;  %v2111_v63 = vrot.slane %v2030_v52, 7 }
0x15c5   :  { %v2107_v55 = vadd.f32 %v2105_v53, %v2096_v10  ;;  %v2108_v24 = vadd.f32 %v2106_v20, %v2097_v14 }
0x15c6   :  { %v2013_v26 = vpop.permute.xlu0 %2012  ;;  %v2022_v9 = vpop.permute.xlu1 %2021 }
0x15c7   :  { %v2119_v41 = vrot.slane %v2107_v55, 3  ;;  %v2120_v28 = vrot.slane %v2108_v24, 2  ;;  %v2346_v40 = vrot.slane %v2108_v24, 7  ;;  %v2018_v46 = vmul.f32 %v2013_v26, %v2008_v51 }
0x15c8   :  { %v2027_v61 = vmul.f32 %v10622_v7, %v2022_v9 }
0x15c9   :  { %v2121_v47 = vsel %vm2112_vm11, %v2120_v28, %v2119_v41  ;;  %v10653_v13 = vsel %vm947_vm10, %v2346_v40, %v2107_v55 }
0x15ca   :  { %v2029_v19 = vadd.f32 %v2027_v61, %v2018_v46  ;;  %2122 = vrot.lane.b32.xlu1 %v2121_v47, %s9634_s10 }
0x15cc   :  { %v2113_v39 = vsel %vm2112_vm11, %v2111_v63, %v2029_v19 }
0x15cd   :  { %2114 = vrot.lane.b32.xlu0 %v2113_v39, %s9633_s22 }
0x163c   :  { %v2123_v60 = vpop.permute.xlu1 %2122 }
0x163f   :  { %v10658_v2 = vpop.permute.xlu0 %2114 }
0x1640   :  { %v2125_v1 = vsel %vm726_vm8, %v10658_v2, %v2123_v60 }
0x1641   :  { %v2127_v7 = vrot.slane %v2125_v1, 6  ;;  %v2252_v63 = vrot.slane %v2125_v1, 7 }
0x1643   :  { %7706 = vmatmul.mubr.msk.f32.vlgmr.msra.gmra.mrb[8].mxu0 %vm510_vm9, %v2127_v7 }
0x1644   :  { %2906 = vmatprep.mubr.f32.mxu0 %v9630_v3 }
0x1716   :  { %v2196_v58 = vpop.f32.mrb[8].mxu0 }
0x1717   :  { %v2197_v59 = vadd.f32 %v2196_v58, %v10152_v33  ;;  %v2198_v17 = vpop.f32.mrb[9].mxu0 }
0x1718   :  { %v10666_v48 = vadd.f32 %v2198_v17, %v10155_v34  ;;  %v2817_v17 = vld [vmem:[%s12232_s4 + $0x18] sm:$0xff] }
0x1719   :  { %v2202_v23 = vrot.slane %v2197_v59, 1  ;;  %v2203_v37 = vrot.slane %v2197_v59, 2  ;;  %v2268_v4 = vadd.f32 %v2197_v59, %v10174_v44 }
0x171a   :  { %v2264_v5 = vrot.slane %v10666_v48, 1 }
0x171b   :  { %2220 = vrot.lane.b32.xlu1 %v2202_v23, %s9632_s14  ;;  %v2206_v33 = vadd.f32 %v2202_v23, %v10174_v44  ;;  %v2270_v34 = vadd.f32 %v2202_v23, %v10172_v43  ;;  %v2207_v22 = vadd.f32 %v2203_v37, %v10172_v43  ;;  %v7709_v36 = vmul.f32 -1.442695, %v2268_v4 }
0x171c   :  { %2298 = vrot.lane.b32.xlu0 %v2264_v5, %s9632_s14 }
0x171d   :  { %v7707_v0 = vmul.f32 -1.442695, %v2206_v33  ;;  %v7711_v42 = vmul.f32 -1.442695, %v2270_v34  ;;  %v7708_v54 = vmul.f32 -1.442695, %v2207_v22 }
0x171e   :  { %v2816_v33 = vld [vmem:[%s12232_s4 + $0x10] sm:$0xff]  ;;  %v2821_v22 = vld [vmem:[%s12232_s4 + $0x38] sm:$0xff] }
0x171f   :  { %2222 = vrot.lane.b32.xlu1 %v2203_v37, %s9632_s14  ;;  %8951 = vpow2.f32 %v7707_v0  ;;  %v2814_v37 = vld [vmem:[%s12232_s4] sm:$0xff] }
0x1720   :  { %2296 = vrot.lane.b32.xlu0 %v10666_v48, %s9632_s14  ;;  %8953 = vpow2.f32 %v7711_v42  ;;  %v10726_v34 = vpack.c.bf16 %v2816_v33, %v2814_v37  ;;  %v2818_v0 = vld [vmem:[%s12232_s4 + $0x20] sm:$0xff]  ;;  %v2823_v42 = vld [vmem:[%s12232_s4 + $0x48] sm:$0xff] }
0x1721   :  { %8955 = vpow2.f32 %v7708_v54  ;;  %v2825_v54 = vld [vmem:[%s12232_s4 + $0x58] sm:$0xff] }
0x1722   :  { %8957 = vpow2.f32 %v7709_v36 }
0x1729   :  { %v8952_v30 = vpop.eup %8951 }
0x172a   :  { %v8954_v12 = vpop.eup %8953  ;;  %v2214_v50 = vadd.f32 1.0, %v8952_v30  ;;  %v10754_v30 = vpack.c.bf16 %v2825_v54, %v2823_v42  ;;  %v2714_v42 = vld [vmem:[%s12233_s8 + $0x58] sm:$0xff] }
0x172b   :  { %v8956_v53 = vpop.eup %8955  ;;  %v2286_v20 = vadd.f32 1.0, %v8954_v12  ;;  %v2822_v12 = vld [vmem:[%s12232_s4 + $0x40] sm:$0xff] }
0x172c   :  { %v8958_v10 = vpop.eup %8957  ;;  %v2215_v14 = vadd.f32 1.0, %v8956_v53  ;;  %8959 = vrcp.f32 %v2214_v50  ;;  %v2824_v50 = vld [vmem:[%s12232_s4 + $0x50] sm:$0xff]  ;;  %v2827_v53 = vld [vmem:[%s12232_s4 + $0x68] sm:$0xff] }
0x172d   :  { %v2284_v57 = vadd.f32 1.0, %v8958_v10  ;;  %8961 = vrcp.f32 %v2286_v20  ;;  %v2829_v20 = vld [vmem:[%s12232_s4 + $0x78] sm:$0xff]  ;;  %v10772_v10 = vpack.c.bf16 %v2824_v50, %v2822_v12  ;;  %v2711_v12 = vld [vmem:[%s12233_s8 + $0x40] sm:$0xff]  ;;  %v2713_v50 = vld [vmem:[%s12233_s8 + $0x50] sm:$0xff] }
0x172e   :  { %8963 = vrcp.f32 %v2215_v14  ;;  %v10775_v14 = vpack.c.bf16 %v2829_v20, %v2827_v53 }
0x172f   :  { %8965 = vrcp.f32 %v2284_v57  ;;  %v2826_v57 = vld [vmem:[%s12232_s4 + $0x60] sm:$0xff] }
0x1736   :  { %v10680_v55 = vpop.eup %8959 }
0x1737   :  { %v8962_v51 = vpop.eup %8961 }
0x1738   :  { %v10684_v41 = vpop.eup %8963 }
0x1739   :  { %v8966_v40 = vpop.eup %8965 }
0x178d   :  { %v2221_v24 = vpop.permute.xlu1 %2220 }
0x178e   :  { %v2226_v52 = vmul.f32 %v10680_v55, %v2221_v24  ;;  %v2299_v26 = vpop.permute.xlu0 %2298  ;;  %v2828_v24 = vld [vmem:[%s12232_s4 + $0x70] sm:$0xff] }
0x178f   :  { %v2303_v9 = vmul.f32 %v8962_v51, %v2299_v26  ;;  %v10784_v51 = vpack.c.bf16 %v2828_v24, %v2826_v57  ;;  %v8423_v57 = vpack.c.bf16 %v2713_v50, %v2711_v12 }
0x1790   :  { %2230 = vrot.lane.b32.xlu1 %v2226_v52, %s9632_s14  ;;  %v2269_v52 = vadd.f32 %v10666_v48, %v10186_v21 }
0x1791   :  { %v2223_v28 = vpop.permute.xlu1 %2222  ;;  %2308 = vrot.lane.b32.xlu0 %v2303_v9, %s9632_s14 }
0x1792   :  { %v2227_v46 = vmul.f32 %v10684_v41, %v2223_v28  ;;  %v2297_v61 = vpop.permute.xlu0 %2296  ;;  %v7710_v9 = vmul.f32 -1.442695, %v2269_v52 }
0x1793   :  { %v2302_v47 = vmul.f32 %v8966_v40, %v2297_v61 }
0x1794   :  { %2232 = vrot.lane.b32.xlu1 %v2227_v46, %s9632_s14 }
0x1795   :  { %2306 = vrot.lane.b32.xlu0 %v2302_v47, %s9632_s14 }
0x1798   :  { %2330 = vrot.lane.b32.xlu1 %v2252_v63, %s9633_s22 }
0x179c   :  { %2253 = vrot.lane.b32.xlu1 %v2252_v63, %s9634_s10  ;;  %v2704_v63 = vld [vmem:[%s12233_s8 + $0x8] sm:$0xff] }
0x17a0   :  { %2328 = vrot.lane.b32.xlu1 %v2127_v7, %s9633_s22 }
0x17a4   :  { %2255 = vrot.lane.b32.xlu1 %v2125_v1, %s9634_s10 }
0x17a8   :  { %2360 = vrot.lane.b32.xlu1 %v10510_v62, %s9634_s10 }
0x17ac   :  { %2372 = vrot.lane.b32.xlu1 %v10366_v38, %s9634_s10 }
0x17b0   :  { %2392 = vrot.lane.b32.xlu1 %v10205_v6, %s9634_s10 }
0x17b4   :  { %2378 = vrot.lane.b32.xlu1 %v10288_v45, %s9634_s10 }
0x1802   :  { %v2231_v19 = vpop.permute.xlu1 %2230 }
0x1803   :  { %v2236_v39 = vadd.f32 %v2231_v19, %v10174_v44  ;;  %v2309_v60 = vpop.permute.xlu0 %2308  ;;  %v2705_v19 = vld [vmem:[%s12233_s8 + $0x10] sm:$0xff] }
0x1804   :  { %v2313_v7 = vadd.f32 %v2309_v60, %v10191_v27 }
0x1805   :  { %8967 = vtanh.f32 %v2236_v39  ;;  %v2240_v39 = vsub.f32 1.0, %v10680_v55 }
0x1806   :  { %8969 = vtanh.f32 %v2313_v7  ;;  %v2233_v58 = vpop.permute.xlu1 %2232 }
0x1807   :  { %v2307_v1 = vpop.permute.xlu0 %2306  ;;  %v2237_v38 = vadd.f32 %v2233_v58, %v10172_v43  ;;  %v2815_v43 = vld [vmem:[%s12232_s4 + $0x8] sm:$0xff] }
0x1808   :  { %v2312_v62 = vadd.f32 %v2307_v1, %v10186_v21  ;;  %v10718_v23 = vpack.c.bf16 %v2817_v17, %v2815_v43 }
0x180a   :  { %8971 = vtanh.f32 %v2312_v62  ;;  %8430 = vmatprep.subr.bf16.mxu0 %v10718_v23  ;;  %v2331_v47 = vpop.permute.xlu1 %2330 }
0x180b   :  { %8973 = vtanh.f32 %v2237_v38  ;;  %8432 = vmatpush1.bf16.msra.mxu0 %v10726_v34  ;;  %v2708_v38 = vld [vmem:[%s12233_s8 + $0x28] sm:$0xff] }
0x180e   :  { %v2254_v21 = vpop.permute.xlu1 %2253 }
0x180f   :  { %v8968_v59 = vpop.eup %8967  ;;  %v2259_v62 = vmul.f32 %v10680_v55, %v2254_v21 }
0x1810   :  { %2244 = vrot.lane.b32.xlu0 %v8968_v59, %s9633_s22  ;;  %v8970_v6 = vpop.eup %8969  ;;  %v2710_v59 = vld [vmem:[%s12233_s8 + $0x38] sm:$0xff] }
0x1812   :  { %v2329_v33 = vpop.permute.xlu1 %2328 }
0x1814   :  { %2322 = vrot.lane.b32.xlu0 %v8970_v6, %s9633_s22  ;;  %v8972_v44 = vpop.eup %8971  ;;  %v8417_v6 = vpack.c.bf16 %v2710_v59, %v2708_v38  ;;  %v9635_v38 = vmov 1966171168  }
0x1815   :  { %v8974_v45 = vpop.eup %8973 }
0x1818   :  { %2320 = vrot.lane.b32.xlu0 %v8972_v44, %s9633_s22  ;;  %v2707_v44 = vld [vmem:[%s12233_s8 + $0x20] sm:$0xff] }
0x181c   :  { %2246 = vrot.lane.b32.xlu0 %v8974_v45, %s9633_s22  ;;  %v2709_v45 = vld [vmem:[%s12233_s8 + $0x30] sm:$0xff] }
0x181d   :  { %v8419_v17 = vpack.c.bf16 %v2709_v45, %v2707_v44 }
0x1820   :  { %2348 = vrot.lane.b32.xlu0 %v10653_v13, %s9634_s10  ;;  %v2819_v13 = vld [vmem:[%s12232_s4 + $0x28] sm:$0xff] }
0x1821   :  { %v10741_v4 = vpack.c.bf16 %v2821_v22, %v2819_v13 }
0x1823   :  { %8434 = vmatprep.subr.bf16.mxu0 %v10741_v4 }
0x1824   :  { %2354 = vrot.lane.b32.xlu0 %v10587_v18, %s9634_s10  ;;  %v2820_v18 = vld [vmem:[%s12232_s4 + $0x30] sm:$0xff] }
0x1825   :  { %v10752_v36 = vpack.c.bf16 %v2820_v18, %v2818_v0  ;;  %v2712_v18 = vld [vmem:[%s12233_s8 + $0x48] sm:$0xff] }
0x1826   :  { %v8421_v54 = vpack.c.bf16 %v2714_v42, %v2712_v18 }
0x1827   :  { %8436 = vmatpush1.bf16.msra.mxu0 %v10752_v36 }
0x1828   :  { %2366 = vrot.lane.b32.xlu0 %v10436_v56, %s9634_s10  ;;  %8438 = vmatprep.subr.bf16.mxu0 %v10754_v30  ;;  %v2271_v56 = vadd.f32 %v2264_v5, %v10191_v27  ;;  %v2706_v27 = vld [vmem:[%s12233_s8 + $0x18] sm:$0xff]  ;;  %v2703_v5 = vld [vmem:[%s12233_s8] sm:$0xff] }
0x1829   :  { %v8413_v48 = vpack.c.bf16 %v2706_v27, %v2704_v63  ;;  %v8415_v60 = vpack.c.bf16 %v2705_v19, %v2703_v5  ;;  %v2241_v27 = vsub.f32 1.0, %v10684_v41 }
0x182a   :  { %v7712_v26 = vmul.f32 -1.442695, %v2271_v56 }
0x182b   :  { %8440 = vmatpush1.bf16.msra.mxu0 %v10772_v10  ;;  %8414 = vmatprep.subr.bf16.mxu1 %v8413_v48 }
0x182c   :  { %8442 = vmatprep.subr.bf16.mxu0 %v10775_v14  ;;  %8975 = vpow2.f32 %v7712_v26  ;;  %8416 = vmatpush1.bf16.msra.mxu1 %v8415_v60  ;;  %v2716_v26 = vld [vmem:[%s12233_s8 + $0x68] sm:$0xff] }
0x182d   :  { %8977 = vpow2.f32 %v7710_v9  ;;  %8418 = vmatprep.subr.bf16.mxu1 %v8417_v6  ;;  %v2718_v9 = vld [vmem:[%s12233_s8 + $0x78] sm:$0xff] }
0x182f   :  { %8444 = vmatpush1.bf16.msra.mxu0 %v10784_v51 }
0x1830   :  { %8462 = vmatprep.subr.bf16.mxu0 %v10718_v23  ;;  %8420 = vmatpush1.bf16.msra.mxu1 %v8419_v17 }
0x1831   :  { %8422 = vmatprep.subr.bf16.mxu1 %v8421_v54 }
0x1832   :  { %2907 = vmatmul.mubr.f32.vlgmr.msra.gmra.mrb[10].mxu0 %v9630_v3 }
0x1833   :  { %8464 = vmatpush1.bf16.msra.mxu0 %v10726_v34  ;;  %3354 = vmatprep.mubr.f32.mxu0 %v9630_v3 }
0x1834   :  { %8466 = vmatprep.subr.bf16.mxu0 %v10741_v4  ;;  %8424 = vmatpush1.bf16.msra.mxu1 %v8423_v57 }
0x1836   :  { %v8976_v28 = vpop.eup %8975 }
0x1837   :  { %8468 = vmatpush1.bf16.msra.mxu0 %v10752_v36  ;;  %v2287_v40 = vadd.f32 1.0, %v8976_v28  ;;  %v8978_v46 = vpop.eup %8977  ;;  %v2256_v28 = vpop.permute.xlu1 %2255 }
0x1838   :  { %8470 = vmatprep.subr.bf16.mxu0 %v10754_v30  ;;  %v2285_v61 = vadd.f32 1.0, %v8978_v46  ;;  %v2715_v46 = vld [vmem:[%s12233_s8 + $0x60] sm:$0xff]  ;;  %v2260_v5 = vmul.f32 %v10684_v41, %v2256_v28  ;;  %v2402_v41 = vunpack.c.l.s4 %v9635_v38 }
0x1839   :  { %8979 = vrcp.f32 %v2287_v40  ;;  %v8425_v40 = vpack.c.bf16 %v2718_v9, %v2716_v26 }
0x183a   :  { %8981 = vrcp.f32 %v2285_v61  ;;  %v2717_v61 = vld [vmem:[%s12233_s8 + $0x70] sm:$0xff]  ;;  %v2403_v44 = vunpack.c.0.s8 %v2402_v41 }
0x183b   :  { %8472 = vmatpush1.bf16.msra.mxu0 %v10772_v10  ;;  %v8427_v21 = vpack.c.bf16 %v2717_v61, %v2715_v46  ;;  %8426 = vmatprep.subr.bf16.mxu1 %v8425_v40  ;;  %v2830_v40 = vld [vmem:[#allocation9] sm:$0x3] }
0x183c   :  { %8474 = vmatprep.subr.bf16.mxu0 %v10775_v14 }
0x183d   :  { %8428 = vmatpush1.bf16.msra.mxu1 %v8427_v21 }
0x183e   :  { %8446 = vmatprep.subr.bf16.mxu1 %v10718_v23 }
0x183f   :  { %8476 = vmatpush1.bf16.msra.mxu0 %v10784_v51 }
0x1840   :  { %8494 = vmatprep.subr.bf16.mxu0 %v10718_v23 }
0x1843   :  { %v8980_v7 = vpop.eup %8979 }
0x1844   :  { %v2317_v43 = vsub.f32 1.0, %v8980_v7  ;;  %v8982_v37 = vpop.eup %8981  ;;  %v2335_v22 = vmul.f32 %v8980_v7, %v2331_v47  ;;  %v2391_v7 = vrot.slane %v10207_v16, 7 }
0x1845   :  { %v2316_v20 = vsub.f32 1.0, %v8982_v37  ;;  %v2334_v56 = vmul.f32 %v8982_v37, %v2329_v33 }
0x1882   :  { %v2245_v1 = vpop.permute.xlu0 %2244 }
0x1883   :  { %v2250_v58 = vmul.f32 %v2245_v1, %v2240_v39 }
0x1885   :  { %v2261_v55 = vadd.f32 %v2259_v62, %v2250_v58  ;;  %v2361_v62 = vpop.permute.xlu1 %2360 }
0x1886   :  { %v2323_v13 = vpop.permute.xlu0 %2322 }
0x1887   :  { %v2327_v0 = vmul.f32 %v2323_v13, %v2317_v43  ;;  %2385 = vrot.lane.b32.xlu0 %v2261_v55, %s9633_s22  ;;  %v10864_v55 = vsub.s32 %v2403_v44, %v10143_v29  ;;  %v2363_v43 = vsel %vm726_vm8, %v10438_v35, %v2361_v62 }
0x1889   :  { %v2337_v53 = vadd.f32 %v2335_v22, %v2327_v0  ;;  %v2373_v58 = vpop.permute.xlu1 %2372  ;;  %v2482_v33 = vrot.slane %v2363_v43, %v10864_v55  ;;  %v2475_v0 = vcombine.high %v2363_v43, %v2363_v43 }
0x188a   :  { %v2321_v24 = vpop.permute.xlu0 %2320  ;;  %v2375_v16 = vsel %vm726_vm8, %v10592_v25, %v2373_v58 }
0x188b   :  { %v2326_v52 = vmul.f32 %v2321_v24, %v2316_v20  ;;  %v2340_v47 = vrot.slane %v2337_v53, 7  ;;  %v2531_v13 = vcombine.high %v2375_v16, %v2375_v16  ;;  %v2490_v42 = vcombine.high %v2482_v33, %v2482_v33 }
0x188c   :  { %v2489_v50 = vrot.slane %v2475_v0, %v10864_v55 }
0x188d   :  { %v2336_v63 = vadd.f32 %v2334_v56, %v2326_v52  ;;  %v2393_v59 = vpop.permute.xlu1 %2392  ;;  %v2538_v54 = vrot.slane %v2531_v13, %v10864_v55  ;;  %v2504_v53 = vrot.slane %v2490_v42, %v10864_v55 }
0x188e   :  { %v2247_v48 = vpop.permute.xlu0 %2246  ;;  %v2497_v28 = vrot.slane %v2489_v50, %v10864_v55 }
0x188f   :  { %v2251_v19 = vmul.f32 %v2247_v48, %v2241_v27  ;;  %v2341_v39 = vsel %vm713_vm7, %v2340_v47, %v2336_v63  ;;  %v2539_v20 = vcombine.high %v2538_v54, %v2538_v54  ;;  %v2505_v46 = vcombine.high %v2504_v53, %v2504_v53 }
0x1890   :  { %2342 = vrot.lane.b32.xlu0 %v2341_v39, %s9634_s10  ;;  %v2641_v38 = vrot.slane %v2497_v28, %v10146_v31 }
0x1891   :  { %v2262_v60 = vadd.f32 %v2260_v5, %v2251_v19  ;;  %v2379_v45 = vpop.permute.xlu1 %2378  ;;  %v10890_v61 = vrot.slane %v2539_v20, %v10864_v55  ;;  %v2637_v58 = vrot.slane %v2505_v46, %v10146_v31 }
0x1892   :  { %v2349_v6 = vpop.permute.xlu0 %2348  ;;  %v2381_v37 = vsel %vm726_vm8, %v10658_v2, %v2379_v45 }
0x1893   :  { %v2384_v1 = vrot.slane %v2262_v60, 7  ;;  %v2556_v22 = vcombine.high %v2381_v37, %v2381_v37  ;;  %v2351_v25 = vsel %vm726_vm8, %v10293_v49, %v2349_v6  ;;  %v2657_v41 = vrot.slane %v10890_v61, %v10146_v31 }
0x1894   :  { %2394 = vrot.lane.b32.xlu0 %v2391_v7, %s9634_s10  ;;  %v2432_v56 = vrot.slane %v2351_v25, %v10864_v55  ;;  %v10901_v7 = vrot.slane %v2830_v40, %v10146_v31 }
0x1895   :  { %2387 = vrot.lane.b32.xlu1 %v2384_v1, %s9633_s22  ;;  %v2563_v35 = vrot.slane %v2556_v22, %v10864_v55  ;;  %v10904_v1 = vrot.slane %v2830_v40, %v10149_v32 }
0x1896   :  { %v2355_v17 = vpop.permute.xlu0 %2354  ;;  %v2433_v21 = vcombine.high %v2432_v56, %v2432_v56  ;;  %v2440_v48 = vrot.slane %v2432_v56, %v10864_v55 }
0x1897   :  { %v2357_v18 = vsel %vm726_vm8, %v10371_v8, %v2355_v17  ;;  %v2546_v8 = vrot.slane %v2538_v54, %v10864_v55  ;;  %v2564_v24 = vcombine.high %v2563_v35, %v2563_v35 }
0x1898   :  { %v2456_v12 = vrot.slane %v2357_v18, %v10864_v55  ;;  %v2447_v44 = vrot.slane %v2433_v21, %v10864_v55  ;;  %v2448_v45 = vcombine.high %v2440_v48, %v2440_v48 }
0x1899   :  { %v2554_v47 = vcombine.high %v2546_v8, %v2546_v8  ;;  %v10894_v27 = vrot.slane %v2564_v24, %v10864_v55 }
0x189a   :  { %v2367_v29 = vpop.permute.xlu0 %2366  ;;  %v2457_v49 = vcombine.high %v2456_v12, %v2456_v12  ;;  %v2464_v19 = vrot.slane %v2456_v12, %v10864_v55 }
0x189b   :  { %v2369_v2 = vsel %vm726_vm8, %v10515_v11, %v2367_v29  ;;  %v2571_v11 = vrot.slane %v2563_v35, %v10864_v55  ;;  %v2580_v6 = vcombine.high %v10894_v27, %v10894_v27  ;;  %v2617_v29 = vrot.slane %v2447_v44, %v10146_v31 }
0x189c   :  { %v2507_v52 = vcombine.high %v2369_v2, %v2369_v2  ;;  %v2471_v39 = vrot.slane %v2457_v49, %v10864_v55  ;;  %v2472_v17 = vcombine.high %v2464_v19, %v2464_v19 }
0x189d   :  { %v2579_v62 = vcombine.high %v2571_v11, %v2571_v11 }
0x189e   :  { %v2514_v5 = vrot.slane %v2507_v52, %v10864_v55  ;;  %v2473_v37 = vcombine.high %v2471_v39, %v2471_v39  ;;  %v2627_v12 = vrot.slane %v2472_v17, %v10146_v31 }
0x189f   :  { %v2667_v22 = vrot.slane %v2579_v62, %v10146_v31  ;;  %v2671_v62 = vrot.slane %v2580_v6, %v10146_v31 }
0x18a0   :  { %v2515_v43 = vcombine.high %v2514_v5, %v2514_v5  ;;  %v2522_v18 = vrot.slane %v2514_v5, %v10864_v55  ;;  %v2631_v2 = vrot.slane %v2473_v37, %v10146_v31 }
0x18a2   :  { %v2529_v42 = vrot.slane %v2515_v43, %v10864_v55 }
0x18a4   :  { %v2651_v11 = vrot.slane %v2529_v42, %v10146_v31 }
0x18f9   :  { %v2386_v57 = vpop.permute.xlu0 %2385 }
0x18fa   :  { %v2398_v26 = vsel %vm726_vm8, %v2386_v57, %v2393_v59  ;;  %v2661_v59 = vrot.slane %v2554_v47, %v10146_v31 }
0x18fb   :  { %v2583_v9 = vcombine.high %v2398_v26, %v2398_v26  ;;  %v2647_v26 = vrot.slane %v2522_v18, %v10146_v31 }
0x18fd   :  { %v2590_v63 = vrot.slane %v2583_v9, %v10864_v55 }
0x18ff   :  { %v2591_v60 = vcombine.high %v2590_v63, %v2590_v63 }
0x1901   :  { %v2598_v33 = vrot.slane %v2591_v60, %v10864_v55 }
0x1902   :  { %v2343_v16 = vpop.permute.xlu0 %2342 }
0x1903   :  { %v2345_v13 = vsel %vm726_vm8, %v10215_v15, %v2343_v16  ;;  %v2621_v15 = vrot.slane %v2448_v45, %v10146_v31  ;;  %v2599_v50 = vcombine.high %v2598_v33, %v2598_v33 }
0x1904   :  { %v2407_v0 = vrot.slane %v2345_v13, %v10864_v55 }
0x1905   :  { %v2908_v20 = vpop.f32.mrb[10].mxu0  ;;  %v2677_v48 = vrot.slane %v2599_v50, %v10146_v31 }
0x1906   :  { %v2408_v54 = vcombine.high %v2407_v0, %v2407_v0  ;;  %v2415_v35 = vrot.slane %v2407_v0, %v10864_v55  ;;  %v2395_v25 = vpop.permute.xlu0 %2394  ;;  %v2909_v56 = vadd.f32 %v2908_v20, %v10901_v7  ;;  %v2910_v52 = vpop.f32.mrb[11].mxu0 }
0x1907   :  { %v2388_v53 = vpop.permute.xlu1 %2387  ;;  %v10934_v28 = vadd.f32 %v2910_v52, %v10904_v1 }
0x1908   :  { %v2422_v8 = vrot.slane %v2408_v54, %v10864_v55  ;;  %v2685_v57 = vsel %vm2684_vm1, %v2415_v35, %v2617_v29  ;;  %v2399_v24 = vsel %vm726_vm8, %v2388_v53, %v2395_v25  ;;  %v2914_v61 = vrot.slane %v2909_v56, 1 }
0x1909   :  { %v2687_v49 = vsel %vm257_vm0, %v2685_v57, %v2627_v12  ;;  %v2606_v9 = vrot.slane %v2399_v24, %v10864_v55  ;;  %v2968_v21 = vrot.slane %v10934_v28, 1  ;;  %v2970_v39 = vrot.slane %v10934_v28, 2 }
0x190a   :  { %v2686_v40 = vsel %vm2684_vm1, %v2422_v8, %v2621_v15  ;;  %v2689_v46 = vsel %vm398_vm4, %v2687_v49, %v2637_v58  ;;  %2933 = vrot.lane.b32.xlu1 %v2914_v61, %s9632_s14  ;;  %v2969_v0 = vrot.slane %v2909_v56, 2 }
0x190b   :  { %v2688_v47 = vsel %vm257_vm0, %v2686_v40, %v2631_v2  ;;  %v2613_v63 = vrot.slane %v2606_v9, %v10864_v55  ;;  %v2692_v27 = vsel %vm2691_vm2, %v2689_v46, %v2647_v26  ;;  %3002 = vrot.lane.b32.xlu0 %v2968_v21, %s9632_s14 }
0x190c   :  { %v2695_v5 = vsel %vm2694_vm3, %v2692_v27, %v2657_v41  ;;  %v2690_v19 = vsel %vm398_vm4, %v2688_v47, %v2641_v38 }
0x190d   :  { %v2698_v60 = vsel %vm2697_vm5, %v2695_v5, %v2667_v22  ;;  %v2693_v58 = vsel %vm2691_vm2, %v2690_v19, %v2651_v11  ;;  %v2681_v44 = vrot.slane %v2613_v63, %v10146_v31 }
0x190e   :  { %v2701_v41 = vsel %vm2700_vm6, %v2698_v60, %v2677_v48  ;;  %v2696_v38 = vsel %vm2694_vm3, %v2693_v58, %v2661_v59  ;;  %3004 = vrot.lane.b32.xlu1 %v2970_v39, %s9632_s14  ;;  %v2719_v59 = vld [vmem:[#allocation7] sm:$0x3] }
0x190f   :  { %7713 = vmatmul.mubr.msk.f32.vlgmr.msra.gmra.mrb[12].mxu1 %vm510_vm9, %v2701_v41  ;;  %v2699_v45 = vsel %vm2697_vm5, %v2696_v38, %v2671_v62  ;;  %2931 = vrot.lane.b32.xlu0 %v2909_v56, %s9632_s14  ;;  %v2724_v43 = vrot.slane %v2719_v59, %v10146_v31  ;;  %v2728_v5 = vrot.slane %v2719_v59, %v10149_v32 }
0x1910   :  { %2807 = vmatprep.mubr.f32.mxu1 %v9630_v3  ;;  %8448 = vmatpush1.bf16.msra.mxu1 %v10726_v34  ;;  %v2702_v6 = vsel %vm2700_vm6, %v2699_v45, %v2681_v44 }
0x1911   :  { %8450 = vmatprep.subr.bf16.mxu1 %v10741_v4 }
0x1913   :  { %7714 = vmatmul.mubr.msk.f32.gmra.mrb[14].mxu1 %vm510_vm9, %v2702_v6 }
0x1914   :  { %3121 = vmatprep.mubr.f32.mxu1 %v9630_v3  ;;  %8452 = vmatpush1.bf16.msra.mxu1 %v10752_v36 }
0x1915   :  { %8454 = vmatprep.subr.bf16.mxu1 %v10754_v30 }
0x1918   :  { %8456 = vmatpush1.bf16.msra.mxu1 %v10772_v10 }
0x1919   :  { %8458 = vmatprep.subr.bf16.mxu1 %v10775_v14 }
0x191c   :  { %8460 = vmatpush1.bf16.msra.mxu1 %v10784_v51 }
0x191d   :  { %8478 = vmatprep.subr.bf16.mxu1 %v10718_v23 }
0x197c   :  { %v2934_v49 = vpop.permute.xlu1 %2933 }
0x197d   :  { %v3003_v52 = vpop.permute.xlu0 %3002 }
0x1980   :  { %v3005_v27 = vpop.permute.xlu1 %3004 }
0x1981   :  { %v2932_v40 = vpop.permute.xlu0 %2931 }
0x19e2   :  { %v2803_v16 = vpop.f32.mrb[12].mxu1 }
0x19e3   :  { %v10976_v17 = vadd.f32 %v2803_v16, %v2724_v43  ;;  %v2805_v37 = vpop.f32.mrb[13].mxu1 }
0x19e4   :  { %v10989_v19 = vadd.f32 %v2805_v37, %v2728_v5 }
0x19e5   :  { %v2974_v33 = vadd.f32 %v2914_v61, %v10976_v17  ;;  %v2917_v13 = vadd.f32 %v2909_v56, %v10976_v17 }
0x19e6   :  { %v2809_v22 = vpop.f32.mrb[14].mxu1 }
0x19e7   :  { %v10980_v18 = vadd.f32 %v2809_v22, %v2724_v43  ;;  %v2811_v29 = vpop.f32.mrb[15].mxu1  ;;  %v7717_v42 = vmul.f32 -1.442695, %v2974_v33  ;;  %v7715_v54 = vmul.f32 -1.442695, %v2917_v13  ;;  %v2975_v33 = vadd.f32 %v2968_v21, %v10989_v19 }
0x19e8   :  { %v10994_v45 = vadd.f32 %v2811_v29, %v2728_v5 }
0x19e9   :  { %8983 = vpow2.f32 %v7717_v42  ;;  %v2918_v35 = vadd.f32 %v2914_v61, %v10980_v18  ;;  %v2976_v25 = vadd.f32 %v2969_v0, %v10980_v18  ;;  %v7718_v13 = vmul.f32 -1.442695, %v2975_v33 }
0x19ea   :  { %8985 = vpow2.f32 %v7715_v54  ;;  %v2977_v22 = vadd.f32 %v2970_v39, %v10994_v45 }
0x19eb   :  { %v7716_v15 = vmul.f32 -1.442695, %v2918_v35  ;;  %v7719_v12 = vmul.f32 -1.442695, %v2976_v25 }
0x19ec   :  { %v7720_v0 = vmul.f32 -1.442695, %v2977_v22 }
0x19ed   :  { %8987 = vpow2.f32 %v7716_v15 }
0x19ee   :  { %8989 = vpow2.f32 %v7719_v12 }
0x19f3   :  { %v8984_v2 = vpop.eup %8983 }
0x19f4   :  { %v8986_v50 = vpop.eup %8985  ;;  %v2990_v53 = vadd.f32 1.0, %v8984_v2 }
0x19f5   :  { %v2925_v20 = vadd.f32 1.0, %v8986_v50 }
0x19f6   :  { %8991 = vrcp.f32 %v2990_v53 }
0x19f7   :  { %v8988_v8 = vpop.eup %8987  ;;  %8993 = vrcp.f32 %v2925_v20 }
0x19f8   :  { %v8990_v57 = vpop.eup %8989  ;;  %v2926_v24 = vadd.f32 1.0, %v8988_v8 }
0x19f9   :  { %v2992_v56 = vadd.f32 1.0, %v8990_v57 }
0x19fa   :  { %8995 = vrcp.f32 %v2926_v24 }
0x19fb   :  { %8997 = vrcp.f32 %v2992_v56 }
0x1a00   :  { %v8992_v26 = vpop.eup %8991 }
0x1a01   :  { %v3008_v9 = vmul.f32 %v8992_v26, %v3003_v52  ;;  %v8994_v11 = vpop.eup %8993 }
0x1a02   :  { %v2937_v61 = vmul.f32 %v8994_v11, %v2932_v40  ;;  %v2951_v2 = vsub.f32 1.0, %v8994_v11  ;;  %v2963_v56 = vmul.f32 0.0, %v8994_v11 }
0x1a03   :  { %3012 = vrot.lane.b32.xlu0 %v3008_v9, %s9632_s14 }
0x1a04   :  { %v8996_v46 = vpop.eup %8995 }
0x1a05   :  { %v2938_v47 = vmul.f32 %v8996_v46, %v2934_v49  ;;  %v8998_v63 = vpop.eup %8997  ;;  %v2952_v21 = vsub.f32 1.0, %v8996_v46  ;;  %v2964_v39 = vmul.f32 0.0, %v8996_v46 }
0x1a06   :  { %v3009_v48 = vmul.f32 %v8998_v63, %v3005_v27 }
0x1a07   :  { %2941 = vrot.lane.b32.xlu0 %v2937_v61, %s9632_s14  ;;  %2943 = vrot.lane.b32.xlu1 %v2938_v47, %s9632_s14 }
0x1a0b   :  { %3014 = vrot.lane.b32.xlu1 %v3009_v48, %s9632_s14 }
0x1a75   :  { %v3013_v60 = vpop.permute.xlu0 %3012 }
0x1a76   :  { %v3018_v62 = vadd.f32 %v3013_v60, %v10989_v19 }
0x1a78   :  { %8999 = vtanh.f32 %v3018_v62 }
0x1a79   :  { %v2942_v58 = vpop.permute.xlu0 %2941  ;;  %v2944_v44 = vpop.permute.xlu1 %2943 }
0x1a7a   :  { %v2947_v41 = vadd.f32 %v2942_v58, %v10976_v17  ;;  %v2948_v38 = vadd.f32 %v2944_v44, %v10980_v18 }
0x1a7c   :  { %9001 = vtanh.f32 %v2947_v41 }
0x1a7d   :  { %9003 = vtanh.f32 %v2948_v38  ;;  %v3015_v6 = vpop.permute.xlu1 %3014 }
0x1a7e   :  { %v3019_v43 = vadd.f32 %v3015_v6, %v10994_v45 }
0x1a80   :  { %9005 = vtanh.f32 %v3019_v43 }
0x1a81   :  { %9007 = vpow2.f32 %v7718_v13 }
0x1a82   :  { %v9000_v32 = vpop.eup %8999  ;;  %9009 = vpow2.f32 %v7720_v0 }
0x1a83   :  { %3026 = vrot.lane.b32.xlu0 %v9000_v32, %s9633_s22 }
0x1a86   :  { %v9002_v59 = vpop.eup %9001 }
0x1a87   :  { %v9004_v16 = vpop.eup %9003  ;;  %2955 = vrot.lane.b32.xlu0 %v9002_v59, %s9633_s22 }
0x1a88   :  { %2957 = vrot.lane.b32.xlu1 %v9004_v16, %s9633_s22 }
0x1a8a   :  { %v9006_v37 = vpop.eup %9005 }
0x1a8b   :  { %v9008_v29 = vpop.eup %9007 }
0x1a8c   :  { %3028 = vrot.lane.b32.xlu1 %v9006_v37, %s9633_s22  ;;  %v2991_v42 = vadd.f32 1.0, %v9008_v29  ;;  %v9010_v54 = vpop.eup %9009 }
0x1a8d   :  { %v2993_v35 = vadd.f32 1.0, %v9010_v54 }
0x1a8e   :  { %9011 = vrcp.f32 %v2991_v42 }
0x1a8f   :  { %9013 = vrcp.f32 %v2993_v35 }
0x1a98   :  { %v9012_v15 = vpop.eup %9011 }
0x1a99   :  { %v3022_v12 = vsub.f32 1.0, %v9012_v15  ;;  %v9014_v53 = vpop.eup %9013  ;;  %v3034_v24 = vmul.f32 0.0, %v9012_v15 }
0x1a9a   :  { %v3023_v26 = vsub.f32 1.0, %v9014_v53  ;;  %v3035_v49 = vmul.f32 0.0, %v9014_v53 }
0x1af5   :  { %v3027_v25 = vpop.permute.xlu0 %3026 }
0x1af6   :  { %v3032_v8 = vmul.f32 %v3027_v25, %v3022_v12 }
0x1af8   :  { %v11007_v40 = vadd.f32 %v3034_v24, %v3032_v8 }
0x1af9   :  { %v2956_v50 = vpop.permute.xlu0 %2955 }
0x1afa   :  { %v2958_v20 = vpop.permute.xlu1 %2957  ;;  %v2961_v28 = vmul.f32 %v2956_v50, %v2951_v2  ;;  %v3047_v46 = vrot.slane %v11007_v40, 7 }
0x1afb   :  { %v2962_v57 = vmul.f32 %v2958_v20, %v2952_v21 }
0x1afc   :  { %v2965_v61 = vadd.f32 %v2963_v56, %v2961_v28 }
0x1afd   :  { %v2966_v52 = vadd.f32 %v2964_v39, %v2962_v57 }
0x1afe   :  { %v3029_v9 = vpop.permute.xlu1 %3028 }
0x1aff   :  { %v3040_v47 = vrot.slane %v2966_v52, 7  ;;  %v3033_v63 = vmul.f32 %v3029_v9, %v3023_v26 }
0x1b01   :  { %v11009_v27 = vadd.f32 %v3035_v49, %v3033_v63  ;;  %v3041_v48 = vsel %vm713_vm7, %v3040_v47, %v2965_v61 }
0x1b02   :  { %3042 = vrot.lane.b32.xlu1 %v3041_v48, %s9633_s22 }
0x1b03   :  { %v3048_v5 = vrot.slane %v11009_v27, 6 }
0x1b05   :  { %v3049_v11 = vsel %vm713_vm7, %v3048_v5, %v3047_v46 }
0x1b06   :  { %3050 = vrot.lane.b32.xlu0 %v3049_v11, %s9634_s10 }
0x1b74   :  { %v11017_v60 = vpop.permute.xlu1 %3042 }
0x1b78   :  { %v3051_v62 = vpop.permute.xlu0 %3050 }
0x1b79   :  { %v11021_v58 = vsel %vm726_vm8, %v11017_v60, %v3051_v62 }
0x1b7a   :  { %7721 = vmatmul.mubr.msk.f32.vlgmr.msra.gmra.mrb[16].mxu1 %vm510_vm9, %v11021_v58  ;;  %v3258_v63 = vrot.slane %v11021_v58, 2  ;;  %v3259_v48 = vrot.slane %v11021_v58, 3 }
0x1b7b   :  { %8480 = vmatpush1.bf16.msra.mxu1 %v10726_v34  ;;  %3588 = vmatprep.mubr.f32.mxu1 %v9630_v3 }
0x1b7c   :  { %8482 = vmatprep.subr.bf16.mxu1 %v10741_v4 }
0x1b7f   :  { %8484 = vmatpush1.bf16.msra.mxu1 %v10752_v36 }
0x1b80   :  { %8486 = vmatprep.subr.bf16.mxu1 %v10754_v30 }
0x1b83   :  { %8488 = vmatpush1.bf16.msra.mxu1 %v10772_v10 }
0x1b84   :  { %8490 = vmatprep.subr.bf16.mxu1 %v10775_v14 }
0x1b87   :  { %8492 = vmatpush1.bf16.msra.mxu1 %v10784_v51 }
0x1b88   :  { %8510 = vmatprep.subr.bf16.mxu1 %v10718_v23 }
0x1c4d   :  { %v3123_v44 = vpop.f32.mrb[16].mxu1 }
0x1c4e   :  { %v3124_v41 = vadd.f32 %v3123_v44, %v10901_v7  ;;  %v3125_v38 = vpop.f32.mrb[17].mxu1 }
0x1c4f   :  { %v11036_v6 = vadd.f32 %v3125_v38, %v10904_v1 }
0x1c50   :  { %3148 = vrot.lane.b32.xlu1 %v3124_v41, %s9632_s14  ;;  %v3129_v59 = vrot.slane %v3124_v41, 7  ;;  %v3190_v16 = vrot.slane %v3124_v41, 2  ;;  %v3133_v37 = vadd.f32 %v3124_v41, %v10980_v18  ;;  %v3192_v33 = vrot.slane %v3124_v41, 3 }
0x1c51   :  { %v3191_v43 = vrot.slane %v11036_v6, 2  ;;  %v3193_v32 = vrot.slane %v11036_v6, 3 }
0x1c52   :  { %v3198_v13 = vadd.f32 %v3190_v16, %v10976_v17  ;;  %v7723_v22 = vmul.f32 -1.442695, %v3133_v37  ;;  %v3200_v0 = vadd.f32 %v3192_v33, %v10980_v18  ;;  %v3132_v42 = vadd.f32 %v3129_v59, %v10976_v17 }
0x1c53   :  { %3226 = vrot.lane.b32.xlu0 %v3191_v43, %s9632_s14 }
0x1c54   :  { %3228 = vrot.lane.b32.xlu1 %v3193_v32, %s9632_s14  ;;  %v7724_v29 = vmul.f32 -1.442695, %v3198_v13  ;;  %9015 = vpow2.f32 %v7723_v22  ;;  %v7726_v54 = vmul.f32 -1.442695, %v3200_v0  ;;  %v7722_v35 = vmul.f32 -1.442695, %v3132_v42 }
0x1c55   :  { %v3178_v22 = vrot.slane %v11021_v58, 7  ;;  %v3199_v0 = vadd.f32 %v3191_v43, %v10989_v19 }
0x1c56   :  { %9017 = vpow2.f32 %v7724_v29  ;;  %v3201_v29 = vadd.f32 %v3193_v32, %v10994_v45 }
0x1c57   :  { %3146 = vrot.lane.b32.xlu0 %v3129_v59, %s9632_s14  ;;  %9019 = vpow2.f32 %v7726_v54  ;;  %v7725_v42 = vmul.f32 -1.442695, %v3199_v0 }
0x1c58   :  { %9021 = vpow2.f32 %v7722_v35  ;;  %v7727_v54 = vmul.f32 -1.442695, %v3201_v29 }
0x1c5e   :  { %v9016_v25 = vpop.eup %9015 }
0x1c5f   :  { %v3141_v12 = vadd.f32 1.0, %v9016_v25 }
0x1c60   :  { %v9018_v15 = vpop.eup %9017 }
0x1c61   :  { %v9020_v2 = vpop.eup %9019  ;;  %v3214_v50 = vadd.f32 1.0, %v9018_v15  ;;  %9023 = vrcp.f32 %v3141_v12 }
0x1c62   :  { %v9022_v21 = vpop.eup %9021  ;;  %v3216_v53 = vadd.f32 1.0, %v9020_v2 }
0x1c63   :  { %v3140_v20 = vadd.f32 1.0, %v9022_v21  ;;  %9025 = vrcp.f32 %v3214_v50 }
0x1c64   :  { %9027 = vrcp.f32 %v3216_v53 }
0x1c65   :  { %9029 = vrcp.f32 %v3140_v20 }
0x1c6b   :  { %v11052_v8 = vpop.eup %9023 }
0x1c6c   :  { %v3167_v20 = vsub.f32 1.0, %v11052_v8 }
0x1c6d   :  { %v9026_v57 = vpop.eup %9025 }
0x1c6e   :  { %v9028_v56 = vpop.eup %9027 }
0x1c6f   :  { %v11057_v9 = vpop.eup %9029 }
0x1cc2   :  { %v3149_v28 = vpop.permute.xlu1 %3148 }
0x1cc3   :  { %v3153_v39 = vmul.f32 %v11052_v8, %v3149_v28 }
0x1cc5   :  { %v3227_v24 = vpop.permute.xlu0 %3226  ;;  %3158 = vrot.lane.b32.xlu1 %v3153_v39, %s9632_s14 }
0x1cc6   :  { %v3232_v52 = vmul.f32 %v9026_v57, %v3227_v24  ;;  %v3229_v26 = vpop.permute.xlu1 %3228 }
0x1cc7   :  { %v3233_v49 = vmul.f32 %v9028_v56, %v3229_v26 }
0x1cc8   :  { %3236 = vrot.lane.b32.xlu0 %v3232_v52, %s9632_s14 }
0x1cc9   :  { %3238 = vrot.lane.b32.xlu1 %v3233_v49, %s9632_s14  ;;  %v3147_v61 = vpop.permute.xlu0 %3146 }
0x1cca   :  { %v3152_v47 = vmul.f32 %v11057_v9, %v3147_v61 }
0x1ccc   :  { %3156 = vrot.lane.b32.xlu0 %v3152_v47, %s9632_s14 }
0x1ccd   :  { %3260 = vrot.lane.b32.xlu1 %v3258_v63, %s9633_s22  ;;  %v3166_v63 = vsub.f32 1.0, %v11057_v9 }
0x1cd0   :  { %3181 = vrot.lane.b32.xlu0 %v11021_v58, %s9634_s10 }
0x1cd4   :  { %3262 = vrot.lane.b32.xlu0 %v3259_v48, %s9633_s22 }
0x1d37   :  { %v3159_v46 = vpop.permute.xlu1 %3158 }
0x1d38   :  { %v3163_v5 = vadd.f32 %v3159_v46, %v10980_v18 }
0x1d3a   :  { %9031 = vtanh.f32 %v3163_v5  ;;  %v3237_v11 = vpop.permute.xlu0 %3236 }
0x1d3b   :  { %v3242_v62 = vadd.f32 %v3237_v11, %v10989_v19  ;;  %v3239_v44 = vpop.permute.xlu1 %3238 }
0x1d3c   :  { %v3243_v41 = vadd.f32 %v3239_v44, %v10994_v45 }
0x1d3d   :  { %9033 = vtanh.f32 %v3242_v62 }
0x1d3e   :  { %9035 = vtanh.f32 %v3243_v41  ;;  %v3157_v38 = vpop.permute.xlu0 %3156 }
0x1d3f   :  { %v3162_v59 = vadd.f32 %v3157_v38, %v10976_v17  ;;  %v3261_v2 = vpop.permute.xlu1 %3260 }
0x1d41   :  { %9037 = vtanh.f32 %v3162_v59 }
0x1d42   :  { %9039 = vpow2.f32 %v7725_v42  ;;  %v3182_v12 = vpop.permute.xlu0 %3181 }
0x1d43   :  { %9041 = vpow2.f32 %v7727_v54  ;;  %v3186_v49 = vmul.f32 %v11052_v8, %v3182_v12 }
0x1d44   :  { %v9032_v16 = vpop.eup %9031 }
0x1d45   :  { %3172 = vrot.lane.b32.xlu1 %v9032_v16, %s9633_s22 }
0x1d46   :  { %v3263_v53 = vpop.permute.xlu0 %3262 }
0x1d47   :  { %v9034_v37 = vpop.eup %9033 }
0x1d48   :  { %v9036_v33 = vpop.eup %9035 }
0x1d49   :  { %3250 = vrot.lane.b32.xlu1 %v9034_v37, %s9633_s22  ;;  %3252 = vrot.lane.b32.xlu0 %v9036_v33, %s9633_s22 }
0x1d4b   :  { %v9038_v13 = vpop.eup %9037 }
0x1d4c   :  { %v9040_v35 = vpop.eup %9039 }
0x1d4d   :  { %3179 = vrot.lane.b32.xlu0 %v3178_v22, %s9634_s10  ;;  %3170 = vrot.lane.b32.xlu1 %v9038_v13, %s9633_s22  ;;  %v9042_v25 = vpop.eup %9041  ;;  %v3215_v15 = vadd.f32 1.0, %v9040_v35 }
0x1d4e   :  { %v3217_v58 = vadd.f32 1.0, %v9042_v25 }
0x1d4f   :  { %9043 = vrcp.f32 %v3215_v15 }
0x1d50   :  { %9045 = vrcp.f32 %v3217_v58 }
0x1d59   :  { %v9044_v50 = vpop.eup %9043 }
0x1d5a   :  { %v9046_v21 = vpop.eup %9045  ;;  %v3246_v6 = vsub.f32 1.0, %v9044_v50  ;;  %v3266_v24 = vmul.f32 %v9044_v50, %v3261_v2 }
0x1d5b   :  { %v3247_v32 = vsub.f32 1.0, %v9046_v21  ;;  %v3267_v56 = vmul.f32 %v9046_v21, %v3263_v53 }
0x1db7   :  { %v3173_v43 = vpop.permute.xlu1 %3172 }
0x1db8   :  { %v3177_v28 = vmul.f32 %v3173_v43, %v3167_v20 }
0x1dba   :  { %v3188_v48 = vadd.f32 %v3186_v49, %v3177_v28 }
0x1dbb   :  { %v3251_v39 = vpop.permute.xlu1 %3250  ;;  %v3253_v57 = vpop.permute.xlu0 %3252 }
0x1dbc   :  { %v3256_v52 = vmul.f32 %v3251_v39, %v3246_v6  ;;  %v3257_v26 = vmul.f32 %v3253_v57, %v3247_v32  ;;  %v3272_v37 = vrot.slane %v3188_v48, 7 }
0x1dbe   :  { %v3268_v61 = vadd.f32 %v3266_v24, %v3256_v52  ;;  %v3269_v47 = vadd.f32 %v3267_v56, %v3257_v26 }
0x1dbf   :  { %v3171_v46 = vpop.permute.xlu1 %3170  ;;  %v3180_v5 = vpop.permute.xlu0 %3179 }
0x1dc0   :  { %v3279_v11 = vrot.slane %v3268_v61, 5  ;;  %v3280_v62 = vrot.slane %v3269_v47, 4  ;;  %v4696_v44 = vrot.slane %v3269_v47, 7  ;;  %v3176_v41 = vmul.f32 %v3171_v46, %v3166_v63 }
0x1dc1   :  { %v3185_v38 = vmul.f32 %v11057_v9, %v3180_v5 }
0x1dc2   :  { %v3281_v59 = vsel %vm947_vm10, %v3280_v62, %v3279_v11  ;;  %v11090_v16 = vsel %vm2112_vm11, %v4696_v44, %v3268_v61 }
0x1dc3   :  { %v3187_v8 = vadd.f32 %v3185_v38, %v3176_v41  ;;  %3282 = vrot.lane.b32.xlu0 %v3281_v59, %s9634_s10 }
0x1dc5   :  { %v3273_v33 = vsel %vm947_vm10, %v3272_v37, %v3187_v8 }
0x1dc6   :  { %3274 = vrot.lane.b32.xlu1 %v3273_v33, %s9633_s22 }
0x1e35   :  { %v3283_v13 = vpop.permute.xlu0 %3282 }
0x1e38   :  { %v11095_v22 = vpop.permute.xlu1 %3274 }
0x1e39   :  { %v11099_v0 = vsel %vm726_vm8, %v11095_v22, %v3283_v13 }
0x1e3a   :  { %v3287_v9 = vrot.slane %v11099_v0, 1  ;;  %v3492_v33 = vrot.slane %v11099_v0, 4  ;;  %v3493_v13 = vrot.slane %v11099_v0, 5 }
0x1e3c   :  { %7728 = vmatmul.mubr.msk.f32.vlgmr.msra.gmra.mrb[12].mxu0 %vm510_vm9, %v3287_v9 }
0x1e3d   :  { %8496 = vmatpush1.bf16.msra.mxu0 %v10726_v34  ;;  %3818 = vmatprep.mubr.f32.mxu0 %v9630_v3 }
0x1e3e   :  { %8498 = vmatprep.subr.bf16.mxu0 %v10741_v4 }
0x1e41   :  { %8500 = vmatpush1.bf16.msra.mxu0 %v10752_v36 }
0x1e42   :  { %8502 = vmatprep.subr.bf16.mxu0 %v10754_v30 }
0x1e45   :  { %8504 = vmatpush1.bf16.msra.mxu0 %v10772_v10 }
0x1e46   :  { %8506 = vmatprep.subr.bf16.mxu0 %v10775_v14 }
0x1e49   :  { %8508 = vmatpush1.bf16.msra.mxu0 %v10784_v51 }
0x1e4a   :  { %8526 = vmatprep.subr.bf16.mxu0 %v10718_v23 }
0x1f0f   :  { %v3356_v29 = vpop.f32.mrb[12].mxu0 }
0x1f10   :  { %v3357_v42 = vadd.f32 %v3356_v29, %v10901_v7  ;;  %v3358_v54 = vpop.f32.mrb[13].mxu0 }
0x1f11   :  { %v11114_v35 = vadd.f32 %v3358_v54, %v10904_v1 }
0x1f12   :  { %v3363_v25 = vrot.slane %v3357_v42, 7  ;;  %v3362_v12 = vrot.slane %v3357_v42, 6  ;;  %v3424_v2 = vrot.slane %v3357_v42, 3  ;;  %v3426_v50 = vrot.slane %v3357_v42, 4 }
0x1f13   :  { %v3425_v15 = vrot.slane %v11114_v35, 3  ;;  %v3427_v58 = vrot.slane %v11114_v35, 4 }
0x1f14   :  { %3382 = vrot.lane.b32.xlu1 %v3363_v25, %s9632_s14  ;;  %v3367_v21 = vadd.f32 %v3363_v25, %v10980_v18  ;;  %v3432_v53 = vadd.f32 %v3424_v2, %v10976_v17  ;;  %v3434_v43 = vadd.f32 %v3426_v50, %v10980_v18  ;;  %v3366_v32 = vadd.f32 %v3362_v12, %v10976_v17 }
0x1f15   :  { %3460 = vrot.lane.b32.xlu0 %v3425_v15, %s9632_s14 }
0x1f16   :  { %v7730_v20 = vmul.f32 -1.442695, %v3367_v21  ;;  %v7731_v6 = vmul.f32 -1.442695, %v3432_v53  ;;  %v7733_v28 = vmul.f32 -1.442695, %v3434_v43 }
0x1f17   :  { %v7729_v39 = vmul.f32 -1.442695, %v3366_v32  ;;  %v3433_v32 = vadd.f32 %v3425_v15, %v10989_v19 }
0x1f18   :  { %3462 = vrot.lane.b32.xlu1 %v3427_v58, %s9632_s14  ;;  %9047 = vpow2.f32 %v7730_v20  ;;  %v3412_v20 = vrot.slane %v11099_v0, 7 }
0x1f19   :  { %3380 = vrot.lane.b32.xlu0 %v3362_v12, %s9632_s14  ;;  %9049 = vpow2.f32 %v7731_v6 }
0x1f1a   :  { %9051 = vpow2.f32 %v7733_v28  ;;  %v3435_v28 = vadd.f32 %v3427_v58, %v10994_v45 }
0x1f1b   :  { %9053 = vpow2.f32 %v7729_v39  ;;  %v7732_v39 = vmul.f32 -1.442695, %v3433_v32 }
0x1f22   :  { %v9048_v57 = vpop.eup %9047 }
0x1f23   :  { %v9050_v24 = vpop.eup %9049  ;;  %v3375_v56 = vadd.f32 1.0, %v9048_v57  ;;  %v7734_v57 = vmul.f32 -1.442695, %v3435_v28 }
0x1f24   :  { %v9052_v52 = vpop.eup %9051  ;;  %v3448_v26 = vadd.f32 1.0, %v9050_v24 }
0x1f25   :  { %v9054_v49 = vpop.eup %9053  ;;  %9055 = vrcp.f32 %v3375_v56  ;;  %v3450_v61 = vadd.f32 1.0, %v9052_v52 }
0x1f26   :  { %v3374_v47 = vadd.f32 1.0, %v9054_v49  ;;  %9057 = vrcp.f32 %v3448_v26 }
0x1f27   :  { %9059 = vrcp.f32 %v3450_v61 }
0x1f28   :  { %9061 = vrcp.f32 %v3374_v47 }
0x1f2f   :  { %v11130_v63 = vpop.eup %9055 }
0x1f30   :  { %v9058_v46 = vpop.eup %9057 }
0x1f31   :  { %v9060_v44 = vpop.eup %9059 }
0x1f32   :  { %v11135_v38 = vpop.eup %9061 }
0x1f86   :  { %v3383_v48 = vpop.permute.xlu1 %3382 }
0x1f87   :  { %v3387_v5 = vmul.f32 %v11130_v63, %v3383_v48  ;;  %v3461_v11 = vpop.permute.xlu0 %3460 }
0x1f88   :  { %v3466_v62 = vmul.f32 %v9058_v46, %v3461_v11  ;;  %v3401_v46 = vsub.f32 1.0, %v11130_v63 }
0x1f89   :  { %3392 = vrot.lane.b32.xlu1 %v3387_v5, %s9632_s14 }
0x1f8a   :  { %v3463_v41 = vpop.permute.xlu1 %3462  ;;  %3470 = vrot.lane.b32.xlu0 %v3466_v62, %s9632_s14 }
0x1f8b   :  { %v3467_v59 = vmul.f32 %v9060_v44, %v3463_v41  ;;  %v3381_v37 = vpop.permute.xlu0 %3380 }
0x1f8c   :  { %v3386_v8 = vmul.f32 %v11135_v38, %v3381_v37 }
0x1f8d   :  { %3472 = vrot.lane.b32.xlu1 %v3467_v59, %s9632_s14 }
0x1f8e   :  { %3390 = vrot.lane.b32.xlu0 %v3386_v8, %s9632_s14 }
0x1f91   :  { %3494 = vrot.lane.b32.xlu1 %v3492_v33, %s9633_s22 }
0x1f92   :  { %3415 = vrot.lane.b32.xlu0 %v11099_v0, %s9634_s10 }
0x1f96   :  { %3496 = vrot.lane.b32.xlu0 %v3493_v13, %s9633_s22 }
0x1ffb   :  { %v3393_v9 = vpop.permute.xlu1 %3392 }
0x1ffc   :  { %v3397_v29 = vadd.f32 %v3393_v9, %v10980_v18  ;;  %v3471_v42 = vpop.permute.xlu0 %3470  ;;  %v3400_v9 = vsub.f32 1.0, %v11135_v38 }
0x1ffd   :  { %v3476_v54 = vadd.f32 %v3471_v42, %v10989_v19 }
0x1ffe   :  { %9063 = vtanh.f32 %v3397_v29 }
0x1fff   :  { %v3473_v25 = vpop.permute.xlu1 %3472  ;;  %9065 = vtanh.f32 %v3476_v54 }
0x2000   :  { %v3477_v12 = vadd.f32 %v3473_v25, %v10994_v45  ;;  %v3391_v2 = vpop.permute.xlu0 %3390 }
0x2001   :  { %v3396_v50 = vadd.f32 %v3391_v2, %v10976_v17 }
0x2002   :  { %9067 = vtanh.f32 %v3477_v12 }
0x2003   :  { %9069 = vtanh.f32 %v3396_v50  ;;  %v3495_v49 = vpop.permute.xlu1 %3494 }
0x2004   :  { %9071 = vpow2.f32 %v7732_v39  ;;  %v3416_v26 = vpop.permute.xlu0 %3415 }
0x2005   :  { %9073 = vpow2.f32 %v7734_v57  ;;  %v3420_v8 = vmul.f32 %v11130_v63, %v3416_v26 }
0x2008   :  { %v9064_v21 = vpop.eup %9063  ;;  %v3497_v48 = vpop.permute.xlu0 %3496 }
0x2009   :  { %3406 = vrot.lane.b32.xlu1 %v9064_v21, %s9633_s22  ;;  %v9066_v53 = vpop.eup %9065 }
0x200c   :  { %v9068_v43 = vpop.eup %9067 }
0x200d   :  { %3484 = vrot.lane.b32.xlu1 %v9066_v53, %s9633_s22  ;;  %3486 = vrot.lane.b32.xlu0 %v9068_v43, %s9633_s22  ;;  %v9070_v6 = vpop.eup %9069 }
0x200e   :  { %v9072_v24 = vpop.eup %9071 }
0x200f   :  { %v9074_v56 = vpop.eup %9073  ;;  %v3449_v0 = vadd.f32 1.0, %v9072_v24 }
0x2010   :  { %v3451_v52 = vadd.f32 1.0, %v9074_v56 }
0x2011   :  { %3413 = vrot.lane.b32.xlu0 %v3412_v20, %s9634_s10  ;;  %3404 = vrot.lane.b32.xlu1 %v9070_v6, %s9633_s22  ;;  %9075 = vrcp.f32 %v3449_v0 }
0x2012   :  { %9077 = vrcp.f32 %v3451_v52 }
0x201b   :  { %v9076_v61 = vpop.eup %9075 }
0x201c   :  { %v9078_v47 = vpop.eup %9077  ;;  %v3480_v35 = vsub.f32 1.0, %v9076_v61  ;;  %v3500_v44 = vmul.f32 %v9076_v61, %v3495_v49 }
0x201d   :  { %v3481_v58 = vsub.f32 1.0, %v9078_v47  ;;  %v3501_v41 = vmul.f32 %v9078_v47, %v3497_v48 }
0x207b   :  { %v3407_v15 = vpop.permute.xlu1 %3406 }
0x207c   :  { %v3411_v5 = vmul.f32 %v3407_v15, %v3401_v46 }
0x207e   :  { %v3422_v29 = vadd.f32 %v3420_v8, %v3411_v5 }
0x207f   :  { %v3485_v11 = vpop.permute.xlu1 %3484  ;;  %v3487_v62 = vpop.permute.xlu0 %3486 }
0x2080   :  { %v3490_v59 = vmul.f32 %v3485_v11, %v3480_v35  ;;  %v3491_v37 = vmul.f32 %v3487_v62, %v3481_v58  ;;  %v3506_v20 = vrot.slane %v3422_v29, 7 }
0x2082   :  { %v3502_v33 = vadd.f32 %v3500_v44, %v3490_v59  ;;  %v3503_v13 = vadd.f32 %v3501_v41, %v3491_v37 }
0x2083   :  { %v3405_v42 = vpop.permute.xlu1 %3404  ;;  %v3414_v54 = vpop.permute.xlu0 %3413 }
0x2084   :  { %v3513_v25 = vrot.slane %v3502_v33, 3  ;;  %v3514_v12 = vrot.slane %v3503_v13, 2  ;;  %v4690_v2 = vrot.slane %v3503_v13, 7  ;;  %v3410_v50 = vmul.f32 %v3405_v42, %v3400_v9 }
0x2085   :  { %v3419_v21 = vmul.f32 %v11135_v38, %v3414_v54 }
0x2086   :  { %v3515_v53 = vsel %vm1182_vm12, %v3514_v12, %v3513_v25  ;;  %v11168_v43 = vsel %vm1880_vm13, %v4690_v2, %v3502_v33 }
0x2087   :  { %v3421_v63 = vadd.f32 %v3419_v21, %v3410_v50  ;;  %3516 = vrot.lane.b32.xlu0 %v3515_v53, %s9634_s10 }
0x2089   :  { %v3507_v6 = vsel %vm1182_vm12, %v3506_v20, %v3421_v63 }
0x208a   :  { %3508 = vrot.lane.b32.xlu1 %v3507_v6, %s9633_s22 }
0x20f9   :  { %v3517_v32 = vpop.permute.xlu0 %3516 }
0x20fc   :  { %v11173_v28 = vpop.permute.xlu1 %3508 }
0x20fd   :  { %v11177_v39 = vsel %vm726_vm8, %v11173_v28, %v3517_v32 }
0x20fe   :  { %v3521_v38 = vrot.slane %v11177_v39, 2  ;;  %v3724_v6 = vrot.slane %v11177_v39, 6  ;;  %v3646_v32 = vrot.slane %v11177_v39, 7 }
0x2100   :  { %7735 = vmatmul.mubr.msk.f32.vlgmr.msra.gmra.mrb[18].mxu1 %vm510_vm9, %v3521_v38 }
0x2101   :  { %8512 = vmatpush1.bf16.msra.mxu1 %v10726_v34  ;;  %4049 = vmatprep.mubr.f32.mxu1 %v9630_v3 }
0x2102   :  { %8514 = vmatprep.subr.bf16.mxu1 %v10741_v4 }
0x2105   :  { %8516 = vmatpush1.bf16.msra.mxu1 %v10752_v36 }
0x2106   :  { %8518 = vmatprep.subr.bf16.mxu1 %v10754_v30 }
0x2109   :  { %8520 = vmatpush1.bf16.msra.mxu1 %v10772_v10 }
0x210a   :  { %8522 = vmatprep.subr.bf16.mxu1 %v10775_v14 }
0x210d   :  { %8524 = vmatpush1.bf16.msra.mxu1 %v10784_v51 }
0x210e   :  { %8542 = vmatprep.subr.bf16.mxu1 %v10718_v23 }
0x21d3   :  { %v3590_v57 = vpop.f32.mrb[18].mxu1 }
0x21d4   :  { %v3591_v24 = vadd.f32 %v3590_v57, %v10901_v7  ;;  %v3592_v56 = vpop.f32.mrb[19].mxu1 }
0x21d5   :  { %v11192_v0 = vadd.f32 %v3592_v56, %v10904_v1 }
0x21d6   :  { %v3597_v52 = vrot.slane %v3591_v24, 6  ;;  %v3596_v49 = vrot.slane %v3591_v24, 5  ;;  %v3658_v23 = vrot.slane %v3591_v24, 4 }
0x21d7   :  { %v3659_v26 = vrot.slane %v11192_v0, 4  ;;  %v3660_v61 = vrot.slane %v11192_v0, 5 }
0x21d8   :  { %3616 = vrot.lane.b32.xlu1 %v3597_v52, %s9632_s14  ;;  %v3601_v47 = vadd.f32 %v3597_v52, %v10980_v18  ;;  %v3664_v48 = vadd.f32 %v3658_v23, %v10976_v17  ;;  %v3600_v15 = vadd.f32 %v3596_v49, %v10976_v17  ;;  %v3666_v35 = vadd.f32 %v3596_v49, %v10980_v18 }
0x21d9   :  { %3692 = vrot.lane.b32.xlu0 %v3659_v26, %s9632_s14 }
0x21da   :  { %v7737_v46 = vmul.f32 -1.442695, %v3601_v47  ;;  %v7738_v58 = vmul.f32 -1.442695, %v3664_v48  ;;  %v7736_v5 = vmul.f32 -1.442695, %v3600_v15 }
0x21db   :  { %v7740_v11 = vmul.f32 -1.442695, %v3666_v35  ;;  %v3665_v35 = vadd.f32 %v3659_v26, %v10989_v19 }
0x21dc   :  { %3614 = vrot.lane.b32.xlu1 %v3596_v49, %s9632_s14  ;;  %9079 = vpow2.f32 %v7737_v46 }
0x21dd   :  { %3694 = vrot.lane.b32.xlu0 %v3660_v61, %s9632_s14  ;;  %9081 = vpow2.f32 %v7738_v58  ;;  %v3667_v58 = vadd.f32 %v3660_v61, %v10994_v45 }
0x21de   :  { %9083 = vpow2.f32 %v7736_v5  ;;  %v7739_v5 = vmul.f32 -1.442695, %v3665_v35 }
0x21df   :  { %9085 = vpow2.f32 %v7740_v11  ;;  %v7741_v11 = vmul.f32 -1.442695, %v3667_v58 }
0x21e6   :  { %v9080_v62 = vpop.eup %9079 }
0x21e7   :  { %v9082_v44 = vpop.eup %9081  ;;  %v3609_v41 = vadd.f32 1.0, %v9080_v62 }
0x21e8   :  { %v9084_v59 = vpop.eup %9083  ;;  %v3680_v37 = vadd.f32 1.0, %v9082_v44 }
0x21e9   :  { %v9086_v8 = vpop.eup %9085  ;;  %v3608_v33 = vadd.f32 1.0, %v9084_v59  ;;  %9087 = vrcp.f32 %v3609_v41 }
0x21ea   :  { %9089 = vrcp.f32 %v3680_v37  ;;  %v3682_v13 = vadd.f32 1.0, %v9086_v8 }
0x21eb   :  { %9091 = vrcp.f32 %v3608_v33 }
0x21ec   :  { %9093 = vrcp.f32 %v3682_v13 }
0x21f3   :  { %v9088_v9 = vpop.eup %9087 }
0x21f4   :  { %v9090_v42 = vpop.eup %9089  ;;  %v3635_v33 = vsub.f32 1.0, %v9088_v9 }
0x21f5   :  { %v9092_v2 = vpop.eup %9091 }
0x21f6   :  { %v9094_v21 = vpop.eup %9093  ;;  %v3634_v0 = vsub.f32 1.0, %v9092_v2 }
0x224a   :  { %v3617_v29 = vpop.permute.xlu1 %3616 }
0x224b   :  { %v3621_v54 = vmul.f32 %v9088_v9, %v3617_v29  ;;  %v3693_v25 = vpop.permute.xlu0 %3692 }
0x224c   :  { %v3698_v12 = vmul.f32 %v9090_v42, %v3693_v25 }
0x224d   :  { %3626 = vrot.lane.b32.xlu1 %v3621_v54, %s9632_s14 }
0x224e   :  { %3702 = vrot.lane.b32.xlu0 %v3698_v12, %s9632_s14  ;;  %v3615_v50 = vpop.permute.xlu1 %3614 }
0x224f   :  { %v3620_v53 = vmul.f32 %v9092_v2, %v3615_v50  ;;  %v3695_v20 = vpop.permute.xlu0 %3694 }
0x2250   :  { %v3699_v63 = vmul.f32 %v9094_v21, %v3695_v20 }
0x2251   :  { %3624 = vrot.lane.b32.xlu1 %v3620_v53, %s9632_s14 }
0x2252   :  { %3704 = vrot.lane.b32.xlu0 %v3699_v63, %s9632_s14 }
0x2256   :  { %3649 = vrot.lane.b32.xlu0 %v11177_v39, %s9634_s10 }
0x225a   :  { %3725 = vrot.lane.b32.xlu0 %v3724_v6, %s9633_s22 }
0x225e   :  { %3647 = vrot.lane.b32.xlu0 %v3646_v32, %s9634_s10 }
0x2262   :  { %3727 = vrot.lane.b32.xlu0 %v3646_v32, %s9633_s22 }
0x22bf   :  { %v3627_v38 = vpop.permute.xlu1 %3626 }
0x22c0   :  { %v3631_v57 = vadd.f32 %v3627_v38, %v10980_v18  ;;  %v3703_v24 = vpop.permute.xlu0 %3702 }
0x22c1   :  { %v3708_v49 = vadd.f32 %v3703_v24, %v10989_v19 }
0x22c2   :  { %9095 = vtanh.f32 %v3631_v57 }
0x22c3   :  { %v3625_v56 = vpop.permute.xlu1 %3624 }
0x22c4   :  { %v3630_v52 = vadd.f32 %v3625_v56, %v10976_v17  ;;  %v3705_v23 = vpop.permute.xlu0 %3704 }
0x22c5   :  { %v3709_v47 = vadd.f32 %v3705_v23, %v10994_v45 }
0x22c6   :  { %9097 = vtanh.f32 %v3630_v52 }
0x22c7   :  { %9099 = vtanh.f32 %v3708_v49 }
0x22c8   :  { %9101 = vtanh.f32 %v3709_v47  ;;  %v3650_v41 = vpop.permute.xlu0 %3649 }
0x22c9   :  { %9103 = vpow2.f32 %v7739_v5  ;;  %v3654_v29 = vmul.f32 %v9088_v9, %v3650_v41 }
0x22ca   :  { %9105 = vpow2.f32 %v7741_v11 }
0x22cc   :  { %v9096_v39 = vpop.eup %9095  ;;  %v3726_v8 = vpop.permute.xlu0 %3725 }
0x22cd   :  { %3640 = vrot.lane.b32.xlu1 %v9096_v39, %s9633_s22 }
0x22d0   :  { %v9098_v48 = vpop.eup %9097  ;;  %v3648_v42 = vpop.permute.xlu0 %3647 }
0x22d1   :  { %3638 = vrot.lane.b32.xlu1 %v9098_v48, %s9633_s22  ;;  %v9100_v15 = vpop.eup %9099  ;;  %v3653_v12 = vmul.f32 %v9092_v2, %v3648_v42 }
0x22d2   :  { %v9102_v46 = vpop.eup %9101 }
0x22d3   :  { %v9104_v62 = vpop.eup %9103 }
0x22d4   :  { %v3681_v44 = vadd.f32 1.0, %v9104_v62  ;;  %v9106_v59 = vpop.eup %9105  ;;  %v3728_v24 = vpop.permute.xlu0 %3727 }
0x22d5   :  { %3716 = vrot.lane.b32.xlu1 %v9100_v15, %s9633_s22  ;;  %v3683_v37 = vadd.f32 1.0, %v9106_v59 }
0x22d6   :  { %9107 = vrcp.f32 %v3681_v44 }
0x22d7   :  { %9109 = vrcp.f32 %v3683_v37 }
0x22d9   :  { %3718 = vrot.lane.b32.xlu1 %v9102_v46, %s9633_s22 }
0x22e0   :  { %v9108_v61 = vpop.eup %9107 }
0x22e1   :  { %v3712_v20 = vsub.f32 1.0, %v9108_v61  ;;  %v9110_v63 = vpop.eup %9109  ;;  %v3731_v32 = vmul.f32 %v9108_v61, %v3726_v8 }
0x22e2   :  { %v3713_v56 = vsub.f32 1.0, %v9110_v63  ;;  %v3732_v49 = vmul.f32 %v9110_v63, %v3728_v24 }
0x233f   :  { %v3641_v13 = vpop.permute.xlu1 %3640 }
0x2340   :  { %v3645_v26 = vmul.f32 %v3641_v13, %v3635_v33 }
0x2342   :  { %v3656_v54 = vadd.f32 %v3654_v29, %v3645_v26 }
0x2343   :  { %v3639_v25 = vpop.permute.xlu1 %3638 }
0x2344   :  { %v3644_v50 = vmul.f32 %v3639_v25, %v3634_v0  ;;  %v3737_v21 = vrot.slane %v3656_v54, 7 }
0x2346   :  { %v3655_v53 = vadd.f32 %v3653_v12, %v3644_v50 }
0x2347   :  { %v3717_v6 = vpop.permute.xlu1 %3716 }
0x2348   :  { %v3722_v38 = vmul.f32 %v3717_v6, %v3712_v20  ;;  %v3738_v57 = vsel %vm1414_vm14, %v3737_v21, %v3655_v53 }
0x2349   :  { %3739 = vrot.lane.b32.xlu1 %v3738_v57, %s9633_s22 }
0x234a   :  { %v3733_v9 = vadd.f32 %v3731_v32, %v3722_v38 }
0x234b   :  { %v3719_v52 = vpop.permute.xlu1 %3718 }
0x234c   :  { %v3723_v23 = vmul.f32 %v3719_v52, %v3713_v56  ;;  %v3744_v47 = vrot.slane %v3733_v9, 1 }
0x234e   :  { %v3734_v2 = vadd.f32 %v3732_v49, %v3723_v23 }
0x2350   :  { %v4684_v39 = vrot.slane %v3734_v2, 7  ;;  %v3745_v48 = vsel %vm1414_vm14, %v3734_v2, %v3744_v47 }
0x2351   :  { %3746 = vrot.lane.b32.xlu0 %v3745_v48, %s9634_s10 }
0x2352   :  { %v11238_v15 = vsel %vm1645_vm15, %v4684_v39, %v3733_v9 }
0x23bb   :  { %v11240_v46 = vpop.permute.xlu1 %3739 }
0x23c3   :  { %v3747_v35 = vpop.permute.xlu0 %3746 }
0x23c4   :  { %v11244_v58 = vsel %vm726_vm8, %v11240_v46, %v3747_v35 }
0x23c5   :  { %v3751_v5 = vrot.slane %v11244_v58, 3 }
0x23c7   :  { %7742 = vmatmul.mubr.msk.f32.vlgmr.msra.gmra.mrb[14].mxu0 %vm510_vm9, %v3751_v5  ;;  %v3954_v5 = vrot.slane %v11244_v58, 1 }
0x23c8   :  { %8528 = vmatpush1.bf16.msra.mxu0 %v10726_v34  ;;  %4283 = vmatprep.mubr.f32.mxu0 %v9630_v3 }
0x23c9   :  { %8530 = vmatprep.subr.bf16.mxu0 %v10741_v4 }
0x23cc   :  { %8532 = vmatpush1.bf16.msra.mxu0 %v10752_v36 }
0x23cd   :  { %8534 = vmatprep.subr.bf16.mxu0 %v10754_v30 }
0x23d0   :  { %8536 = vmatpush1.bf16.msra.mxu0 %v10772_v10 }
0x23d1   :  { %8538 = vmatprep.subr.bf16.mxu0 %v10775_v14 }
0x23d4   :  { %8540 = vmatpush1.bf16.msra.mxu0 %v10784_v51 }
0x249a   :  { %v3820_v11 = vpop.f32.mrb[14].mxu0 }
0x249b   :  { %v3821_v62 = vadd.f32 %v3820_v11, %v10901_v7  ;;  %v3822_v44 = vpop.f32.mrb[15].mxu0 }
0x249c   :  { %v11258_v41 = vadd.f32 %v3822_v44, %v10904_v1 }
0x249d   :  { %v3827_v59 = vrot.slane %v3821_v62, 5  ;;  %v3826_v33 = vrot.slane %v3821_v62, 4  ;;  %v3889_v29 = vrot.slane %v3821_v62, 6 }
0x249e   :  { %v3888_v37 = vrot.slane %v11258_v41, 5  ;;  %v3890_v8 = vrot.slane %v11258_v41, 6 }
0x249f   :  { %3846 = vrot.lane.b32.xlu1 %v3827_v59, %s9632_s14  ;;  %v3831_v13 = vadd.f32 %v3827_v59, %v10980_v18  ;;  %v3894_v26 = vadd.f32 %v3827_v59, %v10976_v17  ;;  %v3896_v54 = vadd.f32 %v3889_v29, %v10980_v18  ;;  %v3830_v0 = vadd.f32 %v3826_v33, %v10976_v17 }
0x24a0   :  { %3922 = vrot.lane.b32.xlu0 %v3888_v37, %s9632_s14 }
0x24a1   :  { %v7744_v42 = vmul.f32 -1.442695, %v3831_v13  ;;  %v7745_v61 = vmul.f32 -1.442695, %v3894_v26  ;;  %v7747_v25 = vmul.f32 -1.442695, %v3896_v54 }
0x24a2   :  { %v7743_v12 = vmul.f32 -1.442695, %v3830_v0 }
0x24a3   :  { %3924 = vrot.lane.b32.xlu1 %v3890_v8, %s9632_s14  ;;  %9111 = vpow2.f32 %v7744_v42 }
0x24a4   :  { %3844 = vrot.lane.b32.xlu0 %v3826_v33, %s9632_s14  ;;  %9113 = vpow2.f32 %v7745_v61  ;;  %v3876_v61 = vrot.slane %v11244_v58, 7 }
0x24a5   :  { %9115 = vpow2.f32 %v7747_v25 }
0x24a6   :  { %9117 = vpow2.f32 %v7743_v12  ;;  %v3895_v12 = vadd.f32 %v3888_v37, %v10989_v19 }
0x24ad   :  { %v9112_v50 = vpop.eup %9111 }
0x24ae   :  { %v9114_v21 = vpop.eup %9113  ;;  %v3839_v53 = vadd.f32 1.0, %v9112_v50  ;;  %v3897_v50 = vadd.f32 %v3890_v8, %v10994_v45 }
0x24af   :  { %v9116_v20 = vpop.eup %9115  ;;  %v3910_v63 = vadd.f32 1.0, %v9114_v21  ;;  %v7746_v21 = vmul.f32 -1.442695, %v3895_v12 }
0x24b0   :  { %v9118_v6 = vpop.eup %9117  ;;  %9119 = vrcp.f32 %v3839_v53  ;;  %v3912_v32 = vadd.f32 1.0, %v9116_v20  ;;  %v7748_v53 = vmul.f32 -1.442695, %v3897_v50 }
0x24b1   :  { %v3838_v38 = vadd.f32 1.0, %v9118_v6  ;;  %9121 = vrcp.f32 %v3910_v63 }
0x24b2   :  { %9123 = vrcp.f32 %v3912_v32 }
0x24b3   :  { %9125 = vrcp.f32 %v3838_v38 }
0x24ba   :  { %v11274_v57 = vpop.eup %9119 }
0x24bb   :  { %v9122_v9 = vpop.eup %9121 }
0x24bc   :  { %v9124_v23 = vpop.eup %9123 }
0x24bd   :  { %v11279_v2 = vpop.eup %9125 }
0x2511   :  { %v3847_v24 = vpop.permute.xlu1 %3846 }
0x2512   :  { %v3851_v56 = vmul.f32 %v11274_v57, %v3847_v24  ;;  %v3923_v52 = vpop.permute.xlu0 %3922 }
0x2513   :  { %v3928_v49 = vmul.f32 %v9122_v9, %v3923_v52  ;;  %v3865_v52 = vsub.f32 1.0, %v11274_v57 }
0x2514   :  { %3856 = vrot.lane.b32.xlu1 %v3851_v56, %s9632_s14 }
0x2515   :  { %v3925_v47 = vpop.permute.xlu1 %3924  ;;  %3932 = vrot.lane.b32.xlu0 %v3928_v49, %s9632_s14 }
0x2516   :  { %v3929_v39 = vmul.f32 %v9124_v23, %v3925_v47  ;;  %v3845_v48 = vpop.permute.xlu0 %3844 }
0x2517   :  { %v3850_v35 = vmul.f32 %v11279_v2, %v3845_v48 }
0x2518   :  { %3934 = vrot.lane.b32.xlu1 %v3929_v39, %s9632_s14 }
0x2519   :  { %3854 = vrot.lane.b32.xlu0 %v3850_v35, %s9632_s14 }
0x251c   :  { %3955 = vrot.lane.b32.xlu1 %v11244_v58, %s9633_s22 }
0x251d   :  { %3879 = vrot.lane.b32.xlu0 %v11244_v58, %s9634_s10 }
0x2521   :  { %3957 = vrot.lane.b32.xlu0 %v3954_v5, %s9633_s22 }
0x2586   :  { %v3857_v11 = vpop.permute.xlu1 %3856 }
0x2587   :  { %v3861_v62 = vadd.f32 %v3857_v11, %v10980_v18  ;;  %v3933_v44 = vpop.permute.xlu0 %3932 }
0x2588   :  { %v3938_v59 = vadd.f32 %v3933_v44, %v10989_v19 }
0x2589   :  { %9127 = vtanh.f32 %v3861_v62 }
0x258a   :  { %v3935_v33 = vpop.permute.xlu1 %3934  ;;  %9129 = vtanh.f32 %v3938_v59  ;;  %v3864_v59 = vsub.f32 1.0, %v11279_v2 }
0x258b   :  { %v3939_v13 = vadd.f32 %v3935_v33, %v10994_v45  ;;  %v3855_v29 = vpop.permute.xlu0 %3854 }
0x258c   :  { %v3860_v26 = vadd.f32 %v3855_v29, %v10976_v17 }
0x258d   :  { %9131 = vtanh.f32 %v3939_v13 }
0x258e   :  { %9133 = vtanh.f32 %v3860_v26  ;;  %v3956_v38 = vpop.permute.xlu1 %3955 }
0x258f   :  { %9135 = vpow2.f32 %v7746_v21  ;;  %v3880_v32 = vpop.permute.xlu0 %3879 }
0x2590   :  { %9137 = vpow2.f32 %v7748_v53  ;;  %v3884_v11 = vmul.f32 %v11274_v57, %v3880_v32 }
0x2593   :  { %v9128_v42 = vpop.eup %9127  ;;  %v3958_v56 = vpop.permute.xlu0 %3957 }
0x2594   :  { %3870 = vrot.lane.b32.xlu1 %v9128_v42, %s9633_s22  ;;  %v9130_v54 = vpop.eup %9129 }
0x2597   :  { %v9132_v0 = vpop.eup %9131 }
0x2598   :  { %3946 = vrot.lane.b32.xlu1 %v9130_v54, %s9633_s22  ;;  %3948 = vrot.lane.b32.xlu0 %v9132_v0, %s9633_s22  ;;  %v9134_v25 = vpop.eup %9133 }
0x2599   :  { %v9136_v20 = vpop.eup %9135 }
0x259a   :  { %v9138_v63 = vpop.eup %9137  ;;  %v3911_v58 = vadd.f32 1.0, %v9136_v20 }
0x259b   :  { %v3913_v6 = vadd.f32 1.0, %v9138_v63 }
0x259c   :  { %3877 = vrot.lane.b32.xlu0 %v3876_v61, %s9634_s10  ;;  %3868 = vrot.lane.b32.xlu1 %v9134_v25, %s9633_s22  ;;  %9139 = vrcp.f32 %v3911_v58 }
0x259d   :  { %9141 = vrcp.f32 %v3913_v6 }
0x25a6   :  { %v9140_v24 = vpop.eup %9139 }
0x25a7   :  { %v9142_v9 = vpop.eup %9141  ;;  %v3942_v41 = vsub.f32 1.0, %v9140_v24  ;;  %v3961_v39 = vmul.f32 %v9140_v24, %v3956_v38 }
0x25a8   :  { %v3943_v8 = vsub.f32 1.0, %v9142_v9  ;;  %v3962_v48 = vmul.f32 %v9142_v9, %v3958_v56 }
0x2606   :  { %v3871_v37 = vpop.permute.xlu1 %3870 }
0x2607   :  { %v3875_v49 = vmul.f32 %v3871_v37, %v3865_v52 }
0x2609   :  { %v3886_v33 = vadd.f32 %v3884_v11, %v3875_v49 }
0x260a   :  { %v3947_v23 = vpop.permute.xlu1 %3946  ;;  %v3949_v47 = vpop.permute.xlu0 %3948 }
0x260b   :  { %v3952_v35 = vmul.f32 %v3947_v23, %v3942_v41  ;;  %v3953_v5 = vmul.f32 %v3949_v47, %v3943_v8  ;;  %v3967_v50 = vrot.slane %v3886_v33, 7 }
0x260d   :  { %v3963_v62 = vadd.f32 %v3961_v39, %v3952_v35  ;;  %v3964_v44 = vadd.f32 %v3962_v48, %v3953_v5 }
0x260e   :  { %v3869_v13 = vpop.permute.xlu1 %3868  ;;  %v3878_v29 = vpop.permute.xlu0 %3877 }
0x260f   :  { %v3974_v26 = vrot.slane %v3963_v62, 7  ;;  %v3975_v42 = vrot.slane %v3964_v44, 6  ;;  %v4678_v54 = vrot.slane %v3964_v44, 7  ;;  %v3874_v0 = vmul.f32 %v3869_v13, %v3864_v59 }
0x2610   :  { %v3883_v61 = vmul.f32 %v11279_v2, %v3878_v29 }
0x2611   :  { %v3976_v25 = vsel %vm1645_vm15, %v3975_v42, %v3974_v26  ;;  %v11312_v12 = vsel %vm1414_vm14, %v4678_v54, %v3963_v62 }
0x2612   :  { %v3885_v57 = vadd.f32 %v3883_v61, %v3874_v0  ;;  %3977 = vrot.lane.b32.xlu0 %v3976_v25, %s9634_s10 }
0x2614   :  { %v3968_v21 = vsel %vm1645_vm15, %v3967_v50, %v3885_v57 }
0x2615   :  { %3969 = vrot.lane.b32.xlu1 %v3968_v21, %s9633_s22 }
0x2684   :  { %v3978_v53 = vpop.permute.xlu0 %3977 }
0x2687   :  { %v11317_v20 = vpop.permute.xlu1 %3969 }
0x2688   :  { %v11321_v63 = vsel %vm726_vm8, %v11317_v20, %v3978_v53 }
0x2689   :  { %v3982_v2 = vrot.slane %v11321_v63, 4  ;;  %v4187_v50 = vrot.slane %v11321_v63, 2  ;;  %v4188_v57 = vrot.slane %v11321_v63, 3 }
0x268b   :  { %7749 = vmatmul.mubr.msk.f32.vlgmr.msra.gmra.mrb[20].mxu1 %vm510_vm9, %v3982_v2 }
0x268c   :  { %8544 = vmatpush1.bf16.msra.mxu1 %v10726_v34  ;;  %4514 = vmatprep.mubr.f32.mxu1 %v9630_v3 }
0x268d   :  { %8546 = vmatprep.subr.bf16.mxu1 %v10741_v4 }
0x2690   :  { %8548 = vmatpush1.bf16.msra.mxu1 %v10752_v36 }
0x2691   :  { %8550 = vmatprep.subr.bf16.mxu1 %v10754_v30 }
0x2694   :  { %8552 = vmatpush1.bf16.msra.mxu1 %v10772_v10 }
0x2695   :  { %8554 = vmatprep.subr.bf16.mxu1 %v10775_v14 }
0x2698   :  { %8556 = vmatpush1.bf16.msra.mxu1 %v10784_v51 }
0x2699   :  { %8007 = vmatprep.subr.mxu1 %v9630_v3 }
0x275e   :  { %v4051_v58 = vpop.f32.mrb[20].mxu1 }
0x275f   :  { %v4052_v6 = vadd.f32 %v4051_v58, %v10901_v7  ;;  %v4053_v34 = vpop.f32.mrb[21].mxu1 }
0x2760   :  { %v11336_v32 = vadd.f32 %v4053_v34, %v10904_v1 }
0x2761   :  { %v4058_v4 = vrot.slane %v4052_v6, 4  ;;  %v4057_v10 = vrot.slane %v4052_v6, 3  ;;  %v4119_v14 = vrot.slane %v4052_v6, 6  ;;  %v4121_v51 = vrot.slane %v4052_v6, 7 }
0x2762   :  { %v4120_v36 = vrot.slane %v11336_v32, 6  ;;  %v4122_v30 = vrot.slane %v11336_v32, 7 }
0x2763   :  { %4077 = vrot.lane.b32.xlu1 %v4058_v4, %s9632_s14  ;;  %v4062_v38 = vadd.f32 %v4058_v4, %v10980_v18  ;;  %v4127_v24 = vadd.f32 %v4119_v14, %v10976_v17  ;;  %v4129_v9 = vadd.f32 %v4121_v51, %v10980_v18  ;;  %v4061_v52 = vadd.f32 %v4057_v10, %v10976_v17 }
0x2764   :  { %4155 = vrot.lane.b32.xlu0 %v4120_v36, %s9632_s14 }
0x2765   :  { %v7751_v56 = vmul.f32 -1.442695, %v4062_v38  ;;  %v7752_v37 = vmul.f32 -1.442695, %v4127_v24  ;;  %v7754_v41 = vmul.f32 -1.442695, %v4129_v9 }
0x2766   :  { %v7750_v8 = vmul.f32 -1.442695, %v4061_v52  ;;  %v4107_v24 = vrot.slane %v11321_v63, 7 }
0x2767   :  { %4157 = vrot.lane.b32.xlu1 %v4122_v30, %s9632_s14  ;;  %9143 = vpow2.f32 %v7751_v56  ;;  %v4128_v56 = vadd.f32 %v4120_v36, %v10989_v19 }
0x2768   :  { %4075 = vrot.lane.b32.xlu0 %v4057_v10, %s9632_s14  ;;  %9145 = vpow2.f32 %v7752_v37  ;;  %v4130_v37 = vadd.f32 %v4122_v30, %v10994_v45 }
0x2769   :  { %9147 = vpow2.f32 %v7754_v41  ;;  %v7753_v52 = vmul.f32 -1.442695, %v4128_v56 }
0x276a   :  { %9149 = vpow2.f32 %v7750_v8  ;;  %v7755_v41 = vmul.f32 -1.442695, %v4130_v37 }
0x2771   :  { %v9144_v49 = vpop.eup %9143 }
0x2772   :  { %v9146_v23 = vpop.eup %9145  ;;  %v4070_v47 = vadd.f32 1.0, %v9144_v49 }
0x2773   :  { %v9148_v39 = vpop.eup %9147  ;;  %v4143_v48 = vadd.f32 1.0, %v9146_v23 }
0x2774   :  { %v9150_v35 = vpop.eup %9149  ;;  %9151 = vrcp.f32 %v4070_v47  ;;  %v4145_v5 = vadd.f32 1.0, %v9148_v39 }
0x2775   :  { %v4069_v11 = vadd.f32 1.0, %v9150_v35  ;;  %9153 = vrcp.f32 %v4143_v48 }
0x2776   :  { %9155 = vrcp.f32 %v4145_v5 }
0x2777   :  { %9157 = vrcp.f32 %v4069_v11 }
0x277e   :  { %v11352_v62 = vpop.eup %9151 }
0x277f   :  { %v9154_v59 = vpop.eup %9153  ;;  %v4096_v11 = vsub.f32 1.0, %v11352_v62 }
0x2780   :  { %v9156_v26 = vpop.eup %9155 }
0x2781   :  { %v11357_v54 = vpop.eup %9157 }
0x27d5   :  { %v4078_v44 = vpop.permute.xlu1 %4077 }
0x27d6   :  { %v4082_v33 = vmul.f32 %v11352_v62, %v4078_v44  ;;  %v4156_v13 = vpop.permute.xlu0 %4155 }
0x27d7   :  { %v4161_v29 = vmul.f32 %v9154_v59, %v4156_v13 }
0x27d8   :  { %4087 = vrot.lane.b32.xlu1 %v4082_v33, %s9632_s14 }
0x27d9   :  { %v4158_v42 = vpop.permute.xlu1 %4157  ;;  %4165 = vrot.lane.b32.xlu0 %v4161_v29, %s9632_s14 }
0x27da   :  { %v4162_v0 = vmul.f32 %v9156_v26, %v4158_v42  ;;  %v4076_v61 = vpop.permute.xlu0 %4075 }
0x27db   :  { %v4081_v25 = vmul.f32 %v11357_v54, %v4076_v61 }
0x27dc   :  { %4167 = vrot.lane.b32.xlu1 %v4162_v0, %s9632_s14 }
0x27dd   :  { %4085 = vrot.lane.b32.xlu0 %v4081_v25, %s9632_s14 }
0x27e0   :  { %4189 = vrot.lane.b32.xlu1 %v4187_v50, %s9633_s22  ;;  %v4095_v50 = vsub.f32 1.0, %v11357_v54 }
0x27e1   :  { %4110 = vrot.lane.b32.xlu0 %v11321_v63, %s9634_s10 }
0x27e5   :  { %4191 = vrot.lane.b32.xlu0 %v4188_v57, %s9633_s22 }
0x284a   :  { %v4088_v21 = vpop.permute.xlu1 %4087 }
0x284b   :  { %v4092_v53 = vadd.f32 %v4088_v21, %v10980_v18  ;;  %v4166_v2 = vpop.permute.xlu0 %4165 }
0x284c   :  { %v4171_v58 = vadd.f32 %v4166_v2, %v10989_v19 }
0x284d   :  { %9159 = vtanh.f32 %v4092_v53 }
0x284e   :  { %v4168_v6 = vpop.permute.xlu1 %4167  ;;  %9161 = vtanh.f32 %v4171_v58 }
0x284f   :  { %v4172_v34 = vadd.f32 %v4168_v6, %v10994_v45  ;;  %v4086_v4 = vpop.permute.xlu0 %4085 }
0x2850   :  { %v4091_v10 = vadd.f32 %v4086_v4, %v10976_v17 }
0x2851   :  { %9163 = vtanh.f32 %v4172_v34 }
0x2852   :  { %9165 = vtanh.f32 %v4091_v10  ;;  %v4190_v39 = vpop.permute.xlu1 %4189 }
0x2853   :  { %9167 = vpow2.f32 %v7753_v52  ;;  %v4111_v47 = vpop.permute.xlu0 %4110 }
0x2854   :  { %9169 = vpow2.f32 %v7755_v41  ;;  %v4115_v0 = vmul.f32 %v11352_v62, %v4111_v47 }
0x2857   :  { %v9160_v14 = vpop.eup %9159  ;;  %v4192_v5 = vpop.permute.xlu0 %4191 }
0x2858   :  { %4101 = vrot.lane.b32.xlu1 %v9160_v14, %s9633_s22  ;;  %v9162_v51 = vpop.eup %9161 }
0x285b   :  { %v9164_v38 = vpop.eup %9163 }
0x285c   :  { %4179 = vrot.lane.b32.xlu1 %v9162_v51, %s9633_s22  ;;  %4181 = vrot.lane.b32.xlu0 %v9164_v38, %s9633_s22  ;;  %v9166_v9 = vpop.eup %9165 }
0x285d   :  { %v9168_v8 = vpop.eup %9167 }
0x285e   :  { %v9170_v49 = vpop.eup %9169  ;;  %v4144_v63 = vadd.f32 1.0, %v9168_v8 }
0x285f   :  { %v4146_v23 = vadd.f32 1.0, %v9170_v49 }
0x2860   :  { %4108 = vrot.lane.b32.xlu0 %v4107_v24, %s9634_s10  ;;  %4099 = vrot.lane.b32.xlu1 %v9166_v9, %s9633_s22  ;;  %9171 = vrcp.f32 %v4144_v63 }
0x2861   :  { %9173 = vrcp.f32 %v4146_v23 }
0x286a   :  { %v9172_v48 = vpop.eup %9171 }
0x286b   :  { %v9174_v35 = vpop.eup %9173  ;;  %v4175_v32 = vsub.f32 1.0, %v9172_v48  ;;  %v4195_v13 = vmul.f32 %v9172_v48, %v4190_v39 }
0x286c   :  { %v4176_v30 = vsub.f32 1.0, %v9174_v35  ;;  %v4196_v29 = vmul.f32 %v9174_v35, %v4192_v5 }
0x28ca   :  { %v4102_v36 = vpop.permute.xlu1 %4101 }
0x28cb   :  { %v4106_v44 = vmul.f32 %v4102_v36, %v4096_v11 }
0x28cd   :  { %v4117_v57 = vadd.f32 %v4115_v0, %v4106_v44 }
0x28ce   :  { %v4180_v59 = vpop.permute.xlu1 %4179  ;;  %v4182_v33 = vpop.permute.xlu0 %4181 }
0x28cf   :  { %v4185_v26 = vmul.f32 %v4180_v59, %v4175_v32  ;;  %v4186_v42 = vmul.f32 %v4182_v33, %v4176_v30  ;;  %v4201_v51 = vrot.slane %v4117_v57, 7 }
0x28d1   :  { %v4197_v61 = vadd.f32 %v4195_v13, %v4185_v26  ;;  %v4198_v25 = vadd.f32 %v4196_v29, %v4186_v42 }
0x28d2   :  { %v4100_v21 = vpop.permute.xlu1 %4099  ;;  %v4109_v53 = vpop.permute.xlu0 %4108 }
0x28d3   :  { %v4208_v2 = vrot.slane %v4197_v61, 5  ;;  %v4209_v58 = vrot.slane %v4198_v25, 4  ;;  %v4672_v6 = vrot.slane %v4198_v25, 7  ;;  %v4105_v34 = vmul.f32 %v4100_v21, %v4095_v50 }
0x28d4   :  { %v4114_v4 = vmul.f32 %v11357_v54, %v4109_v53 }
0x28d5   :  { %v4210_v10 = vsel %vm1880_vm13, %v4209_v58, %v4208_v2  ;;  %v11390_v14 = vsel %vm1182_vm12, %v4672_v6, %v4197_v61 }
0x28d6   :  { %v4116_v62 = vadd.f32 %v4114_v4, %v4105_v34  ;;  %4211 = vrot.lane.b32.xlu0 %v4210_v10, %s9634_s10 }
0x28d8   :  { %v4202_v38 = vsel %vm1880_vm13, %v4201_v51, %v4116_v62 }
0x28d9   :  { %4203 = vrot.lane.b32.xlu1 %v4202_v38, %s9633_s22 }
0x2948   :  { %v4212_v24 = vpop.permute.xlu0 %4211 }
0x294b   :  { %v11395_v9 = vpop.permute.xlu1 %4203 }
0x294c   :  { %v11399_v56 = vsel %vm726_vm8, %v11395_v9, %v4212_v24 }
0x294d   :  { %v4216_v54 = vrot.slane %v11399_v56, 5  ;;  %v4419_v51 = vrot.slane %v11399_v56, 4 }
0x294f   :  { %7756 = vmatmul.mubr.msk.f32.vlgmr.msra.gmra.mrb[16].mxu0 %vm510_vm9, %v4216_v54 }
0x2a22   :  { %v4285_v37 = vpop.f32.mrb[16].mxu0 }
0x2a23   :  { %v4286_v52 = vadd.f32 %v4285_v37, %v10901_v7  ;;  %v4287_v41 = vpop.f32.mrb[17].mxu0 }
0x2a24   :  { %v11405_v8 = vadd.f32 %v4287_v41, %v10904_v1 }
0x2a25   :  { %v4292_v49 = vrot.slane %v4286_v52, 3  ;;  %v4291_v23 = vrot.slane %v4286_v52, 2  ;;  %v4353_v47 = vrot.slane %v4286_v52, 7  ;;  %v4361_v35 = vadd.f32 %v4286_v52, %v10980_v18 }
0x2a26   :  { %v4354_v63 = vrot.slane %v11405_v8, 7 }
0x2a27   :  { %4311 = vrot.lane.b32.xlu1 %v4292_v49, %s9632_s14  ;;  %v4296_v39 = vadd.f32 %v4292_v49, %v10980_v18  ;;  %v4359_v48 = vadd.f32 %v4353_v47, %v10976_v17  ;;  %v4295_v11 = vadd.f32 %v4291_v23, %v10976_v17  ;;  %v7761_v32 = vmul.f32 -1.442695, %v4361_v35 }
0x2a28   :  { %4387 = vrot.lane.b32.xlu0 %v4354_v63, %s9632_s14 }
0x2a29   :  { %v7758_v5 = vmul.f32 -1.442695, %v4296_v39  ;;  %v7759_v36 = vmul.f32 -1.442695, %v4359_v48  ;;  %v7757_v30 = vmul.f32 -1.442695, %v4295_v11 }
0x2a2a   :  { %v4341_v48 = vrot.slane %v11399_v56, 7 }
0x2a2b   :  { %4389 = vrot.lane.b32.xlu1 %v11405_v8, %s9632_s14  ;;  %9175 = vpow2.f32 %v7758_v5  ;;  %v4362_v5 = vadd.f32 %v11405_v8, %v10994_v45 }
0x2a2c   :  { %4309 = vrot.lane.b32.xlu0 %v4291_v23, %s9632_s14  ;;  %9177 = vpow2.f32 %v7759_v36  ;;  %v4360_v36 = vadd.f32 %v4354_v63, %v10989_v19 }
0x2a2d   :  { %9179 = vpow2.f32 %v7761_v32  ;;  %v7762_v11 = vmul.f32 -1.442695, %v4362_v5 }
0x2a2e   :  { %9181 = vpow2.f32 %v7757_v30  ;;  %v7760_v32 = vmul.f32 -1.442695, %v4360_v36 }
0x2a35   :  { %v9176_v44 = vpop.eup %9175 }
0x2a36   :  { %v9178_v59 = vpop.eup %9177  ;;  %v4304_v33 = vadd.f32 1.0, %v9176_v44 }
0x2a37   :  { %v9180_v13 = vpop.eup %9179  ;;  %v4375_v29 = vadd.f32 1.0, %v9178_v59 }
0x2a38   :  { %v9182_v26 = vpop.eup %9181  ;;  %v4377_v42 = vadd.f32 1.0, %v9180_v13  ;;  %9183 = vrcp.f32 %v4304_v33 }
0x2a39   :  { %v4303_v0 = vadd.f32 1.0, %v9182_v26  ;;  %9185 = vrcp.f32 %v4375_v29 }
0x2a3a   :  { %9187 = vrcp.f32 %v4377_v42 }
0x2a3b   :  { %9189 = vrcp.f32 %v4303_v0 }
0x2a42   :  { %v11419_v61 = vpop.eup %9183 }
0x2a43   :  { %v9186_v50 = vpop.eup %9185 }
0x2a44   :  { %v9188_v2 = vpop.eup %9187 }
0x2a45   :  { %v11424_v6 = vpop.eup %9189 }
0x2a99   :  { %v4312_v25 = vpop.permute.xlu1 %4311 }
0x2a9a   :  { %v4316_v57 = vmul.f32 %v11419_v61, %v4312_v25  ;;  %v4388_v21 = vpop.permute.xlu0 %4387  ;;  %v4330_v25 = vsub.f32 1.0, %v11419_v61 }
0x2a9b   :  { %v4393_v53 = vmul.f32 %v9186_v50, %v4388_v21 }
0x2a9c   :  { %4321 = vrot.lane.b32.xlu1 %v4316_v57, %s9632_s14 }
0x2a9d   :  { %v4390_v58 = vpop.permute.xlu1 %4389  ;;  %4397 = vrot.lane.b32.xlu0 %v4393_v53, %s9632_s14 }
0x2a9e   :  { %v4394_v34 = vmul.f32 %v9188_v2, %v4390_v58  ;;  %v4310_v4 = vpop.permute.xlu0 %4309 }
0x2a9f   :  { %v4315_v10 = vmul.f32 %v11424_v6, %v4310_v4 }
0x2aa0   :  { %4399 = vrot.lane.b32.xlu1 %v4394_v34, %s9632_s14 }
0x2aa1   :  { %4319 = vrot.lane.b32.xlu0 %v4315_v10, %s9632_s14 }
0x2aa4   :  { %4420 = vrot.lane.b32.xlu1 %v4419_v51, %s9633_s22 }
0x2aa5   :  { %4344 = vrot.lane.b32.xlu0 %v11399_v56, %s9634_s10 }
0x2aa9   :  { %4422 = vrot.lane.b32.xlu0 %v4216_v54, %s9633_s22 }
0x2b0e   :  { %v4322_v62 = vpop.permute.xlu1 %4321 }
0x2b0f   :  { %v4326_v38 = vadd.f32 %v4322_v62, %v10980_v18  ;;  %v4398_v24 = vpop.permute.xlu0 %4397  ;;  %v4329_v62 = vsub.f32 1.0, %v11424_v6 }
0x2b10   :  { %v4403_v37 = vadd.f32 %v4398_v24, %v10989_v19 }
0x2b11   :  { %9191 = vtanh.f32 %v4326_v38 }
0x2b12   :  { %v4400_v52 = vpop.permute.xlu1 %4399  ;;  %9193 = vtanh.f32 %v4403_v37 }
0x2b13   :  { %v4404_v41 = vadd.f32 %v4400_v52, %v10994_v45  ;;  %v4320_v49 = vpop.permute.xlu0 %4319 }
0x2b14   :  { %v4325_v23 = vadd.f32 %v4320_v49, %v10976_v17 }
0x2b15   :  { %9195 = vtanh.f32 %v4404_v41 }
0x2b16   :  { %9197 = vtanh.f32 %v4325_v23  ;;  %v4421_v13 = vpop.permute.xlu1 %4420 }
0x2b17   :  { %9199 = vpow2.f32 %v7762_v11  ;;  %v4345_v33 = vpop.permute.xlu0 %4344 }
0x2b18   :  { %9201 = vpow2.f32 %v7760_v32  ;;  %v4349_v4 = vmul.f32 %v11419_v61, %v4345_v33 }
0x2b1b   :  { %v9192_v47 = vpop.eup %9191  ;;  %v4423_v42 = vpop.permute.xlu0 %4422 }
0x2b1c   :  { %4335 = vrot.lane.b32.xlu1 %v9192_v47, %s9633_s22  ;;  %v9194_v54 = vpop.eup %9193 }
0x2b1f   :  { %v9196_v39 = vpop.eup %9195 }
0x2b20   :  { %4411 = vrot.lane.b32.xlu1 %v9194_v54, %s9633_s22  ;;  %4413 = vrot.lane.b32.xlu0 %v9196_v39, %s9633_s22  ;;  %v9198_v35 = vpop.eup %9197 }
0x2b21   :  { %v9200_v30 = vpop.eup %9199 }
0x2b22   :  { %v9202_v44 = vpop.eup %9201  ;;  %v4378_v59 = vadd.f32 1.0, %v9200_v30 }
0x2b23   :  { %v4376_v56 = vadd.f32 1.0, %v9202_v44 }
0x2b24   :  { %4342 = vrot.lane.b32.xlu0 %v4341_v48, %s9634_s10  ;;  %4333 = vrot.lane.b32.xlu1 %v9198_v35, %s9633_s22  ;;  %9203 = vrcp.f32 %v4378_v59 }
0x2b25   :  { %9205 = vrcp.f32 %v4376_v56 }
0x2b2e   :  { %v9204_v29 = vpop.eup %9203 }
0x2b2f   :  { %v9206_v26 = vpop.eup %9205  ;;  %v4408_v63 = vsub.f32 1.0, %v9204_v29  ;;  %v4427_v2 = vmul.f32 %v9204_v29, %v4423_v42 }
0x2b30   :  { %v4407_v8 = vsub.f32 1.0, %v9206_v26  ;;  %v4426_v53 = vmul.f32 %v9206_v26, %v4421_v13 }
0x2b8e   :  { %v4336_v0 = vpop.permute.xlu1 %4335 }
0x2b8f   :  { %v4340_v50 = vmul.f32 %v4336_v0, %v4330_v25 }
0x2b91   :  { %v4351_v38 = vadd.f32 %v4349_v4, %v4340_v50 }
0x2b92   :  { %v4412_v57 = vpop.permute.xlu1 %4411  ;;  %v4414_v21 = vpop.permute.xlu0 %4413 }
0x2b93   :  { %v4417_v58 = vmul.f32 %v4412_v57, %v4407_v8  ;;  %v4418_v34 = vmul.f32 %v4414_v21, %v4408_v63  ;;  %v4432_v48 = vrot.slane %v4351_v38, 7 }
0x2b95   :  { %v4428_v10 = vadd.f32 %v4426_v53, %v4417_v58  ;;  %v4429_v51 = vadd.f32 %v4427_v2, %v4418_v34 }
0x2b96   :  { %v4334_v24 = vpop.permute.xlu1 %4333  ;;  %v4343_v37 = vpop.permute.xlu0 %4342 }
0x2b97   :  { %v4439_v52 = vrot.slane %v4428_v10, 3  ;;  %v4440_v41 = vrot.slane %v4429_v51, 2  ;;  %v4666_v49 = vrot.slane %v4429_v51, 7  ;;  %v4339_v23 = vmul.f32 %v4334_v24, %v4329_v62 }
0x2b98   :  { %v4348_v47 = vmul.f32 %v11424_v6, %v4343_v37 }
0x2b99   :  { %v4441_v54 = vsel %vm2112_vm11, %v4440_v41, %v4439_v52  ;;  %v11455_v39 = vsel %vm947_vm10, %v4666_v49, %v4428_v10  ;;  %vm9636_vm10 = vmmov 0  }
0x2b9a   :  { %v4350_v61 = vadd.f32 %v4348_v47, %v4339_v23  ;;  %4442 = vrot.lane.b32.xlu0 %v4441_v54, %s9634_s10 }
0x2b9c   :  { %v4433_v35 = vsel %vm2112_vm11, %v4432_v48, %v4350_v61  ;;  %vm5126_vm11 = vcmask 64512  }
0x2b9d   :  { %4434 = vrot.lane.b32.xlu1 %v4433_v35, %s9633_s22 }
0x2c0c   :  { %v4443_v5 = vpop.permute.xlu0 %4442 }
0x2c0f   :  { %v11460_v36 = vpop.permute.xlu1 %4434 }
0x2c10   :  { %v4445_v11 = vsel %vm726_vm8, %v11460_v36, %v4443_v5 }
0x2c11   :  { %v4447_v6 = vrot.slane %v4445_v11, 6  ;;  %v4572_v54 = vrot.slane %v4445_v11, 7 }
0x2c13   :  { %7763 = vmatmul.mubr.msk.f32.vlgmr.msra.gmra.mrb[22].mxu1 %vm510_vm9, %v4447_v6 }
0x2c14   :  { %8009 = vmatprep.mubr.msk.f32.mxu1 %vm9636_vm10, %v9630_v3 }
0x2ce6   :  { %v4516_v32 = vpop.f32.mrb[22].mxu1 }
0x2ce7   :  { %v4517_v30 = vadd.f32 %v4516_v32, %v10901_v7  ;;  %v4518_v44 = vpop.f32.mrb[23].mxu1 }
0x2ce8   :  { %v11467_v59 = vadd.f32 %v4518_v44, %v10904_v1 }
0x2ce9   :  { %v4522_v56 = vrot.slane %v4517_v30, 1  ;;  %v4523_v13 = vrot.slane %v4517_v30, 2  ;;  %v4588_v42 = vadd.f32 %v4517_v30, %v10976_v17 }
0x2cea   :  { %v4584_v33 = vrot.slane %v11467_v59, 1  ;;  %v4589_v30 = vadd.f32 %v11467_v59, %v10989_v19 }
0x2ceb   :  { %4540 = vrot.lane.b32.xlu0 %v4522_v56, %s9632_s14  ;;  %v4526_v7 = vadd.f32 %v4522_v56, %v10976_v17  ;;  %v4590_v1 = vadd.f32 %v4522_v56, %v10980_v18  ;;  %v4527_v29 = vadd.f32 %v4523_v13, %v10980_v18  ;;  %v7766_v8 = vmul.f32 -1.442695, %v4588_v42 }
0x2cec   :  { %4618 = vrot.lane.b32.xlu1 %v4584_v33, %s9632_s14  ;;  %v7767_v56 = vmul.f32 -1.442695, %v4589_v30 }
0x2ced   :  { %v7764_v26 = vmul.f32 -1.442695, %v4526_v7  ;;  %v7768_v0 = vmul.f32 -1.442695, %v4590_v1  ;;  %v7765_v25 = vmul.f32 -1.442695, %v4527_v29 }
0x2cef   :  { %4542 = vrot.lane.b32.xlu0 %v4523_v13, %s9632_s14  ;;  %9207 = vpow2.f32 %v7764_v26 }
0x2cf0   :  { %4616 = vrot.lane.b32.xlu1 %v11467_v59, %s9632_s14  ;;  %9209 = vpow2.f32 %v7768_v0 }
0x2cf1   :  { %9211 = vpow2.f32 %v7765_v25 }
0x2cf2   :  { %9213 = vpow2.f32 %v7766_v8 }
0x2cf9   :  { %v9208_v63 = vpop.eup %9207 }
0x2cfa   :  { %v9210_v50 = vpop.eup %9209  ;;  %v4534_v57 = vadd.f32 1.0, %v9208_v63  ;;  %v5024_v63 = vld [vmem:[%s12181_s13 + $0x10] sm:$0xff] }
0x2cfb   :  { %v9212_v21 = vpop.eup %9211  ;;  %v4606_v53 = vadd.f32 1.0, %v9210_v50  ;;  %v5025_v50 = vld [vmem:[%s12181_s13 + $0x18] sm:$0xff] }
0x2cfc   :  { %v9214_v2 = vpop.eup %9213  ;;  %v4535_v58 = vadd.f32 1.0, %v9212_v21  ;;  %9215 = vrcp.f32 %v4534_v57 }
0x2cfd   :  { %v4604_v34 = vadd.f32 1.0, %v9214_v2  ;;  %9217 = vrcp.f32 %v4606_v53  ;;  %v8561_v2 = vpack.c.bf16 %v5025_v50, %v5024_v63 }
0x2cfe   :  { %9219 = vrcp.f32 %v4535_v58 }
0x2cff   :  { %9221 = vrcp.f32 %v4604_v34 }
0x2d06   :  { %v11481_v4 = vpop.eup %9215 }
0x2d07   :  { %v9218_v51 = vpop.eup %9217 }
0x2d08   :  { %v11485_v37 = vpop.eup %9219 }
0x2d09   :  { %v9222_v41 = vpop.eup %9221 }
0x2d5d   :  { %v4541_v10 = vpop.permute.xlu0 %4540 }
0x2d5e   :  { %v4546_v62 = vmul.f32 %v11481_v4, %v4541_v10  ;;  %v4619_v38 = vpop.permute.xlu1 %4618 }
0x2d5f   :  { %v4623_v24 = vmul.f32 %v9218_v51, %v4619_v38  ;;  %v5026_v51 = vld [vmem:[%s12181_s13 + $0x20] sm:$0xff] }
0x2d60   :  { %4550 = vrot.lane.b32.xlu0 %v4546_v62, %s9632_s14  ;;  %v5027_v62 = vld [vmem:[%s12181_s13 + $0x28] sm:$0xff] }
0x2d61   :  { %v4543_v52 = vpop.permute.xlu0 %4542  ;;  %4628 = vrot.lane.b32.xlu1 %v4623_v24, %s9632_s14  ;;  %v8565_v24 = vpack.c.bf16 %v5027_v62, %v5026_v51 }
0x2d62   :  { %v4547_v49 = vmul.f32 %v11485_v37, %v4543_v52  ;;  %v4617_v23 = vpop.permute.xlu1 %4616 }
0x2d63   :  { %v4622_v47 = vmul.f32 %v9222_v41, %v4617_v23 }
0x2d64   :  { %4552 = vrot.lane.b32.xlu0 %v4547_v49, %s9632_s14 }
0x2d65   :  { %4626 = vrot.lane.b32.xlu1 %v4622_v47, %s9632_s14 }
0x2d68   :  { %4650 = vrot.lane.b32.xlu0 %v4572_v54, %s9633_s22 }
0x2d6c   :  { %4573 = vrot.lane.b32.xlu0 %v4572_v54, %s9634_s10  ;;  %v4561_v54 = vsub.f32 1.0, %v11485_v37 }
0x2d70   :  { %4648 = vrot.lane.b32.xlu0 %v4447_v6, %s9633_s22 }
0x2d74   :  { %4575 = vrot.lane.b32.xlu0 %v4445_v11, %s9634_s10 }
0x2d78   :  { %4674 = vrot.lane.b32.xlu0 %v11390_v14, %s9634_s10 }
0x2d7c   :  { %4686 = vrot.lane.b32.xlu0 %v11238_v15, %s9634_s10 }
0x2d80   :  { %4698 = vrot.lane.b32.xlu0 %v11090_v16, %s9634_s10 }
0x2d84   :  { %4712 = vrot.lane.b32.xlu0 %v11007_v40, %s9634_s10 }
0x2dd2   :  { %v4551_v48 = vpop.permute.xlu0 %4550 }
0x2dd3   :  { %v4556_v61 = vadd.f32 %v4551_v48, %v10976_v17  ;;  %v4629_v35 = vpop.permute.xlu1 %4628  ;;  %v5028_v48 = vld [vmem:[%s12181_s13 + $0x30] sm:$0xff] }
0x2dd4   :  { %v4633_v5 = vadd.f32 %v4629_v35, %v10994_v45 }
0x2dd5   :  { %9223 = vtanh.f32 %v4556_v61  ;;  %v5029_v61 = vld [vmem:[%s12181_s13 + $0x38] sm:$0xff] }
0x2dd6   :  { %9225 = vtanh.f32 %v4633_v5  ;;  %v4553_v6 = vpop.permute.xlu0 %4552  ;;  %v8569_v5 = vpack.c.bf16 %v5029_v61, %v5028_v48 }
0x2dd7   :  { %v4627_v11 = vpop.permute.xlu1 %4626  ;;  %v4557_v15 = vadd.f32 %v4553_v6, %v10980_v18  ;;  %v4591_v18 = vadd.f32 %v4584_v33, %v10994_v45  ;;  %v5022_v45 = vld [vmem:[%s12181_s13] sm:$0xff] }
0x2dd8   :  { %v4632_v14 = vadd.f32 %v4627_v11, %v10989_v19  ;;  %v5023_v19 = vld [vmem:[%s12181_s13 + $0x8] sm:$0xff] }
0x2dd9   :  { %v7769_v44 = vmul.f32 -1.442695, %v4591_v18  ;;  %v8557_v26 = vpack.c.bf16 %v5023_v19, %v5022_v45 }
0x2dda   :  { %9227 = vtanh.f32 %v4632_v14 }
0x2ddb   :  { %9229 = vtanh.f32 %v4557_v15  ;;  %8558 = vmatprep.subr.bf16.mxu0 %v8557_v26 }
0x2ddc   :  { %9231 = vpow2.f32 %v7769_v44  ;;  %8560 = vmatpush3.bf16.msra.mxu0 %v8557_v26 }
0x2ddd   :  { %9233 = vpow2.f32 %v7767_v56  ;;  %8562 = vmatprep.subr.bf16.mxu0 %v8561_v2 }
0x2ddf   :  { %v9224_v32 = vpop.eup %9223 }
0x2de0   :  { %4564 = vrot.lane.b32.xlu1 %v9224_v32, %s9633_s22  ;;  %v9226_v40 = vpop.eup %9225  ;;  %8564 = vmatpush3.bf16.msra.mxu0 %v8561_v2  ;;  %v4711_v32 = vrot.slane %v11009_v27, 7 }
0x2de1   :  { %8566 = vmatprep.subr.bf16.mxu0 %v8565_v24 }
0x2de4   :  { %4642 = vrot.lane.b32.xlu1 %v9226_v40, %s9633_s22  ;;  %v9228_v17 = vpop.eup %9227  ;;  %8568 = vmatpush3.bf16.msra.mxu0 %v8565_v24 }
0x2de5   :  { %v9230_v16 = vpop.eup %9229  ;;  %8570 = vmatprep.subr.bf16.mxu0 %v8569_v5 }
0x2de6   :  { %v9232_v13 = vpop.eup %9231 }
0x2de7   :  { %v4607_v7 = vadd.f32 1.0, %v9232_v13 }
0x2de8   :  { %4640 = vrot.lane.b32.xlu1 %v9228_v17, %s9633_s22  ;;  %8572 = vmatpush3.bf16.msra.mxu0 %v8569_v5 }
0x2de9   :  { %9235 = vrcp.f32 %v4607_v7  ;;  %8012 = vmatprep.subr.mxu0 %v9630_v3 }
0x2dec   :  { %4566 = vrot.lane.b32.xlu1 %v9230_v16, %s9633_s22 }
0x2df0   :  { %4668 = vrot.lane.b32.xlu1 %v11455_v39, %s9634_s10  ;;  %v9234_v39 = vpop.eup %9233 }
0x2df1   :  { %v4605_v1 = vadd.f32 1.0, %v9234_v39 }
0x2df3   :  { %9237 = vrcp.f32 %v4605_v1  ;;  %v9236_v59 = vpop.eup %9235 }
0x2df4   :  { %4680 = vrot.lane.b32.xlu1 %v11312_v12, %s9634_s10  ;;  %v4651_v12 = vpop.permute.xlu0 %4650  ;;  %v4637_v8 = vsub.f32 1.0, %v9236_v59 }
0x2df5   :  { %v4655_v58 = vmul.f32 %v9236_v59, %v4651_v12 }
0x2df8   :  { %4692 = vrot.lane.b32.xlu1 %v11168_v43, %s9634_s10  ;;  %v4574_v29 = vpop.permute.xlu0 %4573  ;;  %v4560_v43 = vsub.f32 1.0, %v11481_v4 }
0x2df9   :  { %v4579_v42 = vmul.f32 %v11481_v4, %v4574_v29 }
0x2dfc   :  { %v4649_v21 = vpop.permute.xlu0 %4648 }
0x2dfd   :  { %v9238_v57 = vpop.eup %9237 }
0x2dfe   :  { %v4636_v10 = vsub.f32 1.0, %v9238_v57  ;;  %v4654_v52 = vmul.f32 %v9238_v57, %v4649_v21 }
0x2e00   :  { %v4576_v49 = vpop.permute.xlu0 %4575 }
0x2e01   :  { %v4580_v11 = vmul.f32 %v11485_v37, %v4576_v49 }
0x2e04   :  { %v4675_v17 = vpop.permute.xlu0 %4674 }
0x2e05   :  { %v4677_v30 = vsel %vm726_vm8, %v11173_v28, %v4675_v17 }
0x2e06   :  { %v4776_v56 = vrot.slane %v4677_v30, %v10864_v55 }
0x2e08   :  { %v4687_v37 = vpop.permute.xlu0 %4686  ;;  %v4777_v29 = vcombine.high %v4776_v56, %v4776_v56 }
0x2e09   :  { %v4689_v7 = vsel %vm726_vm8, %v11317_v20, %v4687_v37 }
0x2e0c   :  { %v4699_v44 = vpop.permute.xlu0 %4698 }
0x2e0d   :  { %v4701_v39 = vsel %vm726_vm8, %v11460_v36, %v4699_v44 }
0x2e0e   :  { %v4876_v45 = vcombine.high %v4701_v39, %v4701_v39 }
0x2e10   :  { %v4713_v19 = vpop.permute.xlu0 %4712 }
0x2e52   :  { %v4565_v33 = vpop.permute.xlu1 %4564 }
0x2e53   :  { %v4570_v0 = vmul.f32 %v4565_v33, %v4560_v43  ;;  %v4827_v43 = vcombine.high %v4689_v7, %v4689_v7 }
0x2e55   :  { %v4581_v25 = vadd.f32 %v4579_v42, %v4570_v0  ;;  %v4784_v42 = vrot.slane %v4776_v56, %v10864_v55  ;;  %v4834_v0 = vrot.slane %v4827_v43, %v10864_v55 }
0x2e56   :  { %v4643_v53 = vpop.permute.xlu1 %4642 }
0x2e57   :  { %v4647_v34 = vmul.f32 %v4643_v53, %v4637_v8  ;;  %4705 = vrot.lane.b32.xlu1 %v4581_v25, %s9633_s22  ;;  %v4792_v53 = vcombine.high %v4784_v42, %v4784_v42 }
0x2e59   :  { %v4657_v4 = vadd.f32 %v4655_v58, %v4647_v34  ;;  %v4835_v34 = vcombine.high %v4834_v0, %v4834_v0 }
0x2e5a   :  { %v4641_v38 = vpop.permute.xlu1 %4640 }
0x2e5b   :  { %v4646_v41 = vmul.f32 %v4641_v38, %v4636_v10  ;;  %v4660_v23 = vrot.slane %v4657_v4, 7  ;;  %v4842_v4 = vrot.slane %v4834_v0, %v10864_v55  ;;  %v4849_v5 = vrot.slane %v4835_v34, %v10864_v55  ;;  %v11636_v34 = vld [vmem:[%s12234_s20] sm:$0xff] }
0x2e5d   :  { %v4656_v47 = vadd.f32 %v4654_v52, %v4646_v41  ;;  %v4971_v39 = vrot.slane %v4849_v5, %v10146_v31 }
0x2e5e   :  { %v4567_v35 = vpop.permute.xlu1 %4566 }
0x2e5f   :  { %v4571_v14 = vmul.f32 %v4567_v35, %v4561_v54  ;;  %v4661_v6 = vsel %vm713_vm7, %v4660_v23, %v4656_v47  ;;  %v4947_v54 = vrot.slane %v4792_v53, %v10146_v31 }
0x2e60   :  { %4662 = vrot.lane.b32.xlu1 %v4661_v6, %s9634_s10 }
0x2e61   :  { %v4582_v15 = vadd.f32 %v4580_v11, %v4571_v14  ;;  %v4967_v11 = vrot.slane %v4842_v4, %v10146_v31  ;;  %v11641_v4 = vld [vmem:[%s12234_s20 + $0x8] sm:$0xff] }
0x2e62   :  { %v4669_v16 = vpop.permute.xlu1 %4668 }
0x2e63   :  { %v4704_v40 = vrot.slane %v4582_v15, 7  ;;  %v4671_v1 = vsel %vm726_vm8, %v11095_v22, %v4669_v16  ;;  %v4791_v22 = vrot.slane %v4777_v29, %v10864_v55 }
0x2e64   :  { %4714 = vrot.lane.b32.xlu1 %v4711_v32, %s9634_s10 }
0x2e65   :  { %4707 = vrot.lane.b32.xlu0 %v4704_v40, %s9633_s22  ;;  %v4793_v2 = vcombine.high %v4791_v22, %v4791_v22 }
0x2e66   :  { %v4681_v18 = vpop.permute.xlu1 %4680 }
0x2e67   :  { %v4683_v27 = vsel %vm726_vm8, %v11240_v46, %v4681_v18  ;;  %v4752_v46 = vrot.slane %v4671_v1, %v10864_v55  ;;  %v4951_v48 = vrot.slane %v4793_v2, %v10146_v31 }
0x2e68   :  { %v4802_v12 = vrot.slane %v4683_v27, %v10864_v55  ;;  %v4795_v63 = vcombine.high %v4683_v27, %v4683_v27 }
0x2e69   :  { %v4753_v25 = vcombine.high %v4752_v46, %v4752_v46  ;;  %v4760_v57 = vrot.slane %v4752_v46, %v10864_v55 }
0x2e6a   :  { %v4693_v13 = vpop.permute.xlu1 %4692  ;;  %v4810_v26 = vcombine.high %v4802_v12, %v4802_v12  ;;  %v4809_v38 = vrot.slane %v4795_v63, %v10864_v55 }
0x2e6b   :  { %v4695_v28 = vsel %vm726_vm8, %v11395_v9, %v4693_v13  ;;  %v4883_v9 = vrot.slane %v4876_v45, %v10864_v55  ;;  %v4767_v51 = vrot.slane %v4753_v25, %v10864_v55  ;;  %v4768_v41 = vcombine.high %v4760_v57, %v4760_v57 }
0x2e6c   :  { %v4851_v33 = vcombine.high %v4695_v28, %v4695_v28  ;;  %v4824_v21 = vrot.slane %v4810_v26, %v10864_v55  ;;  %v4817_v15 = vrot.slane %v4809_v38, %v10864_v55 }
0x2e6d   :  { %v4884_v10 = vcombine.high %v4883_v9, %v4883_v9  ;;  %v4891_v62 = vrot.slane %v4883_v9, %v10864_v55  ;;  %v4937_v6 = vrot.slane %v4767_v51, %v10146_v31  ;;  %v4941_v37 = vrot.slane %v4768_v41, %v10146_v31  ;;  %v7779_v41 = vld [vmem:[%s12181_s13 + $0x50] sm:$0xff] }
0x2e6e   :  { %v4858_v50 = vrot.slane %v4851_v33, %v10864_v55  ;;  %v4825_v49 = vcombine.high %v4824_v21, %v4824_v21  ;;  %v4961_v29 = vrot.slane %v4817_v15, %v10146_v31  ;;  %v7784_v15 = vld [vmem:[%s12181_s13 + $0x78] sm:$0xff] }
0x2e6f   :  { %v4898_v14 = vrot.slane %v4884_v10, %v10864_v55  ;;  %v4899_v16 = vcombine.high %v4891_v62, %v4891_v62  ;;  %v11658_v10 = vld [vmem:[%s12235_s12 + $0x8] sm:$0xff]  ;;  %v11663_v62 = vld [vmem:[%s12235_s12] sm:$0xff] }
0x2e70   :  { %v4859_v24 = vcombine.high %v4858_v50, %v4858_v50  ;;  %v4866_v23 = vrot.slane %v4858_v50, %v10864_v55  ;;  %v4957_v18 = vrot.slane %v4825_v49, %v10146_v31 }
0x2e71   :  { %v4900_v1 = vcombine.high %v4898_v14, %v4898_v14  ;;  %v4987_v46 = vrot.slane %v4899_v16, %v10146_v31 }
0x2e72   :  { %v4874_v30 = vcombine.high %v4866_v23, %v4866_v23  ;;  %v7780_v23 = vld [vmem:[%s12181_s13 + $0x58] sm:$0xff] }
0x2e73   :  { %v4991_v0 = vrot.slane %v4900_v1, %v10146_v31 }
0x2e74   :  { %v4981_v26 = vrot.slane %v4874_v30, %v10146_v31 }
0x2ec9   :  { %v4706_v59 = vpop.permute.xlu1 %4705 }
0x2eca   :  { %v4718_v20 = vsel %vm726_vm8, %v4706_v59, %v4713_v19 }
0x2ecb   :  { %v4903_v36 = vcombine.high %v4718_v20, %v4718_v20 }
0x2ecd   :  { %v4910_v8 = vrot.slane %v4903_v36, %v10864_v55 }
0x2ecf   :  { %v4911_v58 = vcombine.high %v4910_v8, %v4910_v8 }
0x2ed1   :  { %v4918_v61 = vrot.slane %v4911_v58, %v10864_v55 }
0x2ed2   :  { %v4663_v52 = vpop.permute.xlu1 %4662 }
0x2ed3   :  { %v4665_v47 = vsel %vm726_vm8, %v11017_v60, %v4663_v52  ;;  %v4873_v60 = vrot.slane %v4859_v24, %v10864_v55  ;;  %v4919_v56 = vcombine.high %v4918_v61, %v4918_v61  ;;  %v7777_v24 = vld [vmem:[%s12181_s13 + $0x40] sm:$0xff]  ;;  %v7778_v52 = vld [vmem:[%s12181_s13 + $0x48] sm:$0xff] }
0x2ed4   :  { %v4727_v35 = vrot.slane %v4665_v47, %v10864_v55  ;;  %v8573_v49 = vpack.c.bf16 %v7778_v52, %v7777_v24  ;;  %v8577_v47 = vpack.c.bf16 %v7780_v23, %v7779_v41 }
0x2ed5   :  { %v4977_v43 = vrot.slane %v4873_v60, %v10146_v31  ;;  %v4997_v36 = vrot.slane %v4919_v56, %v10146_v31 }
0x2ed6   :  { %v4728_v32 = vcombine.high %v4727_v35, %v4727_v35  ;;  %v4735_v40 = vrot.slane %v4727_v35, %v10864_v55  ;;  %v4715_v17 = vpop.permute.xlu1 %4714 }
0x2ed7   :  { %v4708_v44 = vpop.permute.xlu0 %4707 }
0x2ed8   :  { %v4742_v27 = vrot.slane %v4728_v32, %v10864_v55  ;;  %v5004_v13 = vsel %vm2684_vm1, %v4735_v40, %v4937_v6  ;;  %v4719_v7 = vsel %vm726_vm8, %v4708_v44, %v4715_v17  ;;  %v7783_v6 = vld [vmem:[%s12181_s13 + $0x70] sm:$0xff] }
0x2ed9   :  { %v5006_v12 = vsel %vm257_vm0, %v5004_v13, %v4947_v54  ;;  %v4926_v28 = vrot.slane %v4719_v7, %v10864_v55  ;;  %v7781_v54 = vld [vmem:[%s12181_s13 + $0x60] sm:$0xff]  ;;  %v8585_v60 = vpack.c.bf16 %v7784_v15, %v7783_v6  ;;  %v7785_v13 = vld [vmem:[#allocation10 + $0x1] ss:$0 sm:$0xff] }
0x2eda   :  { %v5005_v45 = vsel %vm2684_vm1, %v4742_v27, %v4941_v37  ;;  %v5008_v19 = vsel %vm398_vm4, %v5006_v12, %v4957_v18 }
0x2edb   :  { %v5007_v59 = vsel %vm257_vm0, %v5005_v45, %v4951_v48  ;;  %v4933_v33 = vrot.slane %v4926_v28, %v10864_v55  ;;  %v5010_v20 = vsel %vm2691_vm2, %v5008_v19, %v4967_v11  ;;  %v7782_v48 = vld [vmem:[%s12181_s13 + $0x68] sm:$0xff]  ;;  %v5926_v45 = vld [vmem:[#allocation12 + $0x8] sm:$0xff]  ;;  %v5927_v19 = vld [vmem:[#allocation12 + $0x10] sm:$0xff] }
0x2edc   :  { %v5012_v42 = vsel %vm2694_vm3, %v5010_v20, %v4977_v43  ;;  %v5009_v22 = vsel %vm398_vm4, %v5007_v59, %v4961_v29  ;;  %v8581_v61 = vpack.c.bf16 %v7782_v48, %v7781_v54  ;;  %v5925_v43 = vld [vmem:[#allocation12] sm:$0xff]  ;;  %v5829_v20 = vld [vmem:[%s12183_s15] sm:$0xff] }
0x2edd   :  { %v5001_v9 = vrot.slane %v4933_v33, %v10146_v31  ;;  %v5014_v25 = vsel %vm2697_vm5, %v5012_v42, %v4987_v46  ;;  %v5011_v8 = vsel %vm2691_vm2, %v5009_v22, %v4971_v39  ;;  %v7770_v31 = vld [vmem:[#allocation10] ss:$0 sm:$0xff]  ;;  %v9637_v46 = vmov 0.0|0.0   ;;  %v5831_v42 = vld [vmem:[%s12183_s15 + $0x10] sm:$0xff]  ;;  %v5832_v22 = vld [vmem:[%s12183_s15 + $0x18] sm:$0xff] }
0x2ede   :  { %v5016_v55 = vsel %vm2700_vm6, %v5014_v25, %v4997_v36  ;;  %v5013_v63 = vsel %vm2694_vm3, %v5011_v8, %v4981_v26  ;;  %v11724_v59 = vpack.c.bf16 %v5926_v45, %v5925_v43  ;;  %v5928_v33 = vld [vmem:[#allocation12 + $0x18] sm:$0xff] }
0x2edf   :  { %8004 = vmatprep.mubr.msk.f32.mxu0 %vm510_vm9, %v5016_v55  ;;  %v5015_v50 = vsel %vm2697_vm5, %v5013_v63, %v4991_v0  ;;  %v5830_v26 = vld [vmem:[%s12183_s15 + $0x8] sm:$0xff]  ;;  %v11739_v0 = vpack.c.bf16 %v5928_v33, %v5927_v19  ;;  %v5833_v25 = vld [vmem:[%s12183_s15 + $0x20] sm:$0xff] }
0x2ee0   :  { %v5017_v57 = vsel %vm2700_vm6, %v5015_v50, %v5001_v9  ;;  %v8589_v36 = vpack.c.bf16 %v5830_v26, %v5829_v20  ;;  %v8593_v9 = vpack.c.bf16 %v5832_v22, %v5831_v42  ;;  %v5834_v8 = vld [vmem:[%s12183_s15 + $0x28] sm:$0xff] }
0x2ee1   :  { %8005 = vmatmul.mubr.msk.f32.vlgmr.msra.gmra.mrb[18].mxu0 %vm510_vm9, %v5017_v57  ;;  %v8597_v55 = vpack.c.bf16 %v5834_v8, %v5833_v25 }
0x2ee2   :  { %8014 = vmatprep.mubr.msk.f32.mxu0 %vm9636_vm10, %v9630_v3 }
0x2fb4   :  { %v8006_v21 = vpop.f32.mrb[18].mxu0 }
0x2fb5   :  { %v5115_v53 = vadd.f32 %v8006_v21, %v7770_v31  ;;  %v5109_v2 = vpop.f32.mrb[19].mxu0  ;;  %v5835_v21 = vld [vmem:[%s12183_s15 + $0x30] sm:$0xff] }
0x2fb6   :  { %v5110_v58 = vadd.f32 %v7770_v31, %v5109_v2 }
0x2fb7   :  { %5122 = vrot.lane.b32.xlu1 %v5115_v53, %s9633_s22  ;;  %8013 = vmatpush3.msra.mxu0 %v5115_v53  ;;  %v5836_v53 = vld [vmem:[%s12183_s15 + $0x38] sm:$0xff] }
0x2fb8   :  { %5120 = vrot.lane.b32.xlu0 %v5110_v58, %s9633_s22  ;;  %8008 = vmatpush3.msra.mxu1 %v5110_v58  ;;  %v8601_v2 = vpack.c.bf16 %v5836_v53, %v5835_v21 }
0x2fb9   :  { %8010 = vmatmul.mubr.msk.f32.vlgmr.msra.gmra.mrb[24].mxu1 %vm5126_vm11, %v11636_v34  ;;  %8015 = vmatmul.mubr.msk.f32.vlgmr.msra.gmra.mrb[20].mxu0 %vm5126_vm11, %v11641_v4 }
0x2fba   :  { %8022 = vmatprep.subr.mxu0 %v9630_v3  ;;  %8024 = vmatprep.mubr.msk.f32.mxu0 %vm9636_vm10, %v9630_v3 }
0x2fbb   :  { %8017 = vmatprep.subr.mxu1 %v9630_v3  ;;  %8019 = vmatprep.mubr.msk.f32.mxu1 %vm9636_vm10, %v9630_v3 }
0x3029   :  { %v5123_v51 = vpop.permute.xlu1 %5122 }
0x302a   :  { %8023 = vmatpush3.msra.mxu0 %v5123_v51  ;;  %v5121_v38 = vpop.permute.xlu0 %5120  ;;  %v11766_v51 = vld [vmem:[#allocation13] ss:$0 sm:$0xff] }
0x302b   :  { %8018 = vmatpush3.msra.mxu1 %v5121_v38  ;;  %8025 = vmatmul.mubr.msk.f32.vlgmr.msra.gmra.mrb[22].mxu0 %vm5126_vm11, %v11658_v10 }
0x302c   :  { %8020 = vmatmul.mubr.msk.f32.vlgmr.msra.gmra.mrb[26].mxu1 %vm5126_vm11, %v11663_v62  ;;  %8046 = vmatprep.subr.mxu0 %v9630_v3 }
0x302d   :  { %8048 = vmatprep.mubr.msk.f32.mxu0 %vm9636_vm10, %v9630_v3  ;;  %8574 = vmatprep.subr.bf16.mxu1 %v8573_v49 }
0x302e   :  { %8576 = vmatpush3.bf16.msra.mxu1 %v8573_v49 }
0x302f   :  { %8578 = vmatprep.subr.bf16.mxu1 %v8577_v47 }
0x3032   :  { %8580 = vmatpush3.bf16.msra.mxu1 %v8577_v47 }
0x3033   :  { %8582 = vmatprep.subr.bf16.mxu1 %v8581_v61 }
0x3036   :  { %8584 = vmatpush3.bf16.msra.mxu1 %v8581_v61  ;;  %v7792_v61 = vld [vmem:[%s12185_s17] ss:$0 sm:$0xff] }
0x3037   :  { %8586 = vmatprep.subr.bf16.mxu1 %v8585_v60 }
0x303a   :  { %8588 = vmatpush3.bf16.msra.mxu1 %v8585_v60 }
0x303b   :  { %8590 = vmatprep.subr.bf16.mxu1 %v8589_v36 }
0x308c   :  { %v5196_v35 = vpop.f32.mrb[24].mxu1  ;;  %v5269_v5 = vpop.f32.mrb[20].mxu0 }
0x308d   :  { %v8011_v11 = vpop.f32.mrb[25].mxu1  ;;  %v8016_v14 = vpop.f32.mrb[21].mxu0 }
0x30fe   :  { %v5415_v32 = vpop.f32.mrb[22].mxu0 }
0x30ff   :  { %5423 = vrot.lane.b32.xlu1 %v5415_v32, %s9634_s10  ;;  %v5342_v40 = vpop.f32.mrb[26].mxu1  ;;  %v8026_v17 = vpop.f32.mrb[23].mxu0 }
0x3100   :  { %5421 = vrot.lane.b32.xlu0 %v5342_v40, %s9634_s10  ;;  %v8021_v16 = vpop.f32.mrb[27].mxu1 }
0x3171   :  { %v5424_v37 = vpop.permute.xlu1 %5423 }
0x3172   :  { %v5428_v18 = vsel %vm726_vm8, %v5269_v5, %v5424_v37  ;;  %v5422_v30 = vpop.permute.xlu0 %5421 }
0x3173   :  { %v5427_v44 = vsel %vm726_vm8, %v5196_v35, %v5422_v30  ;;  %v5430_v27 = vmax.f32 %v5428_v18, 0.0 }
0x3174   :  { %v5429_v56 = vmax.f32 %v5427_v44, 0.0 }
0x3176   :  { %8043 = vmatprep.mubr.msk.f32.mxu1 %vm510_vm9, %v5429_v56 }
0x3177   :  { %8044 = vmatmul.mubr.msk.f32.vlgmr.msra.gmra.mrb[28].mxu1 %vm510_vm9, %v5430_v27 }
0x3178   :  { %8592 = vmatpush3.bf16.msra.mxu1 %v8589_v36 }
0x3179   :  { %8594 = vmatprep.subr.bf16.mxu1 %v8593_v9 }
0x317c   :  { %8596 = vmatpush3.bf16.msra.mxu1 %v8593_v9 }
0x317d   :  { %8598 = vmatprep.subr.bf16.mxu1 %v8597_v55 }
0x3180   :  { %8600 = vmatpush3.bf16.msra.mxu1 %v8597_v55 }
0x3181   :  { %8602 = vmatprep.subr.bf16.mxu1 %v8601_v2 }
0x3184   :  { %8604 = vmatpush3.bf16.msra.mxu1 %v8601_v2 }
0x3185   :  { %8617 = vmatprep.subr.bf16.mxu1 %v9637_v46 }
0x324a   :  { %v8045_v7 = vpop.f32.mrb[28].mxu1 }
0x324b   :  { %v5526_v39 = vadd.f32 %v8045_v7, %v7785_v13  ;;  %v5520_v1 = vpop.f32.mrb[29].mxu1 }
0x324c   :  { %v5521_v12 = vadd.f32 %v7785_v13, %v5520_v1 }
0x324d   :  { %5533 = vrot.lane.b32.xlu1 %v5526_v39, %s9633_s22 }
0x324e   :  { %5531 = vrot.lane.b32.xlu0 %v5521_v12, %s9633_s22  ;;  %8047 = vmatpush3.msra.mxu0 %v5521_v12 }
0x324f   :  { %8051 = vmatprep.subr.mxu0 %v9630_v3  ;;  %8049 = vmatmul.mubr.msk.f32.vlgmr.msra.gmra.mrb[24].mxu0 %vm5126_vm11, %v11636_v34 }
0x3250   :  { %8052 = vmatpush3.msra.mxu0 %v5526_v39  ;;  %8053 = vmatprep.mubr.msk.f32.mxu0 %vm9636_vm10, %v9630_v3 }
0x3251   :  { %8056 = vmatprep.subr.mxu0 %v9630_v3 }
0x3253   :  { %8054 = vmatmul.mubr.msk.f32.vlgmr.msra.gmra.mrb[26].mxu0 %vm5126_vm11, %v11641_v4 }
0x3254   :  { %8058 = vmatprep.mubr.msk.f32.mxu0 %vm9636_vm10, %v9630_v3 }
0x32bf   :  { %v5534_v29 = vpop.permute.xlu1 %5533 }
0x32c0   :  { %v5532_v28 = vpop.permute.xlu0 %5531 }
0x32c1   :  { %8057 = vmatpush3.msra.mxu0 %v5532_v28 }
0x32c2   :  { %8059 = vmatmul.mubr.msk.f32.vlgmr.msra.gmra.mrb[28].mxu0 %vm5126_vm11, %v11663_v62  ;;  %8061 = vmatprep.subr.mxu0 %v9630_v3 }
0x32c3   :  { %8062 = vmatpush3.msra.mxu0 %v5534_v29  ;;  %8063 = vmatprep.mubr.msk.f32.mxu0 %vm9636_vm10, %v9630_v3 }
0x32c4   :  { %8605 = vmatprep.subr.bf16.mxu0 %v9637_v46 }
0x32c6   :  { %8064 = vmatmul.mubr.msk.f32.vlgmr.msra.gmra.mrb[30].mxu0 %vm5126_vm11, %v11658_v10 }
0x32c7   :  { %8093 = vmatprep.mubr.msk.f32.mxu0 %vm9636_vm10, %v9630_v3  ;;  %8607 = vmatpush3.bf16.msra.mxu0 %v11724_v59 }
0x32c8   :  { %8608 = vmatprep.subr.bf16.mxu0 %v9637_v46 }
0x32cb   :  { %8610 = vmatpush3.bf16.msra.mxu0 %v11739_v0 }
0x32cc   :  { %8611 = vmatprep.subr.bf16.mxu0 %v9637_v46 }
0x32ce   :  { %8094 = vmatmul.mubr.f32.vlgmr.msra.gmra.mrb[32].mxu0 %v9630_v3 }
0x32cf   :  { %8613 = vmatpush3.bf16.msra.mxu0 %v11724_v59  ;;  %8104 = vmatprep.mubr.msk.f32.mxu0 %vm9636_vm10, %v9630_v3 }
0x32d0   :  { %8614 = vmatprep.subr.bf16.mxu0 %v9637_v46 }
0x32d3   :  { %8616 = vmatpush3.bf16.msra.mxu0 %v11739_v0 }
0x32d4   :  { %8623 = vmatprep.subr.bf16.mxu0 %v9637_v46 }
0x3322   :  { %v5603_v63 = vpop.f32.mrb[24].mxu0 }
0x3323   :  { %v8050_v50 = vpop.f32.mrb[25].mxu0 }
0x3326   :  { %v5673_v57 = vpop.f32.mrb[26].mxu0 }
0x3327   :  { %v8055_v31 = vpop.f32.mrb[27].mxu0 }
0x3395   :  { %v5743_v58 = vpop.f32.mrb[28].mxu0 }
0x3396   :  { %5819 = vrot.lane.b32.xlu0 %v5743_v58, %s9634_s10  ;;  %v8060_v34 = vpop.f32.mrb[29].mxu0 }
0x3399   :  { %v5813_v4 = vpop.f32.mrb[30].mxu0 }
0x339a   :  { %5821 = vrot.lane.b32.xlu1 %v5813_v4, %s9634_s10  ;;  %v8065_v10 = vpop.f32.mrb[31].mxu0 }
0x33a1   :  { %v6004_v62 = vpop.f32.mrb[32].mxu0 }
0x33a2   :  { %v6005_v38 = vadd.f32 %v11766_v51, %v6004_v62  ;;  %v8095_v24 = vpop.f32.mrb[33].mxu0 }
0x33a4   :  { %v6009_v52 = vrot.slane %v6005_v38, 1  ;;  %6026 = vrot.lane.b32.xlu1 %v6005_v38, %s9632_s14 }
0x33a6   :  { %6028 = vrot.lane.b32.xlu0 %v6009_v52, %s9632_s14 }
0x3408   :  { %v5820_v41 = vpop.permute.xlu0 %5819 }
0x3409   :  { %v11772_v49 = vsel %vm726_vm8, %v5603_v63, %v5820_v41 }
0x340a   :  { %v5827_v23 = vmax.f32 %v11772_v49, 0.0 }
0x340c   :  { %8082 = vmatprep.mubr.msk.f32.mxu1 %vm510_vm9, %v5827_v23  ;;  %v5822_v47 = vpop.permute.xlu1 %5821 }
0x340d   :  { %v11779_v54 = vsel %vm726_vm8, %v5673_v57, %v5822_v47 }
0x340e   :  { %v5828_v48 = vmax.f32 %v11779_v54, 0.0 }
0x3410   :  { %8083 = vmatmul.mubr.msk.f32.vlgmr.msra.gmra.mrb[30].mxu1 %vm510_vm9, %v5828_v48 }
0x3411   :  { %8619 = vmatpush3.bf16.msra.mxu1 %v11724_v59  ;;  %8115 = vmatprep.mubr.msk.f32.mxu1 %vm9636_vm10, %v9630_v3 }
0x3412   :  { %8620 = vmatprep.subr.bf16.mxu1 %v9637_v46 }
0x3415   :  { %8622 = vmatpush3.bf16.msra.mxu1 %v11739_v0 }
0x3416   :  { %8629 = vmatprep.subr.bf16.mxu1 %v9637_v46  ;;  %v6027_v27 = vpop.permute.xlu1 %6026 }
0x3418   :  { %v6029_v18 = vpop.permute.xlu0 %6028 }
0x34e3   :  { %v8084_v35 = vpop.f32.mrb[30].mxu1 }
0x34e4   :  { %v11794_v5 = vadd.f32 %v8084_v35, %v7792_v61  ;;  %v5916_v11 = vpop.f32.mrb[31].mxu1 }
0x34e5   :  { %v11796_v14 = vadd.f32 %v7792_v61, %v5916_v11 }
0x34e6   :  { %v6013_v6 = vadd.f32 %v6009_v52, %v11794_v5 }
0x34e7   :  { %v6012_v15 = vadd.f32 %v6005_v38, %v11796_v14 }
0x34e8   :  { %v7797_v60 = vmul.f32 -1.442695, %v6013_v6 }
0x34e9   :  { %v7796_v32 = vmul.f32 -1.442695, %v6012_v15 }
0x34ea   :  { %9239 = vpow2.f32 %v7797_v60 }
0x34eb   :  { %9241 = vpow2.f32 %v7796_v32 }
0x34f4   :  { %v9240_v40 = vpop.eup %9239 }
0x34f5   :  { %v9242_v17 = vpop.eup %9241  ;;  %v6021_v16 = vadd.f32 1.0, %v9240_v40 }
0x34f6   :  { %v6020_v37 = vadd.f32 1.0, %v9242_v17 }
0x34f7   :  { %9243 = vrcp.f32 %v6021_v16 }
0x34f8   :  { %9245 = vrcp.f32 %v6020_v37 }
0x3501   :  { %v9244_v30 = vpop.eup %9243 }
0x3502   :  { %v9246_v44 = vpop.eup %9245  ;;  %v6033_v56 = vmul.f32 %v9244_v30, %v6029_v18  ;;  %v6047_v43 = vsub.f32 1.0, %v9244_v30  ;;  %v6059_v33 = vmul.f32 0.0, %v9244_v30 }
0x3503   :  { %v6032_v13 = vmul.f32 %v9246_v44, %v6027_v27  ;;  %v6046_v19 = vsub.f32 1.0, %v9246_v44  ;;  %v6058_v36 = vmul.f32 0.0, %v9246_v44 }
0x3504   :  { %6038 = vrot.lane.b32.xlu0 %v6033_v56, %s9632_s14 }
0x3505   :  { %6036 = vrot.lane.b32.xlu1 %v6032_v13, %s9632_s14 }
0x3576   :  { %v6039_v7 = vpop.permute.xlu0 %6038 }
0x3577   :  { %v6043_v39 = vadd.f32 %v6039_v7, %v11794_v5  ;;  %v6037_v1 = vpop.permute.xlu1 %6036 }
0x3578   :  { %v6042_v12 = vadd.f32 %v6037_v1, %v11796_v14 }
0x3579   :  { %9247 = vtanh.f32 %v6043_v39 }
0x357a   :  { %9249 = vtanh.f32 %v6042_v12 }
0x3583   :  { %v9248_v28 = vpop.eup %9247 }
0x3584   :  { %v9250_v29 = vpop.eup %9249  ;;  %6052 = vrot.lane.b32.xlu0 %v9248_v28, %s9633_s22 }
0x3585   :  { %6050 = vrot.lane.b32.xlu1 %v9250_v29, %s9633_s22 }
0x35f6   :  { %v6053_v45 = vpop.permute.xlu0 %6052 }
0x35f7   :  { %v6057_v20 = vmul.f32 %v6053_v45, %v6047_v43  ;;  %v6051_v26 = vpop.permute.xlu1 %6050 }
0x35f8   :  { %v6056_v42 = vmul.f32 %v6051_v26, %v6046_v19 }
0x35f9   :  { %v11806_v22 = vadd.f32 %v6059_v33, %v6057_v20 }
0x35fa   :  { %v11808_v9 = vadd.f32 %v6058_v36, %v6056_v42 }
0x35fb   :  { %v6064_v25 = vrot.slane %v11806_v22, 7 }
0x35fc   :  { %v6190_v37 = vrot.slane %v11808_v9, 7 }
0x35fd   :  { %v6065_v8 = vsel %vm713_vm7, %v6064_v25, %v11808_v9 }
0x35fe   :  { %6066 = vrot.lane.b32.xlu0 %v6065_v8, %s9633_s22 }
0x3670   :  { %v6067_v55 = vpop.permute.xlu0 %6066 }
0x3671   :  { %8105 = vmatmul.mubr.msk.f32.vlgmr.msra.gmra.mrb[34].mxu0 %vm726_vm8, %v6067_v55 }
0x3672   :  { %8625 = vmatpush3.bf16.msra.mxu0 %v11724_v59  ;;  %8126 = vmatprep.mubr.msk.f32.mxu0 %vm9636_vm10, %v9630_v3 }
0x3673   :  { %8626 = vmatprep.subr.bf16.mxu0 %v9637_v46 }
0x3676   :  { %8628 = vmatpush3.bf16.msra.mxu0 %v11739_v0 }
0x3677   :  { %8635 = vmatprep.subr.bf16.mxu0 %v9637_v46 }
0x3744   :  { %v6136_v63 = vpop.f32.mrb[34].mxu0 }
0x3745   :  { %v6137_v50 = vadd.f32 %v11766_v51, %v6136_v63  ;;  %v8106_v57 = vpop.f32.mrb[35].mxu0 }
0x3747   :  { %v6141_v31 = vrot.slane %v6137_v50, 7  ;;  %6160 = vrot.lane.b32.xlu0 %v6137_v50, %s9632_s14  ;;  %v6145_v21 = vadd.f32 %v6137_v50, %v11794_v5 }
0x3749   :  { %6158 = vrot.lane.b32.xlu1 %v6141_v31, %s9632_s14  ;;  %v6144_v53 = vadd.f32 %v6141_v31, %v11796_v14  ;;  %v7800_v2 = vmul.f32 -1.442695, %v6145_v21 }
0x374b   :  { %v7799_v58 = vmul.f32 -1.442695, %v6144_v53  ;;  %9251 = vpow2.f32 %v7800_v2 }
0x374d   :  { %9253 = vpow2.f32 %v7799_v58 }
0x3755   :  { %v9252_v34 = vpop.eup %9251 }
0x3756   :  { %v6153_v10 = vadd.f32 1.0, %v9252_v34 }
0x3757   :  { %v9254_v4 = vpop.eup %9253 }
0x3758   :  { %v6152_v62 = vadd.f32 1.0, %v9254_v4  ;;  %9255 = vrcp.f32 %v6153_v10 }
0x375a   :  { %9257 = vrcp.f32 %v6152_v62 }
0x3762   :  { %v9256_v38 = vpop.eup %9255 }
0x3763   :  { %v6179_v17 = vsub.f32 1.0, %v9256_v38  ;;  %v6194_v27 = vmul.f32 %v9256_v38, %v6064_v25 }
0x3764   :  { %v9258_v41 = vpop.eup %9257 }
0x3765   :  { %v6178_v16 = vsub.f32 1.0, %v9258_v41  ;;  %v6193_v44 = vmul.f32 %v9258_v41, %v6190_v37 }
0x37b9   :  { %v6161_v24 = vpop.permute.xlu0 %6160 }
0x37ba   :  { %v6165_v52 = vmul.f32 %v9256_v38, %v6161_v24 }
0x37bb   :  { %v6159_v47 = vpop.permute.xlu1 %6158 }
0x37bc   :  { %v6164_v61 = vmul.f32 %v9258_v41, %v6159_v47  ;;  %6170 = vrot.lane.b32.xlu0 %v6165_v52, %s9632_s14 }
0x37be   :  { %6168 = vrot.lane.b32.xlu1 %v6164_v61, %s9632_s14 }
0x382e   :  { %v6171_v35 = vpop.permute.xlu0 %6170 }
0x382f   :  { %v6175_v11 = vadd.f32 %v6171_v35, %v11794_v5 }
0x3830   :  { %v6169_v6 = vpop.permute.xlu1 %6168 }
0x3831   :  { %9259 = vtanh.f32 %v6175_v11  ;;  %v6174_v15 = vadd.f32 %v6169_v6, %v11796_v14 }
0x3833   :  { %9261 = vtanh.f32 %v6174_v15 }
0x383b   :  { %v9260_v60 = vpop.eup %9259 }
0x383c   :  { %6184 = vrot.lane.b32.xlu0 %v9260_v60, %s9633_s22 }
0x383d   :  { %v9262_v32 = vpop.eup %9261 }
0x383e   :  { %6182 = vrot.lane.b32.xlu1 %v9262_v32, %s9633_s22 }
0x38ae   :  { %v6185_v40 = vpop.permute.xlu0 %6184 }
0x38af   :  { %v6189_v30 = vmul.f32 %v6185_v40, %v6179_v17 }
0x38b0   :  { %v6183_v18 = vpop.permute.xlu1 %6182 }
0x38b1   :  { %v6188_v56 = vmul.f32 %v6183_v18, %v6178_v16  ;;  %v6196_v7 = vadd.f32 %v6194_v27, %v6189_v30 }
0x38b3   :  { %v11833_v13 = vadd.f32 %v6193_v44, %v6188_v56  ;;  %v6327_v24 = vrot.slane %v6196_v7, 7  ;;  %v7025_v32 = vsel %vm2684_vm1, %v11806_v22, %v6196_v7 }
0x38b5   :  { %v6199_v39 = vrot.slane %v11833_v13, 1  ;;  %v6326_v47 = vrot.slane %v11833_v13, 7  ;;  %v7024_v17 = vsel %vm2684_vm1, %v11808_v9, %v11833_v13 }
0x38b7   :  { %v6200_v1 = vsel %vm713_vm7, %v6196_v7, %v6199_v39 }
0x38b8   :  { %6201 = vrot.lane.b32.xlu1 %v6200_v1, %s9633_s22 }
0x392a   :  { %v6202_v12 = vpop.permute.xlu1 %6201 }
0x392b   :  { %8116 = vmatmul.mubr.msk.f32.vlgmr.msra.gmra.mrb[32].mxu1 %vm726_vm8, %v6202_v12 }
0x392c   :  { %8631 = vmatpush3.bf16.msra.mxu1 %v11724_v59  ;;  %8137 = vmatprep.mubr.msk.f32.mxu1 %vm9636_vm10, %v9630_v3 }
0x392d   :  { %8632 = vmatprep.subr.bf16.mxu1 %v9637_v46 }
0x3930   :  { %8634 = vmatpush3.bf16.msra.mxu1 %v11739_v0 }
0x3931   :  { %8641 = vmatprep.subr.bf16.mxu1 %v9637_v46 }
0x39fe   :  { %v6271_v28 = vpop.f32.mrb[32].mxu1 }
0x39ff   :  { %v6272_v29 = vadd.f32 %v11766_v51, %v6271_v28  ;;  %v8117_v43 = vpop.f32.mrb[33].mxu1 }
0x3a01   :  { %v6276_v45 = vrot.slane %v6272_v29, 6  ;;  %v6277_v19 = vrot.slane %v6272_v29, 7 }
0x3a03   :  { %6296 = vrot.lane.b32.xlu1 %v6277_v19, %s9632_s14  ;;  %6294 = vrot.lane.b32.xlu0 %v6276_v45, %s9632_s14  ;;  %v6280_v33 = vadd.f32 %v6276_v45, %v11796_v14  ;;  %v6281_v20 = vadd.f32 %v6277_v19, %v11794_v5 }
0x3a05   :  { %v7802_v26 = vmul.f32 -1.442695, %v6280_v33  ;;  %v7803_v36 = vmul.f32 -1.442695, %v6281_v20 }
0x3a07   :  { %9263 = vpow2.f32 %v7802_v26 }
0x3a08   :  { %9265 = vpow2.f32 %v7803_v36 }
0x3a11   :  { %v9264_v42 = vpop.eup %9263 }
0x3a12   :  { %v9266_v25 = vpop.eup %9265  ;;  %v6288_v8 = vadd.f32 1.0, %v9264_v42 }
0x3a13   :  { %v6289_v55 = vadd.f32 1.0, %v9266_v25 }
0x3a14   :  { %9267 = vrcp.f32 %v6288_v8 }
0x3a15   :  { %9269 = vrcp.f32 %v6289_v55 }
0x3a1e   :  { %v9268_v63 = vpop.eup %9267 }
0x3a1f   :  { %v9270_v50 = vpop.eup %9269  ;;  %v6314_v41 = vsub.f32 1.0, %v9268_v63  ;;  %v6330_v6 = vmul.f32 %v9268_v63, %v6326_v47 }
0x3a20   :  { %v6315_v38 = vsub.f32 1.0, %v9270_v50  ;;  %v6331_v61 = vmul.f32 %v9270_v50, %v6327_v24 }
0x3a75   :  { %v6297_v57 = vpop.permute.xlu1 %6296  ;;  %v6295_v31 = vpop.permute.xlu0 %6294 }
0x3a76   :  { %v6301_v21 = vmul.f32 %v9270_v50, %v6297_v57  ;;  %v6300_v53 = vmul.f32 %v9268_v63, %v6295_v31 }
0x3a78   :  { %6306 = vrot.lane.b32.xlu1 %v6301_v21, %s9632_s14  ;;  %6304 = vrot.lane.b32.xlu0 %v6300_v53, %s9632_s14 }
0x3aea   :  { %v6307_v2 = vpop.permute.xlu1 %6306  ;;  %v6305_v58 = vpop.permute.xlu0 %6304 }
0x3aeb   :  { %v6311_v34 = vadd.f32 %v6307_v2, %v11794_v5  ;;  %v6310_v4 = vadd.f32 %v6305_v58, %v11796_v14 }
0x3aed   :  { %9271 = vtanh.f32 %v6311_v34 }
0x3aee   :  { %9273 = vtanh.f32 %v6310_v4 }
0x3af7   :  { %v9272_v10 = vpop.eup %9271 }
0x3af8   :  { %v9274_v62 = vpop.eup %9273  ;;  %6320 = vrot.lane.b32.xlu1 %v9272_v10, %s9633_s22 }
0x3af9   :  { %6318 = vrot.lane.b32.xlu0 %v9274_v62, %s9633_s22 }
0x3b6a   :  { %v6321_v52 = vpop.permute.xlu1 %6320 }
0x3b6b   :  { %v6325_v35 = vmul.f32 %v6321_v52, %v6315_v38  ;;  %v6319_v11 = vpop.permute.xlu0 %6318 }
0x3b6c   :  { %v6324_v15 = vmul.f32 %v6319_v11, %v6314_v41 }
0x3b6d   :  { %v6333_v60 = vadd.f32 %v6331_v61, %v6325_v35 }
0x3b6e   :  { %v6332_v40 = vadd.f32 %v6330_v6, %v6324_v15 }
0x3b6f   :  { %v6337_v16 = vrot.slane %v6333_v60, 1  ;;  %v11863_v37 = vsel %vm257_vm0, %v7025_v32, %v6333_v60  ;;  %v6465_v53 = vrot.slane %v6333_v60, 7 }
0x3b70   :  { %v6336_v18 = vrot.slane %v6332_v40, 2  ;;  %v11866_v30 = vsel %vm257_vm0, %v7024_v17, %v6332_v40  ;;  %v6464_v34 = vrot.slane %v6332_v40, 7  ;;  %vm7134_vm0 = vcmask 39936  }
0x3b72   :  { %v6338_v44 = vsel %vm713_vm7, %v6337_v16, %v6336_v18 }
0x3b73   :  { %6339 = vrot.lane.b32.xlu0 %v6338_v44, %s9633_s22 }
0x3be5   :  { %v6340_v56 = vpop.permute.xlu0 %6339 }
0x3be6   :  { %8127 = vmatmul.mubr.msk.f32.vlgmr.msra.gmra.mrb[36].mxu0 %vm726_vm8, %v6340_v56 }
0x3be7   :  { %8637 = vmatpush3.bf16.msra.mxu0 %v11724_v59  ;;  %8148 = vmatprep.mubr.msk.f32.mxu0 %vm9636_vm10, %v9630_v3 }
0x3be8   :  { %8638 = vmatprep.subr.bf16.mxu0 %v9637_v46 }
0x3beb   :  { %8640 = vmatpush3.bf16.msra.mxu0 %v11739_v0 }
0x3bec   :  { %8647 = vmatprep.subr.bf16.mxu0 %v9637_v46 }
0x3cb9   :  { %v6409_v22 = vpop.f32.mrb[36].mxu0 }
0x3cba   :  { %v6410_v9 = vadd.f32 %v11766_v51, %v6409_v22  ;;  %v8128_v27 = vpop.f32.mrb[37].mxu0 }
0x3cbc   :  { %v6414_v13 = vrot.slane %v6410_v9, 5  ;;  %v6415_v7 = vrot.slane %v6410_v9, 6 }
0x3cbe   :  { %6434 = vrot.lane.b32.xlu0 %v6415_v7, %s9632_s14  ;;  %6432 = vrot.lane.b32.xlu1 %v6414_v13, %s9632_s14  ;;  %v6418_v39 = vadd.f32 %v6414_v13, %v11796_v14  ;;  %v6419_v1 = vadd.f32 %v6415_v7, %v11794_v5 }
0x3cc0   :  { %v7805_v12 = vmul.f32 -1.442695, %v6418_v39  ;;  %v7806_v28 = vmul.f32 -1.442695, %v6419_v1 }
0x3cc2   :  { %9275 = vpow2.f32 %v7805_v12 }
0x3cc3   :  { %9277 = vpow2.f32 %v7806_v28 }
0x3ccc   :  { %v9276_v29 = vpop.eup %9275 }
0x3ccd   :  { %v9278_v43 = vpop.eup %9277  ;;  %v6426_v45 = vadd.f32 1.0, %v9276_v29 }
0x3cce   :  { %v6427_v19 = vadd.f32 1.0, %v9278_v43 }
0x3ccf   :  { %9279 = vrcp.f32 %v6426_v45 }
0x3cd0   :  { %9281 = vrcp.f32 %v6427_v19 }
0x3cd9   :  { %v9280_v33 = vpop.eup %9279 }
0x3cda   :  { %v9282_v20 = vpop.eup %9281  ;;  %v6452_v58 = vsub.f32 1.0, %v9280_v33  ;;  %v6468_v38 = vmul.f32 %v9280_v33, %v6464_v34 }
0x3cdb   :  { %v6453_v21 = vsub.f32 1.0, %v9282_v20  ;;  %v6469_v4 = vmul.f32 %v9282_v20, %v6465_v53 }
0x3d30   :  { %v6435_v26 = vpop.permute.xlu0 %6434  ;;  %v6433_v36 = vpop.permute.xlu1 %6432 }
0x3d31   :  { %v6439_v42 = vmul.f32 %v9282_v20, %v6435_v26  ;;  %v6438_v25 = vmul.f32 %v9280_v33, %v6433_v36 }
0x3d33   :  { %6444 = vrot.lane.b32.xlu0 %v6439_v42, %s9632_s14  ;;  %6442 = vrot.lane.b32.xlu1 %v6438_v25, %s9632_s14 }
0x3da5   :  { %v6445_v8 = vpop.permute.xlu0 %6444  ;;  %v6443_v55 = vpop.permute.xlu1 %6442 }
0x3da6   :  { %v6449_v63 = vadd.f32 %v6445_v8, %v11794_v5  ;;  %v6448_v50 = vadd.f32 %v6443_v55, %v11796_v14 }
0x3da8   :  { %9283 = vtanh.f32 %v6449_v63 }
0x3da9   :  { %9285 = vtanh.f32 %v6448_v50 }
0x3db2   :  { %v9284_v57 = vpop.eup %9283 }
0x3db3   :  { %v9286_v31 = vpop.eup %9285  ;;  %6458 = vrot.lane.b32.xlu0 %v9284_v57, %s9633_s22 }
0x3db4   :  { %6456 = vrot.lane.b32.xlu1 %v9286_v31, %s9633_s22 }
0x3e25   :  { %v6459_v2 = vpop.permute.xlu0 %6458 }
0x3e26   :  { %v6463_v10 = vmul.f32 %v6459_v2, %v6453_v21  ;;  %v6457_v62 = vpop.permute.xlu1 %6456 }
0x3e27   :  { %v6462_v24 = vmul.f32 %v6457_v62, %v6452_v58 }
0x3e28   :  { %v6471_v52 = vadd.f32 %v6469_v4, %v6463_v10 }
0x3e29   :  { %v6470_v41 = vadd.f32 %v6468_v38, %v6462_v24 }
0x3e2a   :  { %v6475_v47 = vrot.slane %v6471_v52, 2  ;;  %v7029_v61 = vsel %vm398_vm4, %v11863_v37, %v6471_v52  ;;  %v6603_v36 = vrot.slane %v6471_v52, 7 }
0x3e2b   :  { %v6474_v35 = vrot.slane %v6470_v41, 3  ;;  %v7028_v11 = vsel %vm398_vm4, %v11866_v30, %v6470_v41  ;;  %v6602_v8 = vrot.slane %v6470_v41, 7  ;;  %vm7617_vm4 = vcmask 23552  }
0x3e2d   :  { %v6476_v6 = vsel %vm713_vm7, %v6475_v47, %v6474_v35 }
0x3e2e   :  { %6477 = vrot.lane.b32.xlu1 %v6476_v6, %s9633_s22 }
0x3ea0   :  { %v6478_v15 = vpop.permute.xlu1 %6477 }
0x3ea1   :  { %8138 = vmatmul.mubr.msk.f32.vlgmr.msra.gmra.mrb[34].mxu1 %vm726_vm8, %v6478_v15 }
0x3ea2   :  { %8643 = vmatpush3.bf16.msra.mxu1 %v11724_v59  ;;  %8159 = vmatprep.mubr.msk.f32.mxu1 %vm9636_vm10, %v9630_v3 }
0x3ea3   :  { %8644 = vmatprep.subr.bf16.mxu1 %v9637_v46 }
0x3ea6   :  { %8646 = vmatpush3.bf16.msra.mxu1 %v11739_v0 }
0x3f74   :  { %v6547_v60 = vpop.f32.mrb[34].mxu1 }
0x3f75   :  { %v6548_v32 = vadd.f32 %v11766_v51, %v6547_v60  ;;  %v8139_v40 = vpop.f32.mrb[35].mxu1 }
0x3f77   :  { %v6552_v17 = vrot.slane %v6548_v32, 4  ;;  %v6553_v16 = vrot.slane %v6548_v32, 5 }
0x3f79   :  { %6572 = vrot.lane.b32.xlu1 %v6553_v16, %s9632_s14  ;;  %6570 = vrot.lane.b32.xlu0 %v6552_v17, %s9632_s14  ;;  %v6556_v37 = vadd.f32 %v6552_v17, %v11796_v14  ;;  %v6557_v18 = vadd.f32 %v6553_v16, %v11794_v5 }
0x3f7b   :  { %v7808_v30 = vmul.f32 -1.442695, %v6556_v37  ;;  %v7809_v44 = vmul.f32 -1.442695, %v6557_v18 }
0x3f7d   :  { %9287 = vpow2.f32 %v7808_v30 }
0x3f7e   :  { %9289 = vpow2.f32 %v7809_v44 }
0x3f87   :  { %v9288_v56 = vpop.eup %9287 }
0x3f88   :  { %v9290_v22 = vpop.eup %9289  ;;  %v6564_v9 = vadd.f32 1.0, %v9288_v56 }
0x3f89   :  { %v6565_v27 = vadd.f32 1.0, %v9290_v22 }
0x3f8a   :  { %9291 = vrcp.f32 %v6564_v9 }
0x3f8b   :  { %9293 = vrcp.f32 %v6565_v27 }
0x3f94   :  { %v9292_v13 = vpop.eup %9291 }
0x3f95   :  { %v9294_v7 = vpop.eup %9293  ;;  %v6590_v25 = vsub.f32 1.0, %v9292_v13  ;;  %v6606_v57 = vmul.f32 %v9292_v13, %v6602_v8 }
0x3f96   :  { %v6591_v26 = vsub.f32 1.0, %v9294_v7  ;;  %v6607_v55 = vmul.f32 %v9294_v7, %v6603_v36 }
0x3feb   :  { %v6573_v39 = vpop.permute.xlu1 %6572  ;;  %v6571_v1 = vpop.permute.xlu0 %6570 }
0x3fec   :  { %v6577_v12 = vmul.f32 %v9294_v7, %v6573_v39  ;;  %v6576_v28 = vmul.f32 %v9292_v13, %v6571_v1 }
0x3fee   :  { %6582 = vrot.lane.b32.xlu1 %v6577_v12, %s9632_s14  ;;  %6580 = vrot.lane.b32.xlu0 %v6576_v28, %s9632_s14 }
0x4060   :  { %v6583_v29 = vpop.permute.xlu1 %6582  ;;  %v6581_v43 = vpop.permute.xlu0 %6580 }
0x4061   :  { %v6587_v45 = vadd.f32 %v6583_v29, %v11794_v5  ;;  %v6586_v19 = vadd.f32 %v6581_v43, %v11796_v14 }
0x4063   :  { %9295 = vtanh.f32 %v6587_v45 }
0x4064   :  { %9297 = vtanh.f32 %v6586_v19 }
0x406d   :  { %v9296_v33 = vpop.eup %9295 }
0x406e   :  { %v9298_v20 = vpop.eup %9297  ;;  %6596 = vrot.lane.b32.xlu1 %v9296_v33, %s9633_s22 }
0x406f   :  { %6594 = vrot.lane.b32.xlu0 %v9298_v20, %s9633_s22 }
0x40e0   :  { %v6597_v42 = vpop.permute.xlu1 %6596 }
0x40e1   :  { %v6601_v63 = vmul.f32 %v6597_v42, %v6591_v26  ;;  %v6595_v50 = vpop.permute.xlu0 %6594 }
0x40e2   :  { %v6600_v31 = vmul.f32 %v6595_v50, %v6590_v25 }
0x40e3   :  { %v6609_v21 = vadd.f32 %v6607_v55, %v6601_v63 }
0x40e4   :  { %v6608_v53 = vadd.f32 %v6606_v57, %v6600_v31 }
0x40e5   :  { %v6613_v2 = vrot.slane %v6609_v21, 3  ;;  %v7031_v58 = vsel %vm2691_vm2, %v7029_v61, %v6609_v21  ;;  %v6741_v27 = vrot.slane %v6609_v21, 7 }
0x40e6   :  { %v6612_v34 = vrot.slane %v6608_v53, 4  ;;  %v7030_v4 = vsel %vm2691_vm2, %v7028_v11, %v6608_v53  ;;  %v6740_v39 = vrot.slane %v6608_v53, 7 }
0x40e8   :  { %v6614_v10 = vsel %vm713_vm7, %v6613_v2, %v6612_v34 }
0x40e9   :  { %6615 = vrot.lane.b32.xlu0 %v6614_v10, %s9633_s22 }
0x415b   :  { %v6616_v62 = vpop.permute.xlu0 %6615 }
0x415c   :  { %8149 = vmatmul.mubr.msk.f32.vlgmr.msra.gmra.mrb[38].mxu0 %vm726_vm8, %v6616_v62 }
0x415d   :  { %8649 = vmatpush3.bf16.msra.mxu0 %v11724_v59  ;;  %8170 = vmatprep.mubr.msk.f32.mxu0 %vm9636_vm10, %v9630_v3 }
0x415e   :  { %8650 = vmatprep.subr.bf16.mxu0 %v9637_v46 }
0x4161   :  { %8652 = vmatpush3.bf16.msra.mxu0 %v11739_v0 }
0x422f   :  { %v6685_v38 = vpop.f32.mrb[38].mxu0 }
0x4230   :  { %v6686_v24 = vadd.f32 %v11766_v51, %v6685_v38  ;;  %v8150_v52 = vpop.f32.mrb[39].mxu0 }
0x4232   :  { %v6690_v41 = vrot.slane %v6686_v24, 3  ;;  %v6691_v47 = vrot.slane %v6686_v24, 4 }
0x4234   :  { %6710 = vrot.lane.b32.xlu0 %v6691_v47, %s9632_s14  ;;  %6708 = vrot.lane.b32.xlu1 %v6690_v41, %s9632_s14  ;;  %v6694_v61 = vadd.f32 %v6690_v41, %v11796_v14  ;;  %v6695_v59 = vadd.f32 %v6691_v47, %v11794_v5 }
0x4236   :  { %v7811_v35 = vmul.f32 -1.442695, %v6694_v61  ;;  %v7812_v3 = vmul.f32 -1.442695, %v6695_v59 }
0x4238   :  { %9299 = vpow2.f32 %v7811_v35 }
0x4239   :  { %9301 = vpow2.f32 %v7812_v3 }
0x4242   :  { %v9300_v46 = vpop.eup %9299 }
0x4243   :  { %v9302_v0 = vpop.eup %9301  ;;  %v6702_v11 = vadd.f32 1.0, %v9300_v46  ;;  %v7137_v46 = vld [vmem:[#allocation16] sm:$0xff] }
0x4244   :  { %v6703_v6 = vadd.f32 1.0, %v9302_v0  ;;  %v7138_v0 = vld [vmem:[#allocation16 + $0x8] sm:$0xff] }
0x4245   :  { %9303 = vrcp.f32 %v6702_v11  ;;  %v8661_v11 = vpack.c.bf16 %v7138_v0, %v7137_v46  ;;  %v7229_v0 = vld [vmem:[%s12191_s23] sm:$0xff] }
0x4246   :  { %9305 = vrcp.f32 %v6703_v6 }
0x4247   :  { %8662 = vmatprep.subr.bf16.mxu0 %v8661_v11 }
0x424f   :  { %v9304_v15 = vpop.eup %9303 }
0x4250   :  { %v9306_v60 = vpop.eup %9305  ;;  %v6728_v7 = vsub.f32 1.0, %v9304_v15  ;;  %v6744_v29 = vmul.f32 %v9304_v15, %v6740_v39 }
0x4251   :  { %v6729_v9 = vsub.f32 1.0, %v9306_v60  ;;  %v6745_v1 = vmul.f32 %v9306_v60, %v6741_v27 }
0x42a6   :  { %v6711_v32 = vpop.permute.xlu0 %6710  ;;  %v6709_v40 = vpop.permute.xlu1 %6708 }
0x42a7   :  { %v6715_v17 = vmul.f32 %v9306_v60, %v6711_v32  ;;  %v6714_v16 = vmul.f32 %v9304_v15, %v6709_v40 }
0x42a9   :  { %6720 = vrot.lane.b32.xlu0 %v6715_v17, %s9632_s14  ;;  %6718 = vrot.lane.b32.xlu1 %v6714_v16, %s9632_s14 }
0x431b   :  { %v6721_v37 = vpop.permute.xlu0 %6720  ;;  %v6719_v18 = vpop.permute.xlu1 %6718 }
0x431c   :  { %v6725_v30 = vadd.f32 %v6721_v37, %v11794_v5  ;;  %v6724_v44 = vadd.f32 %v6719_v18, %v11796_v14 }
0x431e   :  { %9307 = vtanh.f32 %v6725_v30 }
0x431f   :  { %9309 = vtanh.f32 %v6724_v44 }
0x4328   :  { %v9308_v56 = vpop.eup %9307 }
0x4329   :  { %v9310_v22 = vpop.eup %9309  ;;  %6734 = vrot.lane.b32.xlu0 %v9308_v56, %s9633_s22 }
0x432a   :  { %6732 = vrot.lane.b32.xlu1 %v9310_v22, %s9633_s22 }
0x439b   :  { %v6735_v13 = vpop.permute.xlu0 %6734 }
0x439c   :  { %v6739_v12 = vmul.f32 %v6735_v13, %v6729_v9  ;;  %v6733_v28 = vpop.permute.xlu1 %6732 }
0x439d   :  { %v6738_v43 = vmul.f32 %v6733_v28, %v6728_v7  ;;  %v7140_v28 = vld [vmem:[#allocation16 + $0x18] sm:$0xff] }
0x439e   :  { %v6747_v45 = vadd.f32 %v6745_v1, %v6739_v12  ;;  %v7139_v12 = vld [vmem:[#allocation16 + $0x10] sm:$0xff] }
0x439f   :  { %v6746_v19 = vadd.f32 %v6744_v29, %v6738_v43  ;;  %v8665_v29 = vpack.c.bf16 %v7140_v28, %v7139_v12 }
0x43a0   :  { %v6751_v33 = vrot.slane %v6747_v45, 4  ;;  %v7033_v20 = vsel %vm2694_vm3, %v7031_v58, %v6747_v45  ;;  %v6879_v32 = vrot.slane %v6747_v45, 7  ;;  %v7141_v45 = vld [vmem:[#allocation16 + $0x20] sm:$0xff] }
0x43a1   :  { %v6750_v26 = vrot.slane %v6746_v19, 5  ;;  %v7032_v36 = vsel %vm2694_vm3, %v7030_v4, %v6746_v19  ;;  %v6878_v16 = vrot.slane %v6746_v19, 7  ;;  %v7142_v19 = vld [vmem:[#allocation16 + $0x28] sm:$0xff] }
0x43a3   :  { %v6752_v42 = vsel %vm713_vm7, %v6751_v33, %v6750_v26  ;;  %v8669_v33 = vpack.c.bf16 %v7142_v19, %v7141_v45  ;;  %v7144_v26 = vld [vmem:[#allocation16 + $0x38] sm:$0xff] }
0x43a4   :  { %6753 = vrot.lane.b32.xlu1 %v6752_v42, %s9633_s22 }
0x4416   :  { %v6754_v25 = vpop.permute.xlu1 %6753 }
0x4417   :  { %8160 = vmatmul.mubr.msk.f32.vlgmr.msra.gmra.mrb[36].mxu1 %vm726_vm8, %v6754_v25 }
0x44ea   :  { %v6823_v8 = vpop.f32.mrb[36].mxu1 }
0x44eb   :  { %v6824_v55 = vadd.f32 %v11766_v51, %v6823_v8  ;;  %v8161_v63 = vpop.f32.mrb[37].mxu1 }
0x44ed   :  { %v6828_v50 = vrot.slane %v6824_v55, 2  ;;  %v6829_v57 = vrot.slane %v6824_v55, 3 }
0x44ef   :  { %6848 = vrot.lane.b32.xlu1 %v6829_v57, %s9632_s14  ;;  %6846 = vrot.lane.b32.xlu0 %v6828_v50, %s9632_s14  ;;  %v6832_v31 = vadd.f32 %v6828_v50, %v11796_v14  ;;  %v6833_v21 = vadd.f32 %v6829_v57, %v11794_v5 }
0x44f1   :  { %v7814_v53 = vmul.f32 -1.442695, %v6832_v31  ;;  %v7815_v2 = vmul.f32 -1.442695, %v6833_v21 }
0x44f3   :  { %9311 = vpow2.f32 %v7814_v53 }
0x44f4   :  { %9313 = vpow2.f32 %v7815_v2 }
0x44fd   :  { %v9312_v58 = vpop.eup %9311 }
0x44fe   :  { %v9314_v34 = vpop.eup %9313  ;;  %v6840_v4 = vadd.f32 1.0, %v9312_v58 }
0x44ff   :  { %v6841_v10 = vadd.f32 1.0, %v9314_v34 }
0x4500   :  { %9315 = vrcp.f32 %v6840_v4 }
0x4501   :  { %9317 = vrcp.f32 %v6841_v10 }
0x450a   :  { %v9316_v62 = vpop.eup %9315 }
0x450b   :  { %v9318_v38 = vpop.eup %9317  ;;  %v6866_v17 = vsub.f32 1.0, %v9316_v62  ;;  %v6882_v44 = vmul.f32 %v9316_v62, %v6878_v16  ;;  %v7822_v16 = vld [vmem:[#allocation18] ss:$0 sm:$0xff] }
0x450c   :  { %v6867_v60 = vsub.f32 1.0, %v9318_v38  ;;  %v6883_v37 = vmul.f32 %v9318_v38, %v6879_v32 }
0x4561   :  { %v6849_v24 = vpop.permute.xlu1 %6848  ;;  %v6847_v52 = vpop.permute.xlu0 %6846 }
0x4562   :  { %v6853_v41 = vmul.f32 %v9318_v38, %v6849_v24  ;;  %v6852_v47 = vmul.f32 %v9316_v62, %v6847_v52 }
0x4564   :  { %6858 = vrot.lane.b32.xlu1 %v6853_v41, %s9632_s14  ;;  %6856 = vrot.lane.b32.xlu0 %v6852_v47, %s9632_s14  ;;  %v7038_v47 = vld [vmem:[%s12187_s19] sm:$0xff] }
0x45d6   :  { %v6859_v61 = vpop.permute.xlu1 %6858  ;;  %v6857_v59 = vpop.permute.xlu0 %6856 }
0x45d7   :  { %v6863_v35 = vadd.f32 %v6859_v61, %v11794_v5  ;;  %v6862_v3 = vadd.f32 %v6857_v59, %v11796_v14  ;;  %v7039_v61 = vld [vmem:[%s12187_s19 + $0x8] sm:$0xff]  ;;  %v7040_v59 = vld [vmem:[%s12187_s19 + $0x10] sm:$0xff] }
0x45d9   :  { %9319 = vtanh.f32 %v6863_v35  ;;  %v8653_v35 = vpack.c.bf16 %v7039_v61, %v7038_v47  ;;  %v7415_v47 = vld [vmem:[%s12194_s26 + $0x38] sm:$0xff]  ;;  %v7416_v61 = vld [vmem:[%s12194_s26 + $0x40] sm:$0xff] }
0x45da   :  { %9321 = vtanh.f32 %v6862_v3 }
0x45db   :  { %8654 = vmatprep.subr.bf16.mxu1 %v8653_v35 }
0x45dc   :  { %8656 = vmatpush3.bf16.msra.mxu1 %v8653_v35  ;;  %v7418_v35 = vld [vmem:[%s12194_s26 + $0x50] sm:$0xff] }
0x45e3   :  { %v9320_v6 = vpop.eup %9319 }
0x45e4   :  { %v9322_v15 = vpop.eup %9321  ;;  %6872 = vrot.lane.b32.xlu1 %v9320_v6, %s9633_s22 }
0x45e5   :  { %6870 = vrot.lane.b32.xlu0 %v9322_v15, %s9633_s22 }
0x4656   :  { %v6873_v40 = vpop.permute.xlu1 %6872 }
0x4657   :  { %v6877_v18 = vmul.f32 %v6873_v40, %v6867_v60  ;;  %v6871_v30 = vpop.permute.xlu0 %6870 }
0x4658   :  { %v6876_v56 = vmul.f32 %v6871_v30, %v6866_v17 }
0x4659   :  { %v11948_v22 = vadd.f32 %v6883_v37, %v6877_v18 }
0x465a   :  { %v11950_v9 = vadd.f32 %v6882_v44, %v6876_v56 }
0x465b   :  { %v6889_v27 = vrot.slane %v11948_v22, 5  ;;  %v11955_v13 = vsel %vm2697_vm5, %v7033_v20, %v11948_v22  ;;  %v7143_v20 = vld [vmem:[#allocation16 + $0x30] sm:$0xff]  ;;  %v7017_v60 = vrot.slane %v11948_v22, 7 }
0x465c   :  { %v6888_v7 = vrot.slane %v11950_v9, 6  ;;  %v11960_v39 = vsel %vm2697_vm5, %v7032_v36, %v11950_v9  ;;  %v8673_v36 = vpack.c.bf16 %v7144_v26, %v7143_v20  ;;  %v7016_v17 = vrot.slane %v11950_v9, 7  ;;  %v7315_v20 = vld [vmem:[%s12192_s24 + $0x8] sm:$0xff] }
0x465e   :  { %v6890_v1 = vsel %vm713_vm7, %v6889_v27, %v6888_v7 }
0x465f   :  { %6891 = vrot.lane.b32.xlu0 %v6890_v1, %s9633_s22 }
0x46d1   :  { %v6892_v43 = vpop.permute.xlu0 %6891 }
0x46d2   :  { %8171 = vmatmul.mubr.msk.f32.vlgmr.msra.gmra.mrb[40].mxu0 %vm726_vm8, %v6892_v43  ;;  %v7231_v43 = vld [vmem:[%s12191_s23 + $0x10] sm:$0xff] }
0x46d3   :  { %8664 = vmatpush3.bf16.msra.mxu0 %v8661_v11  ;;  %8200 = vmatprep.mubr.msk.f32.mxu0 %vm510_vm9, %v5827_v23  ;;  %v7230_v11 = vld [vmem:[%s12191_s23 + $0x8] sm:$0xff] }
0x46d4   :  { %8666 = vmatprep.subr.bf16.mxu0 %v8665_v29  ;;  %v8677_v6 = vpack.c.bf16 %v7230_v11, %v7229_v0  ;;  %v7423_v0 = vld [vmem:[%s12194_s26 + $0x78] sm:$0xff] }
0x46d7   :  { %8668 = vmatpush3.bf16.msra.mxu0 %v8665_v29 }
0x46d8   :  { %8670 = vmatprep.subr.bf16.mxu0 %v8669_v33 }
0x46db   :  { %8672 = vmatpush3.bf16.msra.mxu0 %v8669_v33 }
0x46dc   :  { %8674 = vmatprep.subr.bf16.mxu0 %v8673_v36 }
0x46df   :  { %8676 = vmatpush3.bf16.msra.mxu0 %v8673_v36  ;;  %v7316_v36 = vld [vmem:[%s12192_s24 + $0x10] sm:$0xff] }
0x46e2   :  { %8201 = vmatmul.mubr.msk.f32.vlgmr.msra.gmra.mrb[42].mxu0 %vm510_vm9, %v5828_v48 }
0x47a5   :  { %v6961_v42 = vpop.f32.mrb[40].mxu0 }
0x47a6   :  { %v6962_v25 = vadd.f32 %v11766_v51, %v6961_v42  ;;  %v8172_v49 = vpop.f32.mrb[41].mxu0  ;;  %v7317_v42 = vld [vmem:[%s12192_s24 + $0x18] sm:$0xff] }
0x47a8   :  { %v6966_v8 = vrot.slane %v6962_v25, 1  ;;  %v6967_v23 = vrot.slane %v6962_v25, 2  ;;  %v8689_v25 = vpack.c.bf16 %v7317_v42, %v7316_v36 }
0x47aa   :  { %6986 = vrot.lane.b32.xlu0 %v6967_v23, %s9632_s14  ;;  %6984 = vrot.lane.b32.xlu1 %v6966_v8, %s9632_s14  ;;  %v6970_v50 = vadd.f32 %v6966_v8, %v11796_v14  ;;  %v6971_v57 = vadd.f32 %v6967_v23, %v11794_v5  ;;  %v7408_v23 = vld [vmem:[%s12194_s26] sm:$0xff] }
0x47ab   :  { %8233 = vmatprep.mubr.msk.f32.mxu0 %vm726_vm8, %v7408_v23 }
0x47ac   :  { %v7817_v31 = vmul.f32 -1.442695, %v6970_v50  ;;  %v7818_v54 = vmul.f32 -1.442695, %v6971_v57 }
0x47ae   :  { %9323 = vpow2.f32 %v7817_v31 }
0x47af   :  { %9325 = vpow2.f32 %v7818_v54 }
0x47b5   :  { %v8202_v55 = vpop.f32.mrb[42].mxu0 }
0x47b6   :  { %v7218_v63 = vpop.f32.mrb[43].mxu0  ;;  %v7224_v7 = vadd.f32 %v8202_v55, %v7822_v16  ;;  %v7819_v55 = vld [vmem:[#allocation15] ss:$0 sm:$0xff] }
0x47b7   :  { %v7219_v12 = vadd.f32 %v7822_v16, %v7218_v63 }
0x47b8   :  { %v9324_v48 = vpop.eup %9323  ;;  %v7228_v9 = vmax.f32 %v7224_v7, 0.0 }
0x47b9   :  { %v9326_v21 = vpop.eup %9325  ;;  %v6978_v51 = vadd.f32 1.0, %v9324_v48  ;;  %v7227_v29 = vmax.f32 %v7219_v12, 0.0 }
0x47ba   :  { %v6979_v53 = vadd.f32 1.0, %v9326_v21 }
0x47bb   :  { %9327 = vrcp.f32 %v6978_v51  ;;  %v7827_v51 = vld [vmem:[#allocation19] ss:$0 sm:$0xff] }
0x47bc   :  { %9329 = vrcp.f32 %v6979_v53 }
0x47c5   :  { %v9328_v2 = vpop.eup %9327 }
0x47c6   :  { %v9330_v58 = vpop.eup %9329  ;;  %v7004_v40 = vsub.f32 1.0, %v9328_v2  ;;  %v7020_v44 = vmul.f32 %v9328_v2, %v7016_v17 }
0x47c7   :  { %v7005_v15 = vsub.f32 1.0, %v9330_v58  ;;  %v7021_v37 = vmul.f32 %v9330_v58, %v7017_v60 }
0x481c   :  { %v6987_v34 = vpop.permute.xlu0 %6986  ;;  %v6985_v4 = vpop.permute.xlu1 %6984 }
0x481d   :  { %v6991_v10 = vmul.f32 %v9330_v58, %v6987_v34  ;;  %v6990_v62 = vmul.f32 %v9328_v2, %v6985_v4 }
0x481f   :  { %6996 = vrot.lane.b32.xlu0 %v6991_v10, %s9632_s14  ;;  %6994 = vrot.lane.b32.xlu1 %v6990_v62, %s9632_s14  ;;  %v7409_v10 = vld [vmem:[%s12194_s26 + $0x8] sm:$0xff]  ;;  %v7410_v62 = vld [vmem:[%s12194_s26 + $0x10] sm:$0xff] }
0x4891   :  { %v6997_v38 = vpop.permute.xlu0 %6996  ;;  %v6995_v24 = vpop.permute.xlu1 %6994 }
0x4892   :  { %v7001_v52 = vadd.f32 %v6997_v38, %v11794_v5  ;;  %v7000_v41 = vadd.f32 %v6995_v24, %v11796_v14  ;;  %v7041_v5 = vld [vmem:[%s12187_s19 + $0x18] sm:$0xff]  ;;  %v7412_v24 = vld [vmem:[%s12194_s26 + $0x20] sm:$0xff] }
0x4893   :  { %v8657_v3 = vpack.c.bf16 %v7041_v5, %v7040_v59  ;;  %v7411_v38 = vld [vmem:[%s12194_s26 + $0x18] sm:$0xff]  ;;  %v7417_v59 = vld [vmem:[%s12194_s26 + $0x48] sm:$0xff] }
0x4894   :  { %9331 = vtanh.f32 %v7001_v52  ;;  %v7413_v52 = vld [vmem:[%s12194_s26 + $0x28] sm:$0xff]  ;;  %v7419_v5 = vld [vmem:[%s12194_s26 + $0x58] sm:$0xff] }
0x4895   :  { %9333 = vtanh.f32 %v7000_v41  ;;  %8658 = vmatprep.subr.bf16.mxu1 %v8657_v3  ;;  %v7414_v41 = vld [vmem:[%s12194_s26 + $0x30] sm:$0xff] }
0x4896   :  { %8660 = vmatpush3.bf16.msra.mxu1 %v8657_v3  ;;  %v7421_v3 = vld [vmem:[%s12194_s26 + $0x68] sm:$0xff] }
0x4897   :  { %8678 = vmatprep.subr.bf16.mxu1 %v8677_v6 }
0x489e   :  { %v9332_v14 = vpop.eup %9331 }
0x489f   :  { %v9334_v46 = vpop.eup %9333  ;;  %7010 = vrot.lane.b32.xlu0 %v9332_v14, %s9633_s22  ;;  %v7420_v14 = vld [vmem:[%s12194_s26 + $0x60] sm:$0xff] }
0x48a0   :  { %7008 = vrot.lane.b32.xlu1 %v9334_v46, %s9633_s22  ;;  %v7422_v46 = vld [vmem:[%s12194_s26 + $0x70] sm:$0xff] }
0x4911   :  { %v7011_v32 = vpop.permute.xlu0 %7010 }
0x4912   :  { %v7015_v18 = vmul.f32 %v7011_v32, %v7005_v15  ;;  %v7009_v30 = vpop.permute.xlu1 %7008 }
0x4913   :  { %v7014_v56 = vmul.f32 %v7009_v30, %v7004_v40 }
0x4914   :  { %v7023_v27 = vadd.f32 %v7021_v37, %v7015_v18 }
0x4915   :  { %v7022_v1 = vadd.f32 %v7020_v44, %v7014_v56 }
0x4916   :  { %v7037_v28 = vsel %vm2700_vm6, %v11955_v13, %v7023_v27  ;;  %v7232_v13 = vld [vmem:[%s12191_s23 + $0x18] sm:$0xff] }
0x4917   :  { %7053 = vrot.lane.b32.xlu0 %v7037_v28, %s9633_s22  ;;  %v7036_v22 = vsel %vm2700_vm6, %v11960_v39, %v7022_v1  ;;  %v8681_v33 = vpack.c.bf16 %v7232_v13, %v7231_v43  ;;  %v7314_v39 = vld [vmem:[%s12192_s24] sm:$0xff] }
0x4918   :  { %7051 = vrot.lane.b32.xlu1 %v7036_v22, %s9633_s22  ;;  %v8685_v26 = vpack.c.bf16 %v7315_v20, %v7314_v39 }
0x491b   :  { %7327 = vrot.lane.b32.xlu0 %v7228_v9, %s9633_s22 }
0x491c   :  { %7325 = vrot.lane.b32.xlu1 %v7227_v29, %s9633_s22 }
0x4989   :  { %v7054_v45 = vpop.permute.xlu0 %7053 }
0x498a   :  { %v7052_v19 = vpop.permute.xlu1 %7051 }
0x498b   :  { %8181 = vmatprep.mubr.msk.f32.mxu1 %vm726_vm8, %v7052_v19 }
0x498c   :  { %8182 = vmatmul.mubr.msk.f32.vlgmr.msra.gmra.mrb[38].mxu1 %vm726_vm8, %v7054_v45 }
0x498d   :  { %8680 = vmatpush3.bf16.msra.mxu1 %v8677_v6  ;;  %8211 = vmatprep.mubr.msk.f32.mxu1 %vm726_vm8, %v7227_v29  ;;  %v7328_v8 = vpop.permute.xlu0 %7327 }
0x498e   :  { %8682 = vmatprep.subr.bf16.mxu1 %v8681_v33  ;;  %v7326_v49 = vpop.permute.xlu1 %7325 }
0x4991   :  { %8684 = vmatpush3.bf16.msra.mxu1 %v8681_v33 }
0x4992   :  { %8686 = vmatprep.subr.bf16.mxu1 %v8685_v26 }
0x4994   :  { %8212 = vmatmul.mubr.msk.f32.vlgmr.msra.gmra.mrb[40].mxu1 %vm726_vm8, %v7228_v9 }
0x4995   :  { %8688 = vmatpush3.bf16.msra.mxu1 %v8685_v26  ;;  %8222 = vmatprep.mubr.msk.f32.mxu1 %vm726_vm8, %v7326_v49 }
0x4996   :  { %8690 = vmatprep.subr.bf16.mxu1 %v8689_v25 }
0x4999   :  { %8692 = vmatpush3.bf16.msra.mxu1 %v8689_v25 }
0x499c   :  { %8223 = vmatmul.mubr.msk.f32.vlgmr.msra.gmra.mrb[42].mxu1 %vm726_vm8, %v7328_v8 }
0x4a5f   :  { %v8183_v63 = vpop.f32.mrb[38].mxu1 }
0x4a60   :  { %v7131_v50 = vadd.f32 %v8183_v63, %v7819_v55  ;;  %v7125_v57 = vpop.f32.mrb[39].mxu1 }
0x4a61   :  { %v7126_v31 = vadd.f32 %v7819_v55, %v7125_v57 }
0x4a62   :  { %7136 = vst.msk [vmem:[%s12195_s27 + $0x8] sm:$0xff] %vm7134_vm0, %v7131_v50 }
0x4a63   :  { %7135 = vst.msk [vmem:[%s12195_s27] sm:$0xff] %vm7134_vm0, %v7126_v31 }
0x4a67   :  { %v8213_v54 = vpop.f32.mrb[40].mxu1 }
0x4a68   :  { %v7305_v48 = vpop.f32.mrb[41].mxu1 }
0x4a69   :  { %v8693_v21 = vpack.c.bf16 %v8213_v54, %v7305_v48 }
0x4a6b   :  { %8694 = vmatprep.subr.bf16.mxu0 %v8693_v21 }
0x4a6c   :  { %8696 = vmatpush3.bf16.msra.mxu0 %v8693_v21 }
0x4a6f   :  { %v8224_v53 = vpop.f32.mrb[42].mxu1 }
0x4a70   :  { %v7405_v2 = vadd.f32 %v8224_v53, %v7827_v51  ;;  %v7399_v58 = vpop.f32.mrb[43].mxu1 }
0x4a71   :  { %v7400_v34 = vadd.f32 %v7827_v51, %v7399_v58 }
0x4a73   :  { %v8697_v4 = vpack.c.bf16 %v7405_v2, %v7400_v34 }
0x4a75   :  { %8698 = vmatprep.subr.bf16.mxu0 %v8697_v4 }
0x4a76   :  { %8700 = vmatpush3.bf16.msra.mxu0 %v8697_v4 }
0x4a79   :  { %8234 = vmatmul.mubr.msk.f32.vlgmr.msra.gmra.mrb[44].mxu0 %vm726_vm8, %v7409_v10 }
0x4a7a   :  { %8236 = vmatprep.mubr.msk.f32.mxu0 %vm726_vm8, %v7410_v62 }
0x4a7d   :  { %8237 = vmatmul.mubr.msk.f32.gmra.mrb[46].mxu0 %vm726_vm8, %v7411_v38 }
0x4a7e   :  { %8239 = vmatprep.mubr.msk.f32.mxu0 %vm726_vm8, %v7412_v24 }
0x4a81   :  { %8240 = vmatmul.mubr.msk.f32.gmra.mrb[48].mxu0 %vm726_vm8, %v7413_v52 }
0x4a82   :  { %8242 = vmatprep.mubr.msk.f32.mxu0 %vm726_vm8, %v7414_v41 }
0x4a85   :  { %8243 = vmatmul.mubr.msk.f32.gmra.mrb[50].mxu0 %vm726_vm8, %v7415_v47 }
0x4a86   :  { %8245 = vmatprep.mubr.msk.f32.mxu0 %vm726_vm8, %v7416_v61 }
0x4a89   :  { %8246 = vmatmul.mubr.msk.f32.gmra.mrb[52].mxu0 %vm726_vm8, %v7417_v59 }
0x4a8a   :  { %8248 = vmatprep.mubr.msk.f32.mxu0 %vm726_vm8, %v7418_v35 }
0x4a8d   :  { %8249 = vmatmul.mubr.msk.f32.gmra.mrb[54].mxu0 %vm726_vm8, %v7419_v5 }
0x4a8e   :  { %8251 = vmatprep.mubr.msk.f32.mxu0 %vm726_vm8, %v7420_v14 }
0x4a91   :  { %8252 = vmatmul.mubr.msk.f32.gmra.mrb[56].mxu0 %vm726_vm8, %v7421_v3 }
0x4a92   :  { %8254 = vmatprep.mubr.msk.f32.mxu0 %vm726_vm8, %v7422_v46 }
0x4a95   :  { %8255 = vmatmul.mubr.msk.f32.gmra.mrb[58].mxu0 %vm726_vm8, %v7423_v0 }
0x4b4c   :  { %v8235_v11 = vpop.f32.mrb[44].mxu0 }
0x4b4d   :  { %7619 = vst.msk [vmem:[%s12196_s28 + $0x8] sm:$0xff] %vm7617_vm4, %v8235_v11  ;;  %v7538_v6 = vpop.f32.mrb[45].mxu0 }
0x4b4e   :  { %7618 = vst.msk [vmem:[%s12196_s28] sm:$0xff] %vm7617_vm4, %v7538_v6 }
0x4b50   :  { %v8238_v15 = vpop.f32.mrb[46].mxu0 }
0x4b51   :  { %7621 = vst.msk [vmem:[%s12196_s28 + $0x18] sm:$0xff] %vm7617_vm4, %v8238_v15  ;;  %v7548_v60 = vpop.f32.mrb[47].mxu0 }
0x4b52   :  { %7620 = vst.msk [vmem:[%s12196_s28 + $0x10] sm:$0xff] %vm7617_vm4, %v7548_v60 }
0x4b54   :  { %v8241_v32 = vpop.f32.mrb[48].mxu0 }
0x4b55   :  { %7623 = vst.msk [vmem:[%s12196_s28 + $0x28] sm:$0xff] %vm7617_vm4, %v8241_v32  ;;  %v7558_v40 = vpop.f32.mrb[49].mxu0 }
0x4b56   :  { %7622 = vst.msk [vmem:[%s12196_s28 + $0x20] sm:$0xff] %vm7617_vm4, %v7558_v40 }
0x4b58   :  { %v8244_v17 = vpop.f32.mrb[50].mxu0 }
0x4b59   :  { %7625 = vst.msk [vmem:[%s12196_s28 + $0x38] sm:$0xff] %vm7617_vm4, %v8244_v17  ;;  %v7568_v16 = vpop.f32.mrb[51].mxu0 }
0x4b5a   :  { %7624 = vst.msk [vmem:[%s12196_s28 + $0x30] sm:$0xff] %vm7617_vm4, %v7568_v16 }
0x4b5c   :  { %v8247_v37 = vpop.f32.mrb[52].mxu0 }
0x4b5d   :  { %7627 = vst.msk [vmem:[%s12196_s28 + $0x48] sm:$0xff] %vm7617_vm4, %v8247_v37  ;;  %v7578_v18 = vpop.f32.mrb[53].mxu0 }
0x4b5e   :  { %7626 = vst.msk [vmem:[%s12196_s28 + $0x40] sm:$0xff] %vm7617_vm4, %v7578_v18 }
0x4b60   :  { %v8250_v30 = vpop.f32.mrb[54].mxu0 }
0x4b61   :  { %7629 = vst.msk [vmem:[%s12196_s28 + $0x58] sm:$0xff] %vm7617_vm4, %v8250_v30  ;;  %v7588_v44 = vpop.f32.mrb[55].mxu0 }
0x4b62   :  { %7628 = vst.msk [vmem:[%s12196_s28 + $0x50] sm:$0xff] %vm7617_vm4, %v7588_v44 }
0x4b64   :  { %v8253_v56 = vpop.f32.mrb[56].mxu0 }
0x4b65   :  { %7631 = vst.msk [vmem:[%s12196_s28 + $0x68] sm:$0xff] %vm7617_vm4, %v8253_v56  ;;  %v7598_v27 = vpop.f32.mrb[57].mxu0 }
0x4b66   :  { %7630 = vst.msk [vmem:[%s12196_s28 + $0x60] sm:$0xff] %vm7617_vm4, %v7598_v27 }
0x4b68   :  { %v8256_v7 = vpop.f32.mrb[58].mxu0 }
0x4b69   :  { %7633 = vst.msk [vmem:[%s12196_s28 + $0x78] sm:$0xff] %vm7617_vm4, %v8256_v7  ;;  %v7608_v1 = vpop.f32.mrb[59].mxu0 }
0x4b6a   :  { %7632 = vst.msk [vmem:[%s12196_s28 + $0x70] sm:$0xff] %vm7617_vm4, %v7608_v1 }
0x4b6b   :  { %7642 = vsyncpa [#allocation3], 1 }
0x4b6c   :  { %7643 = vsyncpa [#allocation5], 1 }
0x4b6d   :  { %7644 = vsyncpa [#allocation8], 1 }
0x4b6e   :  { %7645 = vsyncpa [#allocation11], 1 }
0x4b6f   :  { %7646 = vsyncpa [#allocation14], 1 }
0x4b70   :  { %7647 = vsyncpa [#allocation17], 1 }
0x4b71   :  { %7648 = vsyncpa [#allocation20], 1 }

</bundles_post_ra>
